<compile_context>
chip_gen: v7x
topology: tpu7x:2x2x1
jax: 0.10.0
libtpu: 0.0.40
codegen_flags: <defaults>
</compile_context>

<pallas_src>
import jax
import jax.numpy as jnp
from jax.experimental import pallas as pl
from jax.experimental.pallas import tpu as pltpu


# ----------------------------------------------------------------------------
# exact-erf GELU from Mosaic-safe primitives
# ----------------------------------------------------------------------------
def _erf(x):
    # Numerical-Recipes erfc approximation (fractional error < 1.2e-7).
    a = jnp.abs(x)
    t = 1.0 / (1.0 + 0.5 * a)
    poly = -1.26551223 + t * (1.00002368 + t * (0.37409196 + t * (0.09678418
        + t * (-0.18628806 + t * (0.27886807 + t * (-1.13520398 + t * (1.48851587
        + t * (-0.82215223 + t * 0.17087277))))))))
    erfc_a = t * jnp.exp(-a * a + poly)
    return jnp.where(x >= 0.0, 1.0 - erfc_a, erfc_a - 1.0)


def _gelu(x):
    # Matches torch.nn.GELU() default (erf-based, not tanh approximation).
    return 0.5 * x * (1.0 + _erf(x * 0.7071067811865476))


# ----------------------------------------------------------------------------
# fused ResidualBlock kernel
# ----------------------------------------------------------------------------
def _make_kernel(cin, cmid, cout, h, w):
    hp, wp = h + 2, w + 2  # conv1 is evaluated on this enlarged domain

    def kernel(w1_ref, b1_ref, w2_ref, b2_ref, ws_ref, bs_ref,  # SMEM (prefetch)
               x_ref,                                           # (1,cin,h+4,w+4)
               o_ref,                                           # (1,cout,h,w)
               gx_ref, gh_ref):                                 # VMEM scratch
        # gelu(norm1(x)); norm1 = Identity.  Zero padding survives gelu(0)==0.
        gx_ref[...] = _gelu(x_ref[0])

        # ---- conv1 (3x3, pad 1), evaluated on the (h+2, w+2) domain ---------
        acc1 = [jnp.zeros((hp, wp), jnp.float32) for _ in range(cmid)]
        for ci in range(cin):
            for dy in range(3):
                for dx in range(3):
                    sl = gx_ref[ci, dy:dy + hp, dx:dx + wp]
                    for co in range(cmid):
                        widx = ((co * cin + ci) * 3 + dy) * 3 + dx
                        acc1[co] = acc1[co] + w1_ref[widx] * sl

        # gelu(norm2(h)) with an explicit zero ring -> this *is* conv2's padding,
        # so all stores below stay aligned full-tile writes.
        ry = jax.lax.broadcasted_iota(jnp.int32, (hp, wp), 0)
        rx = jax.lax.broadcasted_iota(jnp.int32, (hp, wp), 1)
        interior = (ry >= 1) & (ry <= h) & (rx >= 1) & (rx <= w)
        for co in range(cmid):
            gh_ref[co] = jnp.where(interior, _gelu(acc1[co] + b1_ref[co]), 0.0)

        # ---- conv2 (3x3, pad 1) on the true (h, w) domain --------------------
        acc2 = [jnp.zeros((h, w), jnp.float32) for _ in range(cout)]
        for ci in range(cmid):
            for dy in range(3):
                for dx in range(3):
                    sl = gh_ref[ci, dy:dy + h, dx:dx + w]
                    for co in range(cout):
                        widx = ((co * cmid + ci) * 3 + dy) * 3 + dx
                        acc2[co] = acc2[co] + w2_ref[widx] * sl

        # ---- shortcut (1x1 conv; identity weights when cin == cout) + add ---
        for co in range(cout):
            sc = jnp.zeros((h, w), jnp.float32)
            for ci in range(cin):
                sc = sc + ws_ref[co * cin + ci] * x_ref[0, ci, 2:2 + h, 2:2 + w]
            o_ref[0, co] = acc2[co] + b2_ref[co] + sc + bs_ref[co]

    return kernel


@jax.jit
def _residual_block_pallas(x, w1, b1, w2, b2, ws, bs):
    b, cin, h, w = x.shape
    cmid = w1.shape[0]
    cout = w2.shape[0]

    # Pad by 2: one ring is conv1's own zero padding, the second ring lets conv1
    # be evaluated on the (h+2, w+2) domain that conv2 needs as padded input.
    xpad = jnp.pad(x, ((0, 0), (0, 0), (2, 2), (2, 2)))

    kernel = _make_kernel(cin, cmid, cout, h, w)

    return pl.pallas_call(
        kernel,
        out_shape=jax.ShapeDtypeStruct((b, cout, h, w), jnp.float32),
        grid_spec=pltpu.PrefetchScalarGridSpec(
            num_scalar_prefetch=6,                       # weights/biases -> SMEM
            grid=(b,),
            in_specs=[pl.BlockSpec((1, cin, h + 4, w + 4),
                                   lambda i, *_: (i, 0, 0, 0))],
            out_specs=pl.BlockSpec((1, cout, h, w),
                                   lambda i, *_: (i, 0, 0, 0)),
            scratch_shapes=[pltpu.VMEM((cin, h + 4, w + 4), jnp.float32),
                            pltpu.VMEM((cmid, h + 2, w + 2), jnp.float32)],
        ),
        compiler_params=pltpu.CompilerParams(
            dimension_semantics=("parallel",)),
    )(w1.reshape(-1), b1, w2.reshape(-1), b2, ws.reshape(-1), bs, xpad)


def residual_block(x, w1, b1, w2, b2, ws=None, bs=None):
    """ResidualBlock forward: conv2(gelu(conv1(gelu(x)))) + shortcut(x)."""
    cout, cin = w2.shape[0], w1.shape[1]
    if ws is None:  # identity shortcut (in_channels == out_channels)
        assert cin == cout, "identity shortcut requires in_channels == out_channels"
        ws = jnp.eye(cout, dtype=jnp.float32)
        bs = jnp.zeros((cout,), jnp.float32)
    # TODO(synk): the norm=True (GroupNorm) branch of the module is not
    # implemented; the module default norm=False (Identity) is what runs here.
    return _residual_block_pallas(x, w1, b1, w2, b2, ws, bs)


# ----------------------------------------------------------------------------
# pure-JAX reference (mirrors the PyTorch forward exactly)
# ----------------------------------------------------------------------------
def reference_residual_block(x, w1, b1, w2, b2, ws=None, bs=None):
    gelu = lambda v: jax.nn.gelu(v, approximate=False)  # torch nn.GELU default
    dn = ("NCHW", "OIHW", "NCHW")
    hi = jax.lax.Precision.HIGHEST
    h = jax.lax.conv_general_dilated(gelu(x), w1, (1, 1), "SAME",
                                     dimension_numbers=dn, precision=hi)
    h = h + b1[None, :, None, None]
    h = jax.lax.conv_general_dilated(gelu(h), w2, (1, 1), "SAME",
                                     dimension_numbers=dn, precision=hi)
    h = h + b2[None, :, None, None]
    if ws is None:
        sc = x
    else:
        sc = jnp.einsum("oi,bihw->bohw", ws, x, precision=hi)
        sc = sc + bs[None, :, None, None]
    return h + sc


if __name__ == "__main__":
    # Small shapes consistent with the module: batch=2, in=out channels=4,
    # spatial 16x16, activation='gelu', norm=False, identity shortcut.
    B, Cin, Cout, H, W = 2, 4, 4, 16, 16

    key = jax.random.PRNGKey(0)
    kx, k1, kb1, k2, kb2 = jax.random.split(key, 5)

    x = jax.random.normal(kx, (B, Cin, H, W), dtype=jnp.float32)

    lim1 = 1.0 / (Cin * 9) ** 0.5
    w1 = jax.random.uniform(k1, (Cout, Cin, 3, 3), jnp.float32, -lim1, lim1)
    b1 = jax.random.uniform(kb1, (Cout,), jnp.float32, -lim1, lim1)
    lim2 = 1.0 / (Cout * 9) ** 0.5
    w2 = jax.random.uniform(k2, (Cout, Cout, 3, 3), jnp.float32, -lim2, lim2)
    b2 = jax.random.uniform(kb2, (Cout,), jnp.float32, -lim2, lim2)

    out = jax.block_until_ready(residual_block(x, w1, b1, w2, b2))
    ref = jax.block_until_ready(reference_residual_block(x, w1, b1, w2, b2))

    assert out.shape == (B, Cout, H, W), out.shape
    max_err = float(jnp.max(jnp.abs(out - ref)))
    assert jnp.allclose(out, ref, rtol=1e-4, atol=2e-5), max_err

    print("KERNEL_OK")
</pallas_src>

<mosaic_0001>
module attributes {stable_mosaic.version = 11 : i64} {
  func.func @kernel(%arg0: i32, %arg1: memref<144xf32, #tpu.memory_space<smem>>, %arg2: memref<4xf32, #tpu.memory_space<smem>>, %arg3: memref<144xf32, #tpu.memory_space<smem>>, %arg4: memref<4xf32, #tpu.memory_space<smem>>, %arg5: memref<16xf32, #tpu.memory_space<smem>>, %arg6: memref<4xf32, #tpu.memory_space<smem>>, %arg7: memref<1x4x20x20xf32, #tpu.memory_space<vmem>>, %arg8: memref<1x4x16x16xf32, #tpu.memory_space<vmem>>, %arg9: memref<4x20x20xf32, #tpu.memory_space<vmem>>, %arg10: memref<4x18x18xf32, #tpu.memory_space<vmem>>) attributes {dimension_semantics = [#tpu.dimension_semantics<parallel>], iteration_bounds = array<i64: 2>, scalar_prefetch = 6 : i64, scratch_operands = 2 : i64, tpu.core_type = #tpu.core_type<tc>, window_params = [{transform_indices = @transform_0, window_bounds = array<i64: 1, 4, 20, 20>}, {transform_indices = @transform_1, window_bounds = array<i64: 1, 4, 16, 16>}]} {
    %c0 = arith.constant 0 : index
    %c0_0 = arith.constant 0 : index
    %c0_1 = arith.constant 0 : index
    %c0_2 = arith.constant 0 : index
    %0 = vector.load %arg7[%c0, %c0_0, %c0_1, %c0_2] : memref<1x4x20x20xf32, #tpu.memory_space<vmem>>, vector<1x4x20x20xf32>
    %1 = vector.shape_cast %0 : vector<1x4x20x20xf32> to vector<4x20x20xf32>
    %cst = arith.constant 5.000000e-01 : f32
    %2 = vector.broadcast %cst : f32 to vector<4x20x20xf32>
    %3 = arith.mulf %2, %1 : vector<4x20x20xf32>
    %cst_3 = arith.constant 0.707106769 : f32
    %4 = vector.broadcast %cst_3 : f32 to vector<4x20x20xf32>
    %5 = arith.mulf %1, %4 : vector<4x20x20xf32>
    %6 = math.absf %5 : vector<4x20x20xf32>
    %cst_4 = arith.constant 5.000000e-01 : f32
    %7 = vector.broadcast %cst_4 : f32 to vector<4x20x20xf32>
    %8 = arith.mulf %7, %6 : vector<4x20x20xf32>
    %cst_5 = arith.constant 1.000000e+00 : f32
    %9 = vector.broadcast %cst_5 : f32 to vector<4x20x20xf32>
    %10 = arith.addf %9, %8 : vector<4x20x20xf32>
    %cst_6 = arith.constant 1.000000e+00 : f32
    %11 = vector.broadcast %cst_6 : f32 to vector<4x20x20xf32>
    %12 = arith.divf %11, %10 : vector<4x20x20xf32>
    %cst_7 = arith.constant 0.170872763 : f32
    %13 = vector.broadcast %cst_7 : f32 to vector<4x20x20xf32>
    %14 = arith.mulf %12, %13 : vector<4x20x20xf32>
    %cst_8 = arith.constant -0.822152256 : f32
    %15 = vector.broadcast %cst_8 : f32 to vector<4x20x20xf32>
    %16 = arith.addf %15, %14 : vector<4x20x20xf32>
    %17 = arith.mulf %12, %16 : vector<4x20x20xf32>
    %cst_9 = arith.constant 1.48851585 : f32
    %18 = vector.broadcast %cst_9 : f32 to vector<4x20x20xf32>
    %19 = arith.addf %18, %17 : vector<4x20x20xf32>
    %20 = arith.mulf %12, %19 : vector<4x20x20xf32>
    %cst_10 = arith.constant -1.13520396 : f32
    %21 = vector.broadcast %cst_10 : f32 to vector<4x20x20xf32>
    %22 = arith.addf %21, %20 : vector<4x20x20xf32>
    %23 = arith.mulf %12, %22 : vector<4x20x20xf32>
    %cst_11 = arith.constant 0.278868079 : f32
    %24 = vector.broadcast %cst_11 : f32 to vector<4x20x20xf32>
    %25 = arith.addf %24, %23 : vector<4x20x20xf32>
    %26 = arith.mulf %12, %25 : vector<4x20x20xf32>
    %cst_12 = arith.constant -0.186288059 : f32
    %27 = vector.broadcast %cst_12 : f32 to vector<4x20x20xf32>
    %28 = arith.addf %27, %26 : vector<4x20x20xf32>
    %29 = arith.mulf %12, %28 : vector<4x20x20xf32>
    %cst_13 = arith.constant 0.0967841818 : f32
    %30 = vector.broadcast %cst_13 : f32 to vector<4x20x20xf32>
    %31 = arith.addf %30, %29 : vector<4x20x20xf32>
    %32 = arith.mulf %12, %31 : vector<4x20x20xf32>
    %cst_14 = arith.constant 0.374091953 : f32
    %33 = vector.broadcast %cst_14 : f32 to vector<4x20x20xf32>
    %34 = arith.addf %33, %32 : vector<4x20x20xf32>
    %35 = arith.mulf %12, %34 : vector<4x20x20xf32>
    %cst_15 = arith.constant 1.00002372 : f32
    %36 = vector.broadcast %cst_15 : f32 to vector<4x20x20xf32>
    %37 = arith.addf %36, %35 : vector<4x20x20xf32>
    %38 = arith.mulf %12, %37 : vector<4x20x20xf32>
    %cst_16 = arith.constant -1.26551223 : f32
    %39 = vector.broadcast %cst_16 : f32 to vector<4x20x20xf32>
    %40 = arith.addf %39, %38 : vector<4x20x20xf32>
    %cst_17 = arith.constant 0.000000e+00 : f32
    %41 = vector.broadcast %cst_17 : f32 to vector<4x20x20xf32>
    %42 = arith.subf %41, %6 : vector<4x20x20xf32>
    %43 = arith.mulf %42, %6 : vector<4x20x20xf32>
    %44 = arith.addf %43, %40 : vector<4x20x20xf32>
    %45 = math.exp %44 : vector<4x20x20xf32>
    %46 = arith.mulf %12, %45 : vector<4x20x20xf32>
    %cst_18 = arith.constant 0.000000e+00 : f32
    %47 = vector.broadcast %cst_18 : f32 to vector<4x20x20xf32>
    %48 = arith.cmpf oge, %5, %47 : vector<4x20x20xf32>
    %cst_19 = arith.constant 1.000000e+00 : f32
    %49 = vector.broadcast %cst_19 : f32 to vector<4x20x20xf32>
    %50 = arith.subf %49, %46 : vector<4x20x20xf32>
    %cst_20 = arith.constant 1.000000e+00 : f32
    %51 = vector.broadcast %cst_20 : f32 to vector<4x20x20xf32>
    %52 = arith.subf %46, %51 : vector<4x20x20xf32>
    %53 = arith.select %48, %50, %52 : vector<4x20x20xi1>, vector<4x20x20xf32>
    %cst_21 = arith.constant 1.000000e+00 : f32
    %54 = vector.broadcast %cst_21 : f32 to vector<4x20x20xf32>
    %55 = arith.addf %54, %53 : vector<4x20x20xf32>
    %56 = arith.mulf %3, %55 : vector<4x20x20xf32>
    %c0_22 = arith.constant 0 : index
    %c0_23 = arith.constant 0 : index
    %c0_24 = arith.constant 0 : index
    %57 = vector.load %arg9[%c0_22, %c0_23, %c0_24] : memref<4x20x20xf32, #tpu.memory_space<vmem>>, vector<4x20x20xf32>
    tpu.vector_store %arg9[%c0_22, %c0_23, %c0_24], %56 {strides = array<i32>} : memref<4x20x20xf32, #tpu.memory_space<vmem>>, vector<4x20x20xf32>,
    %cst_25 = arith.constant 0.000000e+00 : f32
    %58 = vector.broadcast %cst_25 : f32 to vector<18x18xf32>
    %cst_26 = arith.constant 0.000000e+00 : f32
    %59 = vector.broadcast %cst_26 : f32 to vector<18x18xf32>
    %cst_27 = arith.constant 0.000000e+00 : f32
    %60 = vector.broadcast %cst_27 : f32 to vector<18x18xf32>
    %cst_28 = arith.constant 0.000000e+00 : f32
    %61 = vector.broadcast %cst_28 : f32 to vector<18x18xf32>
    %c0_29 = arith.constant 0 : index
    %c0_30 = arith.constant 0 : index
    %c0_31 = arith.constant 0 : index
    %62 = vector.load %arg9[%c0_29, %c0_30, %c0_31] : memref<4x20x20xf32, #tpu.memory_space<vmem>>, vector<1x18x18xf32>
    %63 = vector.shape_cast %62 : vector<1x18x18xf32> to vector<18x18xf32>
    %c0_32 = arith.constant 0 : index
    %64 = memref.load %arg1[%c0_32] : memref<144xf32, #tpu.memory_space<smem>>
    %65 = vector.broadcast %64 : f32 to vector<18x18xf32>
    %66 = arith.mulf %65, %63 : vector<18x18xf32>
    %67 = arith.addf %58, %66 : vector<18x18xf32>
    %c36 = arith.constant 36 : index
    %68 = memref.load %arg1[%c36] : memref<144xf32, #tpu.memory_space<smem>>
    %69 = vector.broadcast %68 : f32 to vector<18x18xf32>
    %70 = arith.mulf %69, %63 : vector<18x18xf32>
    %71 = arith.addf %59, %70 : vector<18x18xf32>
    %c72 = arith.constant 72 : index
    %72 = memref.load %arg1[%c72] : memref<144xf32, #tpu.memory_space<smem>>
    %73 = vector.broadcast %72 : f32 to vector<18x18xf32>
    %74 = arith.mulf %73, %63 : vector<18x18xf32>
    %75 = arith.addf %60, %74 : vector<18x18xf32>
    %c108 = arith.constant 108 : index
    %76 = memref.load %arg1[%c108] : memref<144xf32, #tpu.memory_space<smem>>
    %77 = vector.broadcast %76 : f32 to vector<18x18xf32>
    %78 = arith.mulf %77, %63 : vector<18x18xf32>
    %79 = arith.addf %61, %78 : vector<18x18xf32>
    %c0_33 = arith.constant 0 : index
    %c0_34 = arith.constant 0 : index
    %c1 = arith.constant 1 : index
    %80 = vector.load %arg9[%c0_33, %c0_34, %c1] : memref<4x20x20xf32, #tpu.memory_space<vmem>>, vector<1x18x18xf32>
    %81 = vector.shape_cast %80 : vector<1x18x18xf32> to vector<18x18xf32>
    %c1_35 = arith.constant 1 : index
    %82 = memref.load %arg1[%c1_35] : memref<144xf32, #tpu.memory_space<smem>>
    %83 = vector.broadcast %82 : f32 to vector<18x18xf32>
    %84 = arith.mulf %83, %81 : vector<18x18xf32>
    %85 = arith.addf %67, %84 : vector<18x18xf32>
    %c37 = arith.constant 37 : index
    %86 = memref.load %arg1[%c37] : memref<144xf32, #tpu.memory_space<smem>>
    %87 = vector.broadcast %86 : f32 to vector<18x18xf32>
    %88 = arith.mulf %87, %81 : vector<18x18xf32>
    %89 = arith.addf %71, %88 : vector<18x18xf32>
    %c73 = arith.constant 73 : index
    %90 = memref.load %arg1[%c73] : memref<144xf32, #tpu.memory_space<smem>>
    %91 = vector.broadcast %90 : f32 to vector<18x18xf32>
    %92 = arith.mulf %91, %81 : vector<18x18xf32>
    %93 = arith.addf %75, %92 : vector<18x18xf32>
    %c109 = arith.constant 109 : index
    %94 = memref.load %arg1[%c109] : memref<144xf32, #tpu.memory_space<smem>>
    %95 = vector.broadcast %94 : f32 to vector<18x18xf32>
    %96 = arith.mulf %95, %81 : vector<18x18xf32>
    %97 = arith.addf %79, %96 : vector<18x18xf32>
    %c0_36 = arith.constant 0 : index
    %c0_37 = arith.constant 0 : index
    %c2 = arith.constant 2 : index
    %98 = vector.load %arg9[%c0_36, %c0_37, %c2] : memref<4x20x20xf32, #tpu.memory_space<vmem>>, vector<1x18x18xf32>
    %99 = vector.shape_cast %98 : vector<1x18x18xf32> to vector<18x18xf32>
    %c2_38 = arith.constant 2 : index
    %100 = memref.load %arg1[%c2_38] : memref<144xf32, #tpu.memory_space<smem>>
    %101 = vector.broadcast %100 : f32 to vector<18x18xf32>
    %102 = arith.mulf %101, %99 : vector<18x18xf32>
    %103 = arith.addf %85, %102 : vector<18x18xf32>
    %c38 = arith.constant 38 : index
    %104 = memref.load %arg1[%c38] : memref<144xf32, #tpu.memory_space<smem>>
    %105 = vector.broadcast %104 : f32 to vector<18x18xf32>
    %106 = arith.mulf %105, %99 : vector<18x18xf32>
    %107 = arith.addf %89, %106 : vector<18x18xf32>
    %c74 = arith.constant 74 : index
    %108 = memref.load %arg1[%c74] : memref<144xf32, #tpu.memory_space<smem>>
    %109 = vector.broadcast %108 : f32 to vector<18x18xf32>
    %110 = arith.mulf %109, %99 : vector<18x18xf32>
    %111 = arith.addf %93, %110 : vector<18x18xf32>
    %c110 = arith.constant 110 : index
    %112 = memref.load %arg1[%c110] : memref<144xf32, #tpu.memory_space<smem>>
    %113 = vector.broadcast %112 : f32 to vector<18x18xf32>
    %114 = arith.mulf %113, %99 : vector<18x18xf32>
    %115 = arith.addf %97, %114 : vector<18x18xf32>
    %c0_39 = arith.constant 0 : index
    %c1_40 = arith.constant 1 : index
    %c0_41 = arith.constant 0 : index
    %116 = vector.load %arg9[%c0_39, %c1_40, %c0_41] : memref<4x20x20xf32, #tpu.memory_space<vmem>>, vector<1x18x18xf32>
    %117 = vector.shape_cast %116 : vector<1x18x18xf32> to vector<18x18xf32>
    %c3 = arith.constant 3 : index
    %118 = memref.load %arg1[%c3] : memref<144xf32, #tpu.memory_space<smem>>
    %119 = vector.broadcast %118 : f32 to vector<18x18xf32>
    %120 = arith.mulf %119, %117 : vector<18x18xf32>
    %121 = arith.addf %103, %120 : vector<18x18xf32>
    %c39 = arith.constant 39 : index
    %122 = memref.load %arg1[%c39] : memref<144xf32, #tpu.memory_space<smem>>
    %123 = vector.broadcast %122 : f32 to vector<18x18xf32>
    %124 = arith.mulf %123, %117 : vector<18x18xf32>
    %125 = arith.addf %107, %124 : vector<18x18xf32>
    %c75 = arith.constant 75 : index
    %126 = memref.load %arg1[%c75] : memref<144xf32, #tpu.memory_space<smem>>
    %127 = vector.broadcast %126 : f32 to vector<18x18xf32>
    %128 = arith.mulf %127, %117 : vector<18x18xf32>
    %129 = arith.addf %111, %128 : vector<18x18xf32>
    %c111 = arith.constant 111 : index
    %130 = memref.load %arg1[%c111] : memref<144xf32, #tpu.memory_space<smem>>
    %131 = vector.broadcast %130 : f32 to vector<18x18xf32>
    %132 = arith.mulf %131, %117 : vector<18x18xf32>
    %133 = arith.addf %115, %132 : vector<18x18xf32>
    %c0_42 = arith.constant 0 : index
    %c1_43 = arith.constant 1 : index
    %c1_44 = arith.constant 1 : index
    %134 = vector.load %arg9[%c0_42, %c1_43, %c1_44] : memref<4x20x20xf32, #tpu.memory_space<vmem>>, vector<1x18x18xf32>
    %135 = vector.shape_cast %134 : vector<1x18x18xf32> to vector<18x18xf32>
    %c4 = arith.constant 4 : index
    %136 = memref.load %arg1[%c4] : memref<144xf32, #tpu.memory_space<smem>>
    %137 = vector.broadcast %136 : f32 to vector<18x18xf32>
    %138 = arith.mulf %137, %135 : vector<18x18xf32>
    %139 = arith.addf %121, %138 : vector<18x18xf32>
    %c40 = arith.constant 40 : index
    %140 = memref.load %arg1[%c40] : memref<144xf32, #tpu.memory_space<smem>>
    %141 = vector.broadcast %140 : f32 to vector<18x18xf32>
    %142 = arith.mulf %141, %135 : vector<18x18xf32>
    %143 = arith.addf %125, %142 : vector<18x18xf32>
    %c76 = arith.constant 76 : index
    %144 = memref.load %arg1[%c76] : memref<144xf32, #tpu.memory_space<smem>>
    %145 = vector.broadcast %144 : f32 to vector<18x18xf32>
    %146 = arith.mulf %145, %135 : vector<18x18xf32>
    %147 = arith.addf %129, %146 : vector<18x18xf32>
    %c112 = arith.constant 112 : index
    %148 = memref.load %arg1[%c112] : memref<144xf32, #tpu.memory_space<smem>>
    %149 = vector.broadcast %148 : f32 to vector<18x18xf32>
    %150 = arith.mulf %149, %135 : vector<18x18xf32>
    %151 = arith.addf %133, %150 : vector<18x18xf32>
    %c0_45 = arith.constant 0 : index
    %c1_46 = arith.constant 1 : index
    %c2_47 = arith.constant 2 : index
    %152 = vector.load %arg9[%c0_45, %c1_46, %c2_47] : memref<4x20x20xf32, #tpu.memory_space<vmem>>, vector<1x18x18xf32>
    %153 = vector.shape_cast %152 : vector<1x18x18xf32> to vector<18x18xf32>
    %c5 = arith.constant 5 : index
    %154 = memref.load %arg1[%c5] : memref<144xf32, #tpu.memory_space<smem>>
    %155 = vector.broadcast %154 : f32 to vector<18x18xf32>
    %156 = arith.mulf %155, %153 : vector<18x18xf32>
    %157 = arith.addf %139, %156 : vector<18x18xf32>
    %c41 = arith.constant 41 : index
    %158 = memref.load %arg1[%c41] : memref<144xf32, #tpu.memory_space<smem>>
    %159 = vector.broadcast %158 : f32 to vector<18x18xf32>
    %160 = arith.mulf %159, %153 : vector<18x18xf32>
    %161 = arith.addf %143, %160 : vector<18x18xf32>
    %c77 = arith.constant 77 : index
    %162 = memref.load %arg1[%c77] : memref<144xf32, #tpu.memory_space<smem>>
    %163 = vector.broadcast %162 : f32 to vector<18x18xf32>
    %164 = arith.mulf %163, %153 : vector<18x18xf32>
    %165 = arith.addf %147, %164 : vector<18x18xf32>
    %c113 = arith.constant 113 : index
    %166 = memref.load %arg1[%c113] : memref<144xf32, #tpu.memory_space<smem>>
    %167 = vector.broadcast %166 : f32 to vector<18x18xf32>
    %168 = arith.mulf %167, %153 : vector<18x18xf32>
    %169 = arith.addf %151, %168 : vector<18x18xf32>
    %c0_48 = arith.constant 0 : index
    %c2_49 = arith.constant 2 : index
    %c0_50 = arith.constant 0 : index
    %170 = vector.load %arg9[%c0_48, %c2_49, %c0_50] : memref<4x20x20xf32, #tpu.memory_space<vmem>>, vector<1x18x18xf32>
    %171 = vector.shape_cast %170 : vector<1x18x18xf32> to vector<18x18xf32>
    %c6 = arith.constant 6 : index
    %172 = memref.load %arg1[%c6] : memref<144xf32, #tpu.memory_space<smem>>
    %173 = vector.broadcast %172 : f32 to vector<18x18xf32>
    %174 = arith.mulf %173, %171 : vector<18x18xf32>
    %175 = arith.addf %157, %174 : vector<18x18xf32>
    %c42 = arith.constant 42 : index
    %176 = memref.load %arg1[%c42] : memref<144xf32, #tpu.memory_space<smem>>
    %177 = vector.broadcast %176 : f32 to vector<18x18xf32>
    %178 = arith.mulf %177, %171 : vector<18x18xf32>
    %179 = arith.addf %161, %178 : vector<18x18xf32>
    %c78 = arith.constant 78 : index
    %180 = memref.load %arg1[%c78] : memref<144xf32, #tpu.memory_space<smem>>
    %181 = vector.broadcast %180 : f32 to vector<18x18xf32>
    %182 = arith.mulf %181, %171 : vector<18x18xf32>
    %183 = arith.addf %165, %182 : vector<18x18xf32>
    %c114 = arith.constant 114 : index
    %184 = memref.load %arg1[%c114] : memref<144xf32, #tpu.memory_space<smem>>
    %185 = vector.broadcast %184 : f32 to vector<18x18xf32>
    %186 = arith.mulf %185, %171 : vector<18x18xf32>
    %187 = arith.addf %169, %186 : vector<18x18xf32>
    %c0_51 = arith.constant 0 : index
    %c2_52 = arith.constant 2 : index
    %c1_53 = arith.constant 1 : index
    %188 = vector.load %arg9[%c0_51, %c2_52, %c1_53] : memref<4x20x20xf32, #tpu.memory_space<vmem>>, vector<1x18x18xf32>
    %189 = vector.shape_cast %188 : vector<1x18x18xf32> to vector<18x18xf32>
    %c7 = arith.constant 7 : index
    %190 = memref.load %arg1[%c7] : memref<144xf32, #tpu.memory_space<smem>>
    %191 = vector.broadcast %190 : f32 to vector<18x18xf32>
    %192 = arith.mulf %191, %189 : vector<18x18xf32>
    %193 = arith.addf %175, %192 : vector<18x18xf32>
    %c43 = arith.constant 43 : index
    %194 = memref.load %arg1[%c43] : memref<144xf32, #tpu.memory_space<smem>>
    %195 = vector.broadcast %194 : f32 to vector<18x18xf32>
    %196 = arith.mulf %195, %189 : vector<18x18xf32>
    %197 = arith.addf %179, %196 : vector<18x18xf32>
    %c79 = arith.constant 79 : index
    %198 = memref.load %arg1[%c79] : memref<144xf32, #tpu.memory_space<smem>>
    %199 = vector.broadcast %198 : f32 to vector<18x18xf32>
    %200 = arith.mulf %199, %189 : vector<18x18xf32>
    %201 = arith.addf %183, %200 : vector<18x18xf32>
    %c115 = arith.constant 115 : index
    %202 = memref.load %arg1[%c115] : memref<144xf32, #tpu.memory_space<smem>>
    %203 = vector.broadcast %202 : f32 to vector<18x18xf32>
    %204 = arith.mulf %203, %189 : vector<18x18xf32>
    %205 = arith.addf %187, %204 : vector<18x18xf32>
    %c0_54 = arith.constant 0 : index
    %c2_55 = arith.constant 2 : index
    %c2_56 = arith.constant 2 : index
    %206 = vector.load %arg9[%c0_54, %c2_55, %c2_56] : memref<4x20x20xf32, #tpu.memory_space<vmem>>, vector<1x18x18xf32>
    %207 = vector.shape_cast %206 : vector<1x18x18xf32> to vector<18x18xf32>
    %c8 = arith.constant 8 : index
    %208 = memref.load %arg1[%c8] : memref<144xf32, #tpu.memory_space<smem>>
    %209 = vector.broadcast %208 : f32 to vector<18x18xf32>
    %210 = arith.mulf %209, %207 : vector<18x18xf32>
    %211 = arith.addf %193, %210 : vector<18x18xf32>
    %c44 = arith.constant 44 : index
    %212 = memref.load %arg1[%c44] : memref<144xf32, #tpu.memory_space<smem>>
    %213 = vector.broadcast %212 : f32 to vector<18x18xf32>
    %214 = arith.mulf %213, %207 : vector<18x18xf32>
    %215 = arith.addf %197, %214 : vector<18x18xf32>
    %c80 = arith.constant 80 : index
    %216 = memref.load %arg1[%c80] : memref<144xf32, #tpu.memory_space<smem>>
    %217 = vector.broadcast %216 : f32 to vector<18x18xf32>
    %218 = arith.mulf %217, %207 : vector<18x18xf32>
    %219 = arith.addf %201, %218 : vector<18x18xf32>
    %c116 = arith.constant 116 : index
    %220 = memref.load %arg1[%c116] : memref<144xf32, #tpu.memory_space<smem>>
    %221 = vector.broadcast %220 : f32 to vector<18x18xf32>
    %222 = arith.mulf %221, %207 : vector<18x18xf32>
    %223 = arith.addf %205, %222 : vector<18x18xf32>
    %c1_57 = arith.constant 1 : index
    %c0_58 = arith.constant 0 : index
    %c0_59 = arith.constant 0 : index
    %224 = vector.load %arg9[%c1_57, %c0_58, %c0_59] : memref<4x20x20xf32, #tpu.memory_space<vmem>>, vector<1x18x18xf32>
    %225 = vector.shape_cast %224 : vector<1x18x18xf32> to vector<18x18xf32>
    %c9 = arith.constant 9 : index
    %226 = memref.load %arg1[%c9] : memref<144xf32, #tpu.memory_space<smem>>
    %227 = vector.broadcast %226 : f32 to vector<18x18xf32>
    %228 = arith.mulf %227, %225 : vector<18x18xf32>
    %229 = arith.addf %211, %228 : vector<18x18xf32>
    %c45 = arith.constant 45 : index
    %230 = memref.load %arg1[%c45] : memref<144xf32, #tpu.memory_space<smem>>
    %231 = vector.broadcast %230 : f32 to vector<18x18xf32>
    %232 = arith.mulf %231, %225 : vector<18x18xf32>
    %233 = arith.addf %215, %232 : vector<18x18xf32>
    %c81 = arith.constant 81 : index
    %234 = memref.load %arg1[%c81] : memref<144xf32, #tpu.memory_space<smem>>
    %235 = vector.broadcast %234 : f32 to vector<18x18xf32>
    %236 = arith.mulf %235, %225 : vector<18x18xf32>
    %237 = arith.addf %219, %236 : vector<18x18xf32>
    %c117 = arith.constant 117 : index
    %238 = memref.load %arg1[%c117] : memref<144xf32, #tpu.memory_space<smem>>
    %239 = vector.broadcast %238 : f32 to vector<18x18xf32>
    %240 = arith.mulf %239, %225 : vector<18x18xf32>
    %241 = arith.addf %223, %240 : vector<18x18xf32>
    %c1_60 = arith.constant 1 : index
    %c0_61 = arith.constant 0 : index
    %c1_62 = arith.constant 1 : index
    %242 = vector.load %arg9[%c1_60, %c0_61, %c1_62] : memref<4x20x20xf32, #tpu.memory_space<vmem>>, vector<1x18x18xf32>
    %243 = vector.shape_cast %242 : vector<1x18x18xf32> to vector<18x18xf32>
    %c10 = arith.constant 10 : index
    %244 = memref.load %arg1[%c10] : memref<144xf32, #tpu.memory_space<smem>>
    %245 = vector.broadcast %244 : f32 to vector<18x18xf32>
    %246 = arith.mulf %245, %243 : vector<18x18xf32>
    %247 = arith.addf %229, %246 : vector<18x18xf32>
    %c46 = arith.constant 46 : index
    %248 = memref.load %arg1[%c46] : memref<144xf32, #tpu.memory_space<smem>>
    %249 = vector.broadcast %248 : f32 to vector<18x18xf32>
    %250 = arith.mulf %249, %243 : vector<18x18xf32>
    %251 = arith.addf %233, %250 : vector<18x18xf32>
    %c82 = arith.constant 82 : index
    %252 = memref.load %arg1[%c82] : memref<144xf32, #tpu.memory_space<smem>>
    %253 = vector.broadcast %252 : f32 to vector<18x18xf32>
    %254 = arith.mulf %253, %243 : vector<18x18xf32>
    %255 = arith.addf %237, %254 : vector<18x18xf32>
    %c118 = arith.constant 118 : index
    %256 = memref.load %arg1[%c118] : memref<144xf32, #tpu.memory_space<smem>>
    %257 = vector.broadcast %256 : f32 to vector<18x18xf32>
    %258 = arith.mulf %257, %243 : vector<18x18xf32>
    %259 = arith.addf %241, %258 : vector<18x18xf32>
    %c1_63 = arith.constant 1 : index
    %c0_64 = arith.constant 0 : index
    %c2_65 = arith.constant 2 : index
    %260 = vector.load %arg9[%c1_63, %c0_64, %c2_65] : memref<4x20x20xf32, #tpu.memory_space<vmem>>, vector<1x18x18xf32>
    %261 = vector.shape_cast %260 : vector<1x18x18xf32> to vector<18x18xf32>
    %c11 = arith.constant 11 : index
    %262 = memref.load %arg1[%c11] : memref<144xf32, #tpu.memory_space<smem>>
    %263 = vector.broadcast %262 : f32 to vector<18x18xf32>
    %264 = arith.mulf %263, %261 : vector<18x18xf32>
    %265 = arith.addf %247, %264 : vector<18x18xf32>
    %c47 = arith.constant 47 : index
    %266 = memref.load %arg1[%c47] : memref<144xf32, #tpu.memory_space<smem>>
    %267 = vector.broadcast %266 : f32 to vector<18x18xf32>
    %268 = arith.mulf %267, %261 : vector<18x18xf32>
    %269 = arith.addf %251, %268 : vector<18x18xf32>
    %c83 = arith.constant 83 : index
    %270 = memref.load %arg1[%c83] : memref<144xf32, #tpu.memory_space<smem>>
    %271 = vector.broadcast %270 : f32 to vector<18x18xf32>
    %272 = arith.mulf %271, %261 : vector<18x18xf32>
    %273 = arith.addf %255, %272 : vector<18x18xf32>
    %c119 = arith.constant 119 : index
    %274 = memref.load %arg1[%c119] : memref<144xf32, #tpu.memory_space<smem>>
    %275 = vector.broadcast %274 : f32 to vector<18x18xf32>
    %276 = arith.mulf %275, %261 : vector<18x18xf32>
    %277 = arith.addf %259, %276 : vector<18x18xf32>
    %c1_66 = arith.constant 1 : index
    %c1_67 = arith.constant 1 : index
    %c0_68 = arith.constant 0 : index
    %278 = vector.load %arg9[%c1_66, %c1_67, %c0_68] : memref<4x20x20xf32, #tpu.memory_space<vmem>>, vector<1x18x18xf32>
    %279 = vector.shape_cast %278 : vector<1x18x18xf32> to vector<18x18xf32>
    %c12 = arith.constant 12 : index
    %280 = memref.load %arg1[%c12] : memref<144xf32, #tpu.memory_space<smem>>
    %281 = vector.broadcast %280 : f32 to vector<18x18xf32>
    %282 = arith.mulf %281, %279 : vector<18x18xf32>
    %283 = arith.addf %265, %282 : vector<18x18xf32>
    %c48 = arith.constant 48 : index
    %284 = memref.load %arg1[%c48] : memref<144xf32, #tpu.memory_space<smem>>
    %285 = vector.broadcast %284 : f32 to vector<18x18xf32>
    %286 = arith.mulf %285, %279 : vector<18x18xf32>
    %287 = arith.addf %269, %286 : vector<18x18xf32>
    %c84 = arith.constant 84 : index
    %288 = memref.load %arg1[%c84] : memref<144xf32, #tpu.memory_space<smem>>
    %289 = vector.broadcast %288 : f32 to vector<18x18xf32>
    %290 = arith.mulf %289, %279 : vector<18x18xf32>
    %291 = arith.addf %273, %290 : vector<18x18xf32>
    %c120 = arith.constant 120 : index
    %292 = memref.load %arg1[%c120] : memref<144xf32, #tpu.memory_space<smem>>
    %293 = vector.broadcast %292 : f32 to vector<18x18xf32>
    %294 = arith.mulf %293, %279 : vector<18x18xf32>
    %295 = arith.addf %277, %294 : vector<18x18xf32>
    %c1_69 = arith.constant 1 : index
    %c1_70 = arith.constant 1 : index
    %c1_71 = arith.constant 1 : index
    %296 = vector.load %arg9[%c1_69, %c1_70, %c1_71] : memref<4x20x20xf32, #tpu.memory_space<vmem>>, vector<1x18x18xf32>
    %297 = vector.shape_cast %296 : vector<1x18x18xf32> to vector<18x18xf32>
    %c13 = arith.constant 13 : index
    %298 = memref.load %arg1[%c13] : memref<144xf32, #tpu.memory_space<smem>>
    %299 = vector.broadcast %298 : f32 to vector<18x18xf32>
    %300 = arith.mulf %299, %297 : vector<18x18xf32>
    %301 = arith.addf %283, %300 : vector<18x18xf32>
    %c49 = arith.constant 49 : index
    %302 = memref.load %arg1[%c49] : memref<144xf32, #tpu.memory_space<smem>>
    %303 = vector.broadcast %302 : f32 to vector<18x18xf32>
    %304 = arith.mulf %303, %297 : vector<18x18xf32>
    %305 = arith.addf %287, %304 : vector<18x18xf32>
    %c85 = arith.constant 85 : index
    %306 = memref.load %arg1[%c85] : memref<144xf32, #tpu.memory_space<smem>>
    %307 = vector.broadcast %306 : f32 to vector<18x18xf32>
    %308 = arith.mulf %307, %297 : vector<18x18xf32>
    %309 = arith.addf %291, %308 : vector<18x18xf32>
    %c121 = arith.constant 121 : index
    %310 = memref.load %arg1[%c121] : memref<144xf32, #tpu.memory_space<smem>>
    %311 = vector.broadcast %310 : f32 to vector<18x18xf32>
    %312 = arith.mulf %311, %297 : vector<18x18xf32>
    %313 = arith.addf %295, %312 : vector<18x18xf32>
    %c1_72 = arith.constant 1 : index
    %c1_73 = arith.constant 1 : index
    %c2_74 = arith.constant 2 : index
    %314 = vector.load %arg9[%c1_72, %c1_73, %c2_74] : memref<4x20x20xf32, #tpu.memory_space<vmem>>, vector<1x18x18xf32>
    %315 = vector.shape_cast %314 : vector<1x18x18xf32> to vector<18x18xf32>
    %c14 = arith.constant 14 : index
    %316 = memref.load %arg1[%c14] : memref<144xf32, #tpu.memory_space<smem>>
    %317 = vector.broadcast %316 : f32 to vector<18x18xf32>
    %318 = arith.mulf %317, %315 : vector<18x18xf32>
    %319 = arith.addf %301, %318 : vector<18x18xf32>
    %c50 = arith.constant 50 : index
    %320 = memref.load %arg1[%c50] : memref<144xf32, #tpu.memory_space<smem>>
    %321 = vector.broadcast %320 : f32 to vector<18x18xf32>
    %322 = arith.mulf %321, %315 : vector<18x18xf32>
    %323 = arith.addf %305, %322 : vector<18x18xf32>
    %c86 = arith.constant 86 : index
    %324 = memref.load %arg1[%c86] : memref<144xf32, #tpu.memory_space<smem>>
    %325 = vector.broadcast %324 : f32 to vector<18x18xf32>
    %326 = arith.mulf %325, %315 : vector<18x18xf32>
    %327 = arith.addf %309, %326 : vector<18x18xf32>
    %c122 = arith.constant 122 : index
    %328 = memref.load %arg1[%c122] : memref<144xf32, #tpu.memory_space<smem>>
    %329 = vector.broadcast %328 : f32 to vector<18x18xf32>
    %330 = arith.mulf %329, %315 : vector<18x18xf32>
    %331 = arith.addf %313, %330 : vector<18x18xf32>
    %c1_75 = arith.constant 1 : index
    %c2_76 = arith.constant 2 : index
    %c0_77 = arith.constant 0 : index
    %332 = vector.load %arg9[%c1_75, %c2_76, %c0_77] : memref<4x20x20xf32, #tpu.memory_space<vmem>>, vector<1x18x18xf32>
    %333 = vector.shape_cast %332 : vector<1x18x18xf32> to vector<18x18xf32>
    %c15 = arith.constant 15 : index
    %334 = memref.load %arg1[%c15] : memref<144xf32, #tpu.memory_space<smem>>
    %335 = vector.broadcast %334 : f32 to vector<18x18xf32>
    %336 = arith.mulf %335, %333 : vector<18x18xf32>
    %337 = arith.addf %319, %336 : vector<18x18xf32>
    %c51 = arith.constant 51 : index
    %338 = memref.load %arg1[%c51] : memref<144xf32, #tpu.memory_space<smem>>
    %339 = vector.broadcast %338 : f32 to vector<18x18xf32>
    %340 = arith.mulf %339, %333 : vector<18x18xf32>
    %341 = arith.addf %323, %340 : vector<18x18xf32>
    %c87 = arith.constant 87 : index
    %342 = memref.load %arg1[%c87] : memref<144xf32, #tpu.memory_space<smem>>
    %343 = vector.broadcast %342 : f32 to vector<18x18xf32>
    %344 = arith.mulf %343, %333 : vector<18x18xf32>
    %345 = arith.addf %327, %344 : vector<18x18xf32>
    %c123 = arith.constant 123 : index
    %346 = memref.load %arg1[%c123] : memref<144xf32, #tpu.memory_space<smem>>
    %347 = vector.broadcast %346 : f32 to vector<18x18xf32>
    %348 = arith.mulf %347, %333 : vector<18x18xf32>
    %349 = arith.addf %331, %348 : vector<18x18xf32>
    %c1_78 = arith.constant 1 : index
    %c2_79 = arith.constant 2 : index
    %c1_80 = arith.constant 1 : index
    %350 = vector.load %arg9[%c1_78, %c2_79, %c1_80] : memref<4x20x20xf32, #tpu.memory_space<vmem>>, vector<1x18x18xf32>
    %351 = vector.shape_cast %350 : vector<1x18x18xf32> to vector<18x18xf32>
    %c16 = arith.constant 16 : index
    %352 = memref.load %arg1[%c16] : memref<144xf32, #tpu.memory_space<smem>>
    %353 = vector.broadcast %352 : f32 to vector<18x18xf32>
    %354 = arith.mulf %353, %351 : vector<18x18xf32>
    %355 = arith.addf %337, %354 : vector<18x18xf32>
    %c52 = arith.constant 52 : index
    %356 = memref.load %arg1[%c52] : memref<144xf32, #tpu.memory_space<smem>>
    %357 = vector.broadcast %356 : f32 to vector<18x18xf32>
    %358 = arith.mulf %357, %351 : vector<18x18xf32>
    %359 = arith.addf %341, %358 : vector<18x18xf32>
    %c88 = arith.constant 88 : index
    %360 = memref.load %arg1[%c88] : memref<144xf32, #tpu.memory_space<smem>>
    %361 = vector.broadcast %360 : f32 to vector<18x18xf32>
    %362 = arith.mulf %361, %351 : vector<18x18xf32>
    %363 = arith.addf %345, %362 : vector<18x18xf32>
    %c124 = arith.constant 124 : index
    %364 = memref.load %arg1[%c124] : memref<144xf32, #tpu.memory_space<smem>>
    %365 = vector.broadcast %364 : f32 to vector<18x18xf32>
    %366 = arith.mulf %365, %351 : vector<18x18xf32>
    %367 = arith.addf %349, %366 : vector<18x18xf32>
    %c1_81 = arith.constant 1 : index
    %c2_82 = arith.constant 2 : index
    %c2_83 = arith.constant 2 : index
    %368 = vector.load %arg9[%c1_81, %c2_82, %c2_83] : memref<4x20x20xf32, #tpu.memory_space<vmem>>, vector<1x18x18xf32>
    %369 = vector.shape_cast %368 : vector<1x18x18xf32> to vector<18x18xf32>
    %c17 = arith.constant 17 : index
    %370 = memref.load %arg1[%c17] : memref<144xf32, #tpu.memory_space<smem>>
    %371 = vector.broadcast %370 : f32 to vector<18x18xf32>
    %372 = arith.mulf %371, %369 : vector<18x18xf32>
    %373 = arith.addf %355, %372 : vector<18x18xf32>
    %c53 = arith.constant 53 : index
    %374 = memref.load %arg1[%c53] : memref<144xf32, #tpu.memory_space<smem>>
    %375 = vector.broadcast %374 : f32 to vector<18x18xf32>
    %376 = arith.mulf %375, %369 : vector<18x18xf32>
    %377 = arith.addf %359, %376 : vector<18x18xf32>
    %c89 = arith.constant 89 : index
    %378 = memref.load %arg1[%c89] : memref<144xf32, #tpu.memory_space<smem>>
    %379 = vector.broadcast %378 : f32 to vector<18x18xf32>
    %380 = arith.mulf %379, %369 : vector<18x18xf32>
    %381 = arith.addf %363, %380 : vector<18x18xf32>
    %c125 = arith.constant 125 : index
    %382 = memref.load %arg1[%c125] : memref<144xf32, #tpu.memory_space<smem>>
    %383 = vector.broadcast %382 : f32 to vector<18x18xf32>
    %384 = arith.mulf %383, %369 : vector<18x18xf32>
    %385 = arith.addf %367, %384 : vector<18x18xf32>
    %c2_84 = arith.constant 2 : index
    %c0_85 = arith.constant 0 : index
    %c0_86 = arith.constant 0 : index
    %386 = vector.load %arg9[%c2_84, %c0_85, %c0_86] : memref<4x20x20xf32, #tpu.memory_space<vmem>>, vector<1x18x18xf32>
    %387 = vector.shape_cast %386 : vector<1x18x18xf32> to vector<18x18xf32>
    %c18 = arith.constant 18 : index
    %388 = memref.load %arg1[%c18] : memref<144xf32, #tpu.memory_space<smem>>
    %389 = vector.broadcast %388 : f32 to vector<18x18xf32>
    %390 = arith.mulf %389, %387 : vector<18x18xf32>
    %391 = arith.addf %373, %390 : vector<18x18xf32>
    %c54 = arith.constant 54 : index
    %392 = memref.load %arg1[%c54] : memref<144xf32, #tpu.memory_space<smem>>
    %393 = vector.broadcast %392 : f32 to vector<18x18xf32>
    %394 = arith.mulf %393, %387 : vector<18x18xf32>
    %395 = arith.addf %377, %394 : vector<18x18xf32>
    %c90 = arith.constant 90 : index
    %396 = memref.load %arg1[%c90] : memref<144xf32, #tpu.memory_space<smem>>
    %397 = vector.broadcast %396 : f32 to vector<18x18xf32>
    %398 = arith.mulf %397, %387 : vector<18x18xf32>
    %399 = arith.addf %381, %398 : vector<18x18xf32>
    %c126 = arith.constant 126 : index
    %400 = memref.load %arg1[%c126] : memref<144xf32, #tpu.memory_space<smem>>
    %401 = vector.broadcast %400 : f32 to vector<18x18xf32>
    %402 = arith.mulf %401, %387 : vector<18x18xf32>
    %403 = arith.addf %385, %402 : vector<18x18xf32>
    %c2_87 = arith.constant 2 : index
    %c0_88 = arith.constant 0 : index
    %c1_89 = arith.constant 1 : index
    %404 = vector.load %arg9[%c2_87, %c0_88, %c1_89] : memref<4x20x20xf32, #tpu.memory_space<vmem>>, vector<1x18x18xf32>
    %405 = vector.shape_cast %404 : vector<1x18x18xf32> to vector<18x18xf32>
    %c19 = arith.constant 19 : index
    %406 = memref.load %arg1[%c19] : memref<144xf32, #tpu.memory_space<smem>>
    %407 = vector.broadcast %406 : f32 to vector<18x18xf32>
    %408 = arith.mulf %407, %405 : vector<18x18xf32>
    %409 = arith.addf %391, %408 : vector<18x18xf32>
    %c55 = arith.constant 55 : index
    %410 = memref.load %arg1[%c55] : memref<144xf32, #tpu.memory_space<smem>>
    %411 = vector.broadcast %410 : f32 to vector<18x18xf32>
    %412 = arith.mulf %411, %405 : vector<18x18xf32>
    %413 = arith.addf %395, %412 : vector<18x18xf32>
    %c91 = arith.constant 91 : index
    %414 = memref.load %arg1[%c91] : memref<144xf32, #tpu.memory_space<smem>>
    %415 = vector.broadcast %414 : f32 to vector<18x18xf32>
    %416 = arith.mulf %415, %405 : vector<18x18xf32>
    %417 = arith.addf %399, %416 : vector<18x18xf32>
    %c127 = arith.constant 127 : index
    %418 = memref.load %arg1[%c127] : memref<144xf32, #tpu.memory_space<smem>>
    %419 = vector.broadcast %418 : f32 to vector<18x18xf32>
    %420 = arith.mulf %419, %405 : vector<18x18xf32>
    %421 = arith.addf %403, %420 : vector<18x18xf32>
    %c2_90 = arith.constant 2 : index
    %c0_91 = arith.constant 0 : index
    %c2_92 = arith.constant 2 : index
    %422 = vector.load %arg9[%c2_90, %c0_91, %c2_92] : memref<4x20x20xf32, #tpu.memory_space<vmem>>, vector<1x18x18xf32>
    %423 = vector.shape_cast %422 : vector<1x18x18xf32> to vector<18x18xf32>
    %c20 = arith.constant 20 : index
    %424 = memref.load %arg1[%c20] : memref<144xf32, #tpu.memory_space<smem>>
    %425 = vector.broadcast %424 : f32 to vector<18x18xf32>
    %426 = arith.mulf %425, %423 : vector<18x18xf32>
    %427 = arith.addf %409, %426 : vector<18x18xf32>
    %c56 = arith.constant 56 : index
    %428 = memref.load %arg1[%c56] : memref<144xf32, #tpu.memory_space<smem>>
    %429 = vector.broadcast %428 : f32 to vector<18x18xf32>
    %430 = arith.mulf %429, %423 : vector<18x18xf32>
    %431 = arith.addf %413, %430 : vector<18x18xf32>
    %c92 = arith.constant 92 : index
    %432 = memref.load %arg1[%c92] : memref<144xf32, #tpu.memory_space<smem>>
    %433 = vector.broadcast %432 : f32 to vector<18x18xf32>
    %434 = arith.mulf %433, %423 : vector<18x18xf32>
    %435 = arith.addf %417, %434 : vector<18x18xf32>
    %c128 = arith.constant 128 : index
    %436 = memref.load %arg1[%c128] : memref<144xf32, #tpu.memory_space<smem>>
    %437 = vector.broadcast %436 : f32 to vector<18x18xf32>
    %438 = arith.mulf %437, %423 : vector<18x18xf32>
    %439 = arith.addf %421, %438 : vector<18x18xf32>
    %c2_93 = arith.constant 2 : index
    %c1_94 = arith.constant 1 : index
    %c0_95 = arith.constant 0 : index
    %440 = vector.load %arg9[%c2_93, %c1_94, %c0_95] : memref<4x20x20xf32, #tpu.memory_space<vmem>>, vector<1x18x18xf32>
    %441 = vector.shape_cast %440 : vector<1x18x18xf32> to vector<18x18xf32>
    %c21 = arith.constant 21 : index
    %442 = memref.load %arg1[%c21] : memref<144xf32, #tpu.memory_space<smem>>
    %443 = vector.broadcast %442 : f32 to vector<18x18xf32>
    %444 = arith.mulf %443, %441 : vector<18x18xf32>
    %445 = arith.addf %427, %444 : vector<18x18xf32>
    %c57 = arith.constant 57 : index
    %446 = memref.load %arg1[%c57] : memref<144xf32, #tpu.memory_space<smem>>
    %447 = vector.broadcast %446 : f32 to vector<18x18xf32>
    %448 = arith.mulf %447, %441 : vector<18x18xf32>
    %449 = arith.addf %431, %448 : vector<18x18xf32>
    %c93 = arith.constant 93 : index
    %450 = memref.load %arg1[%c93] : memref<144xf32, #tpu.memory_space<smem>>
    %451 = vector.broadcast %450 : f32 to vector<18x18xf32>
    %452 = arith.mulf %451, %441 : vector<18x18xf32>
    %453 = arith.addf %435, %452 : vector<18x18xf32>
    %c129 = arith.constant 129 : index
    %454 = memref.load %arg1[%c129] : memref<144xf32, #tpu.memory_space<smem>>
    %455 = vector.broadcast %454 : f32 to vector<18x18xf32>
    %456 = arith.mulf %455, %441 : vector<18x18xf32>
    %457 = arith.addf %439, %456 : vector<18x18xf32>
    %c2_96 = arith.constant 2 : index
    %c1_97 = arith.constant 1 : index
    %c1_98 = arith.constant 1 : index
    %458 = vector.load %arg9[%c2_96, %c1_97, %c1_98] : memref<4x20x20xf32, #tpu.memory_space<vmem>>, vector<1x18x18xf32>
    %459 = vector.shape_cast %458 : vector<1x18x18xf32> to vector<18x18xf32>
    %c22 = arith.constant 22 : index
    %460 = memref.load %arg1[%c22] : memref<144xf32, #tpu.memory_space<smem>>
    %461 = vector.broadcast %460 : f32 to vector<18x18xf32>
    %462 = arith.mulf %461, %459 : vector<18x18xf32>
    %463 = arith.addf %445, %462 : vector<18x18xf32>
    %c58 = arith.constant 58 : index
    %464 = memref.load %arg1[%c58] : memref<144xf32, #tpu.memory_space<smem>>
    %465 = vector.broadcast %464 : f32 to vector<18x18xf32>
    %466 = arith.mulf %465, %459 : vector<18x18xf32>
    %467 = arith.addf %449, %466 : vector<18x18xf32>
    %c94 = arith.constant 94 : index
    %468 = memref.load %arg1[%c94] : memref<144xf32, #tpu.memory_space<smem>>
    %469 = vector.broadcast %468 : f32 to vector<18x18xf32>
    %470 = arith.mulf %469, %459 : vector<18x18xf32>
    %471 = arith.addf %453, %470 : vector<18x18xf32>
    %c130 = arith.constant 130 : index
    %472 = memref.load %arg1[%c130] : memref<144xf32, #tpu.memory_space<smem>>
    %473 = vector.broadcast %472 : f32 to vector<18x18xf32>
    %474 = arith.mulf %473, %459 : vector<18x18xf32>
    %475 = arith.addf %457, %474 : vector<18x18xf32>
    %c2_99 = arith.constant 2 : index
    %c1_100 = arith.constant 1 : index
    %c2_101 = arith.constant 2 : index
    %476 = vector.load %arg9[%c2_99, %c1_100, %c2_101] : memref<4x20x20xf32, #tpu.memory_space<vmem>>, vector<1x18x18xf32>
    %477 = vector.shape_cast %476 : vector<1x18x18xf32> to vector<18x18xf32>
    %c23 = arith.constant 23 : index
    %478 = memref.load %arg1[%c23] : memref<144xf32, #tpu.memory_space<smem>>
    %479 = vector.broadcast %478 : f32 to vector<18x18xf32>
    %480 = arith.mulf %479, %477 : vector<18x18xf32>
    %481 = arith.addf %463, %480 : vector<18x18xf32>
    %c59 = arith.constant 59 : index
    %482 = memref.load %arg1[%c59] : memref<144xf32, #tpu.memory_space<smem>>
    %483 = vector.broadcast %482 : f32 to vector<18x18xf32>
    %484 = arith.mulf %483, %477 : vector<18x18xf32>
    %485 = arith.addf %467, %484 : vector<18x18xf32>
    %c95 = arith.constant 95 : index
    %486 = memref.load %arg1[%c95] : memref<144xf32, #tpu.memory_space<smem>>
    %487 = vector.broadcast %486 : f32 to vector<18x18xf32>
    %488 = arith.mulf %487, %477 : vector<18x18xf32>
    %489 = arith.addf %471, %488 : vector<18x18xf32>
    %c131 = arith.constant 131 : index
    %490 = memref.load %arg1[%c131] : memref<144xf32, #tpu.memory_space<smem>>
    %491 = vector.broadcast %490 : f32 to vector<18x18xf32>
    %492 = arith.mulf %491, %477 : vector<18x18xf32>
    %493 = arith.addf %475, %492 : vector<18x18xf32>
    %c2_102 = arith.constant 2 : index
    %c2_103 = arith.constant 2 : index
    %c0_104 = arith.constant 0 : index
    %494 = vector.load %arg9[%c2_102, %c2_103, %c0_104] : memref<4x20x20xf32, #tpu.memory_space<vmem>>, vector<1x18x18xf32>
    %495 = vector.shape_cast %494 : vector<1x18x18xf32> to vector<18x18xf32>
    %c24 = arith.constant 24 : index
    %496 = memref.load %arg1[%c24] : memref<144xf32, #tpu.memory_space<smem>>
    %497 = vector.broadcast %496 : f32 to vector<18x18xf32>
    %498 = arith.mulf %497, %495 : vector<18x18xf32>
    %499 = arith.addf %481, %498 : vector<18x18xf32>
    %c60 = arith.constant 60 : index
    %500 = memref.load %arg1[%c60] : memref<144xf32, #tpu.memory_space<smem>>
    %501 = vector.broadcast %500 : f32 to vector<18x18xf32>
    %502 = arith.mulf %501, %495 : vector<18x18xf32>
    %503 = arith.addf %485, %502 : vector<18x18xf32>
    %c96 = arith.constant 96 : index
    %504 = memref.load %arg1[%c96] : memref<144xf32, #tpu.memory_space<smem>>
    %505 = vector.broadcast %504 : f32 to vector<18x18xf32>
    %506 = arith.mulf %505, %495 : vector<18x18xf32>
    %507 = arith.addf %489, %506 : vector<18x18xf32>
    %c132 = arith.constant 132 : index
    %508 = memref.load %arg1[%c132] : memref<144xf32, #tpu.memory_space<smem>>
    %509 = vector.broadcast %508 : f32 to vector<18x18xf32>
    %510 = arith.mulf %509, %495 : vector<18x18xf32>
    %511 = arith.addf %493, %510 : vector<18x18xf32>
    %c2_105 = arith.constant 2 : index
    %c2_106 = arith.constant 2 : index
    %c1_107 = arith.constant 1 : index
    %512 = vector.load %arg9[%c2_105, %c2_106, %c1_107] : memref<4x20x20xf32, #tpu.memory_space<vmem>>, vector<1x18x18xf32>
    %513 = vector.shape_cast %512 : vector<1x18x18xf32> to vector<18x18xf32>
    %c25 = arith.constant 25 : index
    %514 = memref.load %arg1[%c25] : memref<144xf32, #tpu.memory_space<smem>>
    %515 = vector.broadcast %514 : f32 to vector<18x18xf32>
    %516 = arith.mulf %515, %513 : vector<18x18xf32>
    %517 = arith.addf %499, %516 : vector<18x18xf32>
    %c61 = arith.constant 61 : index
    %518 = memref.load %arg1[%c61] : memref<144xf32, #tpu.memory_space<smem>>
    %519 = vector.broadcast %518 : f32 to vector<18x18xf32>
    %520 = arith.mulf %519, %513 : vector<18x18xf32>
    %521 = arith.addf %503, %520 : vector<18x18xf32>
    %c97 = arith.constant 97 : index
    %522 = memref.load %arg1[%c97] : memref<144xf32, #tpu.memory_space<smem>>
    %523 = vector.broadcast %522 : f32 to vector<18x18xf32>
    %524 = arith.mulf %523, %513 : vector<18x18xf32>
    %525 = arith.addf %507, %524 : vector<18x18xf32>
    %c133 = arith.constant 133 : index
    %526 = memref.load %arg1[%c133] : memref<144xf32, #tpu.memory_space<smem>>
    %527 = vector.broadcast %526 : f32 to vector<18x18xf32>
    %528 = arith.mulf %527, %513 : vector<18x18xf32>
    %529 = arith.addf %511, %528 : vector<18x18xf32>
    %c2_108 = arith.constant 2 : index
    %c2_109 = arith.constant 2 : index
    %c2_110 = arith.constant 2 : index
    %530 = vector.load %arg9[%c2_108, %c2_109, %c2_110] : memref<4x20x20xf32, #tpu.memory_space<vmem>>, vector<1x18x18xf32>
    %531 = vector.shape_cast %530 : vector<1x18x18xf32> to vector<18x18xf32>
    %c26 = arith.constant 26 : index
    %532 = memref.load %arg1[%c26] : memref<144xf32, #tpu.memory_space<smem>>
    %533 = vector.broadcast %532 : f32 to vector<18x18xf32>
    %534 = arith.mulf %533, %531 : vector<18x18xf32>
    %535 = arith.addf %517, %534 : vector<18x18xf32>
    %c62 = arith.constant 62 : index
    %536 = memref.load %arg1[%c62] : memref<144xf32, #tpu.memory_space<smem>>
    %537 = vector.broadcast %536 : f32 to vector<18x18xf32>
    %538 = arith.mulf %537, %531 : vector<18x18xf32>
    %539 = arith.addf %521, %538 : vector<18x18xf32>
    %c98 = arith.constant 98 : index
    %540 = memref.load %arg1[%c98] : memref<144xf32, #tpu.memory_space<smem>>
    %541 = vector.broadcast %540 : f32 to vector<18x18xf32>
    %542 = arith.mulf %541, %531 : vector<18x18xf32>
    %543 = arith.addf %525, %542 : vector<18x18xf32>
    %c134 = arith.constant 134 : index
    %544 = memref.load %arg1[%c134] : memref<144xf32, #tpu.memory_space<smem>>
    %545 = vector.broadcast %544 : f32 to vector<18x18xf32>
    %546 = arith.mulf %545, %531 : vector<18x18xf32>
    %547 = arith.addf %529, %546 : vector<18x18xf32>
    %c3_111 = arith.constant 3 : index
    %c0_112 = arith.constant 0 : index
    %c0_113 = arith.constant 0 : index
    %548 = vector.load %arg9[%c3_111, %c0_112, %c0_113] : memref<4x20x20xf32, #tpu.memory_space<vmem>>, vector<1x18x18xf32>
    %549 = vector.shape_cast %548 : vector<1x18x18xf32> to vector<18x18xf32>
    %c27 = arith.constant 27 : index
    %550 = memref.load %arg1[%c27] : memref<144xf32, #tpu.memory_space<smem>>
    %551 = vector.broadcast %550 : f32 to vector<18x18xf32>
    %552 = arith.mulf %551, %549 : vector<18x18xf32>
    %553 = arith.addf %535, %552 : vector<18x18xf32>
    %c63 = arith.constant 63 : index
    %554 = memref.load %arg1[%c63] : memref<144xf32, #tpu.memory_space<smem>>
    %555 = vector.broadcast %554 : f32 to vector<18x18xf32>
    %556 = arith.mulf %555, %549 : vector<18x18xf32>
    %557 = arith.addf %539, %556 : vector<18x18xf32>
    %c99 = arith.constant 99 : index
    %558 = memref.load %arg1[%c99] : memref<144xf32, #tpu.memory_space<smem>>
    %559 = vector.broadcast %558 : f32 to vector<18x18xf32>
    %560 = arith.mulf %559, %549 : vector<18x18xf32>
    %561 = arith.addf %543, %560 : vector<18x18xf32>
    %c135 = arith.constant 135 : index
    %562 = memref.load %arg1[%c135] : memref<144xf32, #tpu.memory_space<smem>>
    %563 = vector.broadcast %562 : f32 to vector<18x18xf32>
    %564 = arith.mulf %563, %549 : vector<18x18xf32>
    %565 = arith.addf %547, %564 : vector<18x18xf32>
    %c3_114 = arith.constant 3 : index
    %c0_115 = arith.constant 0 : index
    %c1_116 = arith.constant 1 : index
    %566 = vector.load %arg9[%c3_114, %c0_115, %c1_116] : memref<4x20x20xf32, #tpu.memory_space<vmem>>, vector<1x18x18xf32>
    %567 = vector.shape_cast %566 : vector<1x18x18xf32> to vector<18x18xf32>
    %c28 = arith.constant 28 : index
    %568 = memref.load %arg1[%c28] : memref<144xf32, #tpu.memory_space<smem>>
    %569 = vector.broadcast %568 : f32 to vector<18x18xf32>
    %570 = arith.mulf %569, %567 : vector<18x18xf32>
    %571 = arith.addf %553, %570 : vector<18x18xf32>
    %c64 = arith.constant 64 : index
    %572 = memref.load %arg1[%c64] : memref<144xf32, #tpu.memory_space<smem>>
    %573 = vector.broadcast %572 : f32 to vector<18x18xf32>
    %574 = arith.mulf %573, %567 : vector<18x18xf32>
    %575 = arith.addf %557, %574 : vector<18x18xf32>
    %c100 = arith.constant 100 : index
    %576 = memref.load %arg1[%c100] : memref<144xf32, #tpu.memory_space<smem>>
    %577 = vector.broadcast %576 : f32 to vector<18x18xf32>
    %578 = arith.mulf %577, %567 : vector<18x18xf32>
    %579 = arith.addf %561, %578 : vector<18x18xf32>
    %c136 = arith.constant 136 : index
    %580 = memref.load %arg1[%c136] : memref<144xf32, #tpu.memory_space<smem>>
    %581 = vector.broadcast %580 : f32 to vector<18x18xf32>
    %582 = arith.mulf %581, %567 : vector<18x18xf32>
    %583 = arith.addf %565, %582 : vector<18x18xf32>
    %c3_117 = arith.constant 3 : index
    %c0_118 = arith.constant 0 : index
    %c2_119 = arith.constant 2 : index
    %584 = vector.load %arg9[%c3_117, %c0_118, %c2_119] : memref<4x20x20xf32, #tpu.memory_space<vmem>>, vector<1x18x18xf32>
    %585 = vector.shape_cast %584 : vector<1x18x18xf32> to vector<18x18xf32>
    %c29 = arith.constant 29 : index
    %586 = memref.load %arg1[%c29] : memref<144xf32, #tpu.memory_space<smem>>
    %587 = vector.broadcast %586 : f32 to vector<18x18xf32>
    %588 = arith.mulf %587, %585 : vector<18x18xf32>
    %589 = arith.addf %571, %588 : vector<18x18xf32>
    %c65 = arith.constant 65 : index
    %590 = memref.load %arg1[%c65] : memref<144xf32, #tpu.memory_space<smem>>
    %591 = vector.broadcast %590 : f32 to vector<18x18xf32>
    %592 = arith.mulf %591, %585 : vector<18x18xf32>
    %593 = arith.addf %575, %592 : vector<18x18xf32>
    %c101 = arith.constant 101 : index
    %594 = memref.load %arg1[%c101] : memref<144xf32, #tpu.memory_space<smem>>
    %595 = vector.broadcast %594 : f32 to vector<18x18xf32>
    %596 = arith.mulf %595, %585 : vector<18x18xf32>
    %597 = arith.addf %579, %596 : vector<18x18xf32>
    %c137 = arith.constant 137 : index
    %598 = memref.load %arg1[%c137] : memref<144xf32, #tpu.memory_space<smem>>
    %599 = vector.broadcast %598 : f32 to vector<18x18xf32>
    %600 = arith.mulf %599, %585 : vector<18x18xf32>
    %601 = arith.addf %583, %600 : vector<18x18xf32>
    %c3_120 = arith.constant 3 : index
    %c1_121 = arith.constant 1 : index
    %c0_122 = arith.constant 0 : index
    %602 = vector.load %arg9[%c3_120, %c1_121, %c0_122] : memref<4x20x20xf32, #tpu.memory_space<vmem>>, vector<1x18x18xf32>
    %603 = vector.shape_cast %602 : vector<1x18x18xf32> to vector<18x18xf32>
    %c30 = arith.constant 30 : index
    %604 = memref.load %arg1[%c30] : memref<144xf32, #tpu.memory_space<smem>>
    %605 = vector.broadcast %604 : f32 to vector<18x18xf32>
    %606 = arith.mulf %605, %603 : vector<18x18xf32>
    %607 = arith.addf %589, %606 : vector<18x18xf32>
    %c66 = arith.constant 66 : index
    %608 = memref.load %arg1[%c66] : memref<144xf32, #tpu.memory_space<smem>>
    %609 = vector.broadcast %608 : f32 to vector<18x18xf32>
    %610 = arith.mulf %609, %603 : vector<18x18xf32>
    %611 = arith.addf %593, %610 : vector<18x18xf32>
    %c102 = arith.constant 102 : index
    %612 = memref.load %arg1[%c102] : memref<144xf32, #tpu.memory_space<smem>>
    %613 = vector.broadcast %612 : f32 to vector<18x18xf32>
    %614 = arith.mulf %613, %603 : vector<18x18xf32>
    %615 = arith.addf %597, %614 : vector<18x18xf32>
    %c138 = arith.constant 138 : index
    %616 = memref.load %arg1[%c138] : memref<144xf32, #tpu.memory_space<smem>>
    %617 = vector.broadcast %616 : f32 to vector<18x18xf32>
    %618 = arith.mulf %617, %603 : vector<18x18xf32>
    %619 = arith.addf %601, %618 : vector<18x18xf32>
    %c3_123 = arith.constant 3 : index
    %c1_124 = arith.constant 1 : index
    %c1_125 = arith.constant 1 : index
    %620 = vector.load %arg9[%c3_123, %c1_124, %c1_125] : memref<4x20x20xf32, #tpu.memory_space<vmem>>, vector<1x18x18xf32>
    %621 = vector.shape_cast %620 : vector<1x18x18xf32> to vector<18x18xf32>
    %c31 = arith.constant 31 : index
    %622 = memref.load %arg1[%c31] : memref<144xf32, #tpu.memory_space<smem>>
    %623 = vector.broadcast %622 : f32 to vector<18x18xf32>
    %624 = arith.mulf %623, %621 : vector<18x18xf32>
    %625 = arith.addf %607, %624 : vector<18x18xf32>
    %c67 = arith.constant 67 : index
    %626 = memref.load %arg1[%c67] : memref<144xf32, #tpu.memory_space<smem>>
    %627 = vector.broadcast %626 : f32 to vector<18x18xf32>
    %628 = arith.mulf %627, %621 : vector<18x18xf32>
    %629 = arith.addf %611, %628 : vector<18x18xf32>
    %c103 = arith.constant 103 : index
    %630 = memref.load %arg1[%c103] : memref<144xf32, #tpu.memory_space<smem>>
    %631 = vector.broadcast %630 : f32 to vector<18x18xf32>
    %632 = arith.mulf %631, %621 : vector<18x18xf32>
    %633 = arith.addf %615, %632 : vector<18x18xf32>
    %c139 = arith.constant 139 : index
    %634 = memref.load %arg1[%c139] : memref<144xf32, #tpu.memory_space<smem>>
    %635 = vector.broadcast %634 : f32 to vector<18x18xf32>
    %636 = arith.mulf %635, %621 : vector<18x18xf32>
    %637 = arith.addf %619, %636 : vector<18x18xf32>
    %c3_126 = arith.constant 3 : index
    %c1_127 = arith.constant 1 : index
    %c2_128 = arith.constant 2 : index
    %638 = vector.load %arg9[%c3_126, %c1_127, %c2_128] : memref<4x20x20xf32, #tpu.memory_space<vmem>>, vector<1x18x18xf32>
    %639 = vector.shape_cast %638 : vector<1x18x18xf32> to vector<18x18xf32>
    %c32 = arith.constant 32 : index
    %640 = memref.load %arg1[%c32] : memref<144xf32, #tpu.memory_space<smem>>
    %641 = vector.broadcast %640 : f32 to vector<18x18xf32>
    %642 = arith.mulf %641, %639 : vector<18x18xf32>
    %643 = arith.addf %625, %642 : vector<18x18xf32>
    %c68 = arith.constant 68 : index
    %644 = memref.load %arg1[%c68] : memref<144xf32, #tpu.memory_space<smem>>
    %645 = vector.broadcast %644 : f32 to vector<18x18xf32>
    %646 = arith.mulf %645, %639 : vector<18x18xf32>
    %647 = arith.addf %629, %646 : vector<18x18xf32>
    %c104 = arith.constant 104 : index
    %648 = memref.load %arg1[%c104] : memref<144xf32, #tpu.memory_space<smem>>
    %649 = vector.broadcast %648 : f32 to vector<18x18xf32>
    %650 = arith.mulf %649, %639 : vector<18x18xf32>
    %651 = arith.addf %633, %650 : vector<18x18xf32>
    %c140 = arith.constant 140 : index
    %652 = memref.load %arg1[%c140] : memref<144xf32, #tpu.memory_space<smem>>
    %653 = vector.broadcast %652 : f32 to vector<18x18xf32>
    %654 = arith.mulf %653, %639 : vector<18x18xf32>
    %655 = arith.addf %637, %654 : vector<18x18xf32>
    %c3_129 = arith.constant 3 : index
    %c2_130 = arith.constant 2 : index
    %c0_131 = arith.constant 0 : index
    %656 = vector.load %arg9[%c3_129, %c2_130, %c0_131] : memref<4x20x20xf32, #tpu.memory_space<vmem>>, vector<1x18x18xf32>
    %657 = vector.shape_cast %656 : vector<1x18x18xf32> to vector<18x18xf32>
    %c33 = arith.constant 33 : index
    %658 = memref.load %arg1[%c33] : memref<144xf32, #tpu.memory_space<smem>>
    %659 = vector.broadcast %658 : f32 to vector<18x18xf32>
    %660 = arith.mulf %659, %657 : vector<18x18xf32>
    %661 = arith.addf %643, %660 : vector<18x18xf32>
    %c69 = arith.constant 69 : index
    %662 = memref.load %arg1[%c69] : memref<144xf32, #tpu.memory_space<smem>>
    %663 = vector.broadcast %662 : f32 to vector<18x18xf32>
    %664 = arith.mulf %663, %657 : vector<18x18xf32>
    %665 = arith.addf %647, %664 : vector<18x18xf32>
    %c105 = arith.constant 105 : index
    %666 = memref.load %arg1[%c105] : memref<144xf32, #tpu.memory_space<smem>>
    %667 = vector.broadcast %666 : f32 to vector<18x18xf32>
    %668 = arith.mulf %667, %657 : vector<18x18xf32>
    %669 = arith.addf %651, %668 : vector<18x18xf32>
    %c141 = arith.constant 141 : index
    %670 = memref.load %arg1[%c141] : memref<144xf32, #tpu.memory_space<smem>>
    %671 = vector.broadcast %670 : f32 to vector<18x18xf32>
    %672 = arith.mulf %671, %657 : vector<18x18xf32>
    %673 = arith.addf %655, %672 : vector<18x18xf32>
    %c3_132 = arith.constant 3 : index
    %c2_133 = arith.constant 2 : index
    %c1_134 = arith.constant 1 : index
    %674 = vector.load %arg9[%c3_132, %c2_133, %c1_134] : memref<4x20x20xf32, #tpu.memory_space<vmem>>, vector<1x18x18xf32>
    %675 = vector.shape_cast %674 : vector<1x18x18xf32> to vector<18x18xf32>
    %c34 = arith.constant 34 : index
    %676 = memref.load %arg1[%c34] : memref<144xf32, #tpu.memory_space<smem>>
    %677 = vector.broadcast %676 : f32 to vector<18x18xf32>
    %678 = arith.mulf %677, %675 : vector<18x18xf32>
    %679 = arith.addf %661, %678 : vector<18x18xf32>
    %c70 = arith.constant 70 : index
    %680 = memref.load %arg1[%c70] : memref<144xf32, #tpu.memory_space<smem>>
    %681 = vector.broadcast %680 : f32 to vector<18x18xf32>
    %682 = arith.mulf %681, %675 : vector<18x18xf32>
    %683 = arith.addf %665, %682 : vector<18x18xf32>
    %c106 = arith.constant 106 : index
    %684 = memref.load %arg1[%c106] : memref<144xf32, #tpu.memory_space<smem>>
    %685 = vector.broadcast %684 : f32 to vector<18x18xf32>
    %686 = arith.mulf %685, %675 : vector<18x18xf32>
    %687 = arith.addf %669, %686 : vector<18x18xf32>
    %c142 = arith.constant 142 : index
    %688 = memref.load %arg1[%c142] : memref<144xf32, #tpu.memory_space<smem>>
    %689 = vector.broadcast %688 : f32 to vector<18x18xf32>
    %690 = arith.mulf %689, %675 : vector<18x18xf32>
    %691 = arith.addf %673, %690 : vector<18x18xf32>
    %c3_135 = arith.constant 3 : index
    %c2_136 = arith.constant 2 : index
    %c2_137 = arith.constant 2 : index
    %692 = vector.load %arg9[%c3_135, %c2_136, %c2_137] : memref<4x20x20xf32, #tpu.memory_space<vmem>>, vector<1x18x18xf32>
    %693 = vector.shape_cast %692 : vector<1x18x18xf32> to vector<18x18xf32>
    %c35 = arith.constant 35 : index
    %694 = memref.load %arg1[%c35] : memref<144xf32, #tpu.memory_space<smem>>
    %695 = vector.broadcast %694 : f32 to vector<18x18xf32>
    %696 = arith.mulf %695, %693 : vector<18x18xf32>
    %697 = arith.addf %679, %696 : vector<18x18xf32>
    %c71 = arith.constant 71 : index
    %698 = memref.load %arg1[%c71] : memref<144xf32, #tpu.memory_space<smem>>
    %699 = vector.broadcast %698 : f32 to vector<18x18xf32>
    %700 = arith.mulf %699, %693 : vector<18x18xf32>
    %701 = arith.addf %683, %700 : vector<18x18xf32>
    %c107 = arith.constant 107 : index
    %702 = memref.load %arg1[%c107] : memref<144xf32, #tpu.memory_space<smem>>
    %703 = vector.broadcast %702 : f32 to vector<18x18xf32>
    %704 = arith.mulf %703, %693 : vector<18x18xf32>
    %705 = arith.addf %687, %704 : vector<18x18xf32>
    %c143 = arith.constant 143 : index
    %706 = memref.load %arg1[%c143] : memref<144xf32, #tpu.memory_space<smem>>
    %707 = vector.broadcast %706 : f32 to vector<18x18xf32>
    %708 = arith.mulf %707, %693 : vector<18x18xf32>
    %709 = arith.addf %691, %708 : vector<18x18xf32>
    %710 = tpu.iota {dimensions = array<i32: 0>} : vector<18x18xi32>
    %711 = tpu.iota {dimensions = array<i32: 1>} : vector<18x18xi32>
    %c1_i32 = arith.constant 1 : i32
    %712 = vector.broadcast %c1_i32 : i32 to vector<18x18xi32>
    %713 = arith.cmpi sge, %710, %712 : vector<18x18xi32>
    %c16_i32 = arith.constant 16 : i32
    %714 = vector.broadcast %c16_i32 : i32 to vector<18x18xi32>
    %715 = arith.cmpi sle, %710, %714 : vector<18x18xi32>
    %716 = arith.andi %713, %715 : vector<18x18xi1>
    %c1_i32_138 = arith.constant 1 : i32
    %717 = vector.broadcast %c1_i32_138 : i32 to vector<18x18xi32>
    %718 = arith.cmpi sge, %711, %717 : vector<18x18xi32>
    %719 = arith.andi %716, %718 : vector<18x18xi1>
    %c16_i32_139 = arith.constant 16 : i32
    %720 = vector.broadcast %c16_i32_139 : i32 to vector<18x18xi32>
    %721 = arith.cmpi sle, %711, %720 : vector<18x18xi32>
    %722 = arith.andi %719, %721 : vector<18x18xi1>
    %c0_140 = arith.constant 0 : index
    %723 = memref.load %arg2[%c0_140] : memref<4xf32, #tpu.memory_space<smem>>
    %724 = vector.broadcast %723 : f32 to vector<18x18xf32>
    %725 = arith.addf %697, %724 : vector<18x18xf32>
    %cst_141 = arith.constant 5.000000e-01 : f32
    %726 = vector.broadcast %cst_141 : f32 to vector<18x18xf32>
    %727 = arith.mulf %726, %725 : vector<18x18xf32>
    %cst_142 = arith.constant 0.707106769 : f32
    %728 = vector.broadcast %cst_142 : f32 to vector<18x18xf32>
    %729 = arith.mulf %725, %728 : vector<18x18xf32>
    %730 = math.absf %729 : vector<18x18xf32>
    %cst_143 = arith.constant 5.000000e-01 : f32
    %731 = vector.broadcast %cst_143 : f32 to vector<18x18xf32>
    %732 = arith.mulf %731, %730 : vector<18x18xf32>
    %cst_144 = arith.constant 1.000000e+00 : f32
    %733 = vector.broadcast %cst_144 : f32 to vector<18x18xf32>
    %734 = arith.addf %733, %732 : vector<18x18xf32>
    %cst_145 = arith.constant 1.000000e+00 : f32
    %735 = vector.broadcast %cst_145 : f32 to vector<18x18xf32>
    %736 = arith.divf %735, %734 : vector<18x18xf32>
    %cst_146 = arith.constant 0.170872763 : f32
    %737 = vector.broadcast %cst_146 : f32 to vector<18x18xf32>
    %738 = arith.mulf %736, %737 : vector<18x18xf32>
    %cst_147 = arith.constant -0.822152256 : f32
    %739 = vector.broadcast %cst_147 : f32 to vector<18x18xf32>
    %740 = arith.addf %739, %738 : vector<18x18xf32>
    %741 = arith.mulf %736, %740 : vector<18x18xf32>
    %cst_148 = arith.constant 1.48851585 : f32
    %742 = vector.broadcast %cst_148 : f32 to vector<18x18xf32>
    %743 = arith.addf %742, %741 : vector<18x18xf32>
    %744 = arith.mulf %736, %743 : vector<18x18xf32>
    %cst_149 = arith.constant -1.13520396 : f32
    %745 = vector.broadcast %cst_149 : f32 to vector<18x18xf32>
    %746 = arith.addf %745, %744 : vector<18x18xf32>
    %747 = arith.mulf %736, %746 : vector<18x18xf32>
    %cst_150 = arith.constant 0.278868079 : f32
    %748 = vector.broadcast %cst_150 : f32 to vector<18x18xf32>
    %749 = arith.addf %748, %747 : vector<18x18xf32>
    %750 = arith.mulf %736, %749 : vector<18x18xf32>
    %cst_151 = arith.constant -0.186288059 : f32
    %751 = vector.broadcast %cst_151 : f32 to vector<18x18xf32>
    %752 = arith.addf %751, %750 : vector<18x18xf32>
    %753 = arith.mulf %736, %752 : vector<18x18xf32>
    %cst_152 = arith.constant 0.0967841818 : f32
    %754 = vector.broadcast %cst_152 : f32 to vector<18x18xf32>
    %755 = arith.addf %754, %753 : vector<18x18xf32>
    %756 = arith.mulf %736, %755 : vector<18x18xf32>
    %cst_153 = arith.constant 0.374091953 : f32
    %757 = vector.broadcast %cst_153 : f32 to vector<18x18xf32>
    %758 = arith.addf %757, %756 : vector<18x18xf32>
    %759 = arith.mulf %736, %758 : vector<18x18xf32>
    %cst_154 = arith.constant 1.00002372 : f32
    %760 = vector.broadcast %cst_154 : f32 to vector<18x18xf32>
    %761 = arith.addf %760, %759 : vector<18x18xf32>
    %762 = arith.mulf %736, %761 : vector<18x18xf32>
    %cst_155 = arith.constant -1.26551223 : f32
    %763 = vector.broadcast %cst_155 : f32 to vector<18x18xf32>
    %764 = arith.addf %763, %762 : vector<18x18xf32>
    %cst_156 = arith.constant 0.000000e+00 : f32
    %765 = vector.broadcast %cst_156 : f32 to vector<18x18xf32>
    %766 = arith.subf %765, %730 : vector<18x18xf32>
    %767 = arith.mulf %766, %730 : vector<18x18xf32>
    %768 = arith.addf %767, %764 : vector<18x18xf32>
    %769 = math.exp %768 : vector<18x18xf32>
    %770 = arith.mulf %736, %769 : vector<18x18xf32>
    %cst_157 = arith.constant 0.000000e+00 : f32
    %771 = vector.broadcast %cst_157 : f32 to vector<18x18xf32>
    %772 = arith.cmpf oge, %729, %771 : vector<18x18xf32>
    %cst_158 = arith.constant 1.000000e+00 : f32
    %773 = vector.broadcast %cst_158 : f32 to vector<18x18xf32>
    %774 = arith.subf %773, %770 : vector<18x18xf32>
    %cst_159 = arith.constant 1.000000e+00 : f32
    %775 = vector.broadcast %cst_159 : f32 to vector<18x18xf32>
    %776 = arith.subf %770, %775 : vector<18x18xf32>
    %777 = arith.select %772, %774, %776 : vector<18x18xi1>, vector<18x18xf32>
    %cst_160 = arith.constant 1.000000e+00 : f32
    %778 = vector.broadcast %cst_160 : f32 to vector<18x18xf32>
    %779 = arith.addf %778, %777 : vector<18x18xf32>
    %780 = arith.mulf %727, %779 : vector<18x18xf32>
    %cst_161 = arith.constant 0.000000e+00 : f32
    %781 = vector.broadcast %cst_161 : f32 to vector<18x18xf32>
    %782 = arith.select %722, %780, %781 : vector<18x18xi1>, vector<18x18xf32>
    %c0_162 = arith.constant 0 : index
    %c0_163 = arith.constant 0 : index
    %c0_164 = arith.constant 0 : index
    %783 = vector.load %arg10[%c0_162, %c0_163, %c0_164] : memref<4x18x18xf32, #tpu.memory_space<vmem>>, vector<1x18x18xf32>
    %784 = vector.shape_cast %783 : vector<1x18x18xf32> to vector<18x18xf32>
    %785 = vector.shape_cast %782 : vector<18x18xf32> to vector<1x18x18xf32>
    tpu.vector_store %arg10[%c0_162, %c0_163, %c0_164], %785 {strides = array<i32>} : memref<4x18x18xf32, #tpu.memory_space<vmem>>, vector<1x18x18xf32>,
    %c1_165 = arith.constant 1 : index
    %786 = memref.load %arg2[%c1_165] : memref<4xf32, #tpu.memory_space<smem>>
    %787 = vector.broadcast %786 : f32 to vector<18x18xf32>
    %788 = arith.addf %701, %787 : vector<18x18xf32>
    %cst_166 = arith.constant 5.000000e-01 : f32
    %789 = vector.broadcast %cst_166 : f32 to vector<18x18xf32>
    %790 = arith.mulf %789, %788 : vector<18x18xf32>
    %cst_167 = arith.constant 0.707106769 : f32
    %791 = vector.broadcast %cst_167 : f32 to vector<18x18xf32>
    %792 = arith.mulf %788, %791 : vector<18x18xf32>
    %793 = math.absf %792 : vector<18x18xf32>
    %cst_168 = arith.constant 5.000000e-01 : f32
    %794 = vector.broadcast %cst_168 : f32 to vector<18x18xf32>
    %795 = arith.mulf %794, %793 : vector<18x18xf32>
    %cst_169 = arith.constant 1.000000e+00 : f32
    %796 = vector.broadcast %cst_169 : f32 to vector<18x18xf32>
    %797 = arith.addf %796, %795 : vector<18x18xf32>
    %cst_170 = arith.constant 1.000000e+00 : f32
    %798 = vector.broadcast %cst_170 : f32 to vector<18x18xf32>
    %799 = arith.divf %798, %797 : vector<18x18xf32>
    %cst_171 = arith.constant 0.170872763 : f32
    %800 = vector.broadcast %cst_171 : f32 to vector<18x18xf32>
    %801 = arith.mulf %799, %800 : vector<18x18xf32>
    %cst_172 = arith.constant -0.822152256 : f32
    %802 = vector.broadcast %cst_172 : f32 to vector<18x18xf32>
    %803 = arith.addf %802, %801 : vector<18x18xf32>
    %804 = arith.mulf %799, %803 : vector<18x18xf32>
    %cst_173 = arith.constant 1.48851585 : f32
    %805 = vector.broadcast %cst_173 : f32 to vector<18x18xf32>
    %806 = arith.addf %805, %804 : vector<18x18xf32>
    %807 = arith.mulf %799, %806 : vector<18x18xf32>
    %cst_174 = arith.constant -1.13520396 : f32
    %808 = vector.broadcast %cst_174 : f32 to vector<18x18xf32>
    %809 = arith.addf %808, %807 : vector<18x18xf32>
    %810 = arith.mulf %799, %809 : vector<18x18xf32>
    %cst_175 = arith.constant 0.278868079 : f32
    %811 = vector.broadcast %cst_175 : f32 to vector<18x18xf32>
    %812 = arith.addf %811, %810 : vector<18x18xf32>
    %813 = arith.mulf %799, %812 : vector<18x18xf32>
    %cst_176 = arith.constant -0.186288059 : f32
    %814 = vector.broadcast %cst_176 : f32 to vector<18x18xf32>
    %815 = arith.addf %814, %813 : vector<18x18xf32>
    %816 = arith.mulf %799, %815 : vector<18x18xf32>
    %cst_177 = arith.constant 0.0967841818 : f32
    %817 = vector.broadcast %cst_177 : f32 to vector<18x18xf32>
    %818 = arith.addf %817, %816 : vector<18x18xf32>
    %819 = arith.mulf %799, %818 : vector<18x18xf32>
    %cst_178 = arith.constant 0.374091953 : f32
    %820 = vector.broadcast %cst_178 : f32 to vector<18x18xf32>
    %821 = arith.addf %820, %819 : vector<18x18xf32>
    %822 = arith.mulf %799, %821 : vector<18x18xf32>
    %cst_179 = arith.constant 1.00002372 : f32
    %823 = vector.broadcast %cst_179 : f32 to vector<18x18xf32>
    %824 = arith.addf %823, %822 : vector<18x18xf32>
    %825 = arith.mulf %799, %824 : vector<18x18xf32>
    %cst_180 = arith.constant -1.26551223 : f32
    %826 = vector.broadcast %cst_180 : f32 to vector<18x18xf32>
    %827 = arith.addf %826, %825 : vector<18x18xf32>
    %cst_181 = arith.constant 0.000000e+00 : f32
    %828 = vector.broadcast %cst_181 : f32 to vector<18x18xf32>
    %829 = arith.subf %828, %793 : vector<18x18xf32>
    %830 = arith.mulf %829, %793 : vector<18x18xf32>
    %831 = arith.addf %830, %827 : vector<18x18xf32>
    %832 = math.exp %831 : vector<18x18xf32>
    %833 = arith.mulf %799, %832 : vector<18x18xf32>
    %cst_182 = arith.constant 0.000000e+00 : f32
    %834 = vector.broadcast %cst_182 : f32 to vector<18x18xf32>
    %835 = arith.cmpf oge, %792, %834 : vector<18x18xf32>
    %cst_183 = arith.constant 1.000000e+00 : f32
    %836 = vector.broadcast %cst_183 : f32 to vector<18x18xf32>
    %837 = arith.subf %836, %833 : vector<18x18xf32>
    %cst_184 = arith.constant 1.000000e+00 : f32
    %838 = vector.broadcast %cst_184 : f32 to vector<18x18xf32>
    %839 = arith.subf %833, %838 : vector<18x18xf32>
    %840 = arith.select %835, %837, %839 : vector<18x18xi1>, vector<18x18xf32>
    %cst_185 = arith.constant 1.000000e+00 : f32
    %841 = vector.broadcast %cst_185 : f32 to vector<18x18xf32>
    %842 = arith.addf %841, %840 : vector<18x18xf32>
    %843 = arith.mulf %790, %842 : vector<18x18xf32>
    %cst_186 = arith.constant 0.000000e+00 : f32
    %844 = vector.broadcast %cst_186 : f32 to vector<18x18xf32>
    %845 = arith.select %722, %843, %844 : vector<18x18xi1>, vector<18x18xf32>
    %c1_187 = arith.constant 1 : index
    %c0_188 = arith.constant 0 : index
    %c0_189 = arith.constant 0 : index
    %846 = vector.load %arg10[%c1_187, %c0_188, %c0_189] : memref<4x18x18xf32, #tpu.memory_space<vmem>>, vector<1x18x18xf32>
    %847 = vector.shape_cast %846 : vector<1x18x18xf32> to vector<18x18xf32>
    %848 = vector.shape_cast %845 : vector<18x18xf32> to vector<1x18x18xf32>
    tpu.vector_store %arg10[%c1_187, %c0_188, %c0_189], %848 {strides = array<i32>} : memref<4x18x18xf32, #tpu.memory_space<vmem>>, vector<1x18x18xf32>,
    %c2_190 = arith.constant 2 : index
    %849 = memref.load %arg2[%c2_190] : memref<4xf32, #tpu.memory_space<smem>>
    %850 = vector.broadcast %849 : f32 to vector<18x18xf32>
    %851 = arith.addf %705, %850 : vector<18x18xf32>
    %cst_191 = arith.constant 5.000000e-01 : f32
    %852 = vector.broadcast %cst_191 : f32 to vector<18x18xf32>
    %853 = arith.mulf %852, %851 : vector<18x18xf32>
    %cst_192 = arith.constant 0.707106769 : f32
    %854 = vector.broadcast %cst_192 : f32 to vector<18x18xf32>
    %855 = arith.mulf %851, %854 : vector<18x18xf32>
    %856 = math.absf %855 : vector<18x18xf32>
    %cst_193 = arith.constant 5.000000e-01 : f32
    %857 = vector.broadcast %cst_193 : f32 to vector<18x18xf32>
    %858 = arith.mulf %857, %856 : vector<18x18xf32>
    %cst_194 = arith.constant 1.000000e+00 : f32
    %859 = vector.broadcast %cst_194 : f32 to vector<18x18xf32>
    %860 = arith.addf %859, %858 : vector<18x18xf32>
    %cst_195 = arith.constant 1.000000e+00 : f32
    %861 = vector.broadcast %cst_195 : f32 to vector<18x18xf32>
    %862 = arith.divf %861, %860 : vector<18x18xf32>
    %cst_196 = arith.constant 0.170872763 : f32
    %863 = vector.broadcast %cst_196 : f32 to vector<18x18xf32>
    %864 = arith.mulf %862, %863 : vector<18x18xf32>
    %cst_197 = arith.constant -0.822152256 : f32
    %865 = vector.broadcast %cst_197 : f32 to vector<18x18xf32>
    %866 = arith.addf %865, %864 : vector<18x18xf32>
    %867 = arith.mulf %862, %866 : vector<18x18xf32>
    %cst_198 = arith.constant 1.48851585 : f32
    %868 = vector.broadcast %cst_198 : f32 to vector<18x18xf32>
    %869 = arith.addf %868, %867 : vector<18x18xf32>
    %870 = arith.mulf %862, %869 : vector<18x18xf32>
    %cst_199 = arith.constant -1.13520396 : f32
    %871 = vector.broadcast %cst_199 : f32 to vector<18x18xf32>
    %872 = arith.addf %871, %870 : vector<18x18xf32>
    %873 = arith.mulf %862, %872 : vector<18x18xf32>
    %cst_200 = arith.constant 0.278868079 : f32
    %874 = vector.broadcast %cst_200 : f32 to vector<18x18xf32>
    %875 = arith.addf %874, %873 : vector<18x18xf32>
    %876 = arith.mulf %862, %875 : vector<18x18xf32>
    %cst_201 = arith.constant -0.186288059 : f32
    %877 = vector.broadcast %cst_201 : f32 to vector<18x18xf32>
    %878 = arith.addf %877, %876 : vector<18x18xf32>
    %879 = arith.mulf %862, %878 : vector<18x18xf32>
    %cst_202 = arith.constant 0.0967841818 : f32
    %880 = vector.broadcast %cst_202 : f32 to vector<18x18xf32>
    %881 = arith.addf %880, %879 : vector<18x18xf32>
    %882 = arith.mulf %862, %881 : vector<18x18xf32>
    %cst_203 = arith.constant 0.374091953 : f32
    %883 = vector.broadcast %cst_203 : f32 to vector<18x18xf32>
    %884 = arith.addf %883, %882 : vector<18x18xf32>
    %885 = arith.mulf %862, %884 : vector<18x18xf32>
    %cst_204 = arith.constant 1.00002372 : f32
    %886 = vector.broadcast %cst_204 : f32 to vector<18x18xf32>
    %887 = arith.addf %886, %885 : vector<18x18xf32>
    %888 = arith.mulf %862, %887 : vector<18x18xf32>
    %cst_205 = arith.constant -1.26551223 : f32
    %889 = vector.broadcast %cst_205 : f32 to vector<18x18xf32>
    %890 = arith.addf %889, %888 : vector<18x18xf32>
    %cst_206 = arith.constant 0.000000e+00 : f32
    %891 = vector.broadcast %cst_206 : f32 to vector<18x18xf32>
    %892 = arith.subf %891, %856 : vector<18x18xf32>
    %893 = arith.mulf %892, %856 : vector<18x18xf32>
    %894 = arith.addf %893, %890 : vector<18x18xf32>
    %895 = math.exp %894 : vector<18x18xf32>
    %896 = arith.mulf %862, %895 : vector<18x18xf32>
    %cst_207 = arith.constant 0.000000e+00 : f32
    %897 = vector.broadcast %cst_207 : f32 to vector<18x18xf32>
    %898 = arith.cmpf oge, %855, %897 : vector<18x18xf32>
    %cst_208 = arith.constant 1.000000e+00 : f32
    %899 = vector.broadcast %cst_208 : f32 to vector<18x18xf32>
    %900 = arith.subf %899, %896 : vector<18x18xf32>
    %cst_209 = arith.constant 1.000000e+00 : f32
    %901 = vector.broadcast %cst_209 : f32 to vector<18x18xf32>
    %902 = arith.subf %896, %901 : vector<18x18xf32>
    %903 = arith.select %898, %900, %902 : vector<18x18xi1>, vector<18x18xf32>
    %cst_210 = arith.constant 1.000000e+00 : f32
    %904 = vector.broadcast %cst_210 : f32 to vector<18x18xf32>
    %905 = arith.addf %904, %903 : vector<18x18xf32>
    %906 = arith.mulf %853, %905 : vector<18x18xf32>
    %cst_211 = arith.constant 0.000000e+00 : f32
    %907 = vector.broadcast %cst_211 : f32 to vector<18x18xf32>
    %908 = arith.select %722, %906, %907 : vector<18x18xi1>, vector<18x18xf32>
    %c2_212 = arith.constant 2 : index
    %c0_213 = arith.constant 0 : index
    %c0_214 = arith.constant 0 : index
    %909 = vector.load %arg10[%c2_212, %c0_213, %c0_214] : memref<4x18x18xf32, #tpu.memory_space<vmem>>, vector<1x18x18xf32>
    %910 = vector.shape_cast %909 : vector<1x18x18xf32> to vector<18x18xf32>
    %911 = vector.shape_cast %908 : vector<18x18xf32> to vector<1x18x18xf32>
    tpu.vector_store %arg10[%c2_212, %c0_213, %c0_214], %911 {strides = array<i32>} : memref<4x18x18xf32, #tpu.memory_space<vmem>>, vector<1x18x18xf32>,
    %c3_215 = arith.constant 3 : index
    %912 = memref.load %arg2[%c3_215] : memref<4xf32, #tpu.memory_space<smem>>
    %913 = vector.broadcast %912 : f32 to vector<18x18xf32>
    %914 = arith.addf %709, %913 : vector<18x18xf32>
    %cst_216 = arith.constant 5.000000e-01 : f32
    %915 = vector.broadcast %cst_216 : f32 to vector<18x18xf32>
    %916 = arith.mulf %915, %914 : vector<18x18xf32>
    %cst_217 = arith.constant 0.707106769 : f32
    %917 = vector.broadcast %cst_217 : f32 to vector<18x18xf32>
    %918 = arith.mulf %914, %917 : vector<18x18xf32>
    %919 = math.absf %918 : vector<18x18xf32>
    %cst_218 = arith.constant 5.000000e-01 : f32
    %920 = vector.broadcast %cst_218 : f32 to vector<18x18xf32>
    %921 = arith.mulf %920, %919 : vector<18x18xf32>
    %cst_219 = arith.constant 1.000000e+00 : f32
    %922 = vector.broadcast %cst_219 : f32 to vector<18x18xf32>
    %923 = arith.addf %922, %921 : vector<18x18xf32>
    %cst_220 = arith.constant 1.000000e+00 : f32
    %924 = vector.broadcast %cst_220 : f32 to vector<18x18xf32>
    %925 = arith.divf %924, %923 : vector<18x18xf32>
    %cst_221 = arith.constant 0.170872763 : f32
    %926 = vector.broadcast %cst_221 : f32 to vector<18x18xf32>
    %927 = arith.mulf %925, %926 : vector<18x18xf32>
    %cst_222 = arith.constant -0.822152256 : f32
    %928 = vector.broadcast %cst_222 : f32 to vector<18x18xf32>
    %929 = arith.addf %928, %927 : vector<18x18xf32>
    %930 = arith.mulf %925, %929 : vector<18x18xf32>
    %cst_223 = arith.constant 1.48851585 : f32
    %931 = vector.broadcast %cst_223 : f32 to vector<18x18xf32>
    %932 = arith.addf %931, %930 : vector<18x18xf32>
    %933 = arith.mulf %925, %932 : vector<18x18xf32>
    %cst_224 = arith.constant -1.13520396 : f32
    %934 = vector.broadcast %cst_224 : f32 to vector<18x18xf32>
    %935 = arith.addf %934, %933 : vector<18x18xf32>
    %936 = arith.mulf %925, %935 : vector<18x18xf32>
    %cst_225 = arith.constant 0.278868079 : f32
    %937 = vector.broadcast %cst_225 : f32 to vector<18x18xf32>
    %938 = arith.addf %937, %936 : vector<18x18xf32>
    %939 = arith.mulf %925, %938 : vector<18x18xf32>
    %cst_226 = arith.constant -0.186288059 : f32
    %940 = vector.broadcast %cst_226 : f32 to vector<18x18xf32>
    %941 = arith.addf %940, %939 : vector<18x18xf32>
    %942 = arith.mulf %925, %941 : vector<18x18xf32>
    %cst_227 = arith.constant 0.0967841818 : f32
    %943 = vector.broadcast %cst_227 : f32 to vector<18x18xf32>
    %944 = arith.addf %943, %942 : vector<18x18xf32>
    %945 = arith.mulf %925, %944 : vector<18x18xf32>
    %cst_228 = arith.constant 0.374091953 : f32
    %946 = vector.broadcast %cst_228 : f32 to vector<18x18xf32>
    %947 = arith.addf %946, %945 : vector<18x18xf32>
    %948 = arith.mulf %925, %947 : vector<18x18xf32>
    %cst_229 = arith.constant 1.00002372 : f32
    %949 = vector.broadcast %cst_229 : f32 to vector<18x18xf32>
    %950 = arith.addf %949, %948 : vector<18x18xf32>
    %951 = arith.mulf %925, %950 : vector<18x18xf32>
    %cst_230 = arith.constant -1.26551223 : f32
    %952 = vector.broadcast %cst_230 : f32 to vector<18x18xf32>
    %953 = arith.addf %952, %951 : vector<18x18xf32>
    %cst_231 = arith.constant 0.000000e+00 : f32
    %954 = vector.broadcast %cst_231 : f32 to vector<18x18xf32>
    %955 = arith.subf %954, %919 : vector<18x18xf32>
    %956 = arith.mulf %955, %919 : vector<18x18xf32>
    %957 = arith.addf %956, %953 : vector<18x18xf32>
    %958 = math.exp %957 : vector<18x18xf32>
    %959 = arith.mulf %925, %958 : vector<18x18xf32>
    %cst_232 = arith.constant 0.000000e+00 : f32
    %960 = vector.broadcast %cst_232 : f32 to vector<18x18xf32>
    %961 = arith.cmpf oge, %918, %960 : vector<18x18xf32>
    %cst_233 = arith.constant 1.000000e+00 : f32
    %962 = vector.broadcast %cst_233 : f32 to vector<18x18xf32>
    %963 = arith.subf %962, %959 : vector<18x18xf32>
    %cst_234 = arith.constant 1.000000e+00 : f32
    %964 = vector.broadcast %cst_234 : f32 to vector<18x18xf32>
    %965 = arith.subf %959, %964 : vector<18x18xf32>
    %966 = arith.select %961, %963, %965 : vector<18x18xi1>, vector<18x18xf32>
    %cst_235 = arith.constant 1.000000e+00 : f32
    %967 = vector.broadcast %cst_235 : f32 to vector<18x18xf32>
    %968 = arith.addf %967, %966 : vector<18x18xf32>
    %969 = arith.mulf %916, %968 : vector<18x18xf32>
    %cst_236 = arith.constant 0.000000e+00 : f32
    %970 = vector.broadcast %cst_236 : f32 to vector<18x18xf32>
    %971 = arith.select %722, %969, %970 : vector<18x18xi1>, vector<18x18xf32>
    %c3_237 = arith.constant 3 : index
    %c0_238 = arith.constant 0 : index
    %c0_239 = arith.constant 0 : index
    %972 = vector.load %arg10[%c3_237, %c0_238, %c0_239] : memref<4x18x18xf32, #tpu.memory_space<vmem>>, vector<1x18x18xf32>
    %973 = vector.shape_cast %972 : vector<1x18x18xf32> to vector<18x18xf32>
    %974 = vector.shape_cast %971 : vector<18x18xf32> to vector<1x18x18xf32>
    tpu.vector_store %arg10[%c3_237, %c0_238, %c0_239], %974 {strides = array<i32>} : memref<4x18x18xf32, #tpu.memory_space<vmem>>, vector<1x18x18xf32>,
    %cst_240 = arith.constant 0.000000e+00 : f32
    %975 = vector.broadcast %cst_240 : f32 to vector<16x16xf32>
    %cst_241 = arith.constant 0.000000e+00 : f32
    %976 = vector.broadcast %cst_241 : f32 to vector<16x16xf32>
    %cst_242 = arith.constant 0.000000e+00 : f32
    %977 = vector.broadcast %cst_242 : f32 to vector<16x16xf32>
    %cst_243 = arith.constant 0.000000e+00 : f32
    %978 = vector.broadcast %cst_243 : f32 to vector<16x16xf32>
    %c0_244 = arith.constant 0 : index
    %c0_245 = arith.constant 0 : index
    %c0_246 = arith.constant 0 : index
    %979 = vector.load %arg10[%c0_244, %c0_245, %c0_246] : memref<4x18x18xf32, #tpu.memory_space<vmem>>, vector<1x16x16xf32>
    %980 = vector.shape_cast %979 : vector<1x16x16xf32> to vector<16x16xf32>
    %c0_247 = arith.constant 0 : index
    %981 = memref.load %arg3[%c0_247] : memref<144xf32, #tpu.memory_space<smem>>
    %982 = vector.broadcast %981 : f32 to vector<16x16xf32>
    %983 = arith.mulf %982, %980 : vector<16x16xf32>
    %984 = arith.addf %975, %983 : vector<16x16xf32>
    %c36_248 = arith.constant 36 : index
    %985 = memref.load %arg3[%c36_248] : memref<144xf32, #tpu.memory_space<smem>>
    %986 = vector.broadcast %985 : f32 to vector<16x16xf32>
    %987 = arith.mulf %986, %980 : vector<16x16xf32>
    %988 = arith.addf %976, %987 : vector<16x16xf32>
    %c72_249 = arith.constant 72 : index
    %989 = memref.load %arg3[%c72_249] : memref<144xf32, #tpu.memory_space<smem>>
    %990 = vector.broadcast %989 : f32 to vector<16x16xf32>
    %991 = arith.mulf %990, %980 : vector<16x16xf32>
    %992 = arith.addf %977, %991 : vector<16x16xf32>
    %c108_250 = arith.constant 108 : index
    %993 = memref.load %arg3[%c108_250] : memref<144xf32, #tpu.memory_space<smem>>
    %994 = vector.broadcast %993 : f32 to vector<16x16xf32>
    %995 = arith.mulf %994, %980 : vector<16x16xf32>
    %996 = arith.addf %978, %995 : vector<16x16xf32>
    %c0_251 = arith.constant 0 : index
    %c0_252 = arith.constant 0 : index
    %c1_253 = arith.constant 1 : index
    %997 = vector.load %arg10[%c0_251, %c0_252, %c1_253] : memref<4x18x18xf32, #tpu.memory_space<vmem>>, vector<1x16x16xf32>
    %998 = vector.shape_cast %997 : vector<1x16x16xf32> to vector<16x16xf32>
    %c1_254 = arith.constant 1 : index
    %999 = memref.load %arg3[%c1_254] : memref<144xf32, #tpu.memory_space<smem>>
    %1000 = vector.broadcast %999 : f32 to vector<16x16xf32>
    %1001 = arith.mulf %1000, %998 : vector<16x16xf32>
    %1002 = arith.addf %984, %1001 : vector<16x16xf32>
    %c37_255 = arith.constant 37 : index
    %1003 = memref.load %arg3[%c37_255] : memref<144xf32, #tpu.memory_space<smem>>
    %1004 = vector.broadcast %1003 : f32 to vector<16x16xf32>
    %1005 = arith.mulf %1004, %998 : vector<16x16xf32>
    %1006 = arith.addf %988, %1005 : vector<16x16xf32>
    %c73_256 = arith.constant 73 : index
    %1007 = memref.load %arg3[%c73_256] : memref<144xf32, #tpu.memory_space<smem>>
    %1008 = vector.broadcast %1007 : f32 to vector<16x16xf32>
    %1009 = arith.mulf %1008, %998 : vector<16x16xf32>
    %1010 = arith.addf %992, %1009 : vector<16x16xf32>
    %c109_257 = arith.constant 109 : index
    %1011 = memref.load %arg3[%c109_257] : memref<144xf32, #tpu.memory_space<smem>>
    %1012 = vector.broadcast %1011 : f32 to vector<16x16xf32>
    %1013 = arith.mulf %1012, %998 : vector<16x16xf32>
    %1014 = arith.addf %996, %1013 : vector<16x16xf32>
    %c0_258 = arith.constant 0 : index
    %c0_259 = arith.constant 0 : index
    %c2_260 = arith.constant 2 : index
    %1015 = vector.load %arg10[%c0_258, %c0_259, %c2_260] : memref<4x18x18xf32, #tpu.memory_space<vmem>>, vector<1x16x16xf32>
    %1016 = vector.shape_cast %1015 : vector<1x16x16xf32> to vector<16x16xf32>
    %c2_261 = arith.constant 2 : index
    %1017 = memref.load %arg3[%c2_261] : memref<144xf32, #tpu.memory_space<smem>>
    %1018 = vector.broadcast %1017 : f32 to vector<16x16xf32>
    %1019 = arith.mulf %1018, %1016 : vector<16x16xf32>
    %1020 = arith.addf %1002, %1019 : vector<16x16xf32>
    %c38_262 = arith.constant 38 : index
    %1021 = memref.load %arg3[%c38_262] : memref<144xf32, #tpu.memory_space<smem>>
    %1022 = vector.broadcast %1021 : f32 to vector<16x16xf32>
    %1023 = arith.mulf %1022, %1016 : vector<16x16xf32>
    %1024 = arith.addf %1006, %1023 : vector<16x16xf32>
    %c74_263 = arith.constant 74 : index
    %1025 = memref.load %arg3[%c74_263] : memref<144xf32, #tpu.memory_space<smem>>
    %1026 = vector.broadcast %1025 : f32 to vector<16x16xf32>
    %1027 = arith.mulf %1026, %1016 : vector<16x16xf32>
    %1028 = arith.addf %1010, %1027 : vector<16x16xf32>
    %c110_264 = arith.constant 110 : index
    %1029 = memref.load %arg3[%c110_264] : memref<144xf32, #tpu.memory_space<smem>>
    %1030 = vector.broadcast %1029 : f32 to vector<16x16xf32>
    %1031 = arith.mulf %1030, %1016 : vector<16x16xf32>
    %1032 = arith.addf %1014, %1031 : vector<16x16xf32>
    %c0_265 = arith.constant 0 : index
    %c1_266 = arith.constant 1 : index
    %c0_267 = arith.constant 0 : index
    %1033 = vector.load %arg10[%c0_265, %c1_266, %c0_267] : memref<4x18x18xf32, #tpu.memory_space<vmem>>, vector<1x16x16xf32>
    %1034 = vector.shape_cast %1033 : vector<1x16x16xf32> to vector<16x16xf32>
    %c3_268 = arith.constant 3 : index
    %1035 = memref.load %arg3[%c3_268] : memref<144xf32, #tpu.memory_space<smem>>
    %1036 = vector.broadcast %1035 : f32 to vector<16x16xf32>
    %1037 = arith.mulf %1036, %1034 : vector<16x16xf32>
    %1038 = arith.addf %1020, %1037 : vector<16x16xf32>
    %c39_269 = arith.constant 39 : index
    %1039 = memref.load %arg3[%c39_269] : memref<144xf32, #tpu.memory_space<smem>>
    %1040 = vector.broadcast %1039 : f32 to vector<16x16xf32>
    %1041 = arith.mulf %1040, %1034 : vector<16x16xf32>
    %1042 = arith.addf %1024, %1041 : vector<16x16xf32>
    %c75_270 = arith.constant 75 : index
    %1043 = memref.load %arg3[%c75_270] : memref<144xf32, #tpu.memory_space<smem>>
    %1044 = vector.broadcast %1043 : f32 to vector<16x16xf32>
    %1045 = arith.mulf %1044, %1034 : vector<16x16xf32>
    %1046 = arith.addf %1028, %1045 : vector<16x16xf32>
    %c111_271 = arith.constant 111 : index
    %1047 = memref.load %arg3[%c111_271] : memref<144xf32, #tpu.memory_space<smem>>
    %1048 = vector.broadcast %1047 : f32 to vector<16x16xf32>
    %1049 = arith.mulf %1048, %1034 : vector<16x16xf32>
    %1050 = arith.addf %1032, %1049 : vector<16x16xf32>
    %c0_272 = arith.constant 0 : index
    %c1_273 = arith.constant 1 : index
    %c1_274 = arith.constant 1 : index
    %1051 = vector.load %arg10[%c0_272, %c1_273, %c1_274] : memref<4x18x18xf32, #tpu.memory_space<vmem>>, vector<1x16x16xf32>
    %1052 = vector.shape_cast %1051 : vector<1x16x16xf32> to vector<16x16xf32>
    %c4_275 = arith.constant 4 : index
    %1053 = memref.load %arg3[%c4_275] : memref<144xf32, #tpu.memory_space<smem>>
    %1054 = vector.broadcast %1053 : f32 to vector<16x16xf32>
    %1055 = arith.mulf %1054, %1052 : vector<16x16xf32>
    %1056 = arith.addf %1038, %1055 : vector<16x16xf32>
    %c40_276 = arith.constant 40 : index
    %1057 = memref.load %arg3[%c40_276] : memref<144xf32, #tpu.memory_space<smem>>
    %1058 = vector.broadcast %1057 : f32 to vector<16x16xf32>
    %1059 = arith.mulf %1058, %1052 : vector<16x16xf32>
    %1060 = arith.addf %1042, %1059 : vector<16x16xf32>
    %c76_277 = arith.constant 76 : index
    %1061 = memref.load %arg3[%c76_277] : memref<144xf32, #tpu.memory_space<smem>>
    %1062 = vector.broadcast %1061 : f32 to vector<16x16xf32>
    %1063 = arith.mulf %1062, %1052 : vector<16x16xf32>
    %1064 = arith.addf %1046, %1063 : vector<16x16xf32>
    %c112_278 = arith.constant 112 : index
    %1065 = memref.load %arg3[%c112_278] : memref<144xf32, #tpu.memory_space<smem>>
    %1066 = vector.broadcast %1065 : f32 to vector<16x16xf32>
    %1067 = arith.mulf %1066, %1052 : vector<16x16xf32>
    %1068 = arith.addf %1050, %1067 : vector<16x16xf32>
    %c0_279 = arith.constant 0 : index
    %c1_280 = arith.constant 1 : index
    %c2_281 = arith.constant 2 : index
    %1069 = vector.load %arg10[%c0_279, %c1_280, %c2_281] : memref<4x18x18xf32, #tpu.memory_space<vmem>>, vector<1x16x16xf32>
    %1070 = vector.shape_cast %1069 : vector<1x16x16xf32> to vector<16x16xf32>
    %c5_282 = arith.constant 5 : index
    %1071 = memref.load %arg3[%c5_282] : memref<144xf32, #tpu.memory_space<smem>>
    %1072 = vector.broadcast %1071 : f32 to vector<16x16xf32>
    %1073 = arith.mulf %1072, %1070 : vector<16x16xf32>
    %1074 = arith.addf %1056, %1073 : vector<16x16xf32>
    %c41_283 = arith.constant 41 : index
    %1075 = memref.load %arg3[%c41_283] : memref<144xf32, #tpu.memory_space<smem>>
    %1076 = vector.broadcast %1075 : f32 to vector<16x16xf32>
    %1077 = arith.mulf %1076, %1070 : vector<16x16xf32>
    %1078 = arith.addf %1060, %1077 : vector<16x16xf32>
    %c77_284 = arith.constant 77 : index
    %1079 = memref.load %arg3[%c77_284] : memref<144xf32, #tpu.memory_space<smem>>
    %1080 = vector.broadcast %1079 : f32 to vector<16x16xf32>
    %1081 = arith.mulf %1080, %1070 : vector<16x16xf32>
    %1082 = arith.addf %1064, %1081 : vector<16x16xf32>
    %c113_285 = arith.constant 113 : index
    %1083 = memref.load %arg3[%c113_285] : memref<144xf32, #tpu.memory_space<smem>>
    %1084 = vector.broadcast %1083 : f32 to vector<16x16xf32>
    %1085 = arith.mulf %1084, %1070 : vector<16x16xf32>
    %1086 = arith.addf %1068, %1085 : vector<16x16xf32>
    %c0_286 = arith.constant 0 : index
    %c2_287 = arith.constant 2 : index
    %c0_288 = arith.constant 0 : index
    %1087 = vector.load %arg10[%c0_286, %c2_287, %c0_288] : memref<4x18x18xf32, #tpu.memory_space<vmem>>, vector<1x16x16xf32>
    %1088 = vector.shape_cast %1087 : vector<1x16x16xf32> to vector<16x16xf32>
    %c6_289 = arith.constant 6 : index
    %1089 = memref.load %arg3[%c6_289] : memref<144xf32, #tpu.memory_space<smem>>
    %1090 = vector.broadcast %1089 : f32 to vector<16x16xf32>
    %1091 = arith.mulf %1090, %1088 : vector<16x16xf32>
    %1092 = arith.addf %1074, %1091 : vector<16x16xf32>
    %c42_290 = arith.constant 42 : index
    %1093 = memref.load %arg3[%c42_290] : memref<144xf32, #tpu.memory_space<smem>>
    %1094 = vector.broadcast %1093 : f32 to vector<16x16xf32>
    %1095 = arith.mulf %1094, %1088 : vector<16x16xf32>
    %1096 = arith.addf %1078, %1095 : vector<16x16xf32>
    %c78_291 = arith.constant 78 : index
    %1097 = memref.load %arg3[%c78_291] : memref<144xf32, #tpu.memory_space<smem>>
    %1098 = vector.broadcast %1097 : f32 to vector<16x16xf32>
    %1099 = arith.mulf %1098, %1088 : vector<16x16xf32>
    %1100 = arith.addf %1082, %1099 : vector<16x16xf32>
    %c114_292 = arith.constant 114 : index
    %1101 = memref.load %arg3[%c114_292] : memref<144xf32, #tpu.memory_space<smem>>
    %1102 = vector.broadcast %1101 : f32 to vector<16x16xf32>
    %1103 = arith.mulf %1102, %1088 : vector<16x16xf32>
    %1104 = arith.addf %1086, %1103 : vector<16x16xf32>
    %c0_293 = arith.constant 0 : index
    %c2_294 = arith.constant 2 : index
    %c1_295 = arith.constant 1 : index
    %1105 = vector.load %arg10[%c0_293, %c2_294, %c1_295] : memref<4x18x18xf32, #tpu.memory_space<vmem>>, vector<1x16x16xf32>
    %1106 = vector.shape_cast %1105 : vector<1x16x16xf32> to vector<16x16xf32>
    %c7_296 = arith.constant 7 : index
    %1107 = memref.load %arg3[%c7_296] : memref<144xf32, #tpu.memory_space<smem>>
    %1108 = vector.broadcast %1107 : f32 to vector<16x16xf32>
    %1109 = arith.mulf %1108, %1106 : vector<16x16xf32>
    %1110 = arith.addf %1092, %1109 : vector<16x16xf32>
    %c43_297 = arith.constant 43 : index
    %1111 = memref.load %arg3[%c43_297] : memref<144xf32, #tpu.memory_space<smem>>
    %1112 = vector.broadcast %1111 : f32 to vector<16x16xf32>
    %1113 = arith.mulf %1112, %1106 : vector<16x16xf32>
    %1114 = arith.addf %1096, %1113 : vector<16x16xf32>
    %c79_298 = arith.constant 79 : index
    %1115 = memref.load %arg3[%c79_298] : memref<144xf32, #tpu.memory_space<smem>>
    %1116 = vector.broadcast %1115 : f32 to vector<16x16xf32>
    %1117 = arith.mulf %1116, %1106 : vector<16x16xf32>
    %1118 = arith.addf %1100, %1117 : vector<16x16xf32>
    %c115_299 = arith.constant 115 : index
    %1119 = memref.load %arg3[%c115_299] : memref<144xf32, #tpu.memory_space<smem>>
    %1120 = vector.broadcast %1119 : f32 to vector<16x16xf32>
    %1121 = arith.mulf %1120, %1106 : vector<16x16xf32>
    %1122 = arith.addf %1104, %1121 : vector<16x16xf32>
    %c0_300 = arith.constant 0 : index
    %c2_301 = arith.constant 2 : index
    %c2_302 = arith.constant 2 : index
    %1123 = vector.load %arg10[%c0_300, %c2_301, %c2_302] : memref<4x18x18xf32, #tpu.memory_space<vmem>>, vector<1x16x16xf32>
    %1124 = vector.shape_cast %1123 : vector<1x16x16xf32> to vector<16x16xf32>
    %c8_303 = arith.constant 8 : index
    %1125 = memref.load %arg3[%c8_303] : memref<144xf32, #tpu.memory_space<smem>>
    %1126 = vector.broadcast %1125 : f32 to vector<16x16xf32>
    %1127 = arith.mulf %1126, %1124 : vector<16x16xf32>
    %1128 = arith.addf %1110, %1127 : vector<16x16xf32>
    %c44_304 = arith.constant 44 : index
    %1129 = memref.load %arg3[%c44_304] : memref<144xf32, #tpu.memory_space<smem>>
    %1130 = vector.broadcast %1129 : f32 to vector<16x16xf32>
    %1131 = arith.mulf %1130, %1124 : vector<16x16xf32>
    %1132 = arith.addf %1114, %1131 : vector<16x16xf32>
    %c80_305 = arith.constant 80 : index
    %1133 = memref.load %arg3[%c80_305] : memref<144xf32, #tpu.memory_space<smem>>
    %1134 = vector.broadcast %1133 : f32 to vector<16x16xf32>
    %1135 = arith.mulf %1134, %1124 : vector<16x16xf32>
    %1136 = arith.addf %1118, %1135 : vector<16x16xf32>
    %c116_306 = arith.constant 116 : index
    %1137 = memref.load %arg3[%c116_306] : memref<144xf32, #tpu.memory_space<smem>>
    %1138 = vector.broadcast %1137 : f32 to vector<16x16xf32>
    %1139 = arith.mulf %1138, %1124 : vector<16x16xf32>
    %1140 = arith.addf %1122, %1139 : vector<16x16xf32>
    %c1_307 = arith.constant 1 : index
    %c0_308 = arith.constant 0 : index
    %c0_309 = arith.constant 0 : index
    %1141 = vector.load %arg10[%c1_307, %c0_308, %c0_309] : memref<4x18x18xf32, #tpu.memory_space<vmem>>, vector<1x16x16xf32>
    %1142 = vector.shape_cast %1141 : vector<1x16x16xf32> to vector<16x16xf32>
    %c9_310 = arith.constant 9 : index
    %1143 = memref.load %arg3[%c9_310] : memref<144xf32, #tpu.memory_space<smem>>
    %1144 = vector.broadcast %1143 : f32 to vector<16x16xf32>
    %1145 = arith.mulf %1144, %1142 : vector<16x16xf32>
    %1146 = arith.addf %1128, %1145 : vector<16x16xf32>
    %c45_311 = arith.constant 45 : index
    %1147 = memref.load %arg3[%c45_311] : memref<144xf32, #tpu.memory_space<smem>>
    %1148 = vector.broadcast %1147 : f32 to vector<16x16xf32>
    %1149 = arith.mulf %1148, %1142 : vector<16x16xf32>
    %1150 = arith.addf %1132, %1149 : vector<16x16xf32>
    %c81_312 = arith.constant 81 : index
    %1151 = memref.load %arg3[%c81_312] : memref<144xf32, #tpu.memory_space<smem>>
    %1152 = vector.broadcast %1151 : f32 to vector<16x16xf32>
    %1153 = arith.mulf %1152, %1142 : vector<16x16xf32>
    %1154 = arith.addf %1136, %1153 : vector<16x16xf32>
    %c117_313 = arith.constant 117 : index
    %1155 = memref.load %arg3[%c117_313] : memref<144xf32, #tpu.memory_space<smem>>
    %1156 = vector.broadcast %1155 : f32 to vector<16x16xf32>
    %1157 = arith.mulf %1156, %1142 : vector<16x16xf32>
    %1158 = arith.addf %1140, %1157 : vector<16x16xf32>
    %c1_314 = arith.constant 1 : index
    %c0_315 = arith.constant 0 : index
    %c1_316 = arith.constant 1 : index
    %1159 = vector.load %arg10[%c1_314, %c0_315, %c1_316] : memref<4x18x18xf32, #tpu.memory_space<vmem>>, vector<1x16x16xf32>
    %1160 = vector.shape_cast %1159 : vector<1x16x16xf32> to vector<16x16xf32>
    %c10_317 = arith.constant 10 : index
    %1161 = memref.load %arg3[%c10_317] : memref<144xf32, #tpu.memory_space<smem>>
    %1162 = vector.broadcast %1161 : f32 to vector<16x16xf32>
    %1163 = arith.mulf %1162, %1160 : vector<16x16xf32>
    %1164 = arith.addf %1146, %1163 : vector<16x16xf32>
    %c46_318 = arith.constant 46 : index
    %1165 = memref.load %arg3[%c46_318] : memref<144xf32, #tpu.memory_space<smem>>
    %1166 = vector.broadcast %1165 : f32 to vector<16x16xf32>
    %1167 = arith.mulf %1166, %1160 : vector<16x16xf32>
    %1168 = arith.addf %1150, %1167 : vector<16x16xf32>
    %c82_319 = arith.constant 82 : index
    %1169 = memref.load %arg3[%c82_319] : memref<144xf32, #tpu.memory_space<smem>>
    %1170 = vector.broadcast %1169 : f32 to vector<16x16xf32>
    %1171 = arith.mulf %1170, %1160 : vector<16x16xf32>
    %1172 = arith.addf %1154, %1171 : vector<16x16xf32>
    %c118_320 = arith.constant 118 : index
    %1173 = memref.load %arg3[%c118_320] : memref<144xf32, #tpu.memory_space<smem>>
    %1174 = vector.broadcast %1173 : f32 to vector<16x16xf32>
    %1175 = arith.mulf %1174, %1160 : vector<16x16xf32>
    %1176 = arith.addf %1158, %1175 : vector<16x16xf32>
    %c1_321 = arith.constant 1 : index
    %c0_322 = arith.constant 0 : index
    %c2_323 = arith.constant 2 : index
    %1177 = vector.load %arg10[%c1_321, %c0_322, %c2_323] : memref<4x18x18xf32, #tpu.memory_space<vmem>>, vector<1x16x16xf32>
    %1178 = vector.shape_cast %1177 : vector<1x16x16xf32> to vector<16x16xf32>
    %c11_324 = arith.constant 11 : index
    %1179 = memref.load %arg3[%c11_324] : memref<144xf32, #tpu.memory_space<smem>>
    %1180 = vector.broadcast %1179 : f32 to vector<16x16xf32>
    %1181 = arith.mulf %1180, %1178 : vector<16x16xf32>
    %1182 = arith.addf %1164, %1181 : vector<16x16xf32>
    %c47_325 = arith.constant 47 : index
    %1183 = memref.load %arg3[%c47_325] : memref<144xf32, #tpu.memory_space<smem>>
    %1184 = vector.broadcast %1183 : f32 to vector<16x16xf32>
    %1185 = arith.mulf %1184, %1178 : vector<16x16xf32>
    %1186 = arith.addf %1168, %1185 : vector<16x16xf32>
    %c83_326 = arith.constant 83 : index
    %1187 = memref.load %arg3[%c83_326] : memref<144xf32, #tpu.memory_space<smem>>
    %1188 = vector.broadcast %1187 : f32 to vector<16x16xf32>
    %1189 = arith.mulf %1188, %1178 : vector<16x16xf32>
    %1190 = arith.addf %1172, %1189 : vector<16x16xf32>
    %c119_327 = arith.constant 119 : index
    %1191 = memref.load %arg3[%c119_327] : memref<144xf32, #tpu.memory_space<smem>>
    %1192 = vector.broadcast %1191 : f32 to vector<16x16xf32>
    %1193 = arith.mulf %1192, %1178 : vector<16x16xf32>
    %1194 = arith.addf %1176, %1193 : vector<16x16xf32>
    %c1_328 = arith.constant 1 : index
    %c1_329 = arith.constant 1 : index
    %c0_330 = arith.constant 0 : index
    %1195 = vector.load %arg10[%c1_328, %c1_329, %c0_330] : memref<4x18x18xf32, #tpu.memory_space<vmem>>, vector<1x16x16xf32>
    %1196 = vector.shape_cast %1195 : vector<1x16x16xf32> to vector<16x16xf32>
    %c12_331 = arith.constant 12 : index
    %1197 = memref.load %arg3[%c12_331] : memref<144xf32, #tpu.memory_space<smem>>
    %1198 = vector.broadcast %1197 : f32 to vector<16x16xf32>
    %1199 = arith.mulf %1198, %1196 : vector<16x16xf32>
    %1200 = arith.addf %1182, %1199 : vector<16x16xf32>
    %c48_332 = arith.constant 48 : index
    %1201 = memref.load %arg3[%c48_332] : memref<144xf32, #tpu.memory_space<smem>>
    %1202 = vector.broadcast %1201 : f32 to vector<16x16xf32>
    %1203 = arith.mulf %1202, %1196 : vector<16x16xf32>
    %1204 = arith.addf %1186, %1203 : vector<16x16xf32>
    %c84_333 = arith.constant 84 : index
    %1205 = memref.load %arg3[%c84_333] : memref<144xf32, #tpu.memory_space<smem>>
    %1206 = vector.broadcast %1205 : f32 to vector<16x16xf32>
    %1207 = arith.mulf %1206, %1196 : vector<16x16xf32>
    %1208 = arith.addf %1190, %1207 : vector<16x16xf32>
    %c120_334 = arith.constant 120 : index
    %1209 = memref.load %arg3[%c120_334] : memref<144xf32, #tpu.memory_space<smem>>
    %1210 = vector.broadcast %1209 : f32 to vector<16x16xf32>
    %1211 = arith.mulf %1210, %1196 : vector<16x16xf32>
    %1212 = arith.addf %1194, %1211 : vector<16x16xf32>
    %c1_335 = arith.constant 1 : index
    %c1_336 = arith.constant 1 : index
    %c1_337 = arith.constant 1 : index
    %1213 = vector.load %arg10[%c1_335, %c1_336, %c1_337] : memref<4x18x18xf32, #tpu.memory_space<vmem>>, vector<1x16x16xf32>
    %1214 = vector.shape_cast %1213 : vector<1x16x16xf32> to vector<16x16xf32>
    %c13_338 = arith.constant 13 : index
    %1215 = memref.load %arg3[%c13_338] : memref<144xf32, #tpu.memory_space<smem>>
    %1216 = vector.broadcast %1215 : f32 to vector<16x16xf32>
    %1217 = arith.mulf %1216, %1214 : vector<16x16xf32>
    %1218 = arith.addf %1200, %1217 : vector<16x16xf32>
    %c49_339 = arith.constant 49 : index
    %1219 = memref.load %arg3[%c49_339] : memref<144xf32, #tpu.memory_space<smem>>
    %1220 = vector.broadcast %1219 : f32 to vector<16x16xf32>
    %1221 = arith.mulf %1220, %1214 : vector<16x16xf32>
    %1222 = arith.addf %1204, %1221 : vector<16x16xf32>
    %c85_340 = arith.constant 85 : index
    %1223 = memref.load %arg3[%c85_340] : memref<144xf32, #tpu.memory_space<smem>>
    %1224 = vector.broadcast %1223 : f32 to vector<16x16xf32>
    %1225 = arith.mulf %1224, %1214 : vector<16x16xf32>
    %1226 = arith.addf %1208, %1225 : vector<16x16xf32>
    %c121_341 = arith.constant 121 : index
    %1227 = memref.load %arg3[%c121_341] : memref<144xf32, #tpu.memory_space<smem>>
    %1228 = vector.broadcast %1227 : f32 to vector<16x16xf32>
    %1229 = arith.mulf %1228, %1214 : vector<16x16xf32>
    %1230 = arith.addf %1212, %1229 : vector<16x16xf32>
    %c1_342 = arith.constant 1 : index
    %c1_343 = arith.constant 1 : index
    %c2_344 = arith.constant 2 : index
    %1231 = vector.load %arg10[%c1_342, %c1_343, %c2_344] : memref<4x18x18xf32, #tpu.memory_space<vmem>>, vector<1x16x16xf32>
    %1232 = vector.shape_cast %1231 : vector<1x16x16xf32> to vector<16x16xf32>
    %c14_345 = arith.constant 14 : index
    %1233 = memref.load %arg3[%c14_345] : memref<144xf32, #tpu.memory_space<smem>>
    %1234 = vector.broadcast %1233 : f32 to vector<16x16xf32>
    %1235 = arith.mulf %1234, %1232 : vector<16x16xf32>
    %1236 = arith.addf %1218, %1235 : vector<16x16xf32>
    %c50_346 = arith.constant 50 : index
    %1237 = memref.load %arg3[%c50_346] : memref<144xf32, #tpu.memory_space<smem>>
    %1238 = vector.broadcast %1237 : f32 to vector<16x16xf32>
    %1239 = arith.mulf %1238, %1232 : vector<16x16xf32>
    %1240 = arith.addf %1222, %1239 : vector<16x16xf32>
    %c86_347 = arith.constant 86 : index
    %1241 = memref.load %arg3[%c86_347] : memref<144xf32, #tpu.memory_space<smem>>
    %1242 = vector.broadcast %1241 : f32 to vector<16x16xf32>
    %1243 = arith.mulf %1242, %1232 : vector<16x16xf32>
    %1244 = arith.addf %1226, %1243 : vector<16x16xf32>
    %c122_348 = arith.constant 122 : index
    %1245 = memref.load %arg3[%c122_348] : memref<144xf32, #tpu.memory_space<smem>>
    %1246 = vector.broadcast %1245 : f32 to vector<16x16xf32>
    %1247 = arith.mulf %1246, %1232 : vector<16x16xf32>
    %1248 = arith.addf %1230, %1247 : vector<16x16xf32>
    %c1_349 = arith.constant 1 : index
    %c2_350 = arith.constant 2 : index
    %c0_351 = arith.constant 0 : index
    %1249 = vector.load %arg10[%c1_349, %c2_350, %c0_351] : memref<4x18x18xf32, #tpu.memory_space<vmem>>, vector<1x16x16xf32>
    %1250 = vector.shape_cast %1249 : vector<1x16x16xf32> to vector<16x16xf32>
    %c15_352 = arith.constant 15 : index
    %1251 = memref.load %arg3[%c15_352] : memref<144xf32, #tpu.memory_space<smem>>
    %1252 = vector.broadcast %1251 : f32 to vector<16x16xf32>
    %1253 = arith.mulf %1252, %1250 : vector<16x16xf32>
    %1254 = arith.addf %1236, %1253 : vector<16x16xf32>
    %c51_353 = arith.constant 51 : index
    %1255 = memref.load %arg3[%c51_353] : memref<144xf32, #tpu.memory_space<smem>>
    %1256 = vector.broadcast %1255 : f32 to vector<16x16xf32>
    %1257 = arith.mulf %1256, %1250 : vector<16x16xf32>
    %1258 = arith.addf %1240, %1257 : vector<16x16xf32>
    %c87_354 = arith.constant 87 : index
    %1259 = memref.load %arg3[%c87_354] : memref<144xf32, #tpu.memory_space<smem>>
    %1260 = vector.broadcast %1259 : f32 to vector<16x16xf32>
    %1261 = arith.mulf %1260, %1250 : vector<16x16xf32>
    %1262 = arith.addf %1244, %1261 : vector<16x16xf32>
    %c123_355 = arith.constant 123 : index
    %1263 = memref.load %arg3[%c123_355] : memref<144xf32, #tpu.memory_space<smem>>
    %1264 = vector.broadcast %1263 : f32 to vector<16x16xf32>
    %1265 = arith.mulf %1264, %1250 : vector<16x16xf32>
    %1266 = arith.addf %1248, %1265 : vector<16x16xf32>
    %c1_356 = arith.constant 1 : index
    %c2_357 = arith.constant 2 : index
    %c1_358 = arith.constant 1 : index
    %1267 = vector.load %arg10[%c1_356, %c2_357, %c1_358] : memref<4x18x18xf32, #tpu.memory_space<vmem>>, vector<1x16x16xf32>
    %1268 = vector.shape_cast %1267 : vector<1x16x16xf32> to vector<16x16xf32>
    %c16_359 = arith.constant 16 : index
    %1269 = memref.load %arg3[%c16_359] : memref<144xf32, #tpu.memory_space<smem>>
    %1270 = vector.broadcast %1269 : f32 to vector<16x16xf32>
    %1271 = arith.mulf %1270, %1268 : vector<16x16xf32>
    %1272 = arith.addf %1254, %1271 : vector<16x16xf32>
    %c52_360 = arith.constant 52 : index
    %1273 = memref.load %arg3[%c52_360] : memref<144xf32, #tpu.memory_space<smem>>
    %1274 = vector.broadcast %1273 : f32 to vector<16x16xf32>
    %1275 = arith.mulf %1274, %1268 : vector<16x16xf32>
    %1276 = arith.addf %1258, %1275 : vector<16x16xf32>
    %c88_361 = arith.constant 88 : index
    %1277 = memref.load %arg3[%c88_361] : memref<144xf32, #tpu.memory_space<smem>>
    %1278 = vector.broadcast %1277 : f32 to vector<16x16xf32>
    %1279 = arith.mulf %1278, %1268 : vector<16x16xf32>
    %1280 = arith.addf %1262, %1279 : vector<16x16xf32>
    %c124_362 = arith.constant 124 : index
    %1281 = memref.load %arg3[%c124_362] : memref<144xf32, #tpu.memory_space<smem>>
    %1282 = vector.broadcast %1281 : f32 to vector<16x16xf32>
    %1283 = arith.mulf %1282, %1268 : vector<16x16xf32>
    %1284 = arith.addf %1266, %1283 : vector<16x16xf32>
    %c1_363 = arith.constant 1 : index
    %c2_364 = arith.constant 2 : index
    %c2_365 = arith.constant 2 : index
    %1285 = vector.load %arg10[%c1_363, %c2_364, %c2_365] : memref<4x18x18xf32, #tpu.memory_space<vmem>>, vector<1x16x16xf32>
    %1286 = vector.shape_cast %1285 : vector<1x16x16xf32> to vector<16x16xf32>
    %c17_366 = arith.constant 17 : index
    %1287 = memref.load %arg3[%c17_366] : memref<144xf32, #tpu.memory_space<smem>>
    %1288 = vector.broadcast %1287 : f32 to vector<16x16xf32>
    %1289 = arith.mulf %1288, %1286 : vector<16x16xf32>
    %1290 = arith.addf %1272, %1289 : vector<16x16xf32>
    %c53_367 = arith.constant 53 : index
    %1291 = memref.load %arg3[%c53_367] : memref<144xf32, #tpu.memory_space<smem>>
    %1292 = vector.broadcast %1291 : f32 to vector<16x16xf32>
    %1293 = arith.mulf %1292, %1286 : vector<16x16xf32>
    %1294 = arith.addf %1276, %1293 : vector<16x16xf32>
    %c89_368 = arith.constant 89 : index
    %1295 = memref.load %arg3[%c89_368] : memref<144xf32, #tpu.memory_space<smem>>
    %1296 = vector.broadcast %1295 : f32 to vector<16x16xf32>
    %1297 = arith.mulf %1296, %1286 : vector<16x16xf32>
    %1298 = arith.addf %1280, %1297 : vector<16x16xf32>
    %c125_369 = arith.constant 125 : index
    %1299 = memref.load %arg3[%c125_369] : memref<144xf32, #tpu.memory_space<smem>>
    %1300 = vector.broadcast %1299 : f32 to vector<16x16xf32>
    %1301 = arith.mulf %1300, %1286 : vector<16x16xf32>
    %1302 = arith.addf %1284, %1301 : vector<16x16xf32>
    %c2_370 = arith.constant 2 : index
    %c0_371 = arith.constant 0 : index
    %c0_372 = arith.constant 0 : index
    %1303 = vector.load %arg10[%c2_370, %c0_371, %c0_372] : memref<4x18x18xf32, #tpu.memory_space<vmem>>, vector<1x16x16xf32>
    %1304 = vector.shape_cast %1303 : vector<1x16x16xf32> to vector<16x16xf32>
    %c18_373 = arith.constant 18 : index
    %1305 = memref.load %arg3[%c18_373] : memref<144xf32, #tpu.memory_space<smem>>
    %1306 = vector.broadcast %1305 : f32 to vector<16x16xf32>
    %1307 = arith.mulf %1306, %1304 : vector<16x16xf32>
    %1308 = arith.addf %1290, %1307 : vector<16x16xf32>
    %c54_374 = arith.constant 54 : index
    %1309 = memref.load %arg3[%c54_374] : memref<144xf32, #tpu.memory_space<smem>>
    %1310 = vector.broadcast %1309 : f32 to vector<16x16xf32>
    %1311 = arith.mulf %1310, %1304 : vector<16x16xf32>
    %1312 = arith.addf %1294, %1311 : vector<16x16xf32>
    %c90_375 = arith.constant 90 : index
    %1313 = memref.load %arg3[%c90_375] : memref<144xf32, #tpu.memory_space<smem>>
    %1314 = vector.broadcast %1313 : f32 to vector<16x16xf32>
    %1315 = arith.mulf %1314, %1304 : vector<16x16xf32>
    %1316 = arith.addf %1298, %1315 : vector<16x16xf32>
    %c126_376 = arith.constant 126 : index
    %1317 = memref.load %arg3[%c126_376] : memref<144xf32, #tpu.memory_space<smem>>
    %1318 = vector.broadcast %1317 : f32 to vector<16x16xf32>
    %1319 = arith.mulf %1318, %1304 : vector<16x16xf32>
    %1320 = arith.addf %1302, %1319 : vector<16x16xf32>
    %c2_377 = arith.constant 2 : index
    %c0_378 = arith.constant 0 : index
    %c1_379 = arith.constant 1 : index
    %1321 = vector.load %arg10[%c2_377, %c0_378, %c1_379] : memref<4x18x18xf32, #tpu.memory_space<vmem>>, vector<1x16x16xf32>
    %1322 = vector.shape_cast %1321 : vector<1x16x16xf32> to vector<16x16xf32>
    %c19_380 = arith.constant 19 : index
    %1323 = memref.load %arg3[%c19_380] : memref<144xf32, #tpu.memory_space<smem>>
    %1324 = vector.broadcast %1323 : f32 to vector<16x16xf32>
    %1325 = arith.mulf %1324, %1322 : vector<16x16xf32>
    %1326 = arith.addf %1308, %1325 : vector<16x16xf32>
    %c55_381 = arith.constant 55 : index
    %1327 = memref.load %arg3[%c55_381] : memref<144xf32, #tpu.memory_space<smem>>
    %1328 = vector.broadcast %1327 : f32 to vector<16x16xf32>
    %1329 = arith.mulf %1328, %1322 : vector<16x16xf32>
    %1330 = arith.addf %1312, %1329 : vector<16x16xf32>
    %c91_382 = arith.constant 91 : index
    %1331 = memref.load %arg3[%c91_382] : memref<144xf32, #tpu.memory_space<smem>>
    %1332 = vector.broadcast %1331 : f32 to vector<16x16xf32>
    %1333 = arith.mulf %1332, %1322 : vector<16x16xf32>
    %1334 = arith.addf %1316, %1333 : vector<16x16xf32>
    %c127_383 = arith.constant 127 : index
    %1335 = memref.load %arg3[%c127_383] : memref<144xf32, #tpu.memory_space<smem>>
    %1336 = vector.broadcast %1335 : f32 to vector<16x16xf32>
    %1337 = arith.mulf %1336, %1322 : vector<16x16xf32>
    %1338 = arith.addf %1320, %1337 : vector<16x16xf32>
    %c2_384 = arith.constant 2 : index
    %c0_385 = arith.constant 0 : index
    %c2_386 = arith.constant 2 : index
    %1339 = vector.load %arg10[%c2_384, %c0_385, %c2_386] : memref<4x18x18xf32, #tpu.memory_space<vmem>>, vector<1x16x16xf32>
    %1340 = vector.shape_cast %1339 : vector<1x16x16xf32> to vector<16x16xf32>
    %c20_387 = arith.constant 20 : index
    %1341 = memref.load %arg3[%c20_387] : memref<144xf32, #tpu.memory_space<smem>>
    %1342 = vector.broadcast %1341 : f32 to vector<16x16xf32>
    %1343 = arith.mulf %1342, %1340 : vector<16x16xf32>
    %1344 = arith.addf %1326, %1343 : vector<16x16xf32>
    %c56_388 = arith.constant 56 : index
    %1345 = memref.load %arg3[%c56_388] : memref<144xf32, #tpu.memory_space<smem>>
    %1346 = vector.broadcast %1345 : f32 to vector<16x16xf32>
    %1347 = arith.mulf %1346, %1340 : vector<16x16xf32>
    %1348 = arith.addf %1330, %1347 : vector<16x16xf32>
    %c92_389 = arith.constant 92 : index
    %1349 = memref.load %arg3[%c92_389] : memref<144xf32, #tpu.memory_space<smem>>
    %1350 = vector.broadcast %1349 : f32 to vector<16x16xf32>
    %1351 = arith.mulf %1350, %1340 : vector<16x16xf32>
    %1352 = arith.addf %1334, %1351 : vector<16x16xf32>
    %c128_390 = arith.constant 128 : index
    %1353 = memref.load %arg3[%c128_390] : memref<144xf32, #tpu.memory_space<smem>>
    %1354 = vector.broadcast %1353 : f32 to vector<16x16xf32>
    %1355 = arith.mulf %1354, %1340 : vector<16x16xf32>
    %1356 = arith.addf %1338, %1355 : vector<16x16xf32>
    %c2_391 = arith.constant 2 : index
    %c1_392 = arith.constant 1 : index
    %c0_393 = arith.constant 0 : index
    %1357 = vector.load %arg10[%c2_391, %c1_392, %c0_393] : memref<4x18x18xf32, #tpu.memory_space<vmem>>, vector<1x16x16xf32>
    %1358 = vector.shape_cast %1357 : vector<1x16x16xf32> to vector<16x16xf32>
    %c21_394 = arith.constant 21 : index
    %1359 = memref.load %arg3[%c21_394] : memref<144xf32, #tpu.memory_space<smem>>
    %1360 = vector.broadcast %1359 : f32 to vector<16x16xf32>
    %1361 = arith.mulf %1360, %1358 : vector<16x16xf32>
    %1362 = arith.addf %1344, %1361 : vector<16x16xf32>
    %c57_395 = arith.constant 57 : index
    %1363 = memref.load %arg3[%c57_395] : memref<144xf32, #tpu.memory_space<smem>>
    %1364 = vector.broadcast %1363 : f32 to vector<16x16xf32>
    %1365 = arith.mulf %1364, %1358 : vector<16x16xf32>
    %1366 = arith.addf %1348, %1365 : vector<16x16xf32>
    %c93_396 = arith.constant 93 : index
    %1367 = memref.load %arg3[%c93_396] : memref<144xf32, #tpu.memory_space<smem>>
    %1368 = vector.broadcast %1367 : f32 to vector<16x16xf32>
    %1369 = arith.mulf %1368, %1358 : vector<16x16xf32>
    %1370 = arith.addf %1352, %1369 : vector<16x16xf32>
    %c129_397 = arith.constant 129 : index
    %1371 = memref.load %arg3[%c129_397] : memref<144xf32, #tpu.memory_space<smem>>
    %1372 = vector.broadcast %1371 : f32 to vector<16x16xf32>
    %1373 = arith.mulf %1372, %1358 : vector<16x16xf32>
    %1374 = arith.addf %1356, %1373 : vector<16x16xf32>
    %c2_398 = arith.constant 2 : index
    %c1_399 = arith.constant 1 : index
    %c1_400 = arith.constant 1 : index
    %1375 = vector.load %arg10[%c2_398, %c1_399, %c1_400] : memref<4x18x18xf32, #tpu.memory_space<vmem>>, vector<1x16x16xf32>
    %1376 = vector.shape_cast %1375 : vector<1x16x16xf32> to vector<16x16xf32>
    %c22_401 = arith.constant 22 : index
    %1377 = memref.load %arg3[%c22_401] : memref<144xf32, #tpu.memory_space<smem>>
    %1378 = vector.broadcast %1377 : f32 to vector<16x16xf32>
    %1379 = arith.mulf %1378, %1376 : vector<16x16xf32>
    %1380 = arith.addf %1362, %1379 : vector<16x16xf32>
    %c58_402 = arith.constant 58 : index
    %1381 = memref.load %arg3[%c58_402] : memref<144xf32, #tpu.memory_space<smem>>
    %1382 = vector.broadcast %1381 : f32 to vector<16x16xf32>
    %1383 = arith.mulf %1382, %1376 : vector<16x16xf32>
    %1384 = arith.addf %1366, %1383 : vector<16x16xf32>
    %c94_403 = arith.constant 94 : index
    %1385 = memref.load %arg3[%c94_403] : memref<144xf32, #tpu.memory_space<smem>>
    %1386 = vector.broadcast %1385 : f32 to vector<16x16xf32>
    %1387 = arith.mulf %1386, %1376 : vector<16x16xf32>
    %1388 = arith.addf %1370, %1387 : vector<16x16xf32>
    %c130_404 = arith.constant 130 : index
    %1389 = memref.load %arg3[%c130_404] : memref<144xf32, #tpu.memory_space<smem>>
    %1390 = vector.broadcast %1389 : f32 to vector<16x16xf32>
    %1391 = arith.mulf %1390, %1376 : vector<16x16xf32>
    %1392 = arith.addf %1374, %1391 : vector<16x16xf32>
    %c2_405 = arith.constant 2 : index
    %c1_406 = arith.constant 1 : index
    %c2_407 = arith.constant 2 : index
    %1393 = vector.load %arg10[%c2_405, %c1_406, %c2_407] : memref<4x18x18xf32, #tpu.memory_space<vmem>>, vector<1x16x16xf32>
    %1394 = vector.shape_cast %1393 : vector<1x16x16xf32> to vector<16x16xf32>
    %c23_408 = arith.constant 23 : index
    %1395 = memref.load %arg3[%c23_408] : memref<144xf32, #tpu.memory_space<smem>>
    %1396 = vector.broadcast %1395 : f32 to vector<16x16xf32>
    %1397 = arith.mulf %1396, %1394 : vector<16x16xf32>
    %1398 = arith.addf %1380, %1397 : vector<16x16xf32>
    %c59_409 = arith.constant 59 : index
    %1399 = memref.load %arg3[%c59_409] : memref<144xf32, #tpu.memory_space<smem>>
    %1400 = vector.broadcast %1399 : f32 to vector<16x16xf32>
    %1401 = arith.mulf %1400, %1394 : vector<16x16xf32>
    %1402 = arith.addf %1384, %1401 : vector<16x16xf32>
    %c95_410 = arith.constant 95 : index
    %1403 = memref.load %arg3[%c95_410] : memref<144xf32, #tpu.memory_space<smem>>
    %1404 = vector.broadcast %1403 : f32 to vector<16x16xf32>
    %1405 = arith.mulf %1404, %1394 : vector<16x16xf32>
    %1406 = arith.addf %1388, %1405 : vector<16x16xf32>
    %c131_411 = arith.constant 131 : index
    %1407 = memref.load %arg3[%c131_411] : memref<144xf32, #tpu.memory_space<smem>>
    %1408 = vector.broadcast %1407 : f32 to vector<16x16xf32>
    %1409 = arith.mulf %1408, %1394 : vector<16x16xf32>
    %1410 = arith.addf %1392, %1409 : vector<16x16xf32>
    %c2_412 = arith.constant 2 : index
    %c2_413 = arith.constant 2 : index
    %c0_414 = arith.constant 0 : index
    %1411 = vector.load %arg10[%c2_412, %c2_413, %c0_414] : memref<4x18x18xf32, #tpu.memory_space<vmem>>, vector<1x16x16xf32>
    %1412 = vector.shape_cast %1411 : vector<1x16x16xf32> to vector<16x16xf32>
    %c24_415 = arith.constant 24 : index
    %1413 = memref.load %arg3[%c24_415] : memref<144xf32, #tpu.memory_space<smem>>
    %1414 = vector.broadcast %1413 : f32 to vector<16x16xf32>
    %1415 = arith.mulf %1414, %1412 : vector<16x16xf32>
    %1416 = arith.addf %1398, %1415 : vector<16x16xf32>
    %c60_416 = arith.constant 60 : index
    %1417 = memref.load %arg3[%c60_416] : memref<144xf32, #tpu.memory_space<smem>>
    %1418 = vector.broadcast %1417 : f32 to vector<16x16xf32>
    %1419 = arith.mulf %1418, %1412 : vector<16x16xf32>
    %1420 = arith.addf %1402, %1419 : vector<16x16xf32>
    %c96_417 = arith.constant 96 : index
    %1421 = memref.load %arg3[%c96_417] : memref<144xf32, #tpu.memory_space<smem>>
    %1422 = vector.broadcast %1421 : f32 to vector<16x16xf32>
    %1423 = arith.mulf %1422, %1412 : vector<16x16xf32>
    %1424 = arith.addf %1406, %1423 : vector<16x16xf32>
    %c132_418 = arith.constant 132 : index
    %1425 = memref.load %arg3[%c132_418] : memref<144xf32, #tpu.memory_space<smem>>
    %1426 = vector.broadcast %1425 : f32 to vector<16x16xf32>
    %1427 = arith.mulf %1426, %1412 : vector<16x16xf32>
    %1428 = arith.addf %1410, %1427 : vector<16x16xf32>
    %c2_419 = arith.constant 2 : index
    %c2_420 = arith.constant 2 : index
    %c1_421 = arith.constant 1 : index
    %1429 = vector.load %arg10[%c2_419, %c2_420, %c1_421] : memref<4x18x18xf32, #tpu.memory_space<vmem>>, vector<1x16x16xf32>
    %1430 = vector.shape_cast %1429 : vector<1x16x16xf32> to vector<16x16xf32>
    %c25_422 = arith.constant 25 : index
    %1431 = memref.load %arg3[%c25_422] : memref<144xf32, #tpu.memory_space<smem>>
    %1432 = vector.broadcast %1431 : f32 to vector<16x16xf32>
    %1433 = arith.mulf %1432, %1430 : vector<16x16xf32>
    %1434 = arith.addf %1416, %1433 : vector<16x16xf32>
    %c61_423 = arith.constant 61 : index
    %1435 = memref.load %arg3[%c61_423] : memref<144xf32, #tpu.memory_space<smem>>
    %1436 = vector.broadcast %1435 : f32 to vector<16x16xf32>
    %1437 = arith.mulf %1436, %1430 : vector<16x16xf32>
    %1438 = arith.addf %1420, %1437 : vector<16x16xf32>
    %c97_424 = arith.constant 97 : index
    %1439 = memref.load %arg3[%c97_424] : memref<144xf32, #tpu.memory_space<smem>>
    %1440 = vector.broadcast %1439 : f32 to vector<16x16xf32>
    %1441 = arith.mulf %1440, %1430 : vector<16x16xf32>
    %1442 = arith.addf %1424, %1441 : vector<16x16xf32>
    %c133_425 = arith.constant 133 : index
    %1443 = memref.load %arg3[%c133_425] : memref<144xf32, #tpu.memory_space<smem>>
    %1444 = vector.broadcast %1443 : f32 to vector<16x16xf32>
    %1445 = arith.mulf %1444, %1430 : vector<16x16xf32>
    %1446 = arith.addf %1428, %1445 : vector<16x16xf32>
    %c2_426 = arith.constant 2 : index
    %c2_427 = arith.constant 2 : index
    %c2_428 = arith.constant 2 : index
    %1447 = vector.load %arg10[%c2_426, %c2_427, %c2_428] : memref<4x18x18xf32, #tpu.memory_space<vmem>>, vector<1x16x16xf32>
    %1448 = vector.shape_cast %1447 : vector<1x16x16xf32> to vector<16x16xf32>
    %c26_429 = arith.constant 26 : index
    %1449 = memref.load %arg3[%c26_429] : memref<144xf32, #tpu.memory_space<smem>>
    %1450 = vector.broadcast %1449 : f32 to vector<16x16xf32>
    %1451 = arith.mulf %1450, %1448 : vector<16x16xf32>
    %1452 = arith.addf %1434, %1451 : vector<16x16xf32>
    %c62_430 = arith.constant 62 : index
    %1453 = memref.load %arg3[%c62_430] : memref<144xf32, #tpu.memory_space<smem>>
    %1454 = vector.broadcast %1453 : f32 to vector<16x16xf32>
    %1455 = arith.mulf %1454, %1448 : vector<16x16xf32>
    %1456 = arith.addf %1438, %1455 : vector<16x16xf32>
    %c98_431 = arith.constant 98 : index
    %1457 = memref.load %arg3[%c98_431] : memref<144xf32, #tpu.memory_space<smem>>
    %1458 = vector.broadcast %1457 : f32 to vector<16x16xf32>
    %1459 = arith.mulf %1458, %1448 : vector<16x16xf32>
    %1460 = arith.addf %1442, %1459 : vector<16x16xf32>
    %c134_432 = arith.constant 134 : index
    %1461 = memref.load %arg3[%c134_432] : memref<144xf32, #tpu.memory_space<smem>>
    %1462 = vector.broadcast %1461 : f32 to vector<16x16xf32>
    %1463 = arith.mulf %1462, %1448 : vector<16x16xf32>
    %1464 = arith.addf %1446, %1463 : vector<16x16xf32>
    %c3_433 = arith.constant 3 : index
    %c0_434 = arith.constant 0 : index
    %c0_435 = arith.constant 0 : index
    %1465 = vector.load %arg10[%c3_433, %c0_434, %c0_435] : memref<4x18x18xf32, #tpu.memory_space<vmem>>, vector<1x16x16xf32>
    %1466 = vector.shape_cast %1465 : vector<1x16x16xf32> to vector<16x16xf32>
    %c27_436 = arith.constant 27 : index
    %1467 = memref.load %arg3[%c27_436] : memref<144xf32, #tpu.memory_space<smem>>
    %1468 = vector.broadcast %1467 : f32 to vector<16x16xf32>
    %1469 = arith.mulf %1468, %1466 : vector<16x16xf32>
    %1470 = arith.addf %1452, %1469 : vector<16x16xf32>
    %c63_437 = arith.constant 63 : index
    %1471 = memref.load %arg3[%c63_437] : memref<144xf32, #tpu.memory_space<smem>>
    %1472 = vector.broadcast %1471 : f32 to vector<16x16xf32>
    %1473 = arith.mulf %1472, %1466 : vector<16x16xf32>
    %1474 = arith.addf %1456, %1473 : vector<16x16xf32>
    %c99_438 = arith.constant 99 : index
    %1475 = memref.load %arg3[%c99_438] : memref<144xf32, #tpu.memory_space<smem>>
    %1476 = vector.broadcast %1475 : f32 to vector<16x16xf32>
    %1477 = arith.mulf %1476, %1466 : vector<16x16xf32>
    %1478 = arith.addf %1460, %1477 : vector<16x16xf32>
    %c135_439 = arith.constant 135 : index
    %1479 = memref.load %arg3[%c135_439] : memref<144xf32, #tpu.memory_space<smem>>
    %1480 = vector.broadcast %1479 : f32 to vector<16x16xf32>
    %1481 = arith.mulf %1480, %1466 : vector<16x16xf32>
    %1482 = arith.addf %1464, %1481 : vector<16x16xf32>
    %c3_440 = arith.constant 3 : index
    %c0_441 = arith.constant 0 : index
    %c1_442 = arith.constant 1 : index
    %1483 = vector.load %arg10[%c3_440, %c0_441, %c1_442] : memref<4x18x18xf32, #tpu.memory_space<vmem>>, vector<1x16x16xf32>
    %1484 = vector.shape_cast %1483 : vector<1x16x16xf32> to vector<16x16xf32>
    %c28_443 = arith.constant 28 : index
    %1485 = memref.load %arg3[%c28_443] : memref<144xf32, #tpu.memory_space<smem>>
    %1486 = vector.broadcast %1485 : f32 to vector<16x16xf32>
    %1487 = arith.mulf %1486, %1484 : vector<16x16xf32>
    %1488 = arith.addf %1470, %1487 : vector<16x16xf32>
    %c64_444 = arith.constant 64 : index
    %1489 = memref.load %arg3[%c64_444] : memref<144xf32, #tpu.memory_space<smem>>
    %1490 = vector.broadcast %1489 : f32 to vector<16x16xf32>
    %1491 = arith.mulf %1490, %1484 : vector<16x16xf32>
    %1492 = arith.addf %1474, %1491 : vector<16x16xf32>
    %c100_445 = arith.constant 100 : index
    %1493 = memref.load %arg3[%c100_445] : memref<144xf32, #tpu.memory_space<smem>>
    %1494 = vector.broadcast %1493 : f32 to vector<16x16xf32>
    %1495 = arith.mulf %1494, %1484 : vector<16x16xf32>
    %1496 = arith.addf %1478, %1495 : vector<16x16xf32>
    %c136_446 = arith.constant 136 : index
    %1497 = memref.load %arg3[%c136_446] : memref<144xf32, #tpu.memory_space<smem>>
    %1498 = vector.broadcast %1497 : f32 to vector<16x16xf32>
    %1499 = arith.mulf %1498, %1484 : vector<16x16xf32>
    %1500 = arith.addf %1482, %1499 : vector<16x16xf32>
    %c3_447 = arith.constant 3 : index
    %c0_448 = arith.constant 0 : index
    %c2_449 = arith.constant 2 : index
    %1501 = vector.load %arg10[%c3_447, %c0_448, %c2_449] : memref<4x18x18xf32, #tpu.memory_space<vmem>>, vector<1x16x16xf32>
    %1502 = vector.shape_cast %1501 : vector<1x16x16xf32> to vector<16x16xf32>
    %c29_450 = arith.constant 29 : index
    %1503 = memref.load %arg3[%c29_450] : memref<144xf32, #tpu.memory_space<smem>>
    %1504 = vector.broadcast %1503 : f32 to vector<16x16xf32>
    %1505 = arith.mulf %1504, %1502 : vector<16x16xf32>
    %1506 = arith.addf %1488, %1505 : vector<16x16xf32>
    %c65_451 = arith.constant 65 : index
    %1507 = memref.load %arg3[%c65_451] : memref<144xf32, #tpu.memory_space<smem>>
    %1508 = vector.broadcast %1507 : f32 to vector<16x16xf32>
    %1509 = arith.mulf %1508, %1502 : vector<16x16xf32>
    %1510 = arith.addf %1492, %1509 : vector<16x16xf32>
    %c101_452 = arith.constant 101 : index
    %1511 = memref.load %arg3[%c101_452] : memref<144xf32, #tpu.memory_space<smem>>
    %1512 = vector.broadcast %1511 : f32 to vector<16x16xf32>
    %1513 = arith.mulf %1512, %1502 : vector<16x16xf32>
    %1514 = arith.addf %1496, %1513 : vector<16x16xf32>
    %c137_453 = arith.constant 137 : index
    %1515 = memref.load %arg3[%c137_453] : memref<144xf32, #tpu.memory_space<smem>>
    %1516 = vector.broadcast %1515 : f32 to vector<16x16xf32>
    %1517 = arith.mulf %1516, %1502 : vector<16x16xf32>
    %1518 = arith.addf %1500, %1517 : vector<16x16xf32>
    %c3_454 = arith.constant 3 : index
    %c1_455 = arith.constant 1 : index
    %c0_456 = arith.constant 0 : index
    %1519 = vector.load %arg10[%c3_454, %c1_455, %c0_456] : memref<4x18x18xf32, #tpu.memory_space<vmem>>, vector<1x16x16xf32>
    %1520 = vector.shape_cast %1519 : vector<1x16x16xf32> to vector<16x16xf32>
    %c30_457 = arith.constant 30 : index
    %1521 = memref.load %arg3[%c30_457] : memref<144xf32, #tpu.memory_space<smem>>
    %1522 = vector.broadcast %1521 : f32 to vector<16x16xf32>
    %1523 = arith.mulf %1522, %1520 : vector<16x16xf32>
    %1524 = arith.addf %1506, %1523 : vector<16x16xf32>
    %c66_458 = arith.constant 66 : index
    %1525 = memref.load %arg3[%c66_458] : memref<144xf32, #tpu.memory_space<smem>>
    %1526 = vector.broadcast %1525 : f32 to vector<16x16xf32>
    %1527 = arith.mulf %1526, %1520 : vector<16x16xf32>
    %1528 = arith.addf %1510, %1527 : vector<16x16xf32>
    %c102_459 = arith.constant 102 : index
    %1529 = memref.load %arg3[%c102_459] : memref<144xf32, #tpu.memory_space<smem>>
    %1530 = vector.broadcast %1529 : f32 to vector<16x16xf32>
    %1531 = arith.mulf %1530, %1520 : vector<16x16xf32>
    %1532 = arith.addf %1514, %1531 : vector<16x16xf32>
    %c138_460 = arith.constant 138 : index
    %1533 = memref.load %arg3[%c138_460] : memref<144xf32, #tpu.memory_space<smem>>
    %1534 = vector.broadcast %1533 : f32 to vector<16x16xf32>
    %1535 = arith.mulf %1534, %1520 : vector<16x16xf32>
    %1536 = arith.addf %1518, %1535 : vector<16x16xf32>
    %c3_461 = arith.constant 3 : index
    %c1_462 = arith.constant 1 : index
    %c1_463 = arith.constant 1 : index
    %1537 = vector.load %arg10[%c3_461, %c1_462, %c1_463] : memref<4x18x18xf32, #tpu.memory_space<vmem>>, vector<1x16x16xf32>
    %1538 = vector.shape_cast %1537 : vector<1x16x16xf32> to vector<16x16xf32>
    %c31_464 = arith.constant 31 : index
    %1539 = memref.load %arg3[%c31_464] : memref<144xf32, #tpu.memory_space<smem>>
    %1540 = vector.broadcast %1539 : f32 to vector<16x16xf32>
    %1541 = arith.mulf %1540, %1538 : vector<16x16xf32>
    %1542 = arith.addf %1524, %1541 : vector<16x16xf32>
    %c67_465 = arith.constant 67 : index
    %1543 = memref.load %arg3[%c67_465] : memref<144xf32, #tpu.memory_space<smem>>
    %1544 = vector.broadcast %1543 : f32 to vector<16x16xf32>
    %1545 = arith.mulf %1544, %1538 : vector<16x16xf32>
    %1546 = arith.addf %1528, %1545 : vector<16x16xf32>
    %c103_466 = arith.constant 103 : index
    %1547 = memref.load %arg3[%c103_466] : memref<144xf32, #tpu.memory_space<smem>>
    %1548 = vector.broadcast %1547 : f32 to vector<16x16xf32>
    %1549 = arith.mulf %1548, %1538 : vector<16x16xf32>
    %1550 = arith.addf %1532, %1549 : vector<16x16xf32>
    %c139_467 = arith.constant 139 : index
    %1551 = memref.load %arg3[%c139_467] : memref<144xf32, #tpu.memory_space<smem>>
    %1552 = vector.broadcast %1551 : f32 to vector<16x16xf32>
    %1553 = arith.mulf %1552, %1538 : vector<16x16xf32>
    %1554 = arith.addf %1536, %1553 : vector<16x16xf32>
    %c3_468 = arith.constant 3 : index
    %c1_469 = arith.constant 1 : index
    %c2_470 = arith.constant 2 : index
    %1555 = vector.load %arg10[%c3_468, %c1_469, %c2_470] : memref<4x18x18xf32, #tpu.memory_space<vmem>>, vector<1x16x16xf32>
    %1556 = vector.shape_cast %1555 : vector<1x16x16xf32> to vector<16x16xf32>
    %c32_471 = arith.constant 32 : index
    %1557 = memref.load %arg3[%c32_471] : memref<144xf32, #tpu.memory_space<smem>>
    %1558 = vector.broadcast %1557 : f32 to vector<16x16xf32>
    %1559 = arith.mulf %1558, %1556 : vector<16x16xf32>
    %1560 = arith.addf %1542, %1559 : vector<16x16xf32>
    %c68_472 = arith.constant 68 : index
    %1561 = memref.load %arg3[%c68_472] : memref<144xf32, #tpu.memory_space<smem>>
    %1562 = vector.broadcast %1561 : f32 to vector<16x16xf32>
    %1563 = arith.mulf %1562, %1556 : vector<16x16xf32>
    %1564 = arith.addf %1546, %1563 : vector<16x16xf32>
    %c104_473 = arith.constant 104 : index
    %1565 = memref.load %arg3[%c104_473] : memref<144xf32, #tpu.memory_space<smem>>
    %1566 = vector.broadcast %1565 : f32 to vector<16x16xf32>
    %1567 = arith.mulf %1566, %1556 : vector<16x16xf32>
    %1568 = arith.addf %1550, %1567 : vector<16x16xf32>
    %c140_474 = arith.constant 140 : index
    %1569 = memref.load %arg3[%c140_474] : memref<144xf32, #tpu.memory_space<smem>>
    %1570 = vector.broadcast %1569 : f32 to vector<16x16xf32>
    %1571 = arith.mulf %1570, %1556 : vector<16x16xf32>
    %1572 = arith.addf %1554, %1571 : vector<16x16xf32>
    %c3_475 = arith.constant 3 : index
    %c2_476 = arith.constant 2 : index
    %c0_477 = arith.constant 0 : index
    %1573 = vector.load %arg10[%c3_475, %c2_476, %c0_477] : memref<4x18x18xf32, #tpu.memory_space<vmem>>, vector<1x16x16xf32>
    %1574 = vector.shape_cast %1573 : vector<1x16x16xf32> to vector<16x16xf32>
    %c33_478 = arith.constant 33 : index
    %1575 = memref.load %arg3[%c33_478] : memref<144xf32, #tpu.memory_space<smem>>
    %1576 = vector.broadcast %1575 : f32 to vector<16x16xf32>
    %1577 = arith.mulf %1576, %1574 : vector<16x16xf32>
    %1578 = arith.addf %1560, %1577 : vector<16x16xf32>
    %c69_479 = arith.constant 69 : index
    %1579 = memref.load %arg3[%c69_479] : memref<144xf32, #tpu.memory_space<smem>>
    %1580 = vector.broadcast %1579 : f32 to vector<16x16xf32>
    %1581 = arith.mulf %1580, %1574 : vector<16x16xf32>
    %1582 = arith.addf %1564, %1581 : vector<16x16xf32>
    %c105_480 = arith.constant 105 : index
    %1583 = memref.load %arg3[%c105_480] : memref<144xf32, #tpu.memory_space<smem>>
    %1584 = vector.broadcast %1583 : f32 to vector<16x16xf32>
    %1585 = arith.mulf %1584, %1574 : vector<16x16xf32>
    %1586 = arith.addf %1568, %1585 : vector<16x16xf32>
    %c141_481 = arith.constant 141 : index
    %1587 = memref.load %arg3[%c141_481] : memref<144xf32, #tpu.memory_space<smem>>
    %1588 = vector.broadcast %1587 : f32 to vector<16x16xf32>
    %1589 = arith.mulf %1588, %1574 : vector<16x16xf32>
    %1590 = arith.addf %1572, %1589 : vector<16x16xf32>
    %c3_482 = arith.constant 3 : index
    %c2_483 = arith.constant 2 : index
    %c1_484 = arith.constant 1 : index
    %1591 = vector.load %arg10[%c3_482, %c2_483, %c1_484] : memref<4x18x18xf32, #tpu.memory_space<vmem>>, vector<1x16x16xf32>
    %1592 = vector.shape_cast %1591 : vector<1x16x16xf32> to vector<16x16xf32>
    %c34_485 = arith.constant 34 : index
    %1593 = memref.load %arg3[%c34_485] : memref<144xf32, #tpu.memory_space<smem>>
    %1594 = vector.broadcast %1593 : f32 to vector<16x16xf32>
    %1595 = arith.mulf %1594, %1592 : vector<16x16xf32>
    %1596 = arith.addf %1578, %1595 : vector<16x16xf32>
    %c70_486 = arith.constant 70 : index
    %1597 = memref.load %arg3[%c70_486] : memref<144xf32, #tpu.memory_space<smem>>
    %1598 = vector.broadcast %1597 : f32 to vector<16x16xf32>
    %1599 = arith.mulf %1598, %1592 : vector<16x16xf32>
    %1600 = arith.addf %1582, %1599 : vector<16x16xf32>
    %c106_487 = arith.constant 106 : index
    %1601 = memref.load %arg3[%c106_487] : memref<144xf32, #tpu.memory_space<smem>>
    %1602 = vector.broadcast %1601 : f32 to vector<16x16xf32>
    %1603 = arith.mulf %1602, %1592 : vector<16x16xf32>
    %1604 = arith.addf %1586, %1603 : vector<16x16xf32>
    %c142_488 = arith.constant 142 : index
    %1605 = memref.load %arg3[%c142_488] : memref<144xf32, #tpu.memory_space<smem>>
    %1606 = vector.broadcast %1605 : f32 to vector<16x16xf32>
    %1607 = arith.mulf %1606, %1592 : vector<16x16xf32>
    %1608 = arith.addf %1590, %1607 : vector<16x16xf32>
    %c3_489 = arith.constant 3 : index
    %c2_490 = arith.constant 2 : index
    %c2_491 = arith.constant 2 : index
    %1609 = vector.load %arg10[%c3_489, %c2_490, %c2_491] : memref<4x18x18xf32, #tpu.memory_space<vmem>>, vector<1x16x16xf32>
    %1610 = vector.shape_cast %1609 : vector<1x16x16xf32> to vector<16x16xf32>
    %c35_492 = arith.constant 35 : index
    %1611 = memref.load %arg3[%c35_492] : memref<144xf32, #tpu.memory_space<smem>>
    %1612 = vector.broadcast %1611 : f32 to vector<16x16xf32>
    %1613 = arith.mulf %1612, %1610 : vector<16x16xf32>
    %1614 = arith.addf %1596, %1613 : vector<16x16xf32>
    %c71_493 = arith.constant 71 : index
    %1615 = memref.load %arg3[%c71_493] : memref<144xf32, #tpu.memory_space<smem>>
    %1616 = vector.broadcast %1615 : f32 to vector<16x16xf32>
    %1617 = arith.mulf %1616, %1610 : vector<16x16xf32>
    %1618 = arith.addf %1600, %1617 : vector<16x16xf32>
    %c107_494 = arith.constant 107 : index
    %1619 = memref.load %arg3[%c107_494] : memref<144xf32, #tpu.memory_space<smem>>
    %1620 = vector.broadcast %1619 : f32 to vector<16x16xf32>
    %1621 = arith.mulf %1620, %1610 : vector<16x16xf32>
    %1622 = arith.addf %1604, %1621 : vector<16x16xf32>
    %c143_495 = arith.constant 143 : index
    %1623 = memref.load %arg3[%c143_495] : memref<144xf32, #tpu.memory_space<smem>>
    %1624 = vector.broadcast %1623 : f32 to vector<16x16xf32>
    %1625 = arith.mulf %1624, %1610 : vector<16x16xf32>
    %1626 = arith.addf %1608, %1625 : vector<16x16xf32>
    %cst_496 = arith.constant 0.000000e+00 : f32
    %1627 = vector.broadcast %cst_496 : f32 to vector<16x16xf32>
    %c0_497 = arith.constant 0 : index
    %1628 = memref.load %arg5[%c0_497] : memref<16xf32, #tpu.memory_space<smem>>
    %c0_498 = arith.constant 0 : index
    %c0_499 = arith.constant 0 : index
    %c2_500 = arith.constant 2 : index
    %c2_501 = arith.constant 2 : index
    %1629 = vector.load %arg7[%c0_498, %c0_499, %c2_500, %c2_501] : memref<1x4x20x20xf32, #tpu.memory_space<vmem>>, vector<1x1x16x16xf32>
    %1630 = vector.shape_cast %1629 : vector<1x1x16x16xf32> to vector<16x16xf32>
    %1631 = vector.broadcast %1628 : f32 to vector<16x16xf32>
    %1632 = arith.mulf %1631, %1630 : vector<16x16xf32>
    %1633 = arith.addf %1627, %1632 : vector<16x16xf32>
    %c1_502 = arith.constant 1 : index
    %1634 = memref.load %arg5[%c1_502] : memref<16xf32, #tpu.memory_space<smem>>
    %c0_503 = arith.constant 0 : index
    %c1_504 = arith.constant 1 : index
    %c2_505 = arith.constant 2 : index
    %c2_506 = arith.constant 2 : index
    %1635 = vector.load %arg7[%c0_503, %c1_504, %c2_505, %c2_506] : memref<1x4x20x20xf32, #tpu.memory_space<vmem>>, vector<1x1x16x16xf32>
    %1636 = vector.shape_cast %1635 : vector<1x1x16x16xf32> to vector<16x16xf32>
    %1637 = vector.broadcast %1634 : f32 to vector<16x16xf32>
    %1638 = arith.mulf %1637, %1636 : vector<16x16xf32>
    %1639 = arith.addf %1633, %1638 : vector<16x16xf32>
    %c2_507 = arith.constant 2 : index
    %1640 = memref.load %arg5[%c2_507] : memref<16xf32, #tpu.memory_space<smem>>
    %c0_508 = arith.constant 0 : index
    %c2_509 = arith.constant 2 : index
    %c2_510 = arith.constant 2 : index
    %c2_511 = arith.constant 2 : index
    %1641 = vector.load %arg7[%c0_508, %c2_509, %c2_510, %c2_511] : memref<1x4x20x20xf32, #tpu.memory_space<vmem>>, vector<1x1x16x16xf32>
    %1642 = vector.shape_cast %1641 : vector<1x1x16x16xf32> to vector<16x16xf32>
    %1643 = vector.broadcast %1640 : f32 to vector<16x16xf32>
    %1644 = arith.mulf %1643, %1642 : vector<16x16xf32>
    %1645 = arith.addf %1639, %1644 : vector<16x16xf32>
    %c3_512 = arith.constant 3 : index
    %1646 = memref.load %arg5[%c3_512] : memref<16xf32, #tpu.memory_space<smem>>
    %c0_513 = arith.constant 0 : index
    %c3_514 = arith.constant 3 : index
    %c2_515 = arith.constant 2 : index
    %c2_516 = arith.constant 2 : index
    %1647 = vector.load %arg7[%c0_513, %c3_514, %c2_515, %c2_516] : memref<1x4x20x20xf32, #tpu.memory_space<vmem>>, vector<1x1x16x16xf32>
    %1648 = vector.shape_cast %1647 : vector<1x1x16x16xf32> to vector<16x16xf32>
    %1649 = vector.broadcast %1646 : f32 to vector<16x16xf32>
    %1650 = arith.mulf %1649, %1648 : vector<16x16xf32>
    %1651 = arith.addf %1645, %1650 : vector<16x16xf32>
    %c0_517 = arith.constant 0 : index
    %1652 = memref.load %arg4[%c0_517] : memref<4xf32, #tpu.memory_space<smem>>
    %1653 = vector.broadcast %1652 : f32 to vector<16x16xf32>
    %1654 = arith.addf %1614, %1653 : vector<16x16xf32>
    %1655 = arith.addf %1654, %1651 : vector<16x16xf32>
    %c0_518 = arith.constant 0 : index
    %1656 = memref.load %arg6[%c0_518] : memref<4xf32, #tpu.memory_space<smem>>
    %1657 = vector.broadcast %1656 : f32 to vector<16x16xf32>
    %1658 = arith.addf %1655, %1657 : vector<16x16xf32>
    %c0_519 = arith.constant 0 : index
    %c0_520 = arith.constant 0 : index
    %c0_521 = arith.constant 0 : index
    %c0_522 = arith.constant 0 : index
    %1659 = vector.load %arg8[%c0_519, %c0_520, %c0_521, %c0_522] : memref<1x4x16x16xf32, #tpu.memory_space<vmem>>, vector<1x1x16x16xf32>
    %1660 = vector.shape_cast %1659 : vector<1x1x16x16xf32> to vector<16x16xf32>
    %1661 = vector.shape_cast %1658 : vector<16x16xf32> to vector<1x1x16x16xf32>
    tpu.vector_store %arg8[%c0_519, %c0_520, %c0_521, %c0_522], %1661 {strides = array<i32>} : memref<1x4x16x16xf32, #tpu.memory_space<vmem>>, vector<1x1x16x16xf32>,
    %cst_523 = arith.constant 0.000000e+00 : f32
    %1662 = vector.broadcast %cst_523 : f32 to vector<16x16xf32>
    %c4_524 = arith.constant 4 : index
    %1663 = memref.load %arg5[%c4_524] : memref<16xf32, #tpu.memory_space<smem>>
    %c0_525 = arith.constant 0 : index
    %c0_526 = arith.constant 0 : index
    %c2_527 = arith.constant 2 : index
    %c2_528 = arith.constant 2 : index
    %1664 = vector.load %arg7[%c0_525, %c0_526, %c2_527, %c2_528] : memref<1x4x20x20xf32, #tpu.memory_space<vmem>>, vector<1x1x16x16xf32>
    %1665 = vector.shape_cast %1664 : vector<1x1x16x16xf32> to vector<16x16xf32>
    %1666 = vector.broadcast %1663 : f32 to vector<16x16xf32>
    %1667 = arith.mulf %1666, %1665 : vector<16x16xf32>
    %1668 = arith.addf %1662, %1667 : vector<16x16xf32>
    %c5_529 = arith.constant 5 : index
    %1669 = memref.load %arg5[%c5_529] : memref<16xf32, #tpu.memory_space<smem>>
    %c0_530 = arith.constant 0 : index
    %c1_531 = arith.constant 1 : index
    %c2_532 = arith.constant 2 : index
    %c2_533 = arith.constant 2 : index
    %1670 = vector.load %arg7[%c0_530, %c1_531, %c2_532, %c2_533] : memref<1x4x20x20xf32, #tpu.memory_space<vmem>>, vector<1x1x16x16xf32>
    %1671 = vector.shape_cast %1670 : vector<1x1x16x16xf32> to vector<16x16xf32>
    %1672 = vector.broadcast %1669 : f32 to vector<16x16xf32>
    %1673 = arith.mulf %1672, %1671 : vector<16x16xf32>
    %1674 = arith.addf %1668, %1673 : vector<16x16xf32>
    %c6_534 = arith.constant 6 : index
    %1675 = memref.load %arg5[%c6_534] : memref<16xf32, #tpu.memory_space<smem>>
    %c0_535 = arith.constant 0 : index
    %c2_536 = arith.constant 2 : index
    %c2_537 = arith.constant 2 : index
    %c2_538 = arith.constant 2 : index
    %1676 = vector.load %arg7[%c0_535, %c2_536, %c2_537, %c2_538] : memref<1x4x20x20xf32, #tpu.memory_space<vmem>>, vector<1x1x16x16xf32>
    %1677 = vector.shape_cast %1676 : vector<1x1x16x16xf32> to vector<16x16xf32>
    %1678 = vector.broadcast %1675 : f32 to vector<16x16xf32>
    %1679 = arith.mulf %1678, %1677 : vector<16x16xf32>
    %1680 = arith.addf %1674, %1679 : vector<16x16xf32>
    %c7_539 = arith.constant 7 : index
    %1681 = memref.load %arg5[%c7_539] : memref<16xf32, #tpu.memory_space<smem>>
    %c0_540 = arith.constant 0 : index
    %c3_541 = arith.constant 3 : index
    %c2_542 = arith.constant 2 : index
    %c2_543 = arith.constant 2 : index
    %1682 = vector.load %arg7[%c0_540, %c3_541, %c2_542, %c2_543] : memref<1x4x20x20xf32, #tpu.memory_space<vmem>>, vector<1x1x16x16xf32>
    %1683 = vector.shape_cast %1682 : vector<1x1x16x16xf32> to vector<16x16xf32>
    %1684 = vector.broadcast %1681 : f32 to vector<16x16xf32>
    %1685 = arith.mulf %1684, %1683 : vector<16x16xf32>
    %1686 = arith.addf %1680, %1685 : vector<16x16xf32>
    %c1_544 = arith.constant 1 : index
    %1687 = memref.load %arg4[%c1_544] : memref<4xf32, #tpu.memory_space<smem>>
    %1688 = vector.broadcast %1687 : f32 to vector<16x16xf32>
    %1689 = arith.addf %1618, %1688 : vector<16x16xf32>
    %1690 = arith.addf %1689, %1686 : vector<16x16xf32>
    %c1_545 = arith.constant 1 : index
    %1691 = memref.load %arg6[%c1_545] : memref<4xf32, #tpu.memory_space<smem>>
    %1692 = vector.broadcast %1691 : f32 to vector<16x16xf32>
    %1693 = arith.addf %1690, %1692 : vector<16x16xf32>
    %c0_546 = arith.constant 0 : index
    %c1_547 = arith.constant 1 : index
    %c0_548 = arith.constant 0 : index
    %c0_549 = arith.constant 0 : index
    %1694 = vector.load %arg8[%c0_546, %c1_547, %c0_548, %c0_549] : memref<1x4x16x16xf32, #tpu.memory_space<vmem>>, vector<1x1x16x16xf32>
    %1695 = vector.shape_cast %1694 : vector<1x1x16x16xf32> to vector<16x16xf32>
    %1696 = vector.shape_cast %1693 : vector<16x16xf32> to vector<1x1x16x16xf32>
    tpu.vector_store %arg8[%c0_546, %c1_547, %c0_548, %c0_549], %1696 {strides = array<i32>} : memref<1x4x16x16xf32, #tpu.memory_space<vmem>>, vector<1x1x16x16xf32>,
    %cst_550 = arith.constant 0.000000e+00 : f32
    %1697 = vector.broadcast %cst_550 : f32 to vector<16x16xf32>
    %c8_551 = arith.constant 8 : index
    %1698 = memref.load %arg5[%c8_551] : memref<16xf32, #tpu.memory_space<smem>>
    %c0_552 = arith.constant 0 : index
    %c0_553 = arith.constant 0 : index
    %c2_554 = arith.constant 2 : index
    %c2_555 = arith.constant 2 : index
    %1699 = vector.load %arg7[%c0_552, %c0_553, %c2_554, %c2_555] : memref<1x4x20x20xf32, #tpu.memory_space<vmem>>, vector<1x1x16x16xf32>
    %1700 = vector.shape_cast %1699 : vector<1x1x16x16xf32> to vector<16x16xf32>
    %1701 = vector.broadcast %1698 : f32 to vector<16x16xf32>
    %1702 = arith.mulf %1701, %1700 : vector<16x16xf32>
    %1703 = arith.addf %1697, %1702 : vector<16x16xf32>
    %c9_556 = arith.constant 9 : index
    %1704 = memref.load %arg5[%c9_556] : memref<16xf32, #tpu.memory_space<smem>>
    %c0_557 = arith.constant 0 : index
    %c1_558 = arith.constant 1 : index
    %c2_559 = arith.constant 2 : index
    %c2_560 = arith.constant 2 : index
    %1705 = vector.load %arg7[%c0_557, %c1_558, %c2_559, %c2_560] : memref<1x4x20x20xf32, #tpu.memory_space<vmem>>, vector<1x1x16x16xf32>
    %1706 = vector.shape_cast %1705 : vector<1x1x16x16xf32> to vector<16x16xf32>
    %1707 = vector.broadcast %1704 : f32 to vector<16x16xf32>
    %1708 = arith.mulf %1707, %1706 : vector<16x16xf32>
    %1709 = arith.addf %1703, %1708 : vector<16x16xf32>
    %c10_561 = arith.constant 10 : index
    %1710 = memref.load %arg5[%c10_561] : memref<16xf32, #tpu.memory_space<smem>>
    %c0_562 = arith.constant 0 : index
    %c2_563 = arith.constant 2 : index
    %c2_564 = arith.constant 2 : index
    %c2_565 = arith.constant 2 : index
    %1711 = vector.load %arg7[%c0_562, %c2_563, %c2_564, %c2_565] : memref<1x4x20x20xf32, #tpu.memory_space<vmem>>, vector<1x1x16x16xf32>
    %1712 = vector.shape_cast %1711 : vector<1x1x16x16xf32> to vector<16x16xf32>
    %1713 = vector.broadcast %1710 : f32 to vector<16x16xf32>
    %1714 = arith.mulf %1713, %1712 : vector<16x16xf32>
    %1715 = arith.addf %1709, %1714 : vector<16x16xf32>
    %c11_566 = arith.constant 11 : index
    %1716 = memref.load %arg5[%c11_566] : memref<16xf32, #tpu.memory_space<smem>>
    %c0_567 = arith.constant 0 : index
    %c3_568 = arith.constant 3 : index
    %c2_569 = arith.constant 2 : index
    %c2_570 = arith.constant 2 : index
    %1717 = vector.load %arg7[%c0_567, %c3_568, %c2_569, %c2_570] : memref<1x4x20x20xf32, #tpu.memory_space<vmem>>, vector<1x1x16x16xf32>
    %1718 = vector.shape_cast %1717 : vector<1x1x16x16xf32> to vector<16x16xf32>
    %1719 = vector.broadcast %1716 : f32 to vector<16x16xf32>
    %1720 = arith.mulf %1719, %1718 : vector<16x16xf32>
    %1721 = arith.addf %1715, %1720 : vector<16x16xf32>
    %c2_571 = arith.constant 2 : index
    %1722 = memref.load %arg4[%c2_571] : memref<4xf32, #tpu.memory_space<smem>>
    %1723 = vector.broadcast %1722 : f32 to vector<16x16xf32>
    %1724 = arith.addf %1622, %1723 : vector<16x16xf32>
    %1725 = arith.addf %1724, %1721 : vector<16x16xf32>
    %c2_572 = arith.constant 2 : index
    %1726 = memref.load %arg6[%c2_572] : memref<4xf32, #tpu.memory_space<smem>>
    %1727 = vector.broadcast %1726 : f32 to vector<16x16xf32>
    %1728 = arith.addf %1725, %1727 : vector<16x16xf32>
    %c0_573 = arith.constant 0 : index
    %c2_574 = arith.constant 2 : index
    %c0_575 = arith.constant 0 : index
    %c0_576 = arith.constant 0 : index
    %1729 = vector.load %arg8[%c0_573, %c2_574, %c0_575, %c0_576] : memref<1x4x16x16xf32, #tpu.memory_space<vmem>>, vector<1x1x16x16xf32>
    %1730 = vector.shape_cast %1729 : vector<1x1x16x16xf32> to vector<16x16xf32>
    %1731 = vector.shape_cast %1728 : vector<16x16xf32> to vector<1x1x16x16xf32>
    tpu.vector_store %arg8[%c0_573, %c2_574, %c0_575, %c0_576], %1731 {strides = array<i32>} : memref<1x4x16x16xf32, #tpu.memory_space<vmem>>, vector<1x1x16x16xf32>,
    %cst_577 = arith.constant 0.000000e+00 : f32
    %1732 = vector.broadcast %cst_577 : f32 to vector<16x16xf32>
    %c12_578 = arith.constant 12 : index
    %1733 = memref.load %arg5[%c12_578] : memref<16xf32, #tpu.memory_space<smem>>
    %c0_579 = arith.constant 0 : index
    %c0_580 = arith.constant 0 : index
    %c2_581 = arith.constant 2 : index
    %c2_582 = arith.constant 2 : index
    %1734 = vector.load %arg7[%c0_579, %c0_580, %c2_581, %c2_582] : memref<1x4x20x20xf32, #tpu.memory_space<vmem>>, vector<1x1x16x16xf32>
    %1735 = vector.shape_cast %1734 : vector<1x1x16x16xf32> to vector<16x16xf32>
    %1736 = vector.broadcast %1733 : f32 to vector<16x16xf32>
    %1737 = arith.mulf %1736, %1735 : vector<16x16xf32>
    %1738 = arith.addf %1732, %1737 : vector<16x16xf32>
    %c13_583 = arith.constant 13 : index
    %1739 = memref.load %arg5[%c13_583] : memref<16xf32, #tpu.memory_space<smem>>
    %c0_584 = arith.constant 0 : index
    %c1_585 = arith.constant 1 : index
    %c2_586 = arith.constant 2 : index
    %c2_587 = arith.constant 2 : index
    %1740 = vector.load %arg7[%c0_584, %c1_585, %c2_586, %c2_587] : memref<1x4x20x20xf32, #tpu.memory_space<vmem>>, vector<1x1x16x16xf32>
    %1741 = vector.shape_cast %1740 : vector<1x1x16x16xf32> to vector<16x16xf32>
    %1742 = vector.broadcast %1739 : f32 to vector<16x16xf32>
    %1743 = arith.mulf %1742, %1741 : vector<16x16xf32>
    %1744 = arith.addf %1738, %1743 : vector<16x16xf32>
    %c14_588 = arith.constant 14 : index
    %1745 = memref.load %arg5[%c14_588] : memref<16xf32, #tpu.memory_space<smem>>
    %c0_589 = arith.constant 0 : index
    %c2_590 = arith.constant 2 : index
    %c2_591 = arith.constant 2 : index
    %c2_592 = arith.constant 2 : index
    %1746 = vector.load %arg7[%c0_589, %c2_590, %c2_591, %c2_592] : memref<1x4x20x20xf32, #tpu.memory_space<vmem>>, vector<1x1x16x16xf32>
    %1747 = vector.shape_cast %1746 : vector<1x1x16x16xf32> to vector<16x16xf32>
    %1748 = vector.broadcast %1745 : f32 to vector<16x16xf32>
    %1749 = arith.mulf %1748, %1747 : vector<16x16xf32>
    %1750 = arith.addf %1744, %1749 : vector<16x16xf32>
    %c15_593 = arith.constant 15 : index
    %1751 = memref.load %arg5[%c15_593] : memref<16xf32, #tpu.memory_space<smem>>
    %c0_594 = arith.constant 0 : index
    %c3_595 = arith.constant 3 : index
    %c2_596 = arith.constant 2 : index
    %c2_597 = arith.constant 2 : index
    %1752 = vector.load %arg7[%c0_594, %c3_595, %c2_596, %c2_597] : memref<1x4x20x20xf32, #tpu.memory_space<vmem>>, vector<1x1x16x16xf32>
    %1753 = vector.shape_cast %1752 : vector<1x1x16x16xf32> to vector<16x16xf32>
    %1754 = vector.broadcast %1751 : f32 to vector<16x16xf32>
    %1755 = arith.mulf %1754, %1753 : vector<16x16xf32>
    %1756 = arith.addf %1750, %1755 : vector<16x16xf32>
    %c3_598 = arith.constant 3 : index
    %1757 = memref.load %arg4[%c3_598] : memref<4xf32, #tpu.memory_space<smem>>
    %1758 = vector.broadcast %1757 : f32 to vector<16x16xf32>
    %1759 = arith.addf %1626, %1758 : vector<16x16xf32>
    %1760 = arith.addf %1759, %1756 : vector<16x16xf32>
    %c3_599 = arith.constant 3 : index
    %1761 = memref.load %arg6[%c3_599] : memref<4xf32, #tpu.memory_space<smem>>
    %1762 = vector.broadcast %1761 : f32 to vector<16x16xf32>
    %1763 = arith.addf %1760, %1762 : vector<16x16xf32>
    %c0_600 = arith.constant 0 : index
    %c3_601 = arith.constant 3 : index
    %c0_602 = arith.constant 0 : index
    %c0_603 = arith.constant 0 : index
    %1764 = vector.load %arg8[%c0_600, %c3_601, %c0_602, %c0_603] : memref<1x4x16x16xf32, #tpu.memory_space<vmem>>, vector<1x1x16x16xf32>
    %1765 = vector.shape_cast %1764 : vector<1x1x16x16xf32> to vector<16x16xf32>
    %1766 = vector.shape_cast %1763 : vector<16x16xf32> to vector<1x1x16x16xf32>
    tpu.vector_store %arg8[%c0_600, %c3_601, %c0_602, %c0_603], %1766 {strides = array<i32>} : memref<1x4x16x16xf32, #tpu.memory_space<vmem>>, vector<1x1x16x16xf32>,
    return
  }
  func.func @transform_0(%arg0: i32, %arg1: memref<144xf32, #tpu.memory_space<smem>>, %arg2: memref<4xf32, #tpu.memory_space<smem>>, %arg3: memref<144xf32, #tpu.memory_space<smem>>, %arg4: memref<4xf32, #tpu.memory_space<smem>>, %arg5: memref<16xf32, #tpu.memory_space<smem>>, %arg6: memref<4xf32, #tpu.memory_space<smem>>) -> (i32, i32, i32, i32) {
    %c0_i32 = arith.constant 0 : i32
    %c0_i32_0 = arith.constant 0 : i32
    %c0_i32_1 = arith.constant 0 : i32
    %c0_i32_2 = arith.constant 0 : i32
    return %arg0, %c0_i32, %c0_i32_0, %c0_i32_1 : i32, i32, i32, i32
  }
  func.func @transform_1(%arg0: i32, %arg1: memref<144xf32, #tpu.memory_space<smem>>, %arg2: memref<4xf32, #tpu.memory_space<smem>>, %arg3: memref<144xf32, #tpu.memory_space<smem>>, %arg4: memref<4xf32, #tpu.memory_space<smem>>, %arg5: memref<16xf32, #tpu.memory_space<smem>>, %arg6: memref<4xf32, #tpu.memory_space<smem>>) -> (i32, i32, i32, i32) {
    %c0_i32 = arith.constant 0 : i32
    %c0_i32_0 = arith.constant 0 : i32
    %c0_i32_1 = arith.constant 0 : i32
    %c0_i32_2 = arith.constant 0 : i32
    return %arg0, %c0_i32, %c0_i32_0, %c0_i32_1 : i32, i32, i32, i32
  }
}

</mosaic_0001>

<bundles_post_ra>
// kernel: _residual_block_pallas.1
= control target key start
LH: loop header
LB: loop body
LE: loop exit
PB: predicated region body
PF: predicated region fallthrough
CT: control target
= control target key end

     0   :  { %s10409_s0 = inlined_call_operand.vmem [shape: f32[144], index: 0, kind: input, shape index: {}]   ;;  %s10410_s6 = inlined_call_operand.vmem [shape: f32[2,4,20,20], index: 6, kind: input, shape index: {}]   ;;  %s10411_s7 = inlined_call_operand.hbm [shape: f32[2,4,16,16], index: 7, kind: output, shape index: {}]   ;;  %s10412_s1 = inlined_call_operand.vmem [shape: f32[4], index: 1, kind: input, shape index: {}]   ;;  %s10413_s2 = inlined_call_operand.vmem [shape: f32[144], index: 2, kind: input, shape index: {}]   ;;  %s10414_s3 = inlined_call_operand.vmem [shape: f32[4], index: 3, kind: input, shape index: {}]   ;;  %s10415_s4 = inlined_call_operand.vmem [shape: f32[16], index: 4, kind: input, shape index: {}]   ;;  %s10416_s5 = inlined_call_operand.vmem [shape: f32[4], index: 5, kind: input, shape index: {}]  }
   0x1   :  { %s12_s26 = sshll.u32 %s10409_s0, 4  ;;  %s16_s29 = sshll.u32 %s10412_s1, 4  ;;  %s13_s26 = int_to_ptr.vmem [resolvable:$true] %s12_s26  ;;  %s17_s29 = int_to_ptr.vmem [resolvable:$true] %s16_s29 }
   0x2   :  { %s5975_s30 = scalar_lea.vmem %s13_s26, 32  ;;  %p5980_p1 = scmp.lt.s32.totalorder %s13_s26, %s13_s26 }
   0x3   :  { %p5976_p0 = scmp.ne.s32.totalorder %s13_s26, %s5975_s30  ;;  %p5981_p2 = scmp.lt.s32.totalorder %s5975_s30, %s5975_s30 }
   0x5   :  { %p5982_p3 = por %p5981_p2, %p5980_p1 }
   0x7   :  { %p5983_p4 = pnand %p5982_p3, %p5976_p0 }
   0x9   :  { %5986 = shalt.err (!%p5983_p4)  }
   0xa   :  { %s6113_s8 = smov [#allocation5]   ;;  %s5987_s9 = scalar_lea.vmem %s17_s29, 16 }
   0xb   :  { %15 = dma.vmem_to_smem %s13_s26, 32, %s6113_s8, [#allocation4] }
   0xc   :  { %p5988_p5 = scmp.ne.s32.totalorder %s17_s29, %s5987_s9  ;;  %p5992_p6 = scmp.lt.s32.totalorder %s17_s29, %s17_s29 }
   0xd   :  { %p5993_p7 = scmp.lt.s32.totalorder %s5987_s9, %s5987_s9 }
   0xf   :  { %p5994_p8 = por %p5993_p7, %p5992_p6 }
  0x11   :  { %p5995_p9 = pnand %p5994_p8, %p5988_p5 }
  0x13   :  { %5998 = shalt.err (!%p5995_p9)  }
  0x14   :  { %s6114_s0 = smov [#allocation6]   ;;  %s20_s11 = sshll.u32 %s10413_s2, 4  ;;  %s21_s11 = int_to_ptr.vmem [resolvable:$true] %s20_s11 }
  0x15   :  { %19 = dma.vmem_to_smem %s17_s29, 16, %s6114_s0, [#allocation4] }
  0x16   :  { %s24_s14 = sshll.u32 %s10414_s3, 4  ;;  %s5999_s15 = scalar_lea.vmem %s21_s11, 32  ;;  %s25_s14 = int_to_ptr.vmem [resolvable:$true] %s24_s14 }
  0x17   :  { %p6000_p10 = scmp.ne.s32.totalorder %s21_s11, %s5999_s15  ;;  %p6004_p11 = scmp.lt.s32.totalorder %s21_s11, %s21_s11 }
  0x18   :  { %p6005_p12 = scmp.lt.s32.totalorder %s5999_s15, %s5999_s15 }
  0x1a   :  { %p6006_p13 = por %p6005_p12, %p6004_p11 }
  0x1c   :  { %p6007_p0 = pnand %p6006_p13, %p6000_p10 }
  0x1e   :  { %6010 = shalt.err (!%p6007_p0)  }
  0x1f   :  { %s6115_s16 = smov [#allocation7]   ;;  %s6011_s17 = scalar_lea.vmem %s25_s14, 16 }
  0x20   :  { %23 = dma.vmem_to_smem %s21_s11, 32, %s6115_s16, [#allocation4] }
  0x21   :  { %p6012_p1 = scmp.ne.s32.totalorder %s25_s14, %s6011_s17  ;;  %p6016_p2 = scmp.lt.s32.totalorder %s25_s14, %s25_s14 }
  0x22   :  { %p6017_p3 = scmp.lt.s32.totalorder %s6011_s17, %s6011_s17 }
  0x24   :  { %p6018_p4 = por %p6017_p3, %p6016_p2 }
  0x26   :  { %p6019_p5 = pnand %p6018_p4, %p6012_p1 }
  0x28   :  { %6022 = shalt.err (!%p6019_p5)  }
  0x29   :  { %s6116_s2 = smov [#allocation8]   ;;  %s28_s19 = sshll.u32 %s10415_s4, 4  ;;  %s29_s19 = int_to_ptr.vmem [resolvable:$true] %s28_s19 }
  0x2a   :  { %27 = dma.vmem_to_smem %s25_s14, 16, %s6116_s2, [#allocation4] }
  0x2b   :  { %s32_s22 = sshll.u32 %s10416_s5, 4  ;;  %s6023_s23 = scalar_lea.vmem %s29_s19, 16  ;;  %s33_s22 = int_to_ptr.vmem [resolvable:$true] %s32_s22 }
  0x2c   :  { %p6024_p6 = scmp.ne.s32.totalorder %s29_s19, %s6023_s23  ;;  %p6028_p7 = scmp.lt.s32.totalorder %s29_s19, %s29_s19 }
  0x2d   :  { %p6029_p8 = scmp.lt.s32.totalorder %s6023_s23, %s6023_s23 }
  0x2f   :  { %p6030_p9 = por %p6029_p8, %p6028_p7 }
  0x31   :  { %p6031_p10 = pnand %p6030_p9, %p6024_p6 }
  0x33   :  { %6034 = shalt.err (!%p6031_p10)  }
  0x34   :  { %s6117_s24 = smov [#allocation9]   ;;  %s6035_s25 = scalar_lea.vmem %s33_s22, 16 }
  0x35   :  { %31 = dma.vmem_to_smem %s29_s19, 16, %s6117_s24, [#allocation4] }
  0x36   :  { %p6036_p11 = scmp.ne.s32.totalorder %s33_s22, %s6035_s25  ;;  %p6040_p12 = scmp.lt.s32.totalorder %s33_s22, %s33_s22 }
  0x37   :  { %p6041_p13 = scmp.lt.s32.totalorder %s6035_s25, %s6035_s25 }
  0x39   :  { %p6042_p0 = por %p6041_p13, %p6040_p12 }
  0x3b   :  { %p6043_p1 = pnand %p6042_p0, %p6036_p11 }
  0x3d   :  { %6046 = shalt.err (!%p6043_p1)  }
  0x3e   :  { %s6118_s4 = smov [#allocation10]  }
  0x3f   :  { %35 = dma.vmem_to_smem %s33_s22, 16, %s6118_s4, [#allocation4] }
  0x40   :  { %6091 = dma.done.wait [#allocation4], 128 }
  0x41   :  { %6092 = vsyncadd [#allocation4], 4294967168 }
  0x42   :  { %37 = sfence }
  0x43   :  { %38 = vsyncpa [#allocation12], 0 }
  0x44   :  { %40 = vsyncpa [#allocation12 + $0x1], 0  ;;  %s6182_s5 = smov 0   ;;  %s6184_s26 = smov 0  }
  0x45   :  { %s6186_s27 = smov 0   ;;  %s6188_s28 = smov 0  }
  0x46 LB: > { %s6203_s29 = sadd.s32 4294967295, %s6111_s28   ;;  %s5423_s30 = sadd.s32 4294967294, %s6111_s28   ;;  %s6111_s28 = sphi %s6188_s28, %s10932_s28   ;;  %s6107_s27 = sphi %s6186_s27, %s10931_s27   ;;  %s6103_s26 = sphi %s6184_s26, %s10930_s26   ;;  %s6099_s5 = sphi %s6182_s5, %s10929_s5  }
  0x47   : > { %s6207_s8 = sadd.s32 1, %s6111_s28   ;;  %s79_s9 = sadd.s32 1, %s6107_s27 }
  0x48   : > { %s76_s0 = ssub.s32 %s6111_s28, %s6207_s8  ;;  %p89_p2 = scmp.ne.s32.totalorder %s6107_s27, %s6103_s26 }
  0x49   : > { %p77_p3 = scmp.eq.s32.totalorder %s76_s0, 0  ;;  %p90_p4 = scmp.eq.s32.totalorder %s6203_s29, 1 }
  0x4a   : > { %p95_p5 = scmp.ne.s32.totalorder %s6103_s26, %s6099_s5  ;;  %p96_p6 = scmp.eq.s32.totalorder %s5423_s30, 1 }
  0x4b   : > { %s6218_s1 = scalar_select %p77_p3, %s6107_s27, %s79_s9  }
  0x4c   : > { %p6220_p7 = por %p90_p4, %p89_p2  ;;  %p6224_p8 = por %p96_p6, %p95_p5 }
  0x4d   : > { %p5426_p9 = scmp.ge.s32.totalorder %s6111_s28, 1  ;;  %p122_p10 = scmp.lt.s32.totalorder %s6111_s28, 3 }
  0x4f   : > { %p123_p11 = pnand %p5426_p9, %p122_p10 }
  0x51   : > { %126 = sbr.rel (%p123_p11) target bundleno = 1481 (0x5c9), region = 24 }
  0x58   : > { %p142_p12 = scmp.lt.s32.totalorder %s6203_s29, 1  ;;  %vm606_vm3 = vcmask 158720   ;;  %s5444_s17 = sld [smem:[#allocation5 + $0x1]]  ;;  %vm603_vm4 = vcmask 162816  }
  0x59   : > { %s5445_s2 = sld [smem:[#allocation5 + $0x25]]  ;;  %s5446_s3 = sld [smem:[#allocation5 + $0x49]] }
  0x5a   : > { %s143_s12 = scalar_select %p142_p12, %s6203_s29, 1 }
  0x5b   : > { %s6119_s18 = smov 127   ;;  %s5447_s19 = sld [smem:[#allocation5 + $0x6d]] }
  0x5c   : > { %s5799_s13 = smul.u32 96, %s143_s12  ;;  %s5448_s20 = sld [smem:[#allocation5 + $0x2]] }
  0x5d   : > { %s5449_s21 = sld [smem:[#allocation5 + $0x26]]  ;;  %s6421_s22 = sld [smem:[#allocation5 + $0x4a]] }
  0x5e   : > { %s6235_s16 = scalar_lea.vmem %s10410_s6, %s5799_s13  ;;  %s6120_s23 = smov 126  }
  0x5f   : > { %v6238_v0 = vld [vmem:[%s6235_s16 + $0x10] sm:$0xf]  ;;  %v6241_v1 = vld [vmem:[%s6235_s16] sm:$0xff]  ;;  %v6244_v2 = vld [vmem:[%s6235_s16 + $0x8] sm:$0xff]  ;;  %s5451_s24 = sld [smem:[#allocation5 + $0x6e]]  ;;  %s5456_s25 = sld [smem:[#allocation5 + $0x4]] }
  0x60   : > { %v6247_v3 = vmul.f32 0.70710677, %v6238_v0  ;;  %v6250_v4 = vmul.f32 0.70710677, %v6241_v1  ;;  %v6253_v5 = vmul.f32 0.70710677, %v6244_v2 }
  0x61   : > { %v6268_v15 = vld [vmem:[%s6235_s16 + $0x20] sm:$0xff]  ;;  %v6271_v16 = vld [vmem:[%s6235_s16 + $0x18] sm:$0xff]  ;;  %v6294_v26 = vld [vmem:[%s6235_s16 + $0x28] sm:$0xf]  ;;  %s5457_s4 = sld [smem:[#allocation5 + $0x28]]  ;;  %s5458_s30 = sld [smem:[#allocation5 + $0x4c]] }
  0x62   : > { %v6256_v6 = vand.u32 2147483647, %v6247_v3  ;;  %v6259_v7 = vand.u32 2147483647, %v6250_v4  ;;  %v6262_v8 = vand.u32 2147483647, %v6253_v5 }
  0x63   : > { %v6274_v17 = vmul.f32 0.70710677, %v6268_v15  ;;  %v6277_v18 = vmul.f32 0.70710677, %v6271_v16  ;;  %v6300_v32 = vmul.f32 0.70710677, %v6294_v26 }
  0x64   : > { %v197_v9 = vmul.f32 0.5, %v6256_v6  ;;  %v195_v10 = vmul.f32 0.5, %v6259_v7  ;;  %v196_v11 = vmul.f32 0.5, %v6262_v8  ;;  %vm533_vm0 = vcmp.ge.f32.partialorder %v6247_v3, 0.0  ;;  %s5459_s9 = sld [smem:[#allocation5 + $0x70]]  ;;  %s5460_s0 = sld [smem:[#allocation5 + $0x5]] }
  0x65   : > { %v6285_v22 = vand.u32 2147483647, %v6274_v17  ;;  %v6288_v23 = vand.u32 2147483647, %v6277_v18  ;;  %v6305_v38 = vand.u32 2147483647, %v6300_v32 }
  0x66   : > { %v209_v12 = vadd.f32 1.0, %v197_v9  ;;  %v207_v13 = vadd.f32 1.0, %v195_v10  ;;  %v208_v14 = vadd.f32 1.0, %v196_v11  ;;  %vm531_vm1 = vcmp.ge.f32.partialorder %v6250_v4, 0.0  ;;  %s5461_s12 = sld [smem:[#allocation5 + $0x29]]  ;;  %s5462_s13 = sld [smem:[#allocation5 + $0x4d]] }
  0x67   : > { %v199_v29 = vmul.f32 0.5, %v6285_v22  ;;  %v198_v30 = vmul.f32 0.5, %v6288_v23  ;;  %v200_v42 = vmul.f32 0.5, %v6305_v38  ;;  %vm532_vm2 = vcmp.ge.f32.partialorder %v6253_v5, 0.0  ;;  %s5463_s14 = sld [smem:[#allocation5 + $0x71]]  ;;  %s5468_s15 = sld [smem:[#allocation5 + $0x7]] }
  0x68   : > { %5849 = vrcp.f32 %v209_v12  ;;  %v160_v4 = vmul.f32 0.5, %v6244_v2  ;;  %v463_v2 = vsub.f32 0.0, %v6285_v22  ;;  %vm535_vm5 = vcmp.ge.f32.partialorder %v6274_v17, 0.0 }
  0x69   : > { %5851 = vrcp.f32 %v207_v13  ;;  %v211_v35 = vadd.f32 1.0, %v199_v29  ;;  %v210_v37 = vadd.f32 1.0, %v198_v30  ;;  %v212_v46 = vadd.f32 1.0, %v200_v42 }
  0x6a   : > { %5853 = vrcp.f32 %v208_v14  ;;  %vm534_vm6 = vcmp.ge.f32.partialorder %v6277_v18, 0.0  ;;  %vm536_vm7 = vcmp.ge.f32.partialorder %v6300_v32, 0.0  ;;  %v162_v17 = vmul.f32 0.5, %v6271_v16 }
  0x6b   : > { %5855 = vrcp.f32 %v211_v35  ;;  %v164_v32 = vmul.f32 0.5, %v6294_v26 }
  0x6c   : > { %5857 = vrcp.f32 %v210_v37 }
  0x6d   : > { %5859 = vrcp.f32 %v212_v46 }
  0x72   : > { %v6279_v19 = vpop.eup %5849 }
  0x73   : > { %v6281_v20 = vpop.eup %5851  ;;  %v245_v21 = vmul.f32 0.17087276, %v6279_v19 }
  0x74   : > { %v6290_v24 = vpop.eup %5853  ;;  %v243_v25 = vmul.f32 0.17087276, %v6281_v20 }
  0x75   : > { %v257_v27 = vadd.f32 -0.82215226, %v245_v21  ;;  %v244_v28 = vmul.f32 0.17087276, %v6290_v24  ;;  %v6315_v56 = vpop.eup %5855 }
  0x76   : > { %v255_v31 = vadd.f32 -0.82215226, %v243_v25  ;;  %v6318_v59 = vpop.eup %5857  ;;  %v247_v61 = vmul.f32 0.17087276, %v6315_v56 }
  0x77   : > { %v269_v33 = vmul.f32 %v6279_v19, %v257_v27  ;;  %v256_v34 = vadd.f32 -0.82215226, %v244_v28  ;;  %v246_v9 = vmul.f32 0.17087276, %v6318_v59  ;;  %v6325_v21 = vpop.eup %5859 }
  0x78   : > { %v267_v36 = vmul.f32 %v6281_v20, %v255_v31  ;;  %v259_v11 = vadd.f32 -0.82215226, %v247_v61  ;;  %v248_v31 = vmul.f32 0.17087276, %v6325_v21 }
  0x79   : > { %v281_v39 = vadd.f32 1.4885159, %v269_v33  ;;  %v268_v40 = vmul.f32 %v6290_v24, %v256_v34  ;;  %v258_v14 = vadd.f32 -0.82215226, %v246_v9 }
  0x7a   : > { %v279_v41 = vadd.f32 1.4885159, %v267_v36  ;;  %v271_v27 = vmul.f32 %v6315_v56, %v259_v11 }
  0x7b   : > { %v293_v43 = vmul.f32 %v6279_v19, %v281_v39  ;;  %v280_v44 = vadd.f32 1.4885159, %v268_v40  ;;  %v270_v30 = vmul.f32 %v6318_v59, %v258_v14 }
  0x7c   : > { %v291_v45 = vmul.f32 %v6281_v20, %v279_v41  ;;  %v283_v34 = vadd.f32 1.4885159, %v271_v27  ;;  %v260_v41 = vadd.f32 -0.82215226, %v248_v31 }
  0x7d   : > { %v305_v47 = vadd.f32 -1.135204, %v293_v43  ;;  %v292_v48 = vmul.f32 %v6290_v24, %v280_v44  ;;  %v282_v37 = vadd.f32 1.4885159, %v270_v30 }
  0x7e   : > { %v303_v49 = vadd.f32 -1.135204, %v291_v45  ;;  %v295_v40 = vmul.f32 %v6315_v56, %v283_v34 }
  0x7f   : > { %v317_v50 = vmul.f32 %v6279_v19, %v305_v47  ;;  %v304_v51 = vadd.f32 -1.135204, %v292_v48  ;;  %v294_v44 = vmul.f32 %v6318_v59, %v282_v37  ;;  %v272_v47 = vmul.f32 %v6325_v21, %v260_v41 }
  0x80   : > { %v315_v52 = vmul.f32 %v6281_v20, %v303_v49  ;;  %v307_v46 = vadd.f32 -1.135204, %v295_v40  ;;  %v461_v49 = vsub.f32 0.0, %v6256_v6 }
  0x81   : > { %v329_v53 = vadd.f32 0.27886808, %v317_v50  ;;  %v316_v54 = vmul.f32 %v6290_v24, %v304_v51  ;;  %v306_v51 = vadd.f32 -1.135204, %v294_v44 }
  0x82   : > { %v327_v55 = vadd.f32 0.27886808, %v315_v52  ;;  %v473_v11 = vmul.f32 %v461_v49, %v6256_v6 }
  0x83   : > { %v341_v57 = vmul.f32 %v6279_v19, %v329_v53  ;;  %v328_v58 = vadd.f32 0.27886808, %v316_v54  ;;  %v459_v53 = vsub.f32 0.0, %v6259_v7  ;;  %v319_v54 = vmul.f32 %v6315_v56, %v307_v46 }
  0x84   : > { %v339_v60 = vmul.f32 %v6281_v20, %v327_v55  ;;  %v284_v55 = vadd.f32 1.4885159, %v272_v47  ;;  %v318_v61 = vmul.f32 %v6318_v59, %v306_v51 }
  0x85   : > { %v353_v62 = vadd.f32 -0.18628806, %v341_v57  ;;  %v340_v63 = vmul.f32 %v6290_v24, %v328_v58 }
  0x86   : > { %v351_v10 = vadd.f32 -0.18628806, %v339_v60  ;;  %v460_v60 = vsub.f32 0.0, %v6262_v8  ;;  %v296_v9 = vmul.f32 %v6325_v21, %v284_v55 }
  0x87   : > { %v365_v12 = vmul.f32 %v6279_v19, %v353_v62  ;;  %v352_v13 = vadd.f32 -0.18628806, %v340_v63  ;;  %v331_v63 = vadd.f32 0.27886808, %v319_v54 }
  0x88   : > { %v363_v25 = vmul.f32 %v6281_v20, %v351_v10  ;;  %v472_v31 = vmul.f32 %v460_v60, %v6262_v8 }
  0x89   : > { %v377_v28 = vadd.f32 0.09678418, %v365_v12  ;;  %v364_v29 = vmul.f32 %v6290_v24, %v352_v13  ;;  %v330_v13 = vadd.f32 0.27886808, %v318_v61  ;;  %v343_v27 = vmul.f32 %v6315_v56, %v331_v63 }
  0x8a   : > { %v375_v33 = vadd.f32 0.09678418, %v363_v25  ;;  %v471_v25 = vmul.f32 %v459_v53, %v6259_v7  ;;  %v161_v61 = vmul.f32 0.5, %v6238_v0 }
  0x8b   : > { %v389_v35 = vmul.f32 %v6279_v19, %v377_v28  ;;  %v376_v36 = vadd.f32 0.09678418, %v364_v29  ;;  %v308_v28 = vadd.f32 -1.135204, %v296_v9 }
  0x8c   : > { %v387_v39 = vmul.f32 %v6281_v20, %v375_v33  ;;  %v342_v33 = vmul.f32 %v6318_v59, %v330_v13 }
  0x8d   : > { %v401_v42 = vadd.f32 0.37409195, %v389_v35  ;;  %v388_v43 = vmul.f32 %v6290_v24, %v376_v36  ;;  %v355_v35 = vadd.f32 -0.18628806, %v343_v27  ;;  %v320_v6 = vmul.f32 %v6325_v21, %v308_v28 }
  0x8e   : > { %v399_v45 = vadd.f32 0.37409195, %v387_v39  ;;  %v354_v39 = vadd.f32 -0.18628806, %v342_v33 }
  0x8f   : > { %v413_v48 = vmul.f32 %v6279_v19, %v401_v42  ;;  %v400_v50 = vadd.f32 0.37409195, %v388_v43  ;;  %v367_v7 = vmul.f32 %v6315_v56, %v355_v35  ;;  %v332_v41 = vadd.f32 0.27886808, %v320_v6 }
  0x90   : > { %v411_v52 = vmul.f32 %v6281_v20, %v399_v45  ;;  %v366_v44 = vmul.f32 %v6318_v59, %v354_v39 }
  0x91   : > { %v425_v57 = vadd.f32 1.0000237, %v413_v48  ;;  %v412_v58 = vmul.f32 %v6290_v24, %v400_v50  ;;  %v344_v8 = vmul.f32 %v6325_v21, %v332_v41  ;;  %v379_v47 = vadd.f32 0.09678418, %v367_v7 }
  0x92   : > { %v423_v62 = vadd.f32 1.0000237, %v411_v52  ;;  %v378_v49 = vadd.f32 0.09678418, %v366_v44  ;;  %v462_v7 = vsub.f32 0.0, %v6288_v23 }
  0x93   : > { %v437_v10 = vmul.f32 %v6279_v19, %v425_v57  ;;  %v424_v12 = vadd.f32 1.0000237, %v412_v58  ;;  %v356_v48 = vadd.f32 -0.18628806, %v344_v8  ;;  %v391_v51 = vmul.f32 %v6315_v56, %v379_v47 }
  0x94   : > { %v435_v14 = vmul.f32 %v6281_v20, %v423_v62  ;;  %v390_v53 = vmul.f32 %v6318_v59, %v378_v49 }
  0x95   : > { %v449_v29 = vadd.f32 -1.2655122, %v437_v10  ;;  %v436_v30 = vmul.f32 %v6290_v24, %v424_v12  ;;  %v368_v50 = vmul.f32 %v6325_v21, %v356_v48  ;;  %v403_v55 = vadd.f32 0.37409195, %v391_v51 }
  0x96   : > { %v447_v34 = vadd.f32 -1.2655122, %v435_v14  ;;  %v402_v58 = vadd.f32 0.37409195, %v390_v53  ;;  %v159_v10 = vmul.f32 0.5, %v6241_v1  ;;  %v673_v48 = vstv %s5445_s2  ;;  %s5470_s2 = sld [smem:[#allocation5 + $0x4f]] }
  0x97   : > { %v485_v36 = vadd.f32 %v473_v11, %v449_v29  ;;  %v448_v37 = vadd.f32 -1.2655122, %v436_v30  ;;  %v380_v52 = vadd.f32 0.09678418, %v368_v50 }
  0x98   : > { %v483_v40 = vadd.f32 %v471_v25, %v447_v34  ;;  %v415_v25 = vmul.f32 %v6315_v56, %v403_v55 }
  0x99   : > { %v499_v42 = vmul.f32 1.442695, %v485_v36  ;;  %v484_v43 = vadd.f32 %v472_v31, %v448_v37  ;;  %v392_v54 = vmul.f32 %v6325_v21, %v380_v52 }
  0x9a   : > { %v495_v45 = vmul.f32 1.442695, %v483_v40  ;;  %v427_v33 = vadd.f32 1.0000237, %v415_v25 }
  0x9b   : > { %5861 = vpow2.f32 %v499_v42  ;;  %v497_v46 = vmul.f32 1.442695, %v484_v43  ;;  %v404_v63 = vadd.f32 0.37409195, %v392_v54  ;;  %v464_v42 = vsub.f32 0.0, %v6305_v38 }
  0x9c   : > { %5863 = vpow2.f32 %v495_v45  ;;  %v439_v39 = vmul.f32 %v6315_v56, %v427_v33  ;;  %v653_v43 = vstv %s5444_s17  ;;  %v475_v45 = vmul.f32 %v463_v2, %v6285_v22  ;;  %s5469_s17 = sld [smem:[#allocation5 + $0x2b]] }
  0x9d   : > { %5865 = vpow2.f32 %v497_v46  ;;  %v416_v1 = vmul.f32 %v6325_v21, %v404_v63  ;;  %v474_v46 = vmul.f32 %v462_v7, %v6288_v23  ;;  %v476_v50 = vmul.f32 %v464_v42, %v6305_v38 }
  0x9e   : > { %v451_v44 = vadd.f32 -1.2655122, %v439_v39  ;;  %v693_v63 = vstv %s5446_s3  ;;  %s5471_s3 = sld [smem:[#allocation5 + $0x73]] }
  0x9f   : > { %v428_v36 = vadd.f32 1.0000237, %v416_v1 }
  0xa0   : > { %v487_v55 = vadd.f32 %v475_v45, %v451_v44  ;;  %v793_v45 = vstv %s5451_s24  ;;  %s5441_s24 = sld [smem:[#allocation5 + $0x24]] }
  0xa1   : > { %v440_v41 = vmul.f32 %v6325_v21, %v428_v36 }
  0xa3   : > { %v452_v49 = vadd.f32 -1.2655122, %v440_v41 }
  0xa5   : > { %v5862_v57 = vpop.eup %5861  ;;  %v488_v38 = vadd.f32 %v476_v50, %v452_v49 }
  0xa6   : > { %v5864_v60 = vpop.eup %5863  ;;  %v521_v62 = vmul.f32 %v5862_v57, %v6279_v19  ;;  %v414_v19 = vmul.f32 %v6318_v59, %v402_v58  ;;  %v503_v58 = vmul.f32 1.442695, %v487_v55 }
  0xa7   : > { %v5866_v9 = vpop.eup %5865  ;;  %v519_v11 = vmul.f32 %v5864_v60, %v6281_v20 }
  0xa8   : > { %v545_v12 = vsub.f32 1.0, %v521_v62  ;;  %v5431_v13 = vadd.f32 -1.0, %v521_v62  ;;  %v520_v14 = vmul.f32 %v5866_v9, %v6290_v24  ;;  %v426_v5 = vadd.f32 1.0000237, %v414_v19 }
  0xa9   : > { %v543_v27 = vsub.f32 1.0, %v519_v11  ;;  %v5429_v0 = vadd.f32 -1.0, %v519_v11  ;;  %v505_v9 = vmul.f32 1.442695, %v488_v38  ;;  %5867 = vpow2.f32 %v503_v58 }
  0xaa   : > { %v569_v28 = vsel %vm533_vm0, %v545_v12, %v5431_v13  ;;  %v544_v3 = vsub.f32 1.0, %v520_v14  ;;  %v5430_v29 = vadd.f32 -1.0, %v520_v14  ;;  %v438_v40 = vmul.f32 %v6318_v59, %v426_v5 }
  0xab   : > { %v581_v20 = vadd.f32 1.0, %v569_v28  ;;  %v567_v30 = vsel %vm531_vm1, %v543_v27, %v5429_v0  ;;  %v713_v12 = vstv %s5447_s19  ;;  %v733_v19 = vstv %s5448_s20  ;;  %s5472_s19 = sld [smem:[#allocation5 + $0x8]]  ;;  %s5473_s20 = sld [smem:[#allocation5 + $0x2c]] }
  0xac   : > { %v579_v24 = vadd.f32 1.0, %v567_v30  ;;  %v568_v31 = vsel %vm532_vm2, %v544_v3, %v5430_v29  ;;  %v450_v8 = vadd.f32 -1.2655122, %v438_v40  ;;  %v753_v3 = vstv %s5449_s21  ;;  %s5474_s21 = sld [smem:[#allocation5 + $0x50]] }
  0xad   : > { %v593_v34 = vmul.f32 %v581_v20, %v161_v61  ;;  %v580_v35 = vadd.f32 1.0, %v568_v31 }
  0xae   : > { %v591_v6 = vmul.f32 %v579_v24, %v159_v10  ;;  %v486_v23 = vadd.f32 %v474_v46, %v450_v8 }
  0xaf   : > { %607 = vst.msk [vmem:[#allocation2 + $0x10] sm:$0xf] %vm606_vm3, %v593_v34  ;;  %v592_v37 = vmul.f32 %v580_v35, %v160_v4 }
  0xb0   : > { %604 = vst.msk [vmem:[#allocation2] sm:$0xff] %vm603_vm4, %v591_v6  ;;  %v501_v61 = vmul.f32 1.442695, %v486_v23  ;;  %v868_v23 = vstv %s5457_s4  ;;  %s6618_s4 = sld [smem:[#allocation5 + $0x48]] }
  0xb1   : > { %605 = vst.msk [vmem:[#allocation2 + $0x8] sm:$0xff] %vm603_vm4, %v592_v37 }
  0xb2   : > { %5869 = vpow2.f32 %v501_v61 }
  0xb3   : > { %5871 = vpow2.f32 %v505_v9  ;;  %v5868_v27 = vpop.eup %5867 }
  0xb4   : > { %v523_v20 = vmul.f32 %v5868_v27, %v6315_v56  ;;  %v163_v56 = vmul.f32 0.5, %v6268_v15 }
  0xb6   : > { %v6386_v47 = vld [vmem:[#allocation2 + $0x10] sm:$0x3]  ;;  %v547_v31 = vsub.f32 1.0, %v523_v20  ;;  %v5433_v33 = vadd.f32 -1.0, %v523_v20 }
  0xb7   : > { %v656_v51 = vmul.f32 %v653_v43, %v6386_v47  ;;  %v6390_v52 = vld [vmem:[#allocation2] sm:$0xff]  ;;  %v676_v60 = vmul.f32 %v673_v48, %v6386_v47  ;;  %v696_v14 = vmul.f32 %v693_v63, %v6386_v47  ;;  %v716_v25 = vmul.f32 %v713_v12, %v6386_v47 }
  0xb8   : > { %v654_v53 = vmul.f32 %v653_v43, %v6390_v52  ;;  %v6393_v54 = vld [vmem:[#allocation2 + $0x8] sm:$0xff]  ;;  %v674_v22 = vmul.f32 %v673_v48, %v6390_v52  ;;  %v694_v11 = vmul.f32 %v693_v63, %v6390_v52  ;;  %v714_v13 = vmul.f32 %v713_v12, %v6390_v52 }
  0xb9   : > { %664 = vrot.lane.b32.xlu1 %v656_v51, %s6119_s18  ;;  %v655_v57 = vmul.f32 %v653_v43, %v6393_v54  ;;  %v675_v62 = vmul.f32 %v673_v48, %v6393_v54  ;;  %v695_v10 = vmul.f32 %v693_v63, %v6393_v54  ;;  %v715_v0 = vmul.f32 %v713_v12, %v6393_v54  ;;  %v6456_v50 = vld [vmem:[#allocation2 + $0x9] sm:$0xff] }
  0xba   : > { %660 = vrot.lane.b32.xlu0 %v654_v53, %s6119_s18  ;;  %v735_v1 = vmul.f32 %v733_v19, %v6393_v54  ;;  %v734_v30 = vmul.f32 %v733_v19, %v6390_v52  ;;  %v754_v4 = vmul.f32 %v753_v3, %v6390_v52  ;;  %v571_v6 = vsel %vm535_vm5, %v547_v31, %v5433_v33  ;;  %v6458_v53 = vld [vmem:[#allocation2 + $0x1] sm:$0xff] }
  0xbb   : > { %v736_v37 = vmul.f32 %v733_v19, %v6386_v47  ;;  %v756_v16 = vmul.f32 %v753_v3, %v6386_v47  ;;  %v755_v42 = vmul.f32 %v753_v3, %v6393_v54  ;;  %v773_v43 = vstv %s6421_s22  ;;  %v6494_v3 = vld [vmem:[%s6235_s16 + $0x30] sm:$0xff]  ;;  %v6513_v31 = vld [vmem:[%s6235_s16 + $0x40] sm:$0xf]  ;;  %s620_s22 = sld [smem:[#allocation5]] }
  0xbc   : > { %v5870_v28 = vpop.eup %5869  ;;  %v775_v26 = vmul.f32 %v773_v43, %v6393_v54  ;;  %v774_v44 = vmul.f32 %v773_v43, %v6390_v52  ;;  %v794_v8 = vmul.f32 %v793_v45, %v6390_v52  ;;  %v776_v46 = vmul.f32 %v773_v43, %v6386_v47 }
  0xbd   : > { %680 = vrot.lane.b32.xlu1 %v674_v22, %s6119_s18  ;;  %v5872_v29 = vpop.eup %5871  ;;  %v522_v24 = vmul.f32 %v5870_v28, %v6318_v59  ;;  %v796_v48 = vmul.f32 %v793_v45, %v6386_v47  ;;  %v795_v49 = vmul.f32 %v793_v45, %v6393_v54  ;;  %v848_v51 = vstv %s5456_s25  ;;  %v6491_v28 = vld [vmem:[%s6235_s16 + $0x38] sm:$0xff]  ;;  %s6613_s25 = sld [smem:[#allocation5 + $0x74]] }
  0xbe   : > { %662 = vrot.lane.b32.xlu0 %v655_v57, %s6119_s18  ;;  %v524_v34 = vmul.f32 %v5872_v29, %v6325_v21  ;;  %v583_v21 = vadd.f32 1.0, %v571_v6  ;;  %v850_v55 = vmul.f32 %v848_v51, %v6456_v50  ;;  %v849_v22 = vmul.f32 %v848_v51, %v6458_v53  ;;  %v6464_v57 = vld [vmem:[#allocation2 + $0x11] sm:$0x3] }
  0xbf   : > { %v546_v35 = vsub.f32 1.0, %v522_v24  ;;  %v5432_v5 = vadd.f32 -1.0, %v522_v24  ;;  %v869_v38 = vmul.f32 %v868_v23, %v6458_v53  ;;  %v851_v58 = vmul.f32 %v848_v51, %v6464_v57  ;;  %v6554_v51 = vld [vmem:[#allocation2 + $0x12] sm:$0x3] }
  0xc0   : > { %v548_v36 = vsub.f32 1.0, %v524_v34  ;;  %v5434_v59 = vadd.f32 -1.0, %v524_v34  ;;  %v595_v40 = vmul.f32 %v583_v21, %v163_v56  ;;  %v870_v61 = vmul.f32 %v868_v23, %v6456_v50 }
  0xc1   : > { %684 = vrot.lane.b32.xlu1 %v676_v60, %s6119_s18  ;;  %v570_v15 = vsel %vm534_vm6, %v546_v35, %v5432_v5  ;;  %v871_v60 = vmul.f32 %v868_v23, %v6464_v57  ;;  %v948_v19 = vstv %s5461_s12  ;;  %v6502_v20 = vmul.f32 0.70710677, %v6494_v3  ;;  %s6647_s12 = sld [smem:[#allocation5 + $0xa]] }
  0xc2   : > { %682 = vrot.lane.b32.xlu0 %v675_v62, %s6119_s18  ;;  %v582_v39 = vadd.f32 1.0, %v570_v15  ;;  %v572_v2 = vsel %vm536_vm7, %v548_v36, %v5434_v59  ;;  %609 = vst.msk [vmem:[#allocation2 + $0x20] sm:$0xff] %vm603_vm4, %v595_v40  ;;  %v888_v62 = vstv %s5458_s30  ;;  %v949_v29 = vmul.f32 %v948_v19, %v6458_v53  ;;  %s6622_s30 = sld [smem:[#allocation5 + $0x6c]] }
  0xc3   : > { %v584_v7 = vadd.f32 1.0, %v572_v2  ;;  %v890_v63 = vmul.f32 %v888_v62, %v6456_v50  ;;  %v889_v9 = vmul.f32 %v888_v62, %v6458_v53  ;;  %v891_v12 = vmul.f32 %v888_v62, %v6464_v57 }
  0xc4   : > { %v594_v41 = vmul.f32 %v582_v39, %v162_v17  ;;  %v6510_v24 = vand.u32 2147483647, %v6502_v20  ;;  %v951_v33 = vmul.f32 %v948_v19, %v6464_v57  ;;  %v950_v35 = vmul.f32 %v948_v19, %v6456_v50 }
  0xc5   : > { %702 = vrot.lane.b32.xlu1 %v695_v10, %s6119_s18  ;;  %v596_v18 = vmul.f32 %v584_v7, %v164_v32  ;;  %v908_v10 = vstv %s5459_s9  ;;  %v968_v5 = vstv %s5462_s13  ;;  %v6522_v6 = vmul.f32 0.70710677, %v6513_v31  ;;  %s6634_s9 = sld [smem:[#allocation5 + $0x3]]  ;;  %s6664_s13 = sld [smem:[#allocation5 + $0x2e]] }
  0xc6   : > { %700 = vrot.lane.b32.xlu0 %v694_v11, %s6119_s18  ;;  %608 = vst.msk [vmem:[#allocation2 + $0x18] sm:$0xff] %vm603_vm4, %v594_v41  ;;  %v909_v11 = vmul.f32 %v908_v10, %v6458_v53  ;;  %v201_v56 = vmul.f32 0.5, %v6510_v24  ;;  %v969_v21 = vmul.f32 %v968_v5, %v6458_v53  ;;  %v988_v15 = vstv %s5463_s14  ;;  %v6540_v41 = vld [vmem:[#allocation2 + $0xa] sm:$0xff]  ;;  %s6666_s14 = sld [smem:[#allocation5 + $0x52]] }
  0xc7   : > { %610 = vst.msk [vmem:[#allocation2 + $0x28] sm:$0xf] %vm606_vm3, %v596_v18  ;;  %v6525_v59 = vand.u32 2147483647, %v6522_v6  ;;  %v989_v2 = vmul.f32 %v988_v15, %v6458_v53  ;;  %v971_v40 = vmul.f32 %v968_v5, %v6464_v57  ;;  %v991_v7 = vmul.f32 %v988_v15, %v6464_v57  ;;  %v6544_v18 = vld [vmem:[#allocation2 + $0x2] sm:$0xff] }
  0xc8   : > { %v213_v36 = vadd.f32 1.0, %v201_v56  ;;  %vm537_vm9 = vcmp.ge.f32.partialorder %v6502_v20, 0.0  ;;  %vm539_vm10 = vcmp.ge.f32.partialorder %v6522_v6, 0.0 }
  0xc9   : > { %720 = vrot.lane.b32.xlu1 %v714_v13, %s6119_s18  ;;  %v911_v13 = vmul.f32 %v908_v10, %v6464_v57  ;;  %v203_v32 = vmul.f32 0.5, %v6525_v59 }
  0xca   : > { %704 = vrot.lane.b32.xlu0 %v696_v14, %s6119_s18  ;;  %v910_v14 = vmul.f32 %v908_v10, %v6456_v50 }
  0xcb   : > { %v215_v39 = vadd.f32 1.0, %v203_v32 }
  0xcd   : > { %724 = vrot.lane.b32.xlu1 %v716_v25, %s6119_s18  ;;  %v928_v25 = vstv %s5460_s0  ;;  %s6642_s0 = sld [smem:[#allocation5 + $0x27]] }
  0xce   : > { %722 = vrot.lane.b32.xlu0 %v715_v0, %s6119_s18  ;;  %v930_v27 = vmul.f32 %v928_v25, %v6456_v50  ;;  %v929_v0 = vmul.f32 %v928_v25, %v6458_v53 }
  0xd1   : > { %742 = vrot.lane.b32.xlu1 %v735_v1, %s6120_s23  ;;  %v6499_v1 = vmul.f32 0.70710677, %v6491_v28 }
  0xd2   : > { %740 = vrot.lane.b32.xlu0 %v734_v30, %s6120_s23  ;;  %v931_v30 = vmul.f32 %v928_v25, %v6464_v57  ;;  %v1083_v25 = vstv %s5470_s2  ;;  %s6753_s2 = sld [smem:[#allocation5 + $0x76]] }
  0xd3   : > { %v1084_v56 = vmul.f32 %v1083_v25, %v6544_v18  ;;  %vm538_vm8 = vcmp.ge.f32.partialorder %v6499_v1, 0.0 }
  0xd5   : > { %760 = vrot.lane.b32.xlu1 %v754_v4, %s6120_s23  ;;  %v6507_v4 = vand.u32 2147483647, %v6499_v1 }
  0xd6   : > { %744 = vrot.lane.b32.xlu0 %v736_v37, %s6120_s23  ;;  %v970_v37 = vmul.f32 %v968_v5, %v6456_v50 }
  0xd7   : > { %v202_v34 = vmul.f32 0.5, %v6507_v4 }
  0xd9   : > { %764 = vrot.lane.b32.xlu1 %v756_v16, %s6120_s23  ;;  %v214_v17 = vadd.f32 1.0, %v202_v34  ;;  %v990_v16 = vmul.f32 %v988_v15, %v6456_v50 }
  0xda   : > { %762 = vrot.lane.b32.xlu0 %v755_v42, %s6120_s23  ;;  %v1043_v42 = vstv %s5468_s15  ;;  %s6670_s15 = sld [smem:[#allocation5 + $0x4b]] }
  0xdb   : > { %5873 = vrcp.f32 %v214_v17  ;;  %v1045_v45 = vmul.f32 %v1043_v42, %v6540_v41 }
  0xdc   : > { %5875 = vrcp.f32 %v213_v36 }
  0xdd   : > { %782 = vrot.lane.b32.xlu1 %v775_v26, %s6120_s23  ;;  %5877 = vrcp.f32 %v215_v39  ;;  %v1086_v39 = vmul.f32 %v1083_v25, %v6554_v51 }
  0xde   : > { %780 = vrot.lane.b32.xlu0 %v774_v44, %s6120_s23 }
  0xe1   : > { %800 = vrot.lane.b32.xlu1 %v794_v8, %s6120_s23 }
  0xe2   : > { %784 = vrot.lane.b32.xlu0 %v776_v46, %s6120_s23  ;;  %v1044_v46 = vmul.f32 %v1043_v42, %v6544_v18 }
  0xe5   : > { %804 = vrot.lane.b32.xlu1 %v796_v48, %s6120_s23  ;;  %v6542_v43 = vpop.eup %5873  ;;  %v1063_v48 = vstv %s5469_s17  ;;  %s6701_s17 = sld [smem:[#allocation5 + $0x6f]] }
  0xe6   : > { %802 = vrot.lane.b32.xlu0 %v795_v49, %s6120_s23  ;;  %v6546_v26 = vpop.eup %5875  ;;  %v250_v44 = vmul.f32 0.17087276, %v6542_v43 }
  0xe7   : > { %v249_v8 = vmul.f32 0.17087276, %v6546_v26 }
  0xe8   : > { %v262_v49 = vadd.f32 -0.82215226, %v250_v44 }
  0xe9   : > { %857 = vrot.lane.b32.xlu1 %v850_v55, %s6119_s18  ;;  %v261_v55 = vadd.f32 -0.82215226, %v249_v8 }
  0xea   : > { %855 = vrot.lane.b32.xlu0 %v849_v22, %s6119_s18  ;;  %v6556_v22 = vpop.eup %5877  ;;  %v274_v23 = vmul.f32 %v6542_v43, %v262_v49 }
  0xec   : > { %v286_v62 = vadd.f32 1.4885159, %v274_v23 }
  0xed   : > { %875 = vrot.lane.b32.xlu1 %v869_v38, %s6119_s18  ;;  %v1064_v38 = vmul.f32 %v1063_v48, %v6544_v18 }
  0xee   : > { %859 = vrot.lane.b32.xlu0 %v851_v58, %s6119_s18  ;;  %v273_v58 = vmul.f32 %v6546_v26, %v261_v55  ;;  %v298_v10 = vmul.f32 %v6542_v43, %v286_v62 }
  0xf1   : > { %879 = vrot.lane.b32.xlu1 %v871_v60, %s6119_s18  ;;  %v251_v60 = vmul.f32 0.17087276, %v6556_v22 }
  0xf2   : > { %877 = vrot.lane.b32.xlu0 %v870_v61, %s6119_s18  ;;  %v1046_v61 = vmul.f32 %v1043_v42, %v6554_v51 }
  0xf5   : > { %897 = vrot.lane.b32.xlu1 %v890_v63, %s6119_s18  ;;  %v285_v63 = vadd.f32 1.4885159, %v273_v58 }
  0xf6   : > { %895 = vrot.lane.b32.xlu0 %v889_v9, %s6119_s18  ;;  %v263_v9 = vadd.f32 -0.82215226, %v251_v60 }
  0xf9   : > { %915 = vrot.lane.b32.xlu1 %v909_v11, %s6119_s18  ;;  %v1066_v11 = vmul.f32 %v1063_v48, %v6554_v51 }
  0xfa   : > { %899 = vrot.lane.b32.xlu0 %v891_v12, %s6119_s18  ;;  %v297_v12 = vmul.f32 %v6546_v26, %v285_v63  ;;  %v1143_v63 = vstv %s5473_s20  ;;  %s5486_s20 = sld [smem:[#allocation5 + $0x53]] }
  0xfd   : > { %919 = vrot.lane.b32.xlu1 %v911_v13, %s6119_s18  ;;  %v275_v13 = vmul.f32 %v6556_v22, %v263_v9 }
  0xfe   : > { %917 = vrot.lane.b32.xlu0 %v910_v14, %s6119_s18  ;;  %v1065_v14 = vmul.f32 %v1063_v48, %v6540_v41 }
  0xff   : > { %v287_v19 = vadd.f32 1.4885159, %v275_v13 }
 0x101   : > { %937 = vrot.lane.b32.xlu1 %v930_v27, %s6120_s23  ;;  %v310_v27 = vadd.f32 -1.135204, %v298_v10  ;;  %v299_v34 = vmul.f32 %v6556_v22, %v287_v19 }
 0x102   : > { %935 = vrot.lane.b32.xlu0 %v929_v0, %s6120_s23  ;;  %v309_v0 = vadd.f32 -1.135204, %v297_v12 }
 0x103   : > { %v311_v36 = vadd.f32 -1.135204, %v299_v34  ;;  %v1146_v34 = vmul.f32 %v1143_v63, %v6554_v51 }
 0x105   : > { %955 = vrot.lane.b32.xlu1 %v949_v29, %s6120_s23  ;;  %v322_v29 = vmul.f32 %v6542_v43, %v310_v27  ;;  %v323_v32 = vmul.f32 %v6556_v22, %v311_v36 }
 0x106   : > { %939 = vrot.lane.b32.xlu0 %v931_v30, %s6120_s23  ;;  %v1085_v30 = vmul.f32 %v1083_v25, %v6540_v41 }
 0x107   : > { %v334_v5 = vadd.f32 0.27886808, %v322_v29 }
 0x109   : > { %959 = vrot.lane.b32.xlu1 %v951_v33, %s6120_s23  ;;  %v321_v33 = vmul.f32 %v6546_v26, %v309_v0 }
 0x10a   : > { %957 = vrot.lane.b32.xlu0 %v950_v35, %s6120_s23  ;;  %v1103_v35 = vstv %s5471_s3  ;;  %s6796_s3 = sld [smem:[#allocation5 + $0xb]] }
 0x10b   : > { %v333_v17 = vadd.f32 0.27886808, %v321_v33  ;;  %v1106_v42 = vmul.f32 %v1103_v35, %v6554_v51  ;;  %v1105_v8 = vmul.f32 %v1103_v35, %v6540_v41 }
 0x10d   : > { %977 = vrot.lane.b32.xlu1 %v970_v37, %s6120_s23  ;;  %v346_v37 = vmul.f32 %v6542_v43, %v334_v5  ;;  %v345_v15 = vmul.f32 %v6546_v26, %v333_v17  ;;  %v466_v17 = vsub.f32 0.0, %v6507_v4 }
 0x10e   : > { %975 = vrot.lane.b32.xlu0 %v969_v21, %s6120_s23  ;;  %v1104_v21 = vmul.f32 %v1103_v35, %v6544_v18  ;;  %v1163_v35 = vstv %s5474_s21  ;;  %s5487_s21 = sld [smem:[#allocation5 + $0x77]] }
 0x111   : > { %995 = vrot.lane.b32.xlu1 %v989_v2, %s6120_s23  ;;  %v358_v2 = vadd.f32 -0.18628806, %v346_v37  ;;  %v465_v37 = vsub.f32 0.0, %v6510_v24 }
 0x112   : > { %979 = vrot.lane.b32.xlu0 %v971_v40, %s6120_s23  ;;  %v357_v40 = vadd.f32 -0.18628806, %v345_v15 }
 0x114   : > { %v369_v44 = vmul.f32 %v6546_v26, %v357_v40  ;;  %v478_v40 = vmul.f32 %v466_v17, %v6507_v4  ;;  %v477_v4 = vmul.f32 %v465_v37, %v6510_v24 }
 0x115   : > { %999 = vrot.lane.b32.xlu1 %v991_v7, %s6120_s23  ;;  %v335_v7 = vadd.f32 0.27886808, %v323_v32 }
 0x116   : > { %997 = vrot.lane.b32.xlu0 %v990_v16, %s6120_s23  ;;  %v370_v16 = vmul.f32 %v6542_v43, %v358_v2  ;;  %v381_v55 = vadd.f32 0.09678418, %v369_v44 }
 0x118   : > { %v382_v48 = vadd.f32 0.09678418, %v370_v16  ;;  %v1165_v16 = vmul.f32 %v1163_v35, %v6540_v41 }
 0x119   : > { %1052 = vrot.lane.b32.xlu1 %v1045_v45, %s6119_s18  ;;  %v347_v45 = vmul.f32 %v6556_v22, %v335_v7  ;;  %v629_v7 = vstv %s5441_s24  ;;  %s5493_s24 = sld [smem:[#allocation5 + $0x31]] }
 0x11a   : > { %1050 = vrot.lane.b32.xlu0 %v1044_v46, %s6119_s18  ;;  %v1123_v46 = vstv %s5472_s19  ;;  %v394_v58 = vmul.f32 %v6542_v43, %v382_v48  ;;  %s5485_s19 = sld [smem:[#allocation5 + $0x2f]] }
 0x11b   : > { %v359_v23 = vadd.f32 -0.18628806, %v347_v45  ;;  %v1125_v60 = vmul.f32 %v1123_v46, %v6540_v41  ;;  %v1124_v62 = vmul.f32 %v1123_v46, %v6544_v18  ;;  %v1126_v27 = vmul.f32 %v1123_v46, %v6554_v51 }
 0x11c   : > { %v406_v9 = vadd.f32 0.37409195, %v394_v58  ;;  %v1183_v45 = vstv %s6613_s25  ;;  %s5494_s25 = sld [smem:[#allocation5 + $0x55]] }
 0x11d   : > { %1070 = vrot.lane.b32.xlu1 %v1064_v38, %s6119_s18  ;;  %v371_v10 = vmul.f32 %v6556_v22, %v359_v23  ;;  %v637_v23 = vstv %s6618_s4  ;;  %s5495_s4 = sld [smem:[#allocation5 + $0x79]] }
 0x11e   : > { %1054 = vrot.lane.b32.xlu0 %v1046_v61, %s6119_s18  ;;  %v393_v61 = vmul.f32 %v6546_v26, %v381_v55  ;;  %v418_v25 = vmul.f32 %v6542_v43, %v406_v9  ;;  %v6689_v17 = vmul.f32 %v637_v23, %v6390_v52  ;;  %v6696_v37 = vmul.f32 %v637_v23, %v6386_v47 }
 0x11f   : > { %v383_v19 = vadd.f32 0.09678418, %v371_v10  ;;  %v1184_v10 = vmul.f32 %v1183_v45, %v6544_v18 }
 0x120   : > { %v405_v12 = vadd.f32 0.37409195, %v393_v61  ;;  %v630_v61 = vmul.f32 %v629_v7, %v6390_v52 }
 0x121   : > { %1074 = vrot.lane.b32.xlu1 %v1066_v11, %s6119_s18 }
 0x122   : > { %1072 = vrot.lane.b32.xlu0 %v1065_v14, %s6119_s18  ;;  %v1144_v14 = vmul.f32 %v1143_v63, %v6544_v18  ;;  %v417_v0 = vmul.f32 %v6546_v26, %v405_v12 }
 0x124   : > { %v429_v36 = vadd.f32 1.0000237, %v417_v0  ;;  %v6678_v0 = vmul.f32 %v629_v7, %v6393_v54 }
 0x125   : > { %1092 = vrot.lane.b32.xlu1 %v1085_v30, %s6119_s18  ;;  %v430_v30 = vadd.f32 1.0000237, %v418_v25  ;;  %v467_v25 = vsub.f32 0.0, %v6525_v59 }
 0x126   : > { %1090 = vrot.lane.b32.xlu0 %v1084_v56, %s6119_s18  ;;  %v1145_v56 = vmul.f32 %v1143_v63, %v6540_v41  ;;  %v441_v44 = vmul.f32 %v6546_v26, %v429_v36  ;;  %v6660_v63 = vstv %s6622_s30  ;;  %s5496_s30 = sld [smem:[#allocation5 + $0xe]] }
 0x127   : > { %v442_v5 = vmul.f32 %v6542_v43, %v430_v30  ;;  %v6693_v36 = vmul.f32 %v6660_v63, %v6390_v52 }
 0x129   : > { %1110 = vrot.lane.b32.xlu1 %v1104_v21, %s6119_s18  ;;  %v395_v21 = vmul.f32 %v6556_v22, %v383_v19  ;;  %v454_v32 = vadd.f32 -1.2655122, %v442_v5  ;;  %v1166_v19 = vmul.f32 %v1163_v35, %v6554_v51 }
 0x12a   : > { %1094 = vrot.lane.b32.xlu0 %v1086_v39, %s6119_s18  ;;  %v621_v39 = vstv %s620_s22  ;;  %s5492_s22 = sld [smem:[#allocation5 + $0xd]] }
 0x12b   : > { %v6593_v49 = vpop.permute.xlu1 %664  ;;  %v407_v46 = vadd.f32 0.37409195, %v395_v21  ;;  %v6651_v48 = vmul.f32 %v621_v39, %v6386_v47  ;;  %v622_v55 = vmul.f32 %v621_v39, %v6390_v52  ;;  %v1186_v21 = vmul.f32 %v1183_v45, %v6554_v51 }
 0x12c   : > { %v6595_v38 = vpop.permute.xlu0 %660  ;;  %v1239_v51 = vstv %s6647_s12  ;;  %s5499_s12 = sld [smem:[#allocation5 + $0x7a]] }
 0x12d   : > { %1114 = vrot.lane.b32.xlu1 %v1106_v42, %s6119_s18  ;;  %v1164_v42 = vmul.f32 %v1163_v35, %v6544_v18  ;;  %v6683_v18 = vmul.f32 %v637_v23, %v6393_v54 }
 0x12e   : > { %1112 = vrot.lane.b32.xlu0 %v1105_v8, %s6119_s18  ;;  %v490_v8 = vadd.f32 %v478_v40, %v454_v32  ;;  %v824_v32 = vstv %s6642_s0  ;;  %v479_v40 = vmul.f32 %v467_v25, %v6525_v59  ;;  %s5498_s0 = sld [smem:[#allocation5 + $0x56]] }
 0x12f   : > { %v6604_v11 = vpop.permute.xlu1 %680 }
 0x130   : > { %v6606_v13 = vpop.permute.xlu0 %662  ;;  %v509_v24 = vmul.f32 1.442695, %v490_v8  ;;  %v6717_v8 = vmul.f32 %v6660_v63, %v6386_v47 }
 0x131   : > { %1132 = vrot.lane.b32.xlu1 %v1125_v60, %s6120_s23  ;;  %v453_v60 = vadd.f32 -1.2655122, %v441_v44  ;;  %v669_v44 = vadd.f32 %v6595_v38, %v622_v55 }
 0x132   : > { %1130 = vrot.lane.b32.xlu0 %v1124_v62, %s6120_s23  ;;  %v623_v62 = vmul.f32 %v621_v39, %v6393_v54  ;;  %5879 = vpow2.f32 %v509_v24 }
 0x133   : > { %v6616_v29 = vpop.permute.xlu1 %684  ;;  %v489_v12 = vadd.f32 %v477_v4, %v453_v60  ;;  %v6719_v4 = vld [vmem:[#allocation2 + $0x18] sm:$0xff]  ;;  %v6724_v60 = vstv %s6666_s14  ;;  %s5505_s14 = sld [smem:[#allocation5 + $0x34]] }
 0x134   : > { %v6620_v33 = vpop.permute.xlu0 %682  ;;  %v670_v52 = vadd.f32 %v6606_v13, %v623_v62  ;;  %v825_v62 = vmul.f32 %v824_v32, %v6458_v53 }
 0x135   : > { %1150 = vrot.lane.b32.xlu1 %v1144_v14, %s6120_s23  ;;  %v419_v14 = vmul.f32 %v6556_v22, %v407_v46 }
 0x136   : > { %1134 = vrot.lane.b32.xlu0 %v1126_v27, %s6120_s23  ;;  %v6675_v27 = vmul.f32 %v629_v7, %v6386_v47  ;;  %v1185_v7 = vmul.f32 %v1183_v45, %v6540_v41  ;;  %v1259_v45 = vstv %s6664_s13  ;;  %v6730_v47 = vstv %s6670_s15  ;;  %s5504_s13 = sld [smem:[#allocation5 + $0x10]] }
 0x137   : > { %v6632_v15 = vpop.permute.xlu1 %702  ;;  %v431_v5 = vadd.f32 1.0000237, %v419_v14  ;;  %s5506_s15 = sld [smem:[#allocation5 + $0x58]] }
 0x138   : > { %v6636_v2 = vpop.permute.xlu0 %700 }
 0x139   : > { %1154 = vrot.lane.b32.xlu1 %v1146_v34, %s6120_s23  ;;  %v816_v34 = vstv %s6634_s9  ;;  %v443_v39 = vmul.f32 %v6556_v22, %v431_v5  ;;  %v6740_v5 = vld [vmem:[#allocation2 + $0x28] sm:$0x3]  ;;  %s5497_s9 = sld [smem:[#allocation5 + $0x32]] }
 0x13a   : > { %1152 = vrot.lane.b32.xlu0 %v1145_v56, %s6120_s23  ;;  %v507_v56 = vmul.f32 1.442695, %v489_v12  ;;  %v817_v13 = vmul.f32 %v816_v34, %v6458_v53  ;;  %v1240_v12 = vmul.f32 %v1239_v51, %v6719_v4  ;;  %v819_v25 = vmul.f32 %v816_v34, %v6464_v57 }
 0x13b   : > { %v6655_v58 = vpop.permute.xlu1 %720  ;;  %v455_v46 = vadd.f32 -1.2655122, %v443_v39  ;;  %v827_v39 = vmul.f32 %v824_v32, %v6464_v57  ;;  %v1262_v1 = vmul.f32 %v1259_v45, %v6740_v5 }
 0x13c   : > { %v6662_v9 = vpop.permute.xlu0 %704  ;;  %5881 = vpow2.f32 %v507_v56 }
 0x13d   : > { %1172 = vrot.lane.b32.xlu1 %v1165_v16, %s6120_s23  ;;  %v6710_v16 = vld [vmem:[#allocation2 + $0x20] sm:$0xff]  ;;  %v491_v55 = vadd.f32 %v479_v40, %v455_v46 }
 0x13e   : > { %1170 = vrot.lane.b32.xlu0 %v1164_v42, %s6120_s23  ;;  %v818_v42 = vmul.f32 %v816_v34, %v6456_v50  ;;  %v1241_v38 = vmul.f32 %v1239_v51, %v6710_v16  ;;  %v6749_v34 = vstv %s6701_s17  ;;  %v1281_v20 = vmul.f32 %v6724_v60, %v6710_v16  ;;  %s5507_s17 = sld [smem:[#allocation5 + $0x7c]] }
 0x13f   : > { %v6685_v30 = vpop.permute.xlu1 %724 }
 0x140   : > { %v6698_v35 = vpop.permute.xlu0 %722 }
 0x141   : > { %1190 = vrot.lane.b32.xlu1 %v1184_v10, %s6120_s23  ;;  %v689_v10 = vadd.f32 %v6604_v11, %v630_v61  ;;  %v511_v11 = vmul.f32 1.442695, %v491_v55  ;;  %v5880_v61 = vpop.eup %5879 }
 0x142   : > { %1174 = vrot.lane.b32.xlu0 %v1166_v19, %s6120_s23  ;;  %v671_v19 = vadd.f32 %v6593_v49, %v6651_v48  ;;  %v1260_v49 = vmul.f32 %v1259_v45, %v6719_v4  ;;  %v526_v48 = vmul.f32 %v5880_v61, %v6542_v43 }
 0x143   : > { %v743_v59 = vpop.permute.xlu1 %742  ;;  %5883 = vpow2.f32 %v511_v11 }
 0x144   : > { %v750_v23 = vadd.f32 %v743_v59, %v670_v52  ;;  %v741_v41 = vpop.permute.xlu0 %740  ;;  %v691_v59 = vadd.f32 %v6616_v29, %v6675_v27  ;;  %v550_v43 = vsub.f32 1.0, %v526_v48  ;;  %v1261_v29 = vmul.f32 %v1259_v45, %v6710_v16 }
 0x145   : > { %v749_v24 = vadd.f32 %v741_v41, %v669_v44  ;;  %1194 = vrot.lane.b32.xlu1 %v1186_v21, %s6120_s23  ;;  %v833_v27 = vmul.f32 %v6730_v47, %v6458_v53 }
 0x146   : > { %1192 = vrot.lane.b32.xlu0 %v1185_v7, %s6120_s23  ;;  %v6735_v14 = vadd.f32 %v818_v42, %v750_v23  ;;  %v826_v7 = vmul.f32 %v824_v32, %v6456_v50  ;;  %v834_v42 = vmul.f32 %v6730_v47, %v6456_v50  ;;  %v1242_v32 = vmul.f32 %v1239_v51, %v6740_v5  ;;  %v5882_v46 = vpop.eup %5881 }
 0x147   : > { %v761_v56 = vpop.permute.xlu1 %760  ;;  %v6742_v21 = vadd.f32 %v817_v13, %v749_v24  ;;  %v690_v23 = vadd.f32 %v6620_v33, %v6678_v0  ;;  %v166_v51 = vmul.f32 0.5, %v6491_v28  ;;  %v525_v0 = vmul.f32 %v5882_v46, %v6546_v26 }
 0x148   : > { %v769_v40 = vadd.f32 %v761_v56, %v689_v10  ;;  %v745_v52 = vpop.permute.xlu0 %744  ;;  %v709_v28 = vadd.f32 %v6636_v2, %v6689_v17  ;;  %v1299_v2 = vstv %s6753_s2  ;;  %s5508_s2 = sld [smem:[#allocation5 + $0x11]] }
 0x149   : > { %v751_v44 = vadd.f32 %v745_v52, %v671_v19  ;;  %1248 = vrot.lane.b32.xlu1 %v1241_v38, %s6119_s18  ;;  %v5436_v38 = vadd.f32 -1.0, %v526_v48  ;;  %v549_v45 = vsub.f32 1.0, %v525_v0  ;;  %v5435_v61 = vadd.f32 -1.0, %v525_v0 }
 0x14a   : > { %1246 = vrot.lane.b32.xlu0 %v1240_v12, %s6119_s18  ;;  %v6760_v13 = vadd.f32 %v825_v62, %v769_v40  ;;  %v710_v12 = vadd.f32 %v6632_v15, %v6683_v18  ;;  %v841_v15 = vmul.f32 %v6749_v34, %v6458_v53  ;;  %v711_v48 = vadd.f32 %v6662_v9, %v6696_v37 }
 0x14b   : > { %v765_v41 = vpop.permute.xlu1 %764  ;;  %v6765_v24 = vadd.f32 %v819_v25, %v751_v44  ;;  %v574_v33 = vsel %vm538_vm8, %v550_v43, %v5436_v38  ;;  %v573_v17 = vsel %vm537_vm9, %v549_v45, %v5435_v61  ;;  %v1280_v44 = vmul.f32 %v6724_v60, %v6719_v4 }
 0x14c   : > { %v771_v55 = vadd.f32 %v765_v41, %v691_v59  ;;  %v763_v10 = vpop.permute.xlu0 %762  ;;  %v586_v19 = vadd.f32 1.0, %v574_v33  ;;  %v647_v59 = vmul.f32 %v6660_v63, %v6393_v54  ;;  %v1300_v9 = vmul.f32 %v1299_v2, %v6719_v4 }
 0x14d   : > { %v770_v62 = vadd.f32 %v763_v10, %v690_v23  ;;  %1266 = vrot.lane.b32.xlu1 %v1260_v49, %s6119_s18  ;;  %v5884_v49 = vpop.eup %5883  ;;  %v842_v54 = vmul.f32 %v6749_v34, %v6456_v50  ;;  %v731_v37 = vadd.f32 %v6685_v30, %v6717_v8  ;;  %v167_v10 = vmul.f32 0.5, %v6513_v31 }
 0x14e   : > { %1250 = vrot.lane.b32.xlu0 %v1242_v32, %s6119_s18  ;;  %v6777_v25 = vadd.f32 %v827_v39, %v771_v55  ;;  %v598_v18 = vmul.f32 %v586_v19, %v166_v51  ;;  %v165_v39 = vmul.f32 0.5, %v6494_v3  ;;  %v585_v3 = vadd.f32 1.0, %v573_v17 }
 0x14f   : > { %v783_v56 = vpop.permute.xlu1 %782  ;;  %v6782_v11 = vadd.f32 %v826_v7, %v770_v62  ;;  %v729_v7 = vadd.f32 %v6655_v58, %v6693_v36  ;;  %v835_v32 = vmul.f32 %v6730_v47, %v6464_v57  ;;  %v527_v63 = vmul.f32 %v5884_v49, %v6556_v22 }
 0x150   : > { %v790_v26 = vadd.f32 %v783_v56, %v710_v12  ;;  %v781_v40 = vpop.permute.xlu0 %780  ;;  %612 = vst.msk [vmem:[#allocation2 + $0x38] sm:$0xff] %vm603_vm4, %v598_v18  ;;  %v597_v41 = vmul.f32 %v585_v3, %v165_v39  ;;  %v1282_v47 = vmul.f32 %v6724_v60, %v6740_v5  ;;  %v730_v50 = vadd.f32 %v6698_v35, %v647_v59 }
 0x151   : > { %v789_v52 = vadd.f32 %v781_v40, %v709_v28  ;;  %1270 = vrot.lane.b32.xlu1 %v1262_v1, %s6119_s18  ;;  %v551_v38 = vsub.f32 1.0, %v527_v63  ;;  %v5437_v30 = vadd.f32 -1.0, %v527_v63  ;;  %v1301_v6 = vmul.f32 %v1299_v2, %v6710_v16 }
 0x152   : > { %1268 = vrot.lane.b32.xlu0 %v1261_v29, %s6119_s18  ;;  %v6798_v53 = vadd.f32 %v834_v42, %v790_v26  ;;  %v843_v42 = vmul.f32 %v6749_v34, %v6464_v57  ;;  %611 = vst.msk [vmem:[#allocation2 + $0x30] sm:$0xff] %vm603_vm4, %v597_v41  ;;  %v1302_v29 = vmul.f32 %v1299_v2, %v6740_v5  ;;  %v1319_v35 = vstv %s6796_s3  ;;  %s5509_s3 = sld [smem:[#allocation5 + $0x35]] }
 0x153   : > { %v801_v58 = vpop.permute.xlu1 %800  ;;  %v6805_v36 = vadd.f32 %v833_v27, %v789_v52  ;;  %v575_v27 = vsel %vm539_vm10, %v551_v38, %v5437_v30  ;;  %v1321_v12 = vmul.f32 %v1319_v35, %v6710_v16  ;;  %v1320_v19 = vmul.f32 %v1319_v35, %v6719_v4 }
 0x154   : > { %v809_v46 = vadd.f32 %v801_v58, %v729_v7  ;;  %v785_v23 = vpop.permute.xlu0 %784  ;;  %v587_v62 = vadd.f32 1.0, %v575_v27  ;;  %v1339_v28 = vstv %s5485_s19  ;;  %v1322_v26 = vmul.f32 %v1319_v35, %v6740_v5  ;;  %s5510_s19 = sld [smem:[#allocation5 + $0x59]] }
 0x155   : > { %v791_v43 = vadd.f32 %v785_v23, %v711_v48  ;;  %1288 = vrot.lane.b32.xlu1 %v1281_v20, %s6119_s18  ;;  %v1340_v61 = vmul.f32 %v1339_v28, %v6719_v4  ;;  %v1342_v18 = vmul.f32 %v1339_v28, %v6740_v5  ;;  %v1341_v39 = vmul.f32 %v1339_v28, %v6710_v16 }
 0x156   : > { %1286 = vrot.lane.b32.xlu0 %v1280_v44, %s6119_s18  ;;  %v6821_v57 = vadd.f32 %v841_v15, %v809_v46  ;;  %v599_v31 = vmul.f32 %v587_v62, %v167_v10  ;;  %v1359_v52 = vstv %s5486_s20  ;;  %v1379_v44 = vstv %s5487_s21  ;;  %s5511_s20 = sld [smem:[#allocation5 + $0x7d]]  ;;  %s5516_s21 = sld [smem:[#allocation5 + $0x13]] }
 0x157   : > { %v805_v34 = vpop.permute.xlu1 %804  ;;  %v6826_v22 = vadd.f32 %v835_v32, %v791_v43  ;;  %v1361_v17 = vmul.f32 %v1359_v52, %v6710_v16  ;;  %v1360_v7 = vmul.f32 %v1359_v52, %v6719_v4  ;;  %v1380_v48 = vmul.f32 %v1379_v44, %v6719_v4  ;;  %v6891_v43 = vld [vmem:[#allocation2 + $0x19] sm:$0xff] }
 0x158   : > { %v811_v8 = vadd.f32 %v805_v34, %v731_v37  ;;  %v803_v55 = vpop.permute.xlu0 %802  ;;  %613 = vst.msk [vmem:[#allocation2 + $0x40] sm:$0xf] %vm606_vm3, %v599_v31  ;;  %v1362_v59 = vmul.f32 %v1359_v52, %v6740_v5  ;;  %v1382_v46 = vmul.f32 %v1379_v44, %v6740_v5  ;;  %v1381_v23 = vmul.f32 %v1379_v44, %v6710_v16  ;;  %v6901_v37 = vld [vmem:[#allocation2 + $0x29] sm:$0x3] }
 0x159   : > { %v810_v60 = vadd.f32 %v803_v55, %v730_v50  ;;  %1306 = vrot.lane.b32.xlu1 %v1300_v9, %s6119_s18  ;;  %v1434_v4 = vstv %s5492_s22  ;;  %v1454_v63 = vstv %s5493_s24  ;;  %v1474_v10 = vstv %s5494_s25  ;;  %s5517_s22 = sld [smem:[#allocation5 + $0x37]]  ;;  %s5518_s24 = sld [smem:[#allocation5 + $0x5b]] }
 0x15a   : > { %1290 = vrot.lane.b32.xlu0 %v1282_v47, %s6119_s18  ;;  %v6834_v51 = vadd.f32 %v843_v42, %v811_v8  ;;  %v6887_v42 = vld [vmem:[#allocation2 + $0x21] sm:$0xff]  ;;  %v1435_v5 = vmul.f32 %v1434_v4, %v6891_v43  ;;  %v1455_v50 = vmul.f32 %v1454_v63, %v6891_v43  ;;  %v1437_v34 = vmul.f32 %v1434_v4, %v6901_v37  ;;  %s5519_s25 = sld [smem:[#allocation5 + $0x7f]] }
 0x15b   : > { %v6836_v1 = vpop.permute.xlu1 %857  ;;  %v6838_v33 = vadd.f32 %v842_v54, %v810_v60  ;;  %v1436_v54 = vmul.f32 %v1434_v4, %v6887_v42  ;;  %v1457_v8 = vmul.f32 %v1454_v63, %v6901_v37  ;;  %v1456_v55 = vmul.f32 %v1454_v63, %v6887_v42  ;;  %v6957_v4 = vld [vmem:[%s6235_s16 + $0x48] sm:$0xff] }
 0x15c   : > { %v6840_v0 = vpop.permute.xlu0 %855  ;;  %v1476_v27 = vmul.f32 %v1474_v10, %v6887_v42  ;;  %v1494_v35 = vstv %s5495_s4  ;;  %s5520_s4 = sld [smem:[#allocation5 + $0x14]]  ;;  %vm3105_vm8 = vcmask 140288  }
 0x15d   : > { %1310 = vrot.lane.b32.xlu1 %v1302_v29, %s6119_s18 }
 0x15e   : > { %1308 = vrot.lane.b32.xlu0 %v1301_v6, %s6119_s18  ;;  %v1475_v6 = vmul.f32 %v1474_v10, %v6891_v43 }
 0x15f   : > { %v6847_v56 = vpop.permute.xlu1 %875 }
 0x160   : > { %v6849_v45 = vpop.permute.xlu0 %859 }
 0x161   : > { %1328 = vrot.lane.b32.xlu1 %v1321_v12, %s6120_s23  ;;  %v1495_v12 = vmul.f32 %v1494_v35, %v6891_v43 }
 0x162   : > { %1326 = vrot.lane.b32.xlu0 %v1320_v19, %s6120_s23  ;;  %v1477_v19 = vmul.f32 %v1474_v10, %v6901_v37  ;;  %v6977_v10 = vld [vmem:[%s6235_s16 + $0x58] sm:$0xf] }
 0x163   : > { %v6855_v40 = vpop.permute.xlu1 %879 }
 0x164   : > { %v6857_v15 = vpop.permute.xlu0 %877 }
 0x165   : > { %1346 = vrot.lane.b32.xlu1 %v1340_v61, %s6120_s23 }
 0x166   : > { %1330 = vrot.lane.b32.xlu0 %v1322_v26, %s6120_s23  ;;  %v1497_v26 = vmul.f32 %v1494_v35, %v6901_v37 }
 0x167   : > { %v6863_v20 = vpop.permute.xlu1 %897 }
 0x168   : > { %v6865_v2 = vpop.permute.xlu0 %895 }
 0x169   : > { %1350 = vrot.lane.b32.xlu1 %v1342_v18, %s6120_s23  ;;  %v1496_v18 = vmul.f32 %v1494_v35, %v6887_v42 }
 0x16a   : > { %1348 = vrot.lane.b32.xlu0 %v1341_v39, %s6120_s23  ;;  %v1514_v39 = vstv %s5496_s30  ;;  %s5521_s30 = sld [smem:[#allocation5 + $0x38]] }
 0x16b   : > { %v6871_v3 = vpop.permute.xlu1 %915  ;;  %v1515_v44 = vmul.f32 %v1514_v39, %v6891_v43  ;;  %v1517_v63 = vmul.f32 %v1514_v39, %v6901_v37 }
 0x16c   : > { %v6873_v49 = vpop.permute.xlu0 %899 }
 0x16d   : > { %1368 = vrot.lane.b32.xlu1 %v1361_v17, %s6120_s23 }
 0x16e   : > { %1366 = vrot.lane.b32.xlu0 %v1360_v7, %s6120_s23  ;;  %v1516_v7 = vmul.f32 %v1514_v39, %v6887_v42 }
 0x16f   : > { %v6879_v58 = vpop.permute.xlu1 %919 }
 0x170   : > { %v6881_v32 = vpop.permute.xlu0 %917 }
 0x171   : > { %1386 = vrot.lane.b32.xlu1 %v1380_v48, %s6120_s23  ;;  %v1534_v48 = vstv %s5497_s9  ;;  %s5522_s9 = sld [smem:[#allocation5 + $0x5c]] }
 0x172   : > { %1370 = vrot.lane.b32.xlu0 %v1362_v59, %s6120_s23  ;;  %v1536_v35 = vmul.f32 %v1534_v48, %v6887_v42 }
 0x173   : > { %v6889_v41 = vpop.permute.xlu1 %937 }
 0x174   : > { %v6893_v9 = vpop.permute.xlu0 %935 }
 0x175   : > { %1390 = vrot.lane.b32.xlu1 %v1382_v46, %s6120_s23 }
 0x176   : > { %1388 = vrot.lane.b32.xlu0 %v1381_v23, %s6120_s23  ;;  %v6954_v23 = vld [vmem:[%s6235_s16 + $0x50] sm:$0xff] }
 0x177   : > { %v6899_v16 = vpop.permute.xlu1 %955 }
 0x178   : > { %v6903_v47 = vpop.permute.xlu0 %939 }
 0x179   : > { %1443 = vrot.lane.b32.xlu1 %v1436_v54, %s6119_s18  ;;  %v1535_v54 = vmul.f32 %v1534_v48, %v6891_v43 }
 0x17a   : > { %1441 = vrot.lane.b32.xlu0 %v1435_v5, %s6119_s18  ;;  %v6962_v5 = vmul.f32 0.70710677, %v6954_v23 }
 0x17b   : > { %v6909_v38 = vpop.permute.xlu1 %959 }
 0x17c   : > { %v6911_v30 = vpop.permute.xlu0 %957  ;;  %vm541_vm11 = vcmp.ge.f32.partialorder %v6962_v5, 0.0 }
 0x17d   : > { %1461 = vrot.lane.b32.xlu1 %v1455_v50, %s6119_s18  ;;  %v6967_v50 = vmul.f32 0.70710677, %v6957_v4 }
 0x17e   : > { %1445 = vrot.lane.b32.xlu0 %v1437_v34, %s6119_s18 }
 0x17f   : > { %v6917_v60 = vpop.permute.xlu1 %977  ;;  %vm540_vm12 = vcmp.ge.f32.partialorder %v6967_v50, 0.0 }
 0x180   : > { %v6919_v29 = vpop.permute.xlu0 %975 }
 0x181   : > { %10421 = vst [vmem:[#allocation15_spill] sm:$0xff] %v6919_v29  ;;  %1465 = vrot.lane.b32.xlu1 %v1457_v8, %s6119_s18  ;;  %v6972_v8 = vand.u32 2147483647, %v6962_v5 }
 0x182   : > { %1463 = vrot.lane.b32.xlu0 %v1456_v55, %s6119_s18 }
 0x183   : > { %v6925_v62 = vpop.permute.xlu1 %995 }
 0x184   : > { %10422 = vst [vmem:[#allocation16_spill] sm:$0xff] %v6925_v62  ;;  %v6927_v31 = vpop.permute.xlu0 %979 }
 0x185   : > { %10423 = vst [vmem:[#allocation17_spill] sm:$0xff] %v6927_v31  ;;  %1483 = vrot.lane.b32.xlu1 %v1476_v27, %s6119_s18  ;;  %v1537_v27 = vmul.f32 %v1534_v48, %v6901_v37 }
 0x186   : > { %1481 = vrot.lane.b32.xlu0 %v1475_v6, %s6119_s18  ;;  %v205_v6 = vmul.f32 0.5, %v6972_v8 }
 0x187   : > { %v6933_v28 = vpop.permute.xlu1 %999 }
 0x188   : > { %10424 = vst [vmem:[#allocation18_spill] sm:$0xff] %v6933_v28  ;;  %v6935_v61 = vpop.permute.xlu0 %997  ;;  %v217_v39 = vadd.f32 1.0, %v205_v6 }
 0x189   : > { %10425 = vst [vmem:[#allocation19_spill] sm:$0xff] %v6935_v61  ;;  %1501 = vrot.lane.b32.xlu1 %v1495_v12, %s6119_s18  ;;  %v1554_v12 = vstv %s5498_s0  ;;  %s5523_s0 = sld [smem:[#allocation5 + $0x80]] }
 0x18a   : > { %1485 = vrot.lane.b32.xlu0 %v1477_v19, %s6119_s18  ;;  %v6985_v19 = vand.u32 2147483647, %v6967_v50  ;;  %5885 = vrcp.f32 %v217_v39  ;;  %v1555_v48 = vmul.f32 %v1554_v12, %v6891_v43 }
 0x18b   : > { %v6941_v52 = vpop.permute.xlu1 %1052 }
 0x18c   : > { %10426 = vst [vmem:[#allocation20_spill] sm:$0xff] %v6941_v52  ;;  %v6943_v17 = vpop.permute.xlu0 %1050 }
 0x18d   : > { %10427 = vst [vmem:[#allocation21_spill] sm:$0xff] %v6943_v17  ;;  %1505 = vrot.lane.b32.xlu1 %v1497_v26, %s6119_s18  ;;  %v6988_v26 = vmul.f32 0.70710677, %v6977_v10 }
 0x18e   : > { %1503 = vrot.lane.b32.xlu0 %v1496_v18, %s6119_s18 }
 0x18f   : > { %v6949_v59 = vpop.permute.xlu1 %1070  ;;  %vm542_vm13 = vcmp.ge.f32.partialorder %v6988_v26, 0.0 }
 0x190   : > { %10428 = vst [vmem:[#allocation22_spill] sm:$0xff] %v6949_v59  ;;  %v6951_v46 = vpop.permute.xlu0 %1054 }
 0x191   : > { %10429 = vst [vmem:[#allocation23_spill] sm:$0xff] %v6951_v46  ;;  %1523 = vrot.lane.b32.xlu1 %v1516_v7, %s6120_s23 }
 0x192   : > { %1521 = vrot.lane.b32.xlu0 %v1515_v44, %s6120_s23  ;;  %v204_v44 = vmul.f32 0.5, %v6985_v19 }
 0x193   : > { %v6969_v34 = vpop.permute.xlu1 %1074 }
 0x194   : > { %10430 = vst [vmem:[#allocation24_spill] sm:$0xff] %v6969_v34  ;;  %v6974_v55 = vpop.permute.xlu0 %1072  ;;  %v7000_v34 = vand.u32 2147483647, %v6988_v26 }
 0x195   : > { %10431 = vst [vmem:[#allocation25_spill] sm:$0xff] %v6974_v55  ;;  %1541 = vrot.lane.b32.xlu1 %v1535_v54, %s6120_s23  ;;  %v1556_v54 = vmul.f32 %v1554_v12, %v6887_v42  ;;  %v216_v55 = vadd.f32 1.0, %v204_v44 }
 0x196   : > { %1525 = vrot.lane.b32.xlu0 %v1517_v63, %s6120_s23  ;;  %v1574_v63 = vstv %s5499_s12  ;;  %v206_v39 = vmul.f32 0.5, %v7000_v34  ;;  %s5528_s12 = sld [smem:[#allocation5 + $0x16]] }
 0x197   : > { %v6990_v18 = vpop.permute.xlu1 %1092  ;;  %5887 = vrcp.f32 %v216_v55  ;;  %v1577_v55 = vmul.f32 %v1574_v63, %v6901_v37 }
 0x198   : > { %10432 = vst [vmem:[#allocation26_spill] sm:$0xff] %v6990_v18  ;;  %v6992_v7 = vpop.permute.xlu0 %1090  ;;  %v218_v18 = vadd.f32 1.0, %v206_v39 }
 0x199   : > { %10433 = vst [vmem:[#allocation27_spill] sm:$0xff] %v6992_v7  ;;  %1545 = vrot.lane.b32.xlu1 %v1537_v27, %s6120_s23  ;;  %v1575_v27 = vmul.f32 %v1574_v63, %v6891_v43  ;;  %v1576_v43 = vmul.f32 %v1574_v63, %v6887_v42  ;;  %v1649_v63 = vstv %s5505_s14  ;;  %s5530_s14 = sld [smem:[#allocation5 + $0x5e]] }
 0x19a   : > { %1543 = vrot.lane.b32.xlu0 %v1536_v35, %s6120_s23  ;;  %v1557_v35 = vmul.f32 %v1554_v12, %v6901_v37  ;;  %5889 = vrcp.f32 %v218_v18 }
 0x19b   : > { %v7002_v6 = vpop.permute.xlu1 %1110 }
 0x19c   : > { %10434 = vst [vmem:[#allocation28_spill] sm:$0xff] %v7002_v6  ;;  %v7004_v7 = vpop.permute.xlu0 %1094  ;;  %v7038_v6 = vld [vmem:[#allocation2 + $0x2a] sm:$0x3] }
 0x19d   : > { %10435 = vst [vmem:[#allocation29_spill] sm:$0xff] %v7004_v7  ;;  %1563 = vrot.lane.b32.xlu1 %v1556_v54, %s6120_s23  ;;  %v7019_v54 = vld [vmem:[#allocation2 + $0x22] sm:$0xff]  ;;  %v7021_v7 = vpop.eup %5885 }
 0x19e   : > { %1561 = vrot.lane.b32.xlu0 %v1555_v48, %s6120_s23  ;;  %v1629_v48 = vstv %s5504_s13  ;;  %s5529_s13 = sld [smem:[#allocation5 + $0x3a]] }
 0x19f   : > { %v7011_v44 = vpop.permute.xlu1 %1114  ;;  %v1631_v37 = vmul.f32 %v1629_v48, %v7019_v54  ;;  %v1632_v17 = vmul.f32 %v1629_v48, %v7038_v6 }
 0x1a0   : > { %10436 = vst [vmem:[#allocation30_spill] sm:$0xff] %v7011_v44  ;;  %v7013_v46 = vpop.permute.xlu0 %1112  ;;  %v7025_v44 = vld [vmem:[#allocation2 + $0x1a] sm:$0xff] }
 0x1a1   : > { %10437 = vst [vmem:[#allocation31_spill] sm:$0xff] %v7013_v46  ;;  %1581 = vrot.lane.b32.xlu1 %v1575_v27, %s6120_s23  ;;  %v253_v27 = vmul.f32 0.17087276, %v7021_v7  ;;  %v7032_v18 = vpop.eup %5887  ;;  %v1630_v42 = vmul.f32 %v1629_v48, %v7025_v44  ;;  %v1650_v59 = vmul.f32 %v1649_v63, %v7025_v44  ;;  %v1651_v48 = vmul.f32 %v1649_v63, %v7019_v54 }
 0x1a2   : > { %1565 = vrot.lane.b32.xlu0 %v1557_v35, %s6120_s23 }
 0x1a3   : > { %v7023_v12 = vpop.permute.xlu1 %1132  ;;  %v265_v35 = vadd.f32 -0.82215226, %v253_v27 }
 0x1a4   : > { %10438 = vst [vmem:[#allocation32_spill] sm:$0xff] %v7023_v12  ;;  %v7027_v39 = vpop.permute.xlu0 %1130 }
 0x1a5   : > { %10439 = vst [vmem:[#allocation33_spill] sm:$0xff] %v7027_v39  ;;  %1585 = vrot.lane.b32.xlu1 %v1577_v55, %s6120_s23  ;;  %v252_v39 = vmul.f32 0.17087276, %v7032_v18  ;;  %v277_v55 = vmul.f32 %v7021_v7, %v265_v35 }
 0x1a6   : > { %1583 = vrot.lane.b32.xlu0 %v1576_v43, %s6120_s23 }
 0x1a7   : > { %v7036_v46 = vpop.permute.xlu1 %1150  ;;  %v264_v43 = vadd.f32 -0.82215226, %v252_v39  ;;  %v289_v27 = vadd.f32 1.4885159, %v277_v55  ;;  %v1652_v39 = vmul.f32 %v1649_v63, %v7038_v6  ;;  %v1669_v55 = vstv %s5506_s15  ;;  %s5531_s15 = sld [smem:[#allocation5 + $0x82]] }
 0x1a8   : > { %10440 = vst [vmem:[#allocation34_spill] sm:$0xff] %v7036_v46  ;;  %v7041_v12 = vpop.permute.xlu0 %1134  ;;  %v7048_v46 = vpop.eup %5889  ;;  %v1670_v63 = vmul.f32 %v1669_v55, %v7025_v44 }
 0x1a9   : > { %10441 = vst [vmem:[#allocation35_spill] sm:$0xff] %v7041_v12  ;;  %1638 = vrot.lane.b32.xlu1 %v1631_v37, %s6119_s18  ;;  %v276_v61 = vmul.f32 %v7032_v18, %v264_v43  ;;  %v301_v35 = vmul.f32 %v7021_v7, %v289_v27 }
 0x1aa   : > { %1636 = vrot.lane.b32.xlu0 %v1630_v42, %s6119_s18  ;;  %v254_v42 = vmul.f32 0.17087276, %v7048_v46 }
 0x1ab   : > { %v7050_v52 = vpop.permute.xlu1 %1154  ;;  %v288_v37 = vadd.f32 1.4885159, %v276_v61  ;;  %v313_v28 = vadd.f32 -1.135204, %v301_v35  ;;  %v1671_v61 = vmul.f32 %v1669_v55, %v7019_v54  ;;  %v1689_v35 = vstv %s5507_s17  ;;  %s5532_s17 = sld [smem:[#allocation5 + $0x17]] }
 0x1ac   : > { %10442 = vst [vmem:[#allocation36_spill] sm:$0xff] %v7050_v52  ;;  %v7053_v12 = vpop.permute.xlu0 %1152 }
 0x1ad   : > { %10443 = vst [vmem:[#allocation37_spill] sm:$0xff] %v7053_v12  ;;  %1656 = vrot.lane.b32.xlu1 %v1650_v59, %s6119_s18  ;;  %v300_v43 = vmul.f32 %v7032_v18, %v288_v37  ;;  %v266_v12 = vadd.f32 -0.82215226, %v254_v42  ;;  %v325_v59 = vmul.f32 %v7021_v7, %v313_v28 }
 0x1ae   : > { %1640 = vrot.lane.b32.xlu0 %v1632_v17, %s6119_s18 }
 0x1af   : > { %v7061_v52 = vpop.permute.xlu1 %1172  ;;  %v312_v27 = vadd.f32 -1.135204, %v300_v43  ;;  %v278_v17 = vmul.f32 %v7048_v46, %v266_v12 }
 0x1b0   : > { %10444 = vst [vmem:[#allocation38_spill] sm:$0xff] %v7061_v52  ;;  %v7064_v31 = vpop.permute.xlu0 %1170  ;;  %v337_v52 = vadd.f32 0.27886808, %v325_v59 }
 0x1b1   : > { %10445 = vst [vmem:[#allocation39_spill] sm:$0xff] %v7064_v31  ;;  %1660 = vrot.lane.b32.xlu1 %v1652_v39, %s6119_s18  ;;  %v324_v42 = vmul.f32 %v7032_v18, %v312_v27  ;;  %v290_v31 = vadd.f32 1.4885159, %v278_v17  ;;  %v1690_v39 = vmul.f32 %v1689_v35, %v7025_v44 }
 0x1b2   : > { %1658 = vrot.lane.b32.xlu0 %v1651_v48, %s6119_s18  ;;  %v349_v12 = vmul.f32 %v7021_v7, %v337_v52  ;;  %v1672_v48 = vmul.f32 %v1669_v55, %v7038_v6  ;;  %v1691_v52 = vmul.f32 %v1689_v35, %v7019_v54  ;;  %v1709_v55 = vstv %s5508_s2  ;;  %s5533_s2 = sld [smem:[#allocation5 + $0x3b]] }
 0x1b3   : > { %v7072_v37 = vpop.permute.xlu1 %1190  ;;  %v336_v43 = vadd.f32 0.27886808, %v324_v42  ;;  %v302_v59 = vmul.f32 %v7048_v46, %v290_v31 }
 0x1b4   : > { %10446 = vst [vmem:[#allocation40_spill] sm:$0xff] %v7072_v37  ;;  %v7075_v28 = vpop.permute.xlu0 %1174  ;;  %v361_v27 = vadd.f32 -0.18628806, %v349_v12 }
 0x1b5   : > { %10447 = vst [vmem:[#allocation41_spill] sm:$0xff] %v7075_v28  ;;  %1678 = vrot.lane.b32.xlu1 %v1671_v61, %s6119_s18  ;;  %v1692_v61 = vmul.f32 %v1689_v35, %v7038_v6  ;;  %v314_v42 = vadd.f32 -1.135204, %v302_v59  ;;  %v1710_v35 = vmul.f32 %v1709_v55, %v7025_v44 }
 0x1b6   : > { %1676 = vrot.lane.b32.xlu0 %v1670_v63, %s6119_s18  ;;  %v373_v28 = vmul.f32 %v7021_v7, %v361_v27  ;;  %v348_v63 = vmul.f32 %v7032_v18, %v336_v43 }
 0x1b7   : > { %v7083_v37 = vpop.permute.xlu1 %1194  ;;  %v326_v59 = vmul.f32 %v7048_v46, %v314_v42 }
 0x1b8   : > { %10448 = vst [vmem:[#allocation42_spill] sm:$0xff] %v7083_v37  ;;  %v7085_v17 = vpop.permute.xlu0 %1192  ;;  %v385_v37 = vadd.f32 0.09678418, %v373_v28 }
 0x1b9   : > { %10449 = vst [vmem:[#allocation43_spill] sm:$0xff] %v7085_v17  ;;  %1696 = vrot.lane.b32.xlu1 %v1690_v39, %s6119_s18  ;;  %v360_v17 = vadd.f32 -0.18628806, %v348_v63  ;;  %v1711_v39 = vmul.f32 %v1709_v55, %v7019_v54 }
 0x1ba   : > { %1680 = vrot.lane.b32.xlu0 %v1672_v48, %s6119_s18  ;;  %v397_v27 = vmul.f32 %v7021_v7, %v385_v37  ;;  %v1729_v48 = vstv %s5509_s3  ;;  %s5534_s3 = sld [smem:[#allocation5 + $0x5f]] }
 0x1bb   : > { %v7093_v31 = vpop.permute.xlu1 %1248  ;;  %v372_v43 = vmul.f32 %v7032_v18, %v360_v17  ;;  %v338_v17 = vadd.f32 0.27886808, %v326_v59 }
 0x1bc   : > { %10450 = vst [vmem:[#allocation44_spill] sm:$0xff] %v7093_v31  ;;  %v7095_v12 = vpop.permute.xlu0 %1246 }
 0x1bd   : > { %10451 = vst [vmem:[#allocation45_spill] sm:$0xff] %v7095_v12  ;;  %1700 = vrot.lane.b32.xlu1 %v1692_v61, %s6119_s18  ;;  %v409_v12 = vadd.f32 0.37409195, %v397_v27  ;;  %v1730_v61 = vmul.f32 %v1729_v48, %v7025_v44  ;;  %v384_v31 = vadd.f32 0.09678418, %v372_v43  ;;  %v1731_v27 = vmul.f32 %v1729_v48, %v7019_v54 }
 0x1be   : > { %1698 = vrot.lane.b32.xlu0 %v1691_v52, %s6119_s18  ;;  %v1712_v52 = vmul.f32 %v1709_v55, %v7038_v6  ;;  %v469_v55 = vsub.f32 0.0, %v6972_v8  ;;  %v350_v59 = vmul.f32 %v7048_v46, %v338_v17 }
 0x1bf   : > { %v7104_v28 = vpop.permute.xlu1 %1266  ;;  %v421_v37 = vmul.f32 %v7021_v7, %v409_v12  ;;  %v396_v43 = vmul.f32 %v7032_v18, %v384_v31 }
 0x1c0   : > { %10452 = vst [vmem:[#allocation46_spill] sm:$0xff] %v7104_v28  ;;  %v7106_v63 = vpop.permute.xlu0 %1250  ;;  %v362_v17 = vadd.f32 -0.18628806, %v350_v59 }
 0x1c1   : > { %10453 = vst [vmem:[#allocation47_spill] sm:$0xff] %v7106_v63  ;;  %1718 = vrot.lane.b32.xlu1 %v1711_v39, %s6120_s23  ;;  %v433_v42 = vadd.f32 1.0000237, %v421_v37  ;;  %v1732_v39 = vmul.f32 %v1729_v48, %v7038_v6  ;;  %v1769_v63 = vstv %s5511_s20  ;;  %s5540_s20 = sld [smem:[#allocation5 + $0x19]] }
 0x1c2   : > { %1716 = vrot.lane.b32.xlu0 %v1710_v35, %s6120_s23  ;;  %v1749_v35 = vstv %s5510_s19  ;;  %s5535_s19 = sld [smem:[#allocation5 + $0x83]] }
 0x1c3   : > { %v7113_v62 = vpop.permute.xlu1 %1270  ;;  %v445_v12 = vmul.f32 %v7021_v7, %v433_v42  ;;  %v1751_v48 = vmul.f32 %v1749_v35, %v7019_v54  ;;  %v408_v42 = vadd.f32 0.37409195, %v396_v43  ;;  %v374_v43 = vmul.f32 %v7048_v46, %v362_v17  ;;  %v7156_v17 = vld [vmem:[#allocation2 + $0x38] sm:$0xff] }
 0x1c4   : > { %10454 = vst [vmem:[#allocation48_spill] sm:$0xff] %v7113_v62  ;;  %v7115_v28 = vpop.permute.xlu0 %1268 }
 0x1c5   : > { %10455 = vst [vmem:[#allocation49_spill] sm:$0xff] %v7115_v28  ;;  %1736 = vrot.lane.b32.xlu1 %v1730_v61, %s6120_s23  ;;  %v457_v28 = vadd.f32 -1.2655122, %v445_v12  ;;  %v481_v61 = vmul.f32 %v469_v55, %v6972_v8  ;;  %v420_v12 = vmul.f32 %v7032_v18, %v408_v42  ;;  %v1770_v55 = vmul.f32 %v1769_v63, %v7025_v44 }
 0x1c6   : > { %1720 = vrot.lane.b32.xlu0 %v1712_v52, %s6120_s23  ;;  %v1750_v52 = vmul.f32 %v1749_v35, %v7025_v44  ;;  %v1772_v44 = vmul.f32 %v1769_v63, %v7038_v6 }
 0x1c7   : > { %v7125_v37 = vpop.permute.xlu1 %1288  ;;  %v493_v31 = vadd.f32 %v481_v61, %v457_v28  ;;  %v1752_v28 = vmul.f32 %v1749_v35, %v7038_v6  ;;  %v1771_v35 = vmul.f32 %v1769_v63, %v7019_v54  ;;  %v1845_v63 = vstv %s5517_s22  ;;  %s5542_s22 = sld [smem:[#allocation5 + $0x61]] }
 0x1c8   : > { %10456 = vst [vmem:[#allocation50_spill] sm:$0xff] %v7125_v37  ;;  %v7127_v62 = vpop.permute.xlu0 %1286  ;;  %v1847_v5 = vmul.f32 %v1845_v63, %v7156_v17 }
 0x1c9   : > { %10457 = vst [vmem:[#allocation51_spill] sm:$0xff] %v7127_v62  ;;  %1740 = vrot.lane.b32.xlu1 %v1732_v39, %s6120_s23  ;;  %v468_v62 = vsub.f32 0.0, %v6985_v19  ;;  %v515_v39 = vmul.f32 1.442695, %v493_v31  ;;  %v386_v31 = vadd.f32 0.09678418, %v374_v43 }
 0x1ca   : > { %1738 = vrot.lane.b32.xlu0 %v1731_v27, %s6120_s23  ;;  %v432_v27 = vadd.f32 1.0000237, %v420_v12  ;;  %v1825_v12 = vstv %s5516_s21  ;;  %s5541_s21 = sld [smem:[#allocation5 + $0x3d]] }
 0x1cb   : > { %v7134_v29 = vpop.permute.xlu1 %1306  ;;  %5891 = vpow2.f32 %v515_v39  ;;  %v480_v42 = vmul.f32 %v468_v62, %v6985_v19  ;;  %v7160_v62 = vld [vmem:[#allocation2 + $0x30] sm:$0xff]  ;;  %v1827_v6 = vmul.f32 %v1825_v12, %v7156_v17 }
 0x1cc   : > { %10458 = vst [vmem:[#allocation52_spill] sm:$0xff] %v7134_v29  ;;  %v7138_v8 = vpop.permute.xlu0 %1290  ;;  %v444_v61 = vmul.f32 %v7032_v18, %v432_v27  ;;  %v1826_v54 = vmul.f32 %v1825_v12, %v7160_v62  ;;  %v5949_v29 = vld [vmem:[#allocation2 + $0x18] sm:$0xff] }
 0x1cd   : > { %10459 = vst [vmem:[#allocation53_spill] sm:$0xff] %v7138_v8  ;;  %1758 = vrot.lane.b32.xlu1 %v1751_v48, %s6120_s23 }
 0x1ce   : > { %1756 = vrot.lane.b32.xlu0 %v1750_v52, %s6120_s23  ;;  %v456_v48 = vadd.f32 -1.2655122, %v444_v61  ;;  %v398_v52 = vmul.f32 %v7048_v46, %v386_v31  ;;  %v7171_v31 = vld [vmem:[#allocation2 + $0x40] sm:$0x3] }
 0x1cf   : > { %v7145_v59 = vpop.permute.xlu1 %1310 }
 0x1d0   : > { %10460 = vst [vmem:[#allocation54_spill] sm:$0xff] %v7145_v59  ;;  %v7149_v8 = vpop.permute.xlu0 %1308  ;;  %v492_v19 = vadd.f32 %v480_v42, %v456_v48  ;;  %v410_v27 = vadd.f32 0.37409195, %v398_v52  ;;  %v470_v48 = vsub.f32 0.0, %v7000_v34 }
 0x1d1   : > { %10461 = vst [vmem:[#allocation55_spill] sm:$0xff] %v7149_v8  ;;  %1776 = vrot.lane.b32.xlu1 %v1770_v55, %s6120_s23  ;;  %v1828_v8 = vmul.f32 %v1825_v12, %v7171_v31  ;;  %v1865_v12 = vstv %s5518_s24  ;;  %s5543_s24 = sld [smem:[#allocation5 + $0x85]] }
 0x1d2   : > { %1760 = vrot.lane.b32.xlu0 %v1752_v28, %s6120_s23  ;;  %v513_v55 = vmul.f32 1.442695, %v492_v19  ;;  %v422_v28 = vmul.f32 %v7048_v46, %v410_v27  ;;  %v1846_v19 = vmul.f32 %v1845_v63, %v7160_v62 }
 0x1d3   : > { %v7158_v39 = vpop.permute.xlu1 %1328 }
 0x1d4   : > { %10462 = vst [vmem:[#allocation56_spill] sm:$0xff] %v7158_v39  ;;  %v7162_v43 = vpop.permute.xlu0 %1326  ;;  %5893 = vpow2.f32 %v513_v55  ;;  %v434_v42 = vadd.f32 1.0000237, %v422_v28 }
 0x1d5   : > { %10463 = vst [vmem:[#allocation57_spill] sm:$0xff] %v7162_v43  ;;  %1780 = vrot.lane.b32.xlu1 %v1772_v44, %s6120_s23  ;;  %v5892_v44 = vpop.eup %5891 }
 0x1d6   : > { %1778 = vrot.lane.b32.xlu0 %v1771_v35, %s6120_s23  ;;  %v529_v35 = vmul.f32 %v5892_v44, %v7021_v7  ;;  %v446_v27 = vmul.f32 %v7048_v46, %v434_v42  ;;  %v1848_v7 = vmul.f32 %v1845_v63, %v7171_v31 }
 0x1d7   : > { %v7169_v61 = vpop.permute.xlu1 %1346 }
 0x1d8   : > { %10464 = vst [vmem:[#allocation58_spill] sm:$0xff] %v7169_v61  ;;  %v7174_v52 = vpop.permute.xlu0 %1330  ;;  %v553_v28 = vsub.f32 1.0, %v529_v35  ;;  %v5439_v59 = vadd.f32 -1.0, %v529_v35  ;;  %v169_v61 = vmul.f32 0.5, %v6954_v23  ;;  %v458_v42 = vadd.f32 -1.2655122, %v446_v27 }
 0x1d9   : > { %10465 = vst [vmem:[#allocation59_spill] sm:$0xff] %v7174_v52  ;;  %1834 = vrot.lane.b32.xlu1 %v1827_v6, %s6119_s18  ;;  %v482_v52 = vmul.f32 %v470_v48, %v7000_v34  ;;  %v1867_v23 = vmul.f32 %v1865_v12, %v7156_v17 }
 0x1da   : > { %1832 = vrot.lane.b32.xlu0 %v1826_v54, %s6119_s18  ;;  %v577_v54 = vsel %vm541_vm11, %v553_v28, %v5439_v59  ;;  %v1885_v59 = vstv %s5519_s25  ;;  %s5544_s25 = sld [smem:[#allocation5 + $0x1a]] }
 0x1db   : > { %v7183_v55 = vpop.permute.xlu1 %1350  ;;  %v589_v44 = vadd.f32 1.0, %v577_v54  ;;  %v494_v35 = vadd.f32 %v482_v52, %v458_v42  ;;  %v1886_v28 = vmul.f32 %v1885_v59, %v7160_v62  ;;  %v1868_v54 = vmul.f32 %v1865_v12, %v7171_v31 }
 0x1dc   : > { %10466 = vst [vmem:[#allocation60_spill] sm:$0xff] %v7183_v55  ;;  %v7186_v6 = vpop.permute.xlu0 %1348  ;;  %v1888_v50 = vmul.f32 %v1885_v59, %v7171_v31 }
 0x1dd   : > { %10467 = vst [vmem:[#allocation61_spill] sm:$0xff] %v7186_v6  ;;  %1852 = vrot.lane.b32.xlu1 %v1846_v19, %s6119_s18  ;;  %v601_v48 = vmul.f32 %v589_v44, %v169_v61  ;;  %v517_v19 = vmul.f32 1.442695, %v494_v35  ;;  %v1887_v35 = vmul.f32 %v1885_v59, %v7156_v17 }
 0x1de   : > { %1836 = vrot.lane.b32.xlu0 %v1828_v8, %s6119_s18  ;;  %v5894_v6 = vpop.eup %5893  ;;  %v1866_v8 = vmul.f32 %v1865_v12, %v7160_v62 }
 0x1df   : > { %v7193_v55 = vpop.permute.xlu1 %1368  ;;  %615 = vst.msk [vmem:[#allocation2 + $0x50] sm:$0xff] %vm603_vm4, %v601_v48  ;;  %v528_v63 = vmul.f32 %v5894_v6, %v7032_v18  ;;  %5895 = vpow2.f32 %v517_v19  ;;  %v168_v18 = vmul.f32 0.5, %v6957_v4  ;;  %v1905_v48 = vstv %s5520_s4  ;;  %s5545_s4 = sld [smem:[#allocation5 + $0x3e]] }
 0x1e0   : > { %10468 = vst [vmem:[#allocation62_spill] sm:$0xff] %v7193_v55  ;;  %v7195_v34 = vpop.permute.xlu0 %1366 }
 0x1e1   : > { %10469 = vst [vmem:[#allocation63_spill] sm:$0xff] %v7195_v34  ;;  %1856 = vrot.lane.b32.xlu1 %v1848_v7, %s6119_s18  ;;  %v552_v27 = vsub.f32 1.0, %v528_v63  ;;  %v5438_v7 = vadd.f32 -1.0, %v528_v63  ;;  %v1906_v63 = vmul.f32 %v1905_v48, %v7160_v62  ;;  %v5948_v34 = vld [vmem:[#allocation2 + $0x20] sm:$0xff] }
 0x1e2   : > { %1854 = vrot.lane.b32.xlu0 %v1847_v5, %s6119_s18 }
 0x1e3   : > { %v7203_v52 = vpop.permute.xlu1 %1386  ;;  %v576_v42 = vsel %vm540_vm12, %v552_v27, %v5438_v7  ;;  %v1925_v27 = vstv %s5521_s30  ;;  %s5546_s30 = sld [smem:[#allocation5 + $0x62]] }
 0x1e4   : > { %10470 = vst [vmem:[#allocation64_spill] sm:$0xff] %v7203_v52  ;;  %v7205_v61 = vpop.permute.xlu0 %1370  ;;  %v588_v44 = vadd.f32 1.0, %v576_v42  ;;  %v1926_v42 = vmul.f32 %v1925_v27, %v7160_v62 }
 0x1e5   : > { %10471 = vst [vmem:[#allocation65_spill] sm:$0xff] %v7205_v61  ;;  %1874 = vrot.lane.b32.xlu1 %v1867_v23, %s6119_s18 }
 0x1e6   : > { %1872 = vrot.lane.b32.xlu0 %v1866_v8, %s6119_s18  ;;  %v600_v23 = vmul.f32 %v588_v44, %v168_v18  ;;  %v1907_v8 = vmul.f32 %v1905_v48, %v7156_v17  ;;  %v170_v44 = vmul.f32 0.5, %v6977_v10  ;;  %v1927_v10 = vmul.f32 %v1925_v27, %v7156_v17 }
 0x1e7   : > { %v7213_v6 = vpop.permute.xlu1 %1390 }
 0x1e8   : > { %10472 = vst [vmem:[#allocation66_spill] sm:$0xff] %v7213_v6  ;;  %v7215_v5 = vpop.permute.xlu0 %1388  ;;  %614 = vst.msk [vmem:[#allocation2 + $0x48] sm:$0xff] %vm603_vm4, %v600_v23  ;;  %vm3102_vm4 = vcmask 146432  }
 0x1e9   : > { %10473 = vst [vmem:[#allocation67_spill] sm:$0xff] %v7215_v5  ;;  %1892 = vrot.lane.b32.xlu1 %v1886_v28, %s6119_s18  ;;  %v5896_v4 = vpop.eup %5895 }
 0x1ea   : > { %1876 = vrot.lane.b32.xlu0 %v1868_v54, %s6119_s18  ;;  %v530_v59 = vmul.f32 %v5896_v4, %v7048_v46  ;;  %v1928_v4 = vmul.f32 %v1925_v27, %v7171_v31 }
 0x1eb   : > { %v7221_v12 = vpop.permute.xlu1 %1443 }
 0x1ec   : > { %10474 = vst [vmem:[#allocation68_spill] sm:$0xff] %v7221_v12  ;;  %v7223_v19 = vpop.permute.xlu0 %1441  ;;  %v554_v54 = vsub.f32 1.0, %v530_v59  ;;  %v5440_v18 = vadd.f32 -1.0, %v530_v59  ;;  %v1945_v59 = vstv %s5522_s9  ;;  %s5547_s9 = sld [smem:[#allocation5 + $0x86]] }
 0x1ed   : > { %10475 = vst [vmem:[#allocation69_spill] sm:$0xff] %v7223_v19  ;;  %1896 = vrot.lane.b32.xlu1 %v1888_v50, %s6119_s18  ;;  %v1908_v50 = vmul.f32 %v1905_v48, %v7171_v31 }
 0x1ee   : > { %1894 = vrot.lane.b32.xlu0 %v1887_v35, %s6119_s18  ;;  %v578_v46 = vsel %vm542_vm13, %v554_v54, %v5440_v18  ;;  %v1947_v54 = vmul.f32 %v1945_v59, %v7156_v17  ;;  %v1946_v18 = vmul.f32 %v1945_v59, %v7160_v62 }
 0x1ef   : > { %v7231_v28 = vpop.permute.xlu1 %1461  ;;  %v590_v23 = vadd.f32 1.0, %v578_v46  ;;  %v1948_v46 = vmul.f32 %v1945_v59, %v7171_v31 }
 0x1f0   : > { %10476 = vst [vmem:[#allocation70_spill] sm:$0xff] %v7231_v28  ;;  %v7234_v7 = vpop.permute.xlu0 %1445 }
 0x1f1   : > { %10477 = vst [vmem:[#allocation71_spill] sm:$0xff] %v7234_v7  ;;  %1914 = vrot.lane.b32.xlu1 %v1907_v8, %s6120_s23  ;;  %v602_v8 = vmul.f32 %v590_v23, %v170_v44 }
 0x1f2   : > { %1912 = vrot.lane.b32.xlu0 %v1906_v63, %s6120_s23 }
 0x1f3   : > { %v7241_v35 = vpop.permute.xlu1 %1465  ;;  %616 = vst.msk [vmem:[#allocation2 + $0x58] sm:$0xf] %vm606_vm3, %v602_v8 }
 0x1f4   : > { %10478 = vst [vmem:[#allocation72_spill] sm:$0xff] %v7241_v35  ;;  %v7243_v26 = vpop.permute.xlu0 %1463  ;;  %v5947_v35 = vld [vmem:[#allocation2 + $0x12] sm:$0x3] }
 0x1f5   : > { %10479 = vst [vmem:[#allocation73_spill] sm:$0xff] %v7243_v26  ;;  %1932 = vrot.lane.b32.xlu1 %v1926_v42, %s6120_s23  ;;  %v1965_v42 = vstv %s5523_s0  ;;  %s5552_s0 = sld [smem:[#allocation5 + $0x1c]] }
 0x1f6   : > { %1916 = vrot.lane.b32.xlu0 %v1908_v50, %s6120_s23  ;;  %v1966_v50 = vmul.f32 %v1965_v42, %v7160_v62  ;;  %v1968_v8 = vmul.f32 %v1965_v42, %v7171_v31  ;;  %v2020_v62 = vstv %s5528_s12  ;;  %s5553_s12 = sld [smem:[#allocation5 + $0x40]] }
 0x1f7   : > { %v7249_v63 = vpop.permute.xlu1 %1483 }
 0x1f8   : > { %10480 = vst [vmem:[#allocation74_spill] sm:$0xff] %v7249_v63  ;;  %v7252_v48 = vpop.permute.xlu0 %1481 }
 0x1f9   : > { %10481 = vst [vmem:[#allocation75_spill] sm:$0xff] %v7252_v48  ;;  %1936 = vrot.lane.b32.xlu1 %v1928_v4, %s6120_s23 }
 0x1fa   : > { %1934 = vrot.lane.b32.xlu0 %v1927_v10, %s6120_s23  ;;  %v1967_v10 = vmul.f32 %v1965_v42, %v7156_v17  ;;  %v7288_v42 = vld [vmem:[#allocation2 + $0x41] sm:$0x3] }
 0x1fb   : > { %v7258_v44 = vpop.permute.xlu1 %1501 }
 0x1fc   : > { %10482 = vst [vmem:[#allocation76_spill] sm:$0xff] %v7258_v44  ;;  %v7260_v27 = vpop.permute.xlu0 %1485 }
 0x1fd   : > { %10483 = vst [vmem:[#allocation77_spill] sm:$0xff] %v7260_v27  ;;  %1954 = vrot.lane.b32.xlu1 %v1947_v54, %s6120_s23  ;;  %v7274_v54 = vld [vmem:[#allocation2 + $0x39] sm:$0xff] }
 0x1fe   : > { %1952 = vrot.lane.b32.xlu0 %v1946_v18, %s6120_s23  ;;  %v7278_v18 = vld [vmem:[#allocation2 + $0x31] sm:$0xff] }
 0x1ff   : > { %v7266_v23 = vpop.permute.xlu1 %1505  ;;  %v2021_v31 = vmul.f32 %v2020_v62, %v7278_v18 }
 0x200   : > { %10484 = vst [vmem:[#allocation78_spill] sm:$0xff] %v7266_v23  ;;  %v7268_v4 = vpop.permute.xlu0 %1503 }
 0x201   : > { %10485 = vst [vmem:[#allocation79_spill] sm:$0xff] %v7268_v4  ;;  %1972 = vrot.lane.b32.xlu1 %v1966_v50, %s6120_s23  ;;  %v2022_v4 = vmul.f32 %v2020_v62, %v7274_v54  ;;  %v2040_v50 = vstv %s5529_s13  ;;  %s5554_s13 = sld [smem:[#allocation5 + $0x64]] }
 0x202   : > { %1956 = vrot.lane.b32.xlu0 %v1948_v46, %s6120_s23  ;;  %v2041_v23 = vmul.f32 %v2040_v50, %v7278_v18 }
 0x203   : > { %v7276_v27 = vpop.permute.xlu1 %1523 }
 0x204   : > { %10486 = vst [vmem:[#allocation80_spill] sm:$0xff] %v7276_v27  ;;  %v7280_v59 = vpop.permute.xlu0 %1521 }
 0x205   : > { %10487 = vst [vmem:[#allocation81_spill] sm:$0xff] %v7280_v59  ;;  %1976 = vrot.lane.b32.xlu1 %v1968_v8, %s6120_s23  ;;  %v2023_v8 = vmul.f32 %v2020_v62, %v7288_v42 }
 0x206   : > { %1974 = vrot.lane.b32.xlu0 %v1967_v10, %s6120_s23 }
 0x207   : > { %v7286_v17 = vpop.permute.xlu1 %1541 }
 0x208   : > { %10488 = vst [vmem:[#allocation82_spill] sm:$0xff] %v7286_v17  ;;  %v7290_v46 = vpop.permute.xlu0 %1525  ;;  %v2043_v17 = vmul.f32 %v2040_v50, %v7288_v42 }
 0x209   : > { %10489 = vst [vmem:[#allocation83_spill] sm:$0xff] %v7290_v46  ;;  %2029 = vrot.lane.b32.xlu1 %v2022_v4, %s6119_s18  ;;  %v2042_v46 = vmul.f32 %v2040_v50, %v7274_v54  ;;  %v2060_v4 = vstv %s5530_s14  ;;  %s5555_s14 = sld [smem:[#allocation5 + $0x88]] }
 0x20a   : > { %2027 = vrot.lane.b32.xlu0 %v2021_v31, %s6119_s18  ;;  %v2062_v62 = vmul.f32 %v2060_v4, %v7274_v54  ;;  %v2061_v31 = vmul.f32 %v2060_v4, %v7278_v18 }
 0x20b   : > { %v7296_v10 = vpop.permute.xlu1 %1545 }
 0x20c   : > { %10490 = vst [vmem:[#allocation84_spill] sm:$0xff] %v7296_v10  ;;  %v7298_v44 = vpop.permute.xlu0 %1543 }
 0x20d   : > { %10491 = vst [vmem:[#allocation85_spill] sm:$0xff] %v7298_v44  ;;  %2047 = vrot.lane.b32.xlu1 %v2041_v23, %s6119_s18  ;;  %v2080_v23 = vstv %s5531_s15  ;;  %s5556_s15 = sld [smem:[#allocation5 + $0x1d]] }
 0x20e   : > { %2031 = vrot.lane.b32.xlu0 %v2023_v8, %s6119_s18  ;;  %v2081_v50 = vmul.f32 %v2080_v23, %v7278_v18 }
 0x20f   : > { %v7304_v59 = vpop.permute.xlu1 %1563 }
 0x210   : > { %10492 = vst [vmem:[#allocation86_spill] sm:$0xff] %v7304_v59  ;;  %v7306_v27 = vpop.permute.xlu0 %1561  ;;  %v2083_v59 = vmul.f32 %v2080_v23, %v7288_v42 }
 0x211   : > { %10493 = vst [vmem:[#allocation87_spill] sm:$0xff] %v7306_v27  ;;  %2051 = vrot.lane.b32.xlu1 %v2043_v17, %s6119_s18  ;;  %v2063_v17 = vmul.f32 %v2060_v4, %v7288_v42 }
 0x212   : > { %2049 = vrot.lane.b32.xlu0 %v2042_v46, %s6119_s18 }
 0x213   : > { %v7312_v44 = vpop.permute.xlu1 %1581 }
 0x214   : > { %10494 = vst [vmem:[#allocation88_spill] sm:$0xff] %v7312_v44  ;;  %v7314_v8 = vpop.permute.xlu0 %1565 }
 0x215   : > { %10495 = vst [vmem:[#allocation89_spill] sm:$0xff] %v7314_v8  ;;  %2069 = vrot.lane.b32.xlu1 %v2062_v62, %s6119_s18  ;;  %v2082_v8 = vmul.f32 %v2080_v23, %v7274_v54  ;;  %v2100_v62 = vstv %s5532_s17  ;;  %s5557_s17 = sld [smem:[#allocation5 + $0x41]] }
 0x216   : > { %2067 = vrot.lane.b32.xlu0 %v2061_v31, %s6119_s18  ;;  %v2102_v4 = vmul.f32 %v2100_v62, %v7274_v54  ;;  %v2101_v31 = vmul.f32 %v2100_v62, %v7278_v18 }
 0x217   : > { %v7320_v27 = vpop.permute.xlu1 %1585 }
 0x218   : > { %10496 = vst [vmem:[#allocation90_spill] sm:$0xff] %v7320_v27  ;;  %v7322_v46 = vpop.permute.xlu0 %1583 }
 0x219   : > { %10497 = vst [vmem:[#allocation91_spill] sm:$0xff] %v7322_v46  ;;  %2087 = vrot.lane.b32.xlu1 %v2081_v50, %s6119_s18  ;;  %v2120_v50 = vstv %s5533_s2  ;;  %s5558_s2 = sld [smem:[#allocation5 + $0x65]] }
 0x21a   : > { %2071 = vrot.lane.b32.xlu0 %v2063_v17, %s6119_s18  ;;  %v2121_v23 = vmul.f32 %v2120_v50, %v7278_v18 }
 0x21b   : > { %v7328_v44 = vpop.permute.xlu1 %1638 }
 0x21c   : > { %10498 = vst [vmem:[#allocation92_spill] sm:$0xff] %v7328_v44  ;;  %v7330_v10 = vpop.permute.xlu0 %1636  ;;  %v2123_v44 = vmul.f32 %v2120_v50, %v7288_v42 }
 0x21d   : > { %10499 = vst [vmem:[#allocation93_spill] sm:$0xff] %v7330_v10  ;;  %2091 = vrot.lane.b32.xlu1 %v2083_v59, %s6119_s18  ;;  %v2103_v59 = vmul.f32 %v2100_v62, %v7288_v42 }
 0x21e   : > { %2089 = vrot.lane.b32.xlu0 %v2082_v8, %s6119_s18 }
 0x21f   : > { %v7336_v46 = vpop.permute.xlu1 %1656 }
 0x220   : > { %10500 = vst [vmem:[#allocation94_spill] sm:$0xff] %v7336_v46  ;;  %v7338_v17 = vpop.permute.xlu0 %1640 }
 0x221   : > { %10501 = vst [vmem:[#allocation95_spill] sm:$0xff] %v7338_v17  ;;  %2109 = vrot.lane.b32.xlu1 %v2102_v4, %s6120_s23  ;;  %v2122_v17 = vmul.f32 %v2120_v50, %v7274_v54  ;;  %v2140_v4 = vstv %s5534_s3  ;;  %s5559_s3 = sld [smem:[#allocation5 + $0x89]] }
 0x222   : > { %2107 = vrot.lane.b32.xlu0 %v2101_v31, %s6120_s23  ;;  %v2142_v62 = vmul.f32 %v2140_v4, %v7274_v54  ;;  %v2141_v31 = vmul.f32 %v2140_v4, %v7278_v18 }
 0x223   : > { %v7344_v10 = vpop.permute.xlu1 %1660 }
 0x224   : > { %10502 = vst [vmem:[#allocation96_spill] sm:$0xff] %v7344_v10  ;;  %v7346_v8 = vpop.permute.xlu0 %1658 }
 0x225   : > { %10503 = vst [vmem:[#allocation97_spill] sm:$0xff] %v7346_v8  ;;  %2127 = vrot.lane.b32.xlu1 %v2121_v23, %s6120_s23  ;;  %v2160_v23 = vstv %s5535_s19  ;;  %s5564_s19 = sld [smem:[#allocation5 + $0x1f]] }
 0x226   : > { %2111 = vrot.lane.b32.xlu0 %v2103_v59, %s6120_s23  ;;  %v2161_v50 = vmul.f32 %v2160_v23, %v7278_v18  ;;  %v2215_v18 = vstv %s5540_s20  ;;  %s5565_s20 = sld [smem:[#allocation5 + $0x43]] }
 0x227   : > { %v7352_v46 = vpop.permute.xlu1 %1678 }
 0x228   : > { %10504 = vst [vmem:[#allocation98_spill] sm:$0xff] %v7352_v46  ;;  %v7354_v27 = vpop.permute.xlu0 %1676  ;;  %v2163_v46 = vmul.f32 %v2160_v23, %v7288_v42 }
 0x229   : > { %10505 = vst [vmem:[#allocation99_spill] sm:$0xff] %v7354_v27  ;;  %2131 = vrot.lane.b32.xlu1 %v2123_v44, %s6120_s23  ;;  %v2143_v44 = vmul.f32 %v2140_v4, %v7288_v42 }
 0x22a   : > { %2129 = vrot.lane.b32.xlu0 %v2122_v17, %s6120_s23 }
 0x22b   : > { %v7360_v8 = vpop.permute.xlu1 %1696 }
 0x22c   : > { %10506 = vst [vmem:[#allocation100_spill] sm:$0xff] %v7360_v8  ;;  %v7362_v59 = vpop.permute.xlu0 %1680 }
 0x22d   : > { %10507 = vst [vmem:[#allocation101_spill] sm:$0xff] %v7362_v59  ;;  %2149 = vrot.lane.b32.xlu1 %v2142_v62, %s6120_s23  ;;  %v2162_v59 = vmul.f32 %v2160_v23, %v7274_v54  ;;  %v7376_v62 = vld [vmem:[#allocation2 + $0x3a] sm:$0xff]  ;;  %v7390_v23 = vld [vmem:[#allocation2 + $0x42] sm:$0x3] }
 0x22e   : > { %2147 = vrot.lane.b32.xlu0 %v2141_v31, %s6120_s23  ;;  %v7380_v31 = vld [vmem:[#allocation2 + $0x32] sm:$0xff] }
 0x22f   : > { %v7368_v27 = vpop.permute.xlu1 %1700  ;;  %v2216_v42 = vmul.f32 %v2215_v18, %v7380_v31 }
 0x230   : > { %10508 = vst [vmem:[#allocation102_spill] sm:$0xff] %v7368_v27  ;;  %v7370_v17 = vpop.permute.xlu0 %1698 }
 0x231   : > { %10509 = vst [vmem:[#allocation103_spill] sm:$0xff] %v7370_v17  ;;  %2167 = vrot.lane.b32.xlu1 %v2161_v50, %s6120_s23  ;;  %v2217_v17 = vmul.f32 %v2215_v18, %v7376_v62  ;;  %v2235_v50 = vstv %s5541_s21  ;;  %s5566_s21 = sld [smem:[#allocation5 + $0x67]] }
 0x232   : > { %2151 = vrot.lane.b32.xlu0 %v2143_v44, %s6120_s23  ;;  %v2236_v27 = vmul.f32 %v2235_v50, %v7380_v31 }
 0x233   : > { %v7378_v8 = vpop.permute.xlu1 %1718 }
 0x234   : > { %10510 = vst [vmem:[#allocation104_spill] sm:$0xff] %v7378_v8  ;;  %v7382_v4 = vpop.permute.xlu0 %1716 }
 0x235   : > { %10511 = vst [vmem:[#allocation105_spill] sm:$0xff] %v7382_v4  ;;  %2171 = vrot.lane.b32.xlu1 %v2163_v46, %s6120_s23  ;;  %v2218_v46 = vmul.f32 %v2215_v18, %v7390_v23 }
 0x236   : > { %2169 = vrot.lane.b32.xlu0 %v2162_v59, %s6120_s23 }
 0x237   : > { %v7388_v54 = vpop.permute.xlu1 %1736 }
 0x238   : > { %10512 = vst [vmem:[#allocation106_spill] sm:$0xff] %v7388_v54  ;;  %v7392_v44 = vpop.permute.xlu0 %1720  ;;  %v2238_v54 = vmul.f32 %v2235_v50, %v7390_v23 }
 0x239   : > { %10513 = vst [vmem:[#allocation107_spill] sm:$0xff] %v7392_v44  ;;  %2224 = vrot.lane.b32.xlu1 %v2217_v17, %s6119_s18  ;;  %v2237_v44 = vmul.f32 %v2235_v50, %v7376_v62  ;;  %v2255_v17 = vstv %s5542_s22  ;;  %s5567_s22 = sld [smem:[#allocation5 + $0x8b]] }
 0x23a   : > { %2222 = vrot.lane.b32.xlu0 %v2216_v42, %s6119_s18  ;;  %v2257_v18 = vmul.f32 %v2255_v17, %v7376_v62  ;;  %v2256_v42 = vmul.f32 %v2255_v17, %v7380_v31 }
 0x23b   : > { %v7398_v59 = vpop.permute.xlu1 %1740 }
 0x23c   : > { %10514 = vst [vmem:[#allocation108_spill] sm:$0xff] %v7398_v59  ;;  %v7400_v4 = vpop.permute.xlu0 %1738 }
 0x23d   : > { %10515 = vst [vmem:[#allocation109_spill] sm:$0xff] %v7400_v4  ;;  %2242 = vrot.lane.b32.xlu1 %v2236_v27, %s6119_s18  ;;  %v2275_v27 = vstv %s5543_s24  ;;  %s5568_s24 = sld [smem:[#allocation5 + $0x20]] }
 0x23e   : > { %2226 = vrot.lane.b32.xlu0 %v2218_v46, %s6119_s18  ;;  %v2276_v50 = vmul.f32 %v2275_v27, %v7380_v31 }
 0x23f   : > { %v7406_v8 = vpop.permute.xlu1 %1758 }
 0x240   : > { %10516 = vst [vmem:[#allocation110_spill] sm:$0xff] %v7406_v8  ;;  %v7408_v10 = vpop.permute.xlu0 %1756  ;;  %v2278_v8 = vmul.f32 %v2275_v27, %v7390_v23 }
 0x241   : > { %10517 = vst [vmem:[#allocation111_spill] sm:$0xff] %v7408_v10  ;;  %2246 = vrot.lane.b32.xlu1 %v2238_v54, %s6119_s18  ;;  %v2258_v54 = vmul.f32 %v2255_v17, %v7390_v23 }
 0x242   : > { %2244 = vrot.lane.b32.xlu0 %v2237_v44, %s6119_s18 }
 0x243   : > { %v7414_v4 = vpop.permute.xlu1 %1776 }
 0x244   : > { %10518 = vst [vmem:[#allocation112_spill] sm:$0xff] %v7414_v4  ;;  %v7416_v46 = vpop.permute.xlu0 %1760 }
 0x245   : > { %10519 = vst [vmem:[#allocation113_spill] sm:$0xff] %v7416_v46  ;;  %2264 = vrot.lane.b32.xlu1 %v2257_v18, %s6119_s18  ;;  %v2277_v46 = vmul.f32 %v2275_v27, %v7376_v62  ;;  %v2295_v18 = vstv %s5544_s25  ;;  %s5569_s25 = sld [smem:[#allocation5 + $0x44]] }
 0x246   : > { %2262 = vrot.lane.b32.xlu0 %v2256_v42, %s6119_s18  ;;  %v2297_v17 = vmul.f32 %v2295_v18, %v7376_v62  ;;  %v2296_v42 = vmul.f32 %v2295_v18, %v7380_v31 }
 0x247   : > { %v7422_v10 = vpop.permute.xlu1 %1780 }
 0x248   : > { %10520 = vst [vmem:[#allocation114_spill] sm:$0xff] %v7422_v10  ;;  %v7424_v44 = vpop.permute.xlu0 %1778 }
 0x249   : > { %10521 = vst [vmem:[#allocation115_spill] sm:$0xff] %v7424_v44  ;;  %2282 = vrot.lane.b32.xlu1 %v2276_v50, %s6119_s18  ;;  %v2315_v50 = vstv %s5545_s4  ;;  %s5570_s4 = sld [smem:[#allocation5 + $0x68]] }
 0x24a   : > { %2266 = vrot.lane.b32.xlu0 %v2258_v54, %s6119_s18  ;;  %v2316_v27 = vmul.f32 %v2315_v50, %v7380_v31 }
 0x24b   : > { %v7430_v4 = vpop.permute.xlu1 %1834 }
 0x24c   : > { %10522 = vst [vmem:[#allocation116_spill] sm:$0xff] %v7430_v4  ;;  %v7432_v59 = vpop.permute.xlu0 %1832  ;;  %v2318_v4 = vmul.f32 %v2315_v50, %v7390_v23 }
 0x24d   : > { %10523 = vst [vmem:[#allocation117_spill] sm:$0xff] %v7432_v59  ;;  %2286 = vrot.lane.b32.xlu1 %v2278_v8, %s6119_s18  ;;  %v2298_v8 = vmul.f32 %v2295_v18, %v7390_v23 }
 0x24e   : > { %2284 = vrot.lane.b32.xlu0 %v2277_v46, %s6119_s18 }
 0x24f   : > { %v7438_v44 = vpop.permute.xlu1 %1852 }
 0x250   : > { %10524 = vst [vmem:[#allocation118_spill] sm:$0xff] %v7438_v44  ;;  %v7440_v54 = vpop.permute.xlu0 %1836 }
 0x251   : > { %10525 = vst [vmem:[#allocation119_spill] sm:$0xff] %v7440_v54  ;;  %2304 = vrot.lane.b32.xlu1 %v2297_v17, %s6120_s23  ;;  %v2317_v54 = vmul.f32 %v2315_v50, %v7376_v62  ;;  %v2335_v17 = vstv %s5546_s30  ;;  %s5571_s30 = sld [smem:[#allocation5 + $0x8c]] }
 0x252   : > { %2302 = vrot.lane.b32.xlu0 %v2296_v42, %s6120_s23  ;;  %v2337_v18 = vmul.f32 %v2335_v17, %v7376_v62  ;;  %v2336_v42 = vmul.f32 %v2335_v17, %v7380_v31 }
 0x253   : > { %v7446_v59 = vpop.permute.xlu1 %1856 }
 0x254   : > { %10526 = vst [vmem:[#allocation120_spill] sm:$0xff] %v7446_v59  ;;  %v7448_v46 = vpop.permute.xlu0 %1854 }
 0x255   : > { %10527 = vst [vmem:[#allocation121_spill] sm:$0xff] %v7448_v46  ;;  %2322 = vrot.lane.b32.xlu1 %v2316_v27, %s6120_s23  ;;  %v2355_v27 = vstv %s5547_s9  ;;  %s5576_s9 = sld [smem:[#allocation5 + $0x22]] }
 0x256   : > { %2306 = vrot.lane.b32.xlu0 %v2298_v8, %s6120_s23  ;;  %v2356_v50 = vmul.f32 %v2355_v27, %v7380_v31  ;;  %v2411_v31 = vstv %s5552_s0  ;;  %s5577_s0 = sld [smem:[#allocation5 + $0x46]] }
 0x257   : > { %v7454_v44 = vpop.permute.xlu1 %1874 }
 0x258   : > { %10528 = vst [vmem:[#allocation122_spill] sm:$0xff] %v7454_v44  ;;  %v7456_v10 = vpop.permute.xlu0 %1872  ;;  %v2358_v44 = vmul.f32 %v2355_v27, %v7390_v23 }
 0x259   : > { %10529 = vst [vmem:[#allocation123_spill] sm:$0xff] %v7456_v10  ;;  %2326 = vrot.lane.b32.xlu1 %v2318_v4, %s6120_s23  ;;  %v2338_v4 = vmul.f32 %v2335_v17, %v7390_v23 }
 0x25a   : > { %2324 = vrot.lane.b32.xlu0 %v2317_v54, %s6120_s23 }
 0x25b   : > { %v7462_v46 = vpop.permute.xlu1 %1892 }
 0x25c   : > { %10530 = vst [vmem:[#allocation124_spill] sm:$0xff] %v7462_v46  ;;  %v7464_v8 = vpop.permute.xlu0 %1876 }
 0x25d   : > { %10531 = vst [vmem:[#allocation125_spill] sm:$0xff] %v7464_v8  ;;  %2344 = vrot.lane.b32.xlu1 %v2337_v18, %s6120_s23  ;;  %v2357_v8 = vmul.f32 %v2355_v27, %v7376_v62  ;;  %v7478_v18 = vld [vmem:[#allocation2 + $0x50] sm:$0xff]  ;;  %v7492_v27 = vld [vmem:[#allocation2 + $0x58] sm:$0x3] }
 0x25e   : > { %2342 = vrot.lane.b32.xlu0 %v2336_v42, %s6120_s23  ;;  %v7482_v42 = vld [vmem:[#allocation2 + $0x48] sm:$0xff] }
 0x25f   : > { %v7470_v10 = vpop.permute.xlu1 %1896  ;;  %v2412_v23 = vmul.f32 %v2411_v31, %v7482_v42 }
 0x260   : > { %10532 = vst [vmem:[#allocation126_spill] sm:$0xff] %v7470_v10  ;;  %v7472_v54 = vpop.permute.xlu0 %1894 }
 0x261   : > { %10533 = vst [vmem:[#allocation127_spill] sm:$0xff] %v7472_v54  ;;  %2362 = vrot.lane.b32.xlu1 %v2356_v50, %s6120_s23  ;;  %v2413_v54 = vmul.f32 %v2411_v31, %v7478_v18  ;;  %v2431_v50 = vstv %s5553_s12  ;;  %s5578_s12 = sld [smem:[#allocation5 + $0x6a]] }
 0x262   : > { %2346 = vrot.lane.b32.xlu0 %v2338_v4, %s6120_s23  ;;  %v2432_v10 = vmul.f32 %v2431_v50, %v7482_v42 }
 0x263   : > { %v7480_v46 = vpop.permute.xlu1 %1914 }
 0x264   : > { %10534 = vst [vmem:[#allocation128_spill] sm:$0xff] %v7480_v46  ;;  %v7484_v17 = vpop.permute.xlu0 %1912 }
 0x265   : > { %10535 = vst [vmem:[#allocation129_spill] sm:$0xff] %v7484_v17  ;;  %2366 = vrot.lane.b32.xlu1 %v2358_v44, %s6120_s23  ;;  %v2414_v44 = vmul.f32 %v2411_v31, %v7492_v27 }
 0x266   : > { %2364 = vrot.lane.b32.xlu0 %v2357_v8, %s6120_s23 }
 0x267   : > { %v7490_v62 = vpop.permute.xlu1 %1932 }
 0x268   : > { %10536 = vst [vmem:[#allocation130_spill] sm:$0xff] %v7490_v62  ;;  %v7494_v4 = vpop.permute.xlu0 %1916  ;;  %v2434_v62 = vmul.f32 %v2431_v50, %v7492_v27 }
 0x269   : > { %10537 = vst [vmem:[#allocation131_spill] sm:$0xff] %v7494_v4  ;;  %2420 = vrot.lane.b32.xlu1 %v2413_v54, %s6119_s18  ;;  %v2433_v4 = vmul.f32 %v2431_v50, %v7478_v18  ;;  %v2451_v54 = vstv %s5554_s13  ;;  %s5464_s13 = sld [smem:[#allocation5 + $0x6]] }
 0x26a   : > { %2418 = vrot.lane.b32.xlu0 %v2412_v23, %s6119_s18  ;;  %v2453_v31 = vmul.f32 %v2451_v54, %v7478_v18  ;;  %v2452_v23 = vmul.f32 %v2451_v54, %v7482_v42 }
 0x26b   : > { %v7500_v8 = vpop.permute.xlu1 %1936 }
 0x26c   : > { %10538 = vst [vmem:[#allocation132_spill] sm:$0xff] %v7500_v8  ;;  %v7502_v17 = vpop.permute.xlu0 %1934 }
 0x26d   : > { %10539 = vst [vmem:[#allocation133_spill] sm:$0xff] %v7502_v17  ;;  %2438 = vrot.lane.b32.xlu1 %v2432_v10, %s6119_s18  ;;  %v2471_v10 = vstv %s5555_s14  ;;  %s5465_s14 = sld [smem:[#allocation5 + $0x2a]] }
 0x26e   : > { %2422 = vrot.lane.b32.xlu0 %v2414_v44, %s6119_s18  ;;  %v2472_v50 = vmul.f32 %v2471_v10, %v7482_v42 }
 0x26f   : > { %v7508_v46 = vpop.permute.xlu1 %1954 }
 0x270   : > { %10540 = vst [vmem:[#allocation134_spill] sm:$0xff] %v7508_v46  ;;  %v7510_v59 = vpop.permute.xlu0 %1952  ;;  %v2474_v46 = vmul.f32 %v2471_v10, %v7492_v27 }
 0x271   : > { %10541 = vst [vmem:[#allocation135_spill] sm:$0xff] %v7510_v59  ;;  %2442 = vrot.lane.b32.xlu1 %v2434_v62, %s6119_s18  ;;  %v2454_v62 = vmul.f32 %v2451_v54, %v7492_v27 }
 0x272   : > { %2440 = vrot.lane.b32.xlu0 %v2433_v4, %s6119_s18 }
 0x273   : > { %v7516_v17 = vpop.permute.xlu1 %1972 }
 0x274   : > { %10542 = vst [vmem:[#allocation136_spill] sm:$0xff] %v7516_v17  ;;  %v7518_v44 = vpop.permute.xlu0 %1956 }
 0x275   : > { %10543 = vst [vmem:[#allocation137_spill] sm:$0xff] %v7518_v44  ;;  %2460 = vrot.lane.b32.xlu1 %v2453_v31, %s6119_s18  ;;  %v2473_v44 = vmul.f32 %v2471_v10, %v7478_v18  ;;  %v2491_v31 = vstv %s5556_s15  ;;  %s5579_s15 = sld [smem:[#allocation5 + $0x8e]] }
 0x276   : > { %2458 = vrot.lane.b32.xlu0 %v2452_v23, %s6119_s18  ;;  %v2493_v54 = vmul.f32 %v2491_v31, %v7478_v18  ;;  %v2492_v23 = vmul.f32 %v2491_v31, %v7482_v42 }
 0x277   : > { %v7524_v59 = vpop.permute.xlu1 %1976 }
 0x278   : > { %10544 = vst [vmem:[#allocation138_spill] sm:$0xff] %v7524_v59  ;;  %v7526_v4 = vpop.permute.xlu0 %1974 }
 0x279   : > { %10545 = vst [vmem:[#allocation139_spill] sm:$0xff] %v7526_v4  ;;  %2478 = vrot.lane.b32.xlu1 %v2472_v50, %s6119_s18  ;;  %v2511_v50 = vstv %s5557_s17  ;;  %s5466_s17 = sld [smem:[#allocation5 + $0x4e]] }
 0x27a   : > { %2462 = vrot.lane.b32.xlu0 %v2454_v62, %s6119_s18  ;;  %v2512_v10 = vmul.f32 %v2511_v50, %v7482_v42 }
 0x27b   : > { %v7532_v17 = vpop.permute.xlu1 %2029 }
 0x27c   : > { %10546 = vst [vmem:[#allocation140_spill] sm:$0xff] %v7532_v17  ;;  %v7534_v8 = vpop.permute.xlu0 %2027  ;;  %v2514_v17 = vmul.f32 %v2511_v50, %v7492_v27 }
 0x27d   : > { %10547 = vst [vmem:[#allocation141_spill] sm:$0xff] %v7534_v8  ;;  %2482 = vrot.lane.b32.xlu1 %v2474_v46, %s6119_s18  ;;  %v2494_v46 = vmul.f32 %v2491_v31, %v7492_v27 }
 0x27e   : > { %2480 = vrot.lane.b32.xlu0 %v2473_v44, %s6119_s18 }
 0x27f   : > { %v7540_v4 = vpop.permute.xlu1 %2047 }
 0x280   : > { %10548 = vst [vmem:[#allocation142_spill] sm:$0xff] %v7540_v4  ;;  %v7542_v62 = vpop.permute.xlu0 %2031 }
 0x281   : > { %10549 = vst [vmem:[#allocation143_spill] sm:$0xff] %v7542_v62  ;;  %2500 = vrot.lane.b32.xlu1 %v2493_v54, %s6120_s23  ;;  %v2513_v62 = vmul.f32 %v2511_v50, %v7478_v18  ;;  %v2531_v54 = vstv %s5558_s2  ;;  %s5467_s2 = sld [smem:[#allocation5 + $0x72]] }
 0x282   : > { %2498 = vrot.lane.b32.xlu0 %v2492_v23, %s6120_s23  ;;  %v2533_v31 = vmul.f32 %v2531_v54, %v7478_v18  ;;  %v2532_v23 = vmul.f32 %v2531_v54, %v7482_v42 }
 0x283   : > { %v7548_v8 = vpop.permute.xlu1 %2051 }
 0x284   : > { %10550 = vst [vmem:[#allocation144_spill] sm:$0xff] %v7548_v8  ;;  %v7550_v44 = vpop.permute.xlu0 %2049 }
 0x285   : > { %10551 = vst [vmem:[#allocation145_spill] sm:$0xff] %v7550_v44  ;;  %2518 = vrot.lane.b32.xlu1 %v2512_v10, %s6120_s23  ;;  %v2551_v10 = vstv %s5559_s3  ;;  %s7706_s3 = sld [smem:[#allocation5 + $0x9]] }
 0x286   : > { %2502 = vrot.lane.b32.xlu0 %v2494_v46, %s6120_s23  ;;  %v2552_v50 = vmul.f32 %v2551_v10, %v7482_v42  ;;  %v2606_v42 = vstv %s5564_s19  ;;  %s7710_s19 = sld [smem:[#allocation5 + $0x2d]] }
 0x287   : > { %v7556_v4 = vpop.permute.xlu1 %2069 }
 0x288   : > { %10552 = vst [vmem:[#allocation146_spill] sm:$0xff] %v7556_v4  ;;  %v7558_v59 = vpop.permute.xlu0 %2067  ;;  %v2554_v4 = vmul.f32 %v2551_v10, %v7492_v27 }
 0x289   : > { %10553 = vst [vmem:[#allocation147_spill] sm:$0xff] %v7558_v59  ;;  %2522 = vrot.lane.b32.xlu1 %v2514_v17, %s6120_s23  ;;  %v2534_v17 = vmul.f32 %v2531_v54, %v7492_v27 }
 0x28a   : > { %2520 = vrot.lane.b32.xlu0 %v2513_v62, %s6120_s23 }
 0x28b   : > { %v7564_v44 = vpop.permute.xlu1 %2087  ;;  %v1207_v7 = vstv %s7706_s3  ;;  %s7964_s3 = sld [smem:[#allocation5 + $0x36]] }
 0x28c   : > { %10554 = vst [vmem:[#allocation148_spill] sm:$0xff] %v7564_v44  ;;  %v7566_v46 = vpop.permute.xlu0 %2071  ;;  %v1215_v5 = vstv %s7710_s19  ;;  %v7774_v55 = vmul.f32 %v5948_v34, %v1207_v7  ;;  %s7986_s19 = sld [smem:[#allocation5 + $0x5a]] }
 0x28d   : > { %10555 = vst [vmem:[#allocation149_spill] sm:$0xff] %v7566_v46  ;;  %2540 = vrot.lane.b32.xlu1 %v2533_v31, %s6120_s23  ;;  %v2553_v46 = vmul.f32 %v2551_v10, %v7478_v18  ;;  %v7580_v31 = vld [vmem:[#allocation2 + $0x51] sm:$0xff]  ;;  %v7594_v10 = vld [vmem:[#allocation2 + $0x59] sm:$0x3] }
 0x28e   : > { %2538 = vrot.lane.b32.xlu0 %v2532_v23, %s6120_s23  ;;  %v7584_v23 = vld [vmem:[#allocation2 + $0x49] sm:$0xff]  ;;  %10595 = vst [vmem:[#allocation189_spill] sm:$0xff] %v7774_v55  ;;  %v7793_v55 = vmul.f32 %v5948_v34, %v1215_v5 }
 0x28f   : > { %v7572_v59 = vpop.permute.xlu1 %2091  ;;  %v2607_v27 = vmul.f32 %v2606_v42, %v7584_v23 }
 0x290   : > { %10556 = vst [vmem:[#allocation150_spill] sm:$0xff] %v7572_v59  ;;  %v7574_v62 = vpop.permute.xlu0 %2089  ;;  %10602 = vst [vmem:[#allocation196_spill] sm:$0xff] %v7793_v55 }
 0x291   : > { %10557 = vst [vmem:[#allocation151_spill] sm:$0xff] %v7574_v62  ;;  %2558 = vrot.lane.b32.xlu1 %v2552_v50, %s6120_s23  ;;  %v2608_v62 = vmul.f32 %v2606_v42, %v7580_v31  ;;  %v2626_v50 = vstv %s5565_s20  ;;  %s7718_s20 = sld [smem:[#allocation5 + $0x51]] }
 0x292   : > { %2542 = vrot.lane.b32.xlu0 %v2534_v17, %s6120_s23  ;;  %v2627_v59 = vmul.f32 %v2626_v50, %v7584_v23 }
 0x293   : > { %v7582_v44 = vpop.permute.xlu1 %2109 }
 0x294   : > { %10558 = vst [vmem:[#allocation152_spill] sm:$0xff] %v7582_v44  ;;  %v7586_v54 = vpop.permute.xlu0 %2107 }
 0x295   : > { %10559 = vst [vmem:[#allocation153_spill] sm:$0xff] %v7586_v54  ;;  %2562 = vrot.lane.b32.xlu1 %v2554_v4, %s6120_s23  ;;  %v2609_v4 = vmul.f32 %v2606_v42, %v7594_v10 }
 0x296   : > { %2560 = vrot.lane.b32.xlu0 %v2553_v46, %s6120_s23 }
 0x297   : > { %v7592_v18 = vpop.permute.xlu1 %2127  ;;  %v1223_v43 = vstv %s7718_s20  ;;  %s7995_s20 = sld [smem:[#allocation5 + $0x7e]] }
 0x298   : > { %10560 = vst [vmem:[#allocation154_spill] sm:$0xff] %v7592_v18  ;;  %v7596_v17 = vpop.permute.xlu0 %2111  ;;  %v2629_v18 = vmul.f32 %v2626_v50, %v7594_v10 }
 0x299   : > { %10561 = vst [vmem:[#allocation155_spill] sm:$0xff] %v7596_v17  ;;  %2615 = vrot.lane.b32.xlu1 %v2608_v62, %s6119_s18  ;;  %v2628_v17 = vmul.f32 %v2626_v50, %v7580_v31  ;;  %v2646_v62 = vstv %s5566_s21  ;;  %s7720_s21 = sld [smem:[#allocation5 + $0x75]] }
 0x29a   : > { %2613 = vrot.lane.b32.xlu0 %v2607_v27, %s6119_s18  ;;  %v2648_v42 = vmul.f32 %v2646_v62, %v7580_v31  ;;  %v2647_v27 = vmul.f32 %v2646_v62, %v7584_v23 }
 0x29b   : > { %v7602_v46 = vpop.permute.xlu1 %2131 }
 0x29c   : > { %10562 = vst [vmem:[#allocation156_spill] sm:$0xff] %v7602_v46  ;;  %v7604_v54 = vpop.permute.xlu0 %2129 }
 0x29d   : > { %10563 = vst [vmem:[#allocation157_spill] sm:$0xff] %v7604_v54  ;;  %2633 = vrot.lane.b32.xlu1 %v2627_v59, %s6119_s18  ;;  %v2666_v59 = vstv %s5567_s22  ;;  %s7724_s22 = sld [smem:[#allocation5 + $0xc]] }
 0x29e   : > { %2617 = vrot.lane.b32.xlu0 %v2609_v4, %s6119_s18  ;;  %v2667_v50 = vmul.f32 %v2666_v59, %v7584_v23 }
 0x29f   : > { %v7610_v44 = vpop.permute.xlu1 %2149  ;;  %v1231_v39 = vstv %s7720_s21  ;;  %s8043_s21 = sld [smem:[#allocation5 + $0x15]] }
 0x2a0   : > { %10564 = vst [vmem:[#allocation158_spill] sm:$0xff] %v7610_v44  ;;  %v7612_v8 = vpop.permute.xlu0 %2147  ;;  %v2669_v44 = vmul.f32 %v2666_v59, %v7594_v10  ;;  %v7811_v55 = vmul.f32 %v5948_v34, %v1231_v39 }
 0x2a1   : > { %10565 = vst [vmem:[#allocation159_spill] sm:$0xff] %v7612_v8  ;;  %2637 = vrot.lane.b32.xlu1 %v2629_v18, %s6119_s18  ;;  %v2649_v18 = vmul.f32 %v2646_v62, %v7594_v10 }
 0x2a2   : > { %2635 = vrot.lane.b32.xlu0 %v2628_v17, %s6119_s18 }
 0x2a3   : > { %v7618_v54 = vpop.permute.xlu1 %2167 }
 0x2a4   : > { %10566 = vst [vmem:[#allocation160_spill] sm:$0xff] %v7618_v54  ;;  %v7620_v4 = vpop.permute.xlu0 %2151 }
 0x2a5   : > { %10567 = vst [vmem:[#allocation161_spill] sm:$0xff] %v7620_v4  ;;  %2655 = vrot.lane.b32.xlu1 %v2648_v42, %s6119_s18  ;;  %v2668_v4 = vmul.f32 %v2666_v59, %v7580_v31  ;;  %v2686_v42 = vstv %s5568_s24  ;;  %s7728_s24 = sld [smem:[#allocation5 + $0x30]] }
 0x2a6   : > { %2653 = vrot.lane.b32.xlu0 %v2647_v27, %s6119_s18  ;;  %v2688_v62 = vmul.f32 %v2686_v42, %v7580_v31  ;;  %v2687_v27 = vmul.f32 %v2686_v42, %v7584_v23 }
 0x2a7   : > { %v7626_v8 = vpop.permute.xlu1 %2171 }
 0x2a8   : > { %10568 = vst [vmem:[#allocation162_spill] sm:$0xff] %v7626_v8  ;;  %v7628_v17 = vpop.permute.xlu0 %2169 }
 0x2a9   : > { %10569 = vst [vmem:[#allocation163_spill] sm:$0xff] %v7628_v17  ;;  %2673 = vrot.lane.b32.xlu1 %v2667_v50, %s6119_s18  ;;  %v2706_v50 = vstv %s5569_s25  ;;  %s7732_s25 = sld [smem:[#allocation5 + $0x23]] }
 0x2aa   : > { %2657 = vrot.lane.b32.xlu0 %v2649_v18, %s6119_s18  ;;  %v2707_v59 = vmul.f32 %v2706_v50, %v7584_v23 }
 0x2ab   : > { %v7634_v54 = vpop.permute.xlu1 %2224 }
 0x2ac   : > { %10570 = vst [vmem:[#allocation164_spill] sm:$0xff] %v7634_v54  ;;  %v7636_v46 = vpop.permute.xlu0 %2222  ;;  %v2709_v54 = vmul.f32 %v2706_v50, %v7594_v10 }
 0x2ad   : > { %10571 = vst [vmem:[#allocation165_spill] sm:$0xff] %v7636_v46  ;;  %2677 = vrot.lane.b32.xlu1 %v2669_v44, %s6119_s18  ;;  %v2689_v44 = vmul.f32 %v2686_v42, %v7594_v10 }
 0x2ae   : > { %2675 = vrot.lane.b32.xlu0 %v2668_v4, %s6119_s18 }
 0x2af   : > { %v7642_v17 = vpop.permute.xlu1 %2242 }
 0x2b0   : > { %10572 = vst [vmem:[#allocation166_spill] sm:$0xff] %v7642_v17  ;;  %v7644_v18 = vpop.permute.xlu0 %2226 }
 0x2b1   : > { %10573 = vst [vmem:[#allocation167_spill] sm:$0xff] %v7644_v18  ;;  %2695 = vrot.lane.b32.xlu1 %v2688_v62, %s6120_s23  ;;  %v2708_v18 = vmul.f32 %v2706_v50, %v7580_v31  ;;  %v2726_v62 = vstv %s5570_s4  ;;  %s7752_s4 = sld [smem:[#allocation5 + $0x54]] }
 0x2b2   : > { %2693 = vrot.lane.b32.xlu0 %v2687_v27, %s6120_s23  ;;  %v2728_v42 = vmul.f32 %v2726_v62, %v7580_v31  ;;  %v2727_v27 = vmul.f32 %v2726_v62, %v7584_v23 }
 0x2b3   : > { %v7650_v46 = vpop.permute.xlu1 %2246 }
 0x2b4   : > { %10574 = vst [vmem:[#allocation168_spill] sm:$0xff] %v7650_v46  ;;  %v7652_v4 = vpop.permute.xlu0 %2244  ;;  %v1011_v46 = vstv %s5464_s13  ;;  %s7861_s13 = sld [smem:[#allocation5 + $0x33]] }
 0x2b5   : > { %10575 = vst [vmem:[#allocation169_spill] sm:$0xff] %v7652_v4  ;;  %2713 = vrot.lane.b32.xlu1 %v2707_v59, %s6120_s23  ;;  %v2746_v59 = vstv %s5571_s30  ;;  %s7762_s30 = sld [smem:[#allocation5 + $0x78]] }
 0x2b6   : > { %2697 = vrot.lane.b32.xlu0 %v2689_v44, %s6120_s23  ;;  %v2747_v50 = vmul.f32 %v2746_v59, %v7584_v23  ;;  %v2801_v23 = vstv %s5576_s9  ;;  %s7766_s9 = sld [smem:[#allocation5 + $0x47]] }
 0x2b7   : > { %v7658_v17 = vpop.permute.xlu1 %2264 }
 0x2b8   : > { %10576 = vst [vmem:[#allocation170_spill] sm:$0xff] %v7658_v17  ;;  %v7660_v8 = vpop.permute.xlu0 %2262  ;;  %v2749_v17 = vmul.f32 %v2746_v59, %v7594_v10 }
 0x2b9   : > { %10577 = vst [vmem:[#allocation171_spill] sm:$0xff] %v7660_v8  ;;  %2717 = vrot.lane.b32.xlu1 %v2709_v54, %s6120_s23  ;;  %v2729_v54 = vmul.f32 %v2726_v62, %v7594_v10 }
 0x2ba   : > { %2715 = vrot.lane.b32.xlu0 %v2708_v18, %s6120_s23 }
 0x2bb   : > { %v7666_v4 = vpop.permute.xlu1 %2282 }
 0x2bc   : > { %10578 = vst [vmem:[#allocation172_spill] sm:$0xff] %v7666_v4  ;;  %v7668_v44 = vpop.permute.xlu0 %2266 }
 0x2bd   : > { %10579 = vst [vmem:[#allocation173_spill] sm:$0xff] %v7668_v44  ;;  %2735 = vrot.lane.b32.xlu1 %v2728_v42, %s6120_s23  ;;  %v2748_v44 = vmul.f32 %v2746_v59, %v7580_v31  ;;  %v7682_v42 = vld [vmem:[#allocation2 + $0x52] sm:$0xff]  ;;  %v7696_v59 = vld [vmem:[#allocation2 + $0x5a] sm:$0x3] }
 0x2be   : > { %2733 = vrot.lane.b32.xlu0 %v2727_v27, %s6120_s23  ;;  %v7686_v27 = vld [vmem:[#allocation2 + $0x4a] sm:$0xff] }
 0x2bf   : > { %v7674_v8 = vpop.permute.xlu1 %2286  ;;  %v2802_v10 = vmul.f32 %v2801_v23, %v7686_v27 }
 0x2c0   : > { %10580 = vst [vmem:[#allocation174_spill] sm:$0xff] %v7674_v8  ;;  %v7676_v18 = vpop.permute.xlu0 %2284 }
 0x2c1   : > { %10581 = vst [vmem:[#allocation175_spill] sm:$0xff] %v7676_v18  ;;  %2753 = vrot.lane.b32.xlu1 %v2747_v50, %s6120_s23  ;;  %v2803_v18 = vmul.f32 %v2801_v23, %v7682_v42  ;;  %v2821_v50 = vstv %s5577_s0  ;;  %s7832_s0 = sld [smem:[#allocation5 + $0x6b]] }
 0x2c2   : > { %2737 = vrot.lane.b32.xlu0 %v2729_v54, %s6120_s23 }
 0x2c3   : > { %v7684_v4 = vpop.permute.xlu1 %2304 }
 0x2c4   : > { %10582 = vst [vmem:[#allocation176_spill] sm:$0xff] %v7684_v4  ;;  %v7688_v62 = vpop.permute.xlu0 %2302  ;;  %v1035_v4 = vstv %s5467_s2  ;;  %s7954_s2 = sld [smem:[#allocation5 + $0x12]] }
 0x2c5   : > { %10583 = vst [vmem:[#allocation177_spill] sm:$0xff] %v7688_v62  ;;  %2757 = vrot.lane.b32.xlu1 %v2749_v17, %s6120_s23  ;;  %v2822_v17 = vmul.f32 %v2821_v50, %v7686_v27  ;;  %v1027_v62 = vstv %s5466_s17  ;;  %s7898_s17 = sld [smem:[#allocation5 + $0x7b]] }
 0x2c6   : > { %2755 = vrot.lane.b32.xlu0 %v2748_v44, %s6120_s23  ;;  %v2804_v44 = vmul.f32 %v2801_v23, %v7696_v59  ;;  %v2841_v23 = vstv %s5578_s12  ;;  %s7852_s12 = sld [smem:[#allocation5 + $0xf]] }
 0x2c7   : > { %v7694_v31 = vpop.permute.xlu1 %2322 }
 0x2c8   : > { %10584 = vst [vmem:[#allocation178_spill] sm:$0xff] %v7694_v31  ;;  %v7698_v54 = vpop.permute.xlu0 %2306 }
 0x2c9   : > { %10585 = vst [vmem:[#allocation179_spill] sm:$0xff] %v7698_v54  ;;  %2810 = vrot.lane.b32.xlu1 %v2803_v18, %s6119_s18  ;;  %v2824_v18 = vmul.f32 %v2821_v50, %v7696_v59 }
 0x2ca   : > { %2808 = vrot.lane.b32.xlu0 %v2802_v10, %s6119_s18  ;;  %v2823_v10 = vmul.f32 %v2821_v50, %v7682_v42  ;;  %v2842_v50 = vmul.f32 %v2841_v23, %v7686_v27 }
 0x2cb   : > { %v7704_v8 = vpop.permute.xlu1 %2326 }
 0x2cc   : > { %10586 = vst [vmem:[#allocation180_spill] sm:$0xff] %v7704_v8  ;;  %v7708_v31 = vpop.permute.xlu0 %2324 }
 0x2cd   : > { %10587 = vst [vmem:[#allocation181_spill] sm:$0xff] %v7708_v31  ;;  %2828 = vrot.lane.b32.xlu1 %v2822_v17, %s6119_s18  ;;  %v1019_v31 = vstv %s5465_s14  ;;  %v2843_v17 = vmul.f32 %v2841_v23, %v7682_v42  ;;  %s7873_s14 = sld [smem:[#allocation5 + $0x8f]] }
 0x2ce   : > { %2812 = vrot.lane.b32.xlu0 %v2804_v44, %s6119_s18  ;;  %v2861_v44 = vstv %s5579_s15  ;;  %v7747_v19 = vmul.f32 %v5947_v35, %v1019_v31  ;;  %s7889_s15 = sld [smem:[#allocation5 + $0x57]] }
 0x2cf   : > { %v7716_v54 = vpop.permute.xlu1 %2344 }
 0x2d0   : > { %10588 = vst [vmem:[#allocation182_spill] sm:$0xff] %v7716_v54  ;;  %v7722_v8 = vpop.permute.xlu0 %2342  ;;  %v5945_v54 = vld [vmem:[#allocation2 + $0xa] sm:$0xff] }
 0x2d1   : > { %10589 = vst [vmem:[#allocation183_spill] sm:$0xff] %v7722_v8  ;;  %2832 = vrot.lane.b32.xlu1 %v2824_v18, %s6119_s18  ;;  %v7734_v8 = vmul.f32 %v5945_v54, %v1011_v46  ;;  %v5946_v18 = vld [vmem:[#allocation2 + $0x2] sm:$0xff]  ;;  %v7749_v12 = vmul.f32 %v5945_v54, %v1019_v31  ;;  %v7756_v6 = vmul.f32 %v5945_v54, %v1027_v62 }
 0x2d2   : > { %2830 = vrot.lane.b32.xlu0 %v2823_v10, %s6119_s18  ;;  %v7738_v63 = vmul.f32 %v5946_v18, %v1011_v46  ;;  %v7740_v26 = vmul.f32 %v5946_v18, %v1019_v31  ;;  %v7742_v10 = vmul.f32 %v5947_v35, %v1011_v46  ;;  %v7758_v61 = vmul.f32 %v5946_v18, %v1027_v62 }
 0x2d3   : > { %v7736_v48 = vpop.permute.xlu1 %2362  ;;  %v7760_v46 = vmul.f32 %v5946_v18, %v1035_v4  ;;  %v2844_v31 = vmul.f32 %v2841_v23, %v7696_v59  ;;  %v7772_v52 = vmul.f32 %v5945_v54, %v1035_v4  ;;  %v7780_v23 = vmul.f32 %v5949_v29, %v1215_v5 }
 0x2d4   : > { %10590 = vst [vmem:[#allocation184_spill] sm:$0xff] %v7736_v48  ;;  %v7745_v28 = vpop.permute.xlu0 %2346  ;;  %v2862_v48 = vmul.f32 %v2861_v44, %v7686_v27  ;;  %v1402_v54 = vstv %s7724_s22  ;;  %s8053_s22 = sld [smem:[#allocation5 + $0x39]] }
 0x2d5   : > { %10591 = vst [vmem:[#allocation185_spill] sm:$0xff] %v7745_v28  ;;  %2850 = vrot.lane.b32.xlu1 %v2843_v17, %s6119_s18  ;;  %v7768_v17 = vmul.f32 %v5947_v35, %v1027_v62  ;;  %v7770_v28 = vmul.f32 %v5947_v35, %v1035_v4  ;;  %10594 = vst [vmem:[#allocation188_spill] sm:$0xff] %v7772_v52  ;;  %v5950_v35 = vld [vmem:[#allocation2 + $0x28] sm:$0x3]  ;;  %v1410_v52 = vstv %s7728_s24  ;;  %s8074_s24 = sld [smem:[#allocation5 + $0x5d]] }
 0x2d6   : > { %2848 = vrot.lane.b32.xlu0 %v2842_v50, %s6119_s18  ;;  %v7778_v50 = vmul.f32 %v5949_v29, %v1207_v7  ;;  %10598 = vst [vmem:[#allocation192_spill] sm:$0xff] %v7780_v23  ;;  %v7786_v37 = vmul.f32 %v5950_v35, %v1207_v7  ;;  %v7788_v4 = vmul.f32 %v5950_v35, %v1215_v5 }
 0x2d7   : > { %10592 = vst [vmem:[#allocation186_spill] sm:$0xff] %v7768_v17  ;;  %10593 = vst [vmem:[#allocation187_spill] sm:$0xff] %v7770_v28  ;;  %v7776_v18 = vpop.permute.xlu1 %2366  ;;  %v2863_v23 = vmul.f32 %v2861_v44, %v7682_v42  ;;  %v7801_v7 = vmul.f32 %v5949_v29, %v1223_v43  ;;  %v7809_v5 = vmul.f32 %v5950_v35, %v1231_v39  ;;  %v5952_v28 = vld [vmem:[#allocation2 + $0x19] sm:$0xff] }
 0x2d8   : > { %10596 = vst [vmem:[#allocation190_spill] sm:$0xff] %v7776_v18  ;;  %10597 = vst [vmem:[#allocation191_spill] sm:$0xff] %v7778_v50  ;;  %v7784_v62 = vpop.permute.xlu0 %2364  ;;  %v2864_v18 = vmul.f32 %v2861_v44, %v7696_v59  ;;  %v2881_v50 = vstv %s7732_s25  ;;  %v7815_v17 = vmul.f32 %v5952_v28, %v1402_v54  ;;  %s8083_s25 = sld [smem:[#allocation5 + $0x81]] }
 0x2d9   : > { %10599 = vst [vmem:[#allocation193_spill] sm:$0xff] %v7784_v62  ;;  %10600 = vst [vmem:[#allocation194_spill] sm:$0xff] %v7786_v37  ;;  %2868 = vrot.lane.b32.xlu1 %v2862_v48, %s6119_s18  ;;  %v7799_v62 = vmul.f32 %v5948_v34, %v1223_v43  ;;  %v7803_v37 = vmul.f32 %v5949_v29, %v1231_v39  ;;  %v7819_v29 = vmul.f32 %v5952_v28, %v1410_v52 }
 0x2da   : > { %10601 = vst [vmem:[#allocation195_spill] sm:$0xff] %v7788_v4  ;;  %2852 = vrot.lane.b32.xlu0 %v2844_v31, %s6119_s18  ;;  %v7805_v4 = vmul.f32 %v5950_v35, %v1223_v43  ;;  %v5951_v31 = vld [vmem:[#allocation2 + $0x21] sm:$0xff]  ;;  %10608 = vst [vmem:[#allocation202_spill] sm:$0xff] %v7815_v17  ;;  %v5953_v43 = vld [vmem:[#allocation2 + $0x29] sm:$0x3]  ;;  %v2883_v39 = vmul.f32 %v2881_v50, %v7682_v42  ;;  %v865_v34 = vadd.f32 %v6836_v1, %v6735_v14 }
 0x2db   : > { %10603 = vst [vmem:[#allocation197_spill] sm:$0xff] %v7799_v62  ;;  %10604 = vst [vmem:[#allocation198_spill] sm:$0xff] %v7803_v37  ;;  %v7807_v48 = vpop.permute.xlu1 %2420  ;;  %v7813_v44 = vmul.f32 %v5951_v31, %v1402_v54  ;;  %v1418_v37 = vstv %s7752_s4  ;;  %v1426_v35 = vstv %s7762_s30  ;;  %v2901_v17 = vstv %s7766_s9  ;;  %s8129_s4 = sld [smem:[#allocation5 + $0x18]]  ;;  %s8139_s30 = sld [smem:[#allocation5 + $0x3c]] }
 0x2dc   : > { %10605 = vst [vmem:[#allocation199_spill] sm:$0xff] %v7805_v4  ;;  %10606 = vst [vmem:[#allocation200_spill] sm:$0xff] %v7807_v48  ;;  %v7817_v62 = vpop.permute.xlu0 %2418  ;;  %v7821_v4 = vmul.f32 %v5953_v43, %v1402_v54  ;;  %v2882_v48 = vmul.f32 %v2881_v50, %v7686_v27  ;;  %v864_v54 = vadd.f32 %v6840_v0, %v6742_v21  ;;  %s8160_s9 = sld [smem:[#allocation5 + $0x60]] }
 0x2dd   : > { %10607 = vst [vmem:[#allocation201_spill] sm:$0xff] %v7813_v44  ;;  %10609 = vst [vmem:[#allocation203_spill] sm:$0xff] %v7817_v62  ;;  %2872 = vrot.lane.b32.xlu1 %v2864_v18, %s6119_s18  ;;  %v884_v62 = vadd.f32 %v6847_v56, %v6760_v13  ;;  %v7838_v18 = vmul.f32 %v5953_v43, %v1410_v52  ;;  %v866_v14 = vadd.f32 %v6849_v45, %v6765_v24 }
 0x2de   : > { %10610 = vst [vmem:[#allocation204_spill] sm:$0xff] %v7819_v29  ;;  %10611 = vst [vmem:[#allocation205_spill] sm:$0xff] %v7821_v4  ;;  %2870 = vrot.lane.b32.xlu0 %v2863_v23, %s6119_s18  ;;  %v7840_v4 = vmul.f32 %v5951_v31, %v1410_v52  ;;  %v886_v1 = vadd.f32 %v6855_v40, %v6777_v25  ;;  %v7848_v23 = vmul.f32 %v5951_v31, %v1418_v37 }
 0x2df   : > { %v7842_v29 = vpop.permute.xlu1 %2438  ;;  %v7850_v44 = vmul.f32 %v5952_v28, %v1418_v37  ;;  %v885_v13 = vadd.f32 %v6857_v15, %v6782_v11  ;;  %v945_v0 = vadd.f32 %v6889_v41, %v865_v34  ;;  %v7859_v56 = vmul.f32 %v5952_v28, %v1426_v35  ;;  %v10621_v34 = vld [vmem:[#allocation18_spill] sm:$0xff] }
 0x2e0   : > { %10612 = vst [vmem:[#allocation206_spill] sm:$0xff] %v7842_v29  ;;  %v7854_v21 = vpop.permute.xlu0 %2422  ;;  %v2902_v24 = vmul.f32 %v2901_v17, %v7686_v27  ;;  %v905_v25 = vadd.f32 %v6863_v20, %v6798_v53  ;;  %v904_v45 = vadd.f32 %v6865_v2, %v6805_v36  ;;  %v7869_v40 = vmul.f32 %v5953_v43, %v1418_v37  ;;  %v10693_v29 = vld [vmem:[#allocation65_spill] sm:$0xff] }
 0x2e1   : > { %10613 = vst [vmem:[#allocation207_spill] sm:$0xff] %v7854_v21  ;;  %2890 = vrot.lane.b32.xlu1 %v2883_v39, %s6120_s23  ;;  %v2884_v11 = vmul.f32 %v2881_v50, %v7696_v59  ;;  %v944_v15 = vadd.f32 %v6893_v9, %v864_v54  ;;  %v964_v41 = vadd.f32 %v6899_v16, %v884_v62  ;;  %v1597_v39 = vstv %s7852_s12  ;;  %v10622_v54 = vld [vmem:[#allocation19_spill] sm:$0xff]  ;;  %s8215_s12 = sld [smem:[#allocation5 + $0x1b]] }
 0x2e2   : > { %2888 = vrot.lane.b32.xlu0 %v2882_v48, %s6120_s23  ;;  %v7877_v52 = vmul.f32 %v5953_v43, %v1426_v35  ;;  %v7879_v28 = vmul.f32 %v5951_v31, %v1426_v35  ;;  %v924_v36 = vadd.f32 %v6871_v3, %v6821_v57  ;;  %v906_v20 = vadd.f32 %v6873_v49, %v6826_v22 }
 0x2e3   : > { %v7881_v53 = vpop.permute.xlu1 %2442  ;;  %v946_v2 = vadd.f32 %v6903_v47, %v866_v14  ;;  %v966_v37 = vadd.f32 %v6909_v38, %v886_v1  ;;  %v926_v16 = vadd.f32 %v6879_v58, %v6834_v51  ;;  %v925_v50 = vadd.f32 %v6881_v32, %v6838_v33  ;;  %v10616_v33 = vld [vmem:[#allocation15_spill] sm:$0xff]  ;;  %v10617_v47 = vld [vmem:[#allocation16_spill] sm:$0xff] }
 0x2e4   : > { %10614 = vst [vmem:[#allocation208_spill] sm:$0xff] %v7881_v53  ;;  %v7891_v9 = vpop.permute.xlu0 %2440  ;;  %v1016_v57 = vadd.f32 %v7734_v8, %v945_v0  ;;  %v2904_v22 = vmul.f32 %v2901_v17, %v7696_v59  ;;  %v965_v3 = vadd.f32 %v6911_v30, %v885_v13  ;;  %v985_v49 = vadd.f32 %v6917_v60, %v905_v25  ;;  %v10619_v30 = vld [vmem:[#allocation17_spill] sm:$0xff]  ;;  %v5954_v25 = vld [vmem:[#allocation2 + $0x22] sm:$0xff] }
 0x2e5   : > { %10615 = vst [vmem:[#allocation209_spill] sm:$0xff] %v7891_v9  ;;  %2908 = vrot.lane.b32.xlu1 %v2902_v24, %s6120_s23  ;;  %v2903_v51 = vmul.f32 %v2901_v17, %v7682_v42  ;;  %v2921_v58 = vstv %s7832_s0  ;;  %v984_v32 = vadd.f32 %v10616_v33, %v904_v45  ;;  %v1004_v38 = vadd.f32 %v10617_v47, %v924_v36  ;;  %v10676_v9 = vld [vmem:[#allocation51_spill] sm:$0xff]  ;;  %s8169_s0 = sld [smem:[#allocation5 + $0x84]] }
 0x2e6   : > { %2892 = vrot.lane.b32.xlu0 %v2884_v11, %s6120_s23  ;;  %v1015_v8 = vadd.f32 %v7738_v63, %v944_v15  ;;  %v1023_v62 = vadd.f32 %v7740_v26, %v964_v41  ;;  %v986_v31 = vadd.f32 %v10619_v30, %v906_v20  ;;  %v1017_v60 = vadd.f32 %v7742_v10, %v946_v2  ;;  %v5955_v11 = vld [vmem:[#allocation2 + $0x1a] sm:$0xff]  ;;  %v5956_v20 = vld [vmem:[#allocation2 + $0x2a] sm:$0x3] }
 0x2e7   : > { %v7911_v48 = vpop.permute.xlu1 %2460  ;;  %v1025_v43 = vadd.f32 %v7747_v19, %v966_v37  ;;  %v1006_v35 = vadd.f32 %v10621_v34, %v926_v16  ;;  %v1005_v14 = vadd.f32 %v10622_v54, %v925_v50  ;;  %v1605_v1 = vstv %s7861_s13  ;;  %v10624_v41 = vld [vmem:[#allocation186_spill] sm:$0xff]  ;;  %v10627_v50 = vld [vmem:[#allocation188_spill] sm:$0xff]  ;;  %v10631_v34 = vld [vmem:[#allocation23_spill] sm:$0xff]  ;;  %s8223_s13 = sld [smem:[#allocation5 + $0x3f]] }
 0x2e8   : > { %10618 = vst [vmem:[#allocation15_spill] sm:$0xff] %v7911_v48  ;;  %v7917_v17 = vpop.permute.xlu0 %2458  ;;  %v2923_v26 = vmul.f32 %v2921_v58, %v7682_v42  ;;  %v1024_v63 = vadd.f32 %v7749_v12, %v965_v3  ;;  %v1032_v13 = vadd.f32 %v7756_v6, %v985_v49  ;;  %v2922_v19 = vmul.f32 %v2921_v58, %v7686_v27 }
 0x2e9   : > { %10620 = vst [vmem:[#allocation16_spill] sm:$0xff] %v7917_v17  ;;  %2912 = vrot.lane.b32.xlu1 %v2904_v22, %s6120_s23  ;;  %v2941_v10 = vstv %s7873_s14  ;;  %v1031_v0 = vadd.f32 %v7758_v61, %v984_v32  ;;  %v1039_v24 = vadd.f32 %v7760_v46, %v1004_v38  ;;  %v7931_v45 = vmul.f32 %v5954_v25, %v1597_v39  ;;  %v10626_v61 = vld [vmem:[#allocation187_spill] sm:$0xff]  ;;  %v10629_v32 = vld [vmem:[#allocation21_spill] sm:$0xff]  ;;  %s8246_s14 = sld [smem:[#allocation5 + $0x63]] }
 0x2ea   : > { %2910 = vrot.lane.b32.xlu0 %v2903_v51, %s6120_s23  ;;  %v7933_v15 = vmul.f32 %v5955_v11, %v1597_v39  ;;  %v1033_v6 = vadd.f32 %v10624_v41, %v986_v31  ;;  %v7938_v36 = vmul.f32 %v5955_v11, %v1605_v1  ;;  %v7940_v2 = vmul.f32 %v5956_v20, %v1597_v39  ;;  %v10628_v51 = vld [vmem:[#allocation20_spill] sm:$0xff]  ;;  %v10630_v31 = vld [vmem:[#allocation22_spill] sm:$0xff] }
 0x2eb   : > { %v7935_v12 = vpop.permute.xlu1 %2478  ;;  %v1613_v37 = vstv %s7889_s15  ;;  %v1041_v46 = vadd.f32 %v10626_v61, %v1006_v35  ;;  %v1040_v22 = vadd.f32 %v10627_v50, %v1005_v14  ;;  %v1621_v3 = vstv %s7898_s17  ;;  %s8253_s15 = sld [smem:[#allocation5 + $0x87]]  ;;  %s8299_s17 = sld [smem:[#allocation5 + $0x1e]] }
 0x2ec   : > { %10623 = vst [vmem:[#allocation17_spill] sm:$0xff] %v7935_v12  ;;  %v7943_v16 = vpop.permute.xlu0 %2462  ;;  %v2942_v49 = vmul.f32 %v2941_v10, %v7686_v27  ;;  %v1060_v33 = vadd.f32 %v10628_v51, %v1016_v57  ;;  %v1059_v47 = vadd.f32 %v10629_v32, %v1015_v8  ;;  %v7952_v38 = vmul.f32 %v5956_v20, %v1605_v1  ;;  %v10633_v57 = vld [vmem:[#allocation24_spill] sm:$0xff] }
 0x2ed   : > { %10625 = vst [vmem:[#allocation18_spill] sm:$0xff] %v7943_v16  ;;  %2930 = vrot.lane.b32.xlu1 %v2923_v26, %s6120_s23  ;;  %v2924_v30 = vmul.f32 %v2921_v58, %v7696_v59  ;;  %v1079_v39 = vadd.f32 %v10630_v31, %v1023_v62  ;;  %v1061_v35 = vadd.f32 %v10631_v34, %v1017_v60  ;;  %v10634_v26 = vld [vmem:[#allocation25_spill] sm:$0xff]  ;;  %v10636_v62 = vld [vmem:[#allocation26_spill] sm:$0xff]  ;;  %v10638_v31 = vld [vmem:[#allocation32_spill] sm:$0xff] }
 0x2ee   : > { %2928 = vrot.lane.b32.xlu0 %v2922_v19, %s6120_s23  ;;  %v7960_v54 = vmul.f32 %v5954_v25, %v1605_v1  ;;  %v7962_v14 = vmul.f32 %v5954_v25, %v1613_v37  ;;  %v1081_v8 = vadd.f32 %v10633_v57, %v1025_v43  ;;  %v1080_v41 = vadd.f32 %v10634_v26, %v1024_v63  ;;  %v10637_v1 = vld [vmem:[#allocation27_spill] sm:$0xff]  ;;  %v10639_v34 = vld [vmem:[#allocation33_spill] sm:$0xff] }
 0x2ef   : > { %v7966_v27 = vpop.permute.xlu1 %2482  ;;  %v7970_v61 = vmul.f32 %v5955_v11, %v1613_v37  ;;  %v7972_v19 = vmul.f32 %v5955_v11, %v1621_v3  ;;  %v1100_v60 = vadd.f32 %v10636_v62, %v1032_v13  ;;  %v1099_v50 = vadd.f32 %v10637_v1, %v1031_v0  ;;  %v10640_v11 = vld [vmem:[#allocation28_spill] sm:$0xff]  ;;  %v10642_v62 = vld [vmem:[#allocation34_spill] sm:$0xff]  ;;  %v10669_v16 = vld [vmem:[#allocation45_spill] sm:$0xff] }
 0x2f0   : > { %10632 = vst [vmem:[#allocation19_spill] sm:$0xff] %v7966_v27  ;;  %v7974_v58 = vpop.permute.xlu0 %2480  ;;  %v7978_v51 = vmul.f32 %v5956_v20, %v1613_v37  ;;  %v2944_v32 = vmul.f32 %v2941_v10, %v7696_v59  ;;  %v1140_v43 = vadd.f32 %v10638_v31, %v1060_v33  ;;  %v1139_v63 = vadd.f32 %v10639_v34, %v1059_v47  ;;  %v10641_v37 = vld [vmem:[#allocation29_spill] sm:$0xff]  ;;  %v10645_v47 = vld [vmem:[#allocation36_spill] sm:$0xff] }
 0x2f1   : > { %10635 = vst [vmem:[#allocation186_spill] sm:$0xff] %v7974_v58  ;;  %2948 = vrot.lane.b32.xlu1 %v2942_v49, %s6120_s23  ;;  %v7984_v57 = vmul.f32 %v5956_v20, %v1621_v3  ;;  %v2943_v13 = vmul.f32 %v2941_v10, %v7682_v42  ;;  %v1119_v0 = vadd.f32 %v10640_v11, %v1039_v24  ;;  %v10644_v20 = vld [vmem:[#allocation35_spill] sm:$0xff]  ;;  %v10647_v42 = vld [vmem:[#allocation38_spill] sm:$0xff]  ;;  %v1793_v27 = vstv %s7954_s2  ;;  %s8307_s2 = sld [smem:[#allocation5 + $0x42]] }
 0x2f2   : > { %2932 = vrot.lane.b32.xlu0 %v2924_v30, %s6120_s23  ;;  %v1101_v26 = vadd.f32 %v10641_v37, %v1033_v6  ;;  %v1159_v49 = vadd.f32 %v10642_v62, %v1079_v39  ;;  %v7993_v1 = vmul.f32 %v5954_v25, %v1621_v3  ;;  %v1141_v33 = vadd.f32 %v10644_v20, %v1061_v35  ;;  %v10646_v30 = vld [vmem:[#allocation37_spill] sm:$0xff]  ;;  %v10649_v6 = vld [vmem:[#allocation30_spill] sm:$0xff]  ;;  %v10650_v25 = vld [vmem:[#allocation31_spill] sm:$0xff] }
 0x2f3   : > { %v7997_v59 = vpop.permute.xlu1 %2500  ;;  %v1161_v31 = vadd.f32 %v10645_v47, %v1081_v8  ;;  %v1160_v34 = vadd.f32 %v10646_v30, %v1080_v41  ;;  %v1180_v10 = vadd.f32 %v10647_v42, %v1100_v60  ;;  %v1121_v39 = vadd.f32 %v10649_v6, %v1041_v46  ;;  %v10651_v11 = vld [vmem:[#allocation39_spill] sm:$0xff]  ;;  %v10652_v62 = vld [vmem:[#allocation40_spill] sm:$0xff]  ;;  %v10653_v35 = vld [vmem:[#allocation41_spill] sm:$0xff] }
 0x2f4   : > { %10643 = vst [vmem:[#allocation187_spill] sm:$0xff] %v7997_v59  ;;  %v8003_v24 = vpop.permute.xlu0 %2498  ;;  %v1120_v3 = vadd.f32 %v10650_v25, %v1040_v22  ;;  %v1179_v37 = vadd.f32 %v10651_v11, %v1099_v50  ;;  %v1199_v58 = vadd.f32 %v10652_v62, %v1119_v0  ;;  %v1181_v20 = vadd.f32 %v10653_v35, %v1101_v26  ;;  %v10654_v8 = vld [vmem:[#allocation189_spill] sm:$0xff]  ;;  %v10655_v41 = vld [vmem:[#allocation191_spill] sm:$0xff]  ;;  %v10656_v60 = vld [vmem:[#allocation42_spill] sm:$0xff] }
 0x2f5   : > { %10648 = vst [vmem:[#allocation188_spill] sm:$0xff] %v8003_v24  ;;  %2952 = vrot.lane.b32.xlu1 %v2944_v32, %s6120_s23  ;;  %v1212_v47 = vadd.f32 %v10654_v8, %v1140_v43  ;;  %v1211_v30 = vadd.f32 %v10655_v41, %v1139_v63  ;;  %v1201_v42 = vadd.f32 %v10656_v60, %v1121_v39  ;;  %v10657_v46 = vld [vmem:[#allocation43_spill] sm:$0xff]  ;;  %v10658_v22 = vld [vmem:[#allocation192_spill] sm:$0xff]  ;;  %v1801_v50 = vstv %s7964_s3  ;;  %v10660_v0 = vld [vmem:[#allocation194_spill] sm:$0xff]  ;;  %s8330_s3 = sld [smem:[#allocation5 + $0x66]] }
 0x2f6   : > { %2950 = vrot.lane.b32.xlu0 %v2943_v13, %s6120_s23  ;;  %v1200_v6 = vadd.f32 %v10657_v46, %v1120_v3  ;;  %v1219_v25 = vadd.f32 %v10658_v22, %v1159_v49  ;;  %v1213_v32 = vadd.f32 %v10660_v0, %v1141_v33  ;;  %v10661_v26 = vld [vmem:[#allocation195_spill] sm:$0xff]  ;;  %v10662_v43 = vld [vmem:[#allocation196_spill] sm:$0xff]  ;;  %v10663_v63 = vld [vmem:[#allocation197_spill] sm:$0xff]  ;;  %v1227_v39 = vadd.f32 %v7801_v7, %v1179_v37 }
 0x2f7   : > { %v8019_v11 = vpop.permute.xlu1 %2518  ;;  %v1221_v62 = vadd.f32 %v10661_v26, %v1161_v31  ;;  %v1220_v35 = vadd.f32 %v10662_v43, %v1160_v34  ;;  %v1228_v8 = vadd.f32 %v10663_v63, %v1180_v10  ;;  %v10665_v3 = vld [vmem:[#allocation198_spill] sm:$0xff]  ;;  %v5958_v46 = vld [vmem:[#allocation2 + $0x30] sm:$0xff]  ;;  %v10666_v33 = vld [vmem:[#allocation199_spill] sm:$0xff]  ;;  %v1809_v10 = vstv %s7986_s19  ;;  %s8337_s19 = sld [smem:[#allocation5 + $0x8a]] }
 0x2f8   : > { %10659 = vst [vmem:[#allocation20_spill] sm:$0xff] %v8019_v11  ;;  %v8025_v13 = vpop.permute.xlu0 %2502  ;;  %v1235_v41 = vadd.f32 %v10665_v3, %v1199_v58  ;;  %v5957_v49 = vld [vmem:[#allocation2 + $0x38] sm:$0xff]  ;;  %v8031_v22 = vmul.f32 %v5958_v46, %v1793_v27  ;;  %v1229_v0 = vadd.f32 %v10666_v33, %v1181_v20  ;;  %v8034_v31 = vmul.f32 %v5958_v46, %v1801_v50  ;;  %v5959_v34 = vld [vmem:[#allocation2 + $0x40] sm:$0x3]  ;;  %v10667_v43 = vld [vmem:[#allocation44_spill] sm:$0xff] }
 0x2f9   : > { %10664 = vst [vmem:[#allocation21_spill] sm:$0xff] %v8025_v13  ;;  %v8029_v60 = vmul.f32 %v5957_v49, %v1793_v27  ;;  %v8036_v26 = vmul.f32 %v5959_v34, %v1793_v27  ;;  %v1256_v63 = vadd.f32 %v10667_v43, %v1212_v47  ;;  %v1237_v7 = vadd.f32 %v7809_v5, %v1201_v42  ;;  %v10670_v20 = vld [vmem:[#allocation46_spill] sm:$0xff]  ;;  %v10672_v5 = vld [vmem:[#allocation47_spill] sm:$0xff]  ;;  %v10677_v13 = vld [vmem:[#allocation56_spill] sm:$0xff] }
 0x2fa   : > { %v1236_v58 = vadd.f32 %v7811_v55, %v1200_v6  ;;  %v1817_v37 = vstv %s7995_s20  ;;  %v1255_v12 = vadd.f32 %v10669_v16, %v1211_v30  ;;  %v1275_v33 = vadd.f32 %v10670_v20, %v1219_v25  ;;  %v10673_v55 = vld [vmem:[#allocation48_spill] sm:$0xff]  ;;  %v10675_v30 = vld [vmem:[#allocation50_spill] sm:$0xff]  ;;  %v10678_v11 = vld [vmem:[#allocation57_spill] sm:$0xff]  ;;  %s8385_s20 = sld [smem:[#allocation5 + $0x21]] }
 0x2fb   : > { %v8045_v3 = vpop.permute.xlu1 %2522  ;;  %v8049_v17 = vmul.f32 %v5959_v34, %v1801_v50  ;;  %v8051_v27 = vmul.f32 %v5957_v49, %v1801_v50  ;;  %v1257_v42 = vadd.f32 %v10672_v5, %v1213_v32  ;;  %v1277_v6 = vadd.f32 %v10673_v55, %v1221_v62  ;;  %v10680_v55 = vld [vmem:[#allocation52_spill] sm:$0xff] }
 0x2fc   : > { %10668 = vst [vmem:[#allocation22_spill] sm:$0xff] %v8045_v3  ;;  %v8055_v47 = vpop.permute.xlu0 %2520  ;;  %v8059_v43 = vmul.f32 %v5957_v49, %v1809_v10  ;;  %v8061_v48 = vmul.f32 %v5958_v46, %v1809_v10  ;;  %v10674_v3 = vld [vmem:[#allocation49_spill] sm:$0xff]  ;;  %v1296_v25 = vadd.f32 %v10675_v30, %v1228_v8  ;;  %v8065_v20 = vmul.f32 %v5958_v46, %v1817_v37  ;;  %v10682_v46 = vld [vmem:[#allocation58_spill] sm:$0xff] }
 0x2fd   : > { %10671 = vst [vmem:[#allocation23_spill] sm:$0xff] %v8055_v47  ;;  %v1276_v16 = vadd.f32 %v10674_v3, %v1220_v35  ;;  %v8067_v50 = vmul.f32 %v5959_v34, %v1809_v10  ;;  %v1295_v53 = vadd.f32 %v10676_v9, %v1227_v39  ;;  %v1336_v47 = vadd.f32 %v10677_v13, %v1256_v63  ;;  %v10681_v3 = vld [vmem:[#allocation53_spill] sm:$0xff]  ;;  %v10686_v13 = vld [vmem:[#allocation60_spill] sm:$0xff] }
 0x2fe   : > { %v1335_v32 = vadd.f32 %v10678_v11, %v1255_v12  ;;  %v8072_v5 = vmul.f32 %v5959_v34, %v1817_v37  ;;  %v1315_v35 = vadd.f32 %v10680_v55, %v1235_v41  ;;  %v1297_v8 = vadd.f32 %v10681_v3, %v1229_v0  ;;  %v10685_v12 = vld [vmem:[#allocation59_spill] sm:$0xff]  ;;  %v10687_v34 = vld [vmem:[#allocation61_spill] sm:$0xff]  ;;  %v10689_v55 = vld [vmem:[#allocation54_spill] sm:$0xff] }
 0x2ff   : > { %v8076_v62 = vpop.permute.xlu1 %2540  ;;  %v1355_v10 = vadd.f32 %v10682_v46, %v1275_v33  ;;  %v8081_v30 = vmul.f32 %v5957_v49, %v1817_v37  ;;  %v1337_v11 = vadd.f32 %v10685_v12, %v1257_v42  ;;  %v1357_v39 = vadd.f32 %v10686_v13, %v1277_v6  ;;  %v10690_v3 = vld [vmem:[#allocation55_spill] sm:$0xff]  ;;  %v10692_v37 = vld [vmem:[#allocation64_spill] sm:$0xff]  ;;  %v10695_v42 = vld [vmem:[#allocation202_spill] sm:$0xff] }
 0x300   : > { %10679 = vst [vmem:[#allocation24_spill] sm:$0xff] %v8076_v62  ;;  %v8085_v9 = vpop.permute.xlu0 %2538  ;;  %v1356_v63 = vadd.f32 %v10687_v34, %v1276_v16  ;;  %v10688_v62 = vld [vmem:[#allocation62_spill] sm:$0xff]  ;;  %v1317_v0 = vadd.f32 %v10689_v55, %v1237_v7  ;;  %v1316_v21 = vadd.f32 %v10690_v3, %v1236_v58  ;;  %v10691_v33 = vld [vmem:[#allocation63_spill] sm:$0xff]  ;;  %v1395_v46 = vadd.f32 %v10692_v37, %v1315_v35  ;;  %v10699_v7 = vld [vmem:[#allocation204_spill] sm:$0xff] }
 0x301   : > { %10683 = vst [vmem:[#allocation25_spill] sm:$0xff] %v8081_v30  ;;  %10684 = vst [vmem:[#allocation26_spill] sm:$0xff] %v8085_v9  ;;  %v1376_v41 = vadd.f32 %v10688_v62, %v1296_v25  ;;  %v1375_v49 = vadd.f32 %v10691_v33, %v1295_v53  ;;  %v1377_v24 = vadd.f32 %v10693_v29, %v1297_v8  ;;  %v10694_v9 = vld [vmem:[#allocation201_spill] sm:$0xff]  ;;  %v1988_v30 = vstv %s8043_s21  ;;  %v10697_v16 = vld [vmem:[#allocation66_spill] sm:$0xff]  ;;  %s8401_s21 = sld [smem:[#allocation5 + $0x45]] }
 0x302   : > { %v1407_v59 = vadd.f32 %v10694_v9, %v1336_v47  ;;  %v1406_v12 = vadd.f32 %v10695_v42, %v1335_v32  ;;  %v1397_v13 = vadd.f32 %v10697_v16, %v1317_v0  ;;  %v10698_v25 = vld [vmem:[#allocation67_spill] sm:$0xff]  ;;  %v1414_v34 = vadd.f32 %v10699_v7, %v1355_v10  ;;  %v10701_v35 = vld [vmem:[#allocation205_spill] sm:$0xff] }
 0x303   : > { %v8099_v6 = vpop.permute.xlu1 %2558  ;;  %v1396_v62 = vadd.f32 %v10698_v25, %v1316_v21  ;;  %v1996_v58 = vstv %s8053_s22  ;;  %v1408_v55 = vadd.f32 %v10701_v35, %v1337_v11  ;;  %v1416_v29 = vadd.f32 %v7838_v18, %v1357_v39  ;;  %v5960_v21 = vld [vmem:[#allocation2 + $0x39] sm:$0xff]  ;;  %v5961_v10 = vld [vmem:[#allocation2 + $0x31] sm:$0xff]  ;;  %v5962_v18 = vld [vmem:[#allocation2 + $0x41] sm:$0x3]  ;;  %s8416_s22 = sld [smem:[#allocation5 + $0x69]] }
 0x304   : > { %10696 = vst [vmem:[#allocation27_spill] sm:$0xff] %v8099_v6  ;;  %v8105_v53 = vpop.permute.xlu0 %2542  ;;  %v1415_v47 = vadd.f32 %v7840_v4, %v1356_v63  ;;  %v1423_v32 = vadd.f32 %v7848_v23, %v1376_v41  ;;  %v1422_v8 = vadd.f32 %v7850_v44, %v1375_v49  ;;  %v1430_v9 = vadd.f32 %v7859_v56, %v1395_v46  ;;  %v10703_v63 = vld [vmem:[#allocation68_spill] sm:$0xff]  ;;  %v10706_v46 = vld [vmem:[#allocation70_spill] sm:$0xff]  ;;  %v10709_v7 = vld [vmem:[#allocation73_spill] sm:$0xff] }
 0x305   : > { %10700 = vst [vmem:[#allocation32_spill] sm:$0xff] %v8105_v53  ;;  %v8113_v0 = vmul.f32 %v5960_v21, %v1988_v30  ;;  %v8115_v3 = vmul.f32 %v5961_v10, %v1988_v30  ;;  %v1424_v33 = vadd.f32 %v7869_v40, %v1377_v24  ;;  %v8118_v11 = vmul.f32 %v5961_v10, %v1996_v58  ;;  %v10705_v40 = vld [vmem:[#allocation69_spill] sm:$0xff] }
 0x306   : > { %v8120_v39 = vmul.f32 %v5962_v18, %v1988_v30  ;;  %v2004_v4 = vstv %s8074_s24  ;;  %v1451_v44 = vadd.f32 %v10703_v63, %v1407_v59  ;;  %v1432_v56 = vadd.f32 %v7877_v52, %v1397_v13  ;;  %v10707_v59 = vld [vmem:[#allocation71_spill] sm:$0xff]  ;;  %v10708_v52 = vld [vmem:[#allocation72_spill] sm:$0xff]  ;;  %v10710_v63 = vld [vmem:[#allocation74_spill] sm:$0xff]  ;;  %s8424_s24 = sld [smem:[#allocation5 + $0x8d]] }
 0x307   : > { %v8123_v23 = vpop.permute.xlu1 %2562  ;;  %v1431_v41 = vadd.f32 %v7879_v28, %v1396_v62  ;;  %v2012_v49 = vstv %s8083_s25  ;;  %v1450_v24 = vadd.f32 %v10705_v40, %v1406_v12  ;;  %v1470_v42 = vadd.f32 %v10706_v46, %v1414_v34  ;;  %v10712_v46 = vld [vmem:[#allocation75_spill] sm:$0xff]  ;;  %s8506_s25 = sld [smem:[#allocation6]] }
 0x308   : > { %10702 = vst [vmem:[#allocation33_spill] sm:$0xff] %v8123_v23  ;;  %v8131_v37 = vpop.permute.xlu0 %2560  ;;  %v8135_v30 = vmul.f32 %v5962_v18, %v1996_v58  ;;  %v8137_v16 = vmul.f32 %v5960_v21, %v1996_v58  ;;  %v1452_v25 = vadd.f32 %v10707_v59, %v1408_v55  ;;  %v1472_v13 = vadd.f32 %v10708_v52, %v1416_v29  ;;  %v10713_v23 = vld [vmem:[#allocation80_spill] sm:$0xff]  ;;  %v10714_v59 = vld [vmem:[#allocation81_spill] sm:$0xff] }
 0x309   : > { %10704 = vst [vmem:[#allocation28_spill] sm:$0xff] %v8131_v37  ;;  %v8143_v28 = vmul.f32 %v5960_v21, %v2004_v4  ;;  %v8145_v62 = vmul.f32 %v5961_v10, %v2004_v4  ;;  %v1471_v35 = vadd.f32 %v10709_v7, %v1415_v47  ;;  %v1491_v12 = vadd.f32 %v10710_v63, %v1423_v32  ;;  %v10717_v47 = vld [vmem:[#allocation76_spill] sm:$0xff] }
 0x30a   : > { %v8149_v40 = vmul.f32 %v5961_v10, %v2012_v49  ;;  %v8151_v34 = vmul.f32 %v5962_v18, %v2004_v4  ;;  %v1490_v37 = vadd.f32 %v10712_v46, %v1422_v8  ;;  %v1531_v55 = vadd.f32 %v10713_v23, %v1451_v44  ;;  %v10718_v10 = vld [vmem:[#allocation77_spill] sm:$0xff]  ;;  %v10719_v4 = vld [vmem:[#allocation82_spill] sm:$0xff]  ;;  %v10721_v8 = vld [vmem:[#allocation83_spill] sm:$0xff] }
 0x30b   : > { %v8153_v58 = vpop.permute.xlu1 %2615  ;;  %v1530_v29 = vadd.f32 %v10714_v59, %v1450_v24  ;;  %v8158_v52 = vmul.f32 %v5962_v18, %v2012_v49  ;;  %v1510_v32 = vadd.f32 %v10717_v47, %v1430_v9  ;;  %v1492_v7 = vadd.f32 %v10718_v10, %v1424_v33  ;;  %v10722_v44 = vld [vmem:[#allocation84_spill] sm:$0xff]  ;;  %v10723_v24 = vld [vmem:[#allocation85_spill] sm:$0xff]  ;;  %v10724_v59 = vld [vmem:[#allocation86_spill] sm:$0xff] }
 0x30c   : > { %10711 = vst [vmem:[#allocation29_spill] sm:$0xff] %v8153_v58  ;;  %v8162_v53 = vpop.permute.xlu0 %2613  ;;  %v1550_v63 = vadd.f32 %v10719_v4, %v1470_v42  ;;  %v8167_v6 = vmul.f32 %v5960_v21, %v2012_v49  ;;  %v1532_v23 = vadd.f32 %v10721_v8, %v1452_v25  ;;  %v1552_v18 = vadd.f32 %v10722_v44, %v1472_v13  ;;  %v10725_v58 = vld [vmem:[#allocation78_spill] sm:$0xff]  ;;  %v10726_v47 = vld [vmem:[#allocation79_spill] sm:$0xff]  ;;  %v10728_v42 = vld [vmem:[#allocation88_spill] sm:$0xff] }
 0x30d   : > { %10715 = vst [vmem:[#allocation34_spill] sm:$0xff] %v8158_v52  ;;  %10716 = vst [vmem:[#allocation35_spill] sm:$0xff] %v8162_v53  ;;  %v1551_v46 = vadd.f32 %v10723_v24, %v1471_v35  ;;  %v1571_v53 = vadd.f32 %v10724_v59, %v1491_v12  ;;  %v1512_v9 = vadd.f32 %v10725_v58, %v1432_v56  ;;  %v10727_v10 = vld [vmem:[#allocation87_spill] sm:$0xff]  ;;  %v10730_v4 = vld [vmem:[#allocation89_spill] sm:$0xff]  ;;  %v2183_v8 = vstv %s8129_s4  ;;  %s8552_s4 = sld [smem:[#allocation6 + $0x1]] }
 0x30e   : > { %10720 = vst [vmem:[#allocation36_spill] sm:$0xff] %v8167_v6  ;;  %v1511_v33 = vadd.f32 %v10726_v47, %v1431_v41  ;;  %v1570_v52 = vadd.f32 %v10727_v10, %v1490_v37  ;;  %v1590_v21 = vadd.f32 %v10728_v42, %v1510_v32  ;;  %v1572_v6 = vadd.f32 %v10730_v4, %v1492_v7  ;;  %v10732_v12 = vld [vmem:[#allocation90_spill] sm:$0xff]  ;;  %v10733_v56 = vld [vmem:[#allocation91_spill] sm:$0xff]  ;;  %v10737_v47 = vld [vmem:[#allocation93_spill] sm:$0xff] }
 0x30f   : > { %v8179_v49 = vpop.permute.xlu1 %2633  ;;  %v1602_v25 = vadd.f32 %v7931_v45, %v1531_v55  ;;  %v1601_v13 = vadd.f32 %v7933_v15, %v1530_v29  ;;  %v1592_v44 = vadd.f32 %v10732_v12, %v1512_v9  ;;  %v1609_v41 = vadd.f32 %v7938_v36, %v1550_v63  ;;  %v5963_v29 = vld [vmem:[#allocation2 + $0x3a] sm:$0xff]  ;;  %v5964_v9 = vld [vmem:[#allocation2 + $0x32] sm:$0xff] }
 0x310   : > { %10729 = vst [vmem:[#allocation37_spill] sm:$0xff] %v8179_v49  ;;  %v8185_v35 = vpop.permute.xlu0 %2617  ;;  %v1591_v58 = vadd.f32 %v10733_v56, %v1511_v33  ;;  %v2191_v37 = vstv %s8139_s30  ;;  %v1603_v32 = vadd.f32 %v7940_v2, %v1532_v23  ;;  %v1611_v24 = vadd.f32 %v7952_v38, %v1552_v18  ;;  %v10743_v56 = vld [vmem:[#allocation98_spill] sm:$0xff]  ;;  %s8554_s30 = sld [smem:[#allocation6 + $0x2]] }
 0x311   : > { %10731 = vst [vmem:[#allocation38_spill] sm:$0xff] %v8185_v35  ;;  %v1610_v7 = vadd.f32 %v7960_v54, %v1551_v46  ;;  %v1618_v45 = vadd.f32 %v7962_v14, %v1571_v53  ;;  %v1617_v15 = vadd.f32 %v7970_v61, %v1570_v52  ;;  %v1625_v55 = vadd.f32 %v7972_v19, %v1590_v21  ;;  %v5965_v54 = vld [vmem:[#allocation2 + $0x42] sm:$0x3]  ;;  %v10736_v53 = vld [vmem:[#allocation92_spill] sm:$0xff] }
 0x312   : > { %v8197_v59 = vmul.f32 %v5963_v29, %v2183_v8  ;;  %v8199_v36 = vmul.f32 %v5964_v9, %v2183_v8  ;;  %v1619_v2 = vadd.f32 %v7978_v51, %v1572_v6  ;;  %v8204_v38 = vmul.f32 %v5964_v9, %v2191_v37  ;;  %v10738_v51 = vld [vmem:[#allocation94_spill] sm:$0xff]  ;;  %v10739_v21 = vld [vmem:[#allocation95_spill] sm:$0xff] }
 0x313   : > { %v8201_v63 = vpop.permute.xlu1 %2637  ;;  %v8206_v23 = vmul.f32 %v5965_v54, %v2183_v8  ;;  %v2199_v14 = vstv %s8160_s9  ;;  %v1646_v19 = vadd.f32 %v10736_v53, %v1602_v25  ;;  %v1627_v52 = vadd.f32 %v7984_v57, %v1592_v44  ;;  %v10740_v25 = vld [vmem:[#allocation96_spill] sm:$0xff]  ;;  %v10742_v44 = vld [vmem:[#allocation97_spill] sm:$0xff]  ;;  %s8662_s9 = sld [smem:[#allocation6 + $0x3]] }
 0x314   : > { %10734 = vst [vmem:[#allocation30_spill] sm:$0xff] %v8201_v63  ;;  %v8209_v61 = vpop.permute.xlu0 %2635  ;;  %v1626_v18 = vadd.f32 %v7993_v1, %v1591_v58  ;;  %v2207_v46 = vstv %s8169_s0  ;;  %v1645_v33 = vadd.f32 %v10737_v47, %v1601_v13  ;;  %v1665_v6 = vadd.f32 %v10738_v51, %v1609_v41  ;;  %v10745_v47 = vld [vmem:[#allocation99_spill] sm:$0xff]  ;;  %v10746_v51 = vld [vmem:[#allocation104_spill] sm:$0xff]  ;;  %s8979_s0 = sld [smem:[#allocation7 + $0x1]] }
 0x315   : > { %10735 = vst [vmem:[#allocation31_spill] sm:$0xff] %v8209_v61  ;;  %v8219_v10 = vmul.f32 %v5965_v54, %v2191_v37  ;;  %v8221_v42 = vmul.f32 %v5963_v29, %v2191_v37  ;;  %v1647_v4 = vadd.f32 %v10739_v21, %v1603_v32  ;;  %v1667_v8 = vadd.f32 %v10740_v25, %v1611_v24  ;;  %v10747_v21 = vld [vmem:[#allocation105_spill] sm:$0xff] }
 0x316   : > { %v8227_v57 = vmul.f32 %v5963_v29, %v2199_v14  ;;  %v8229_v1 = vmul.f32 %v5964_v9, %v2199_v14  ;;  %v1666_v13 = vadd.f32 %v10742_v44, %v1610_v7  ;;  %v1686_v58 = vadd.f32 %v10743_v56, %v1618_v45  ;;  %v10749_v44 = vld [vmem:[#allocation101_spill] sm:$0xff] }
 0x317   : > { %v8231_v12 = vpop.permute.xlu1 %2655  ;;  %v8235_v41 = vmul.f32 %v5964_v9, %v2207_v46  ;;  %v8237_v37 = vmul.f32 %v5965_v54, %v2199_v14  ;;  %v1685_v32 = vadd.f32 %v10745_v47, %v1617_v15  ;;  %v1726_v24 = vadd.f32 %v10746_v51, %v1646_v19  ;;  %v10750_v9 = vld [vmem:[#allocation106_spill] sm:$0xff]  ;;  %v10751_v15 = vld [vmem:[#allocation107_spill] sm:$0xff]  ;;  %v10752_v19 = vld [vmem:[#allocation108_spill] sm:$0xff] }
 0x318   : > { %10741 = vst [vmem:[#allocation39_spill] sm:$0xff] %v8231_v12  ;;  %v8239_v53 = vpop.permute.xlu0 %2653  ;;  %v1725_v25 = vadd.f32 %v10747_v21, %v1645_v33  ;;  %v8244_v61 = vmul.f32 %v5965_v54, %v2207_v46  ;;  %v10748_v12 = vld [vmem:[#allocation100_spill] sm:$0xff]  ;;  %v1687_v45 = vadd.f32 %v10749_v44, %v1619_v2  ;;  %v1745_v56 = vadd.f32 %v10750_v9, %v1665_v6  ;;  %v10753_v33 = vld [vmem:[#allocation109_spill] sm:$0xff]  ;;  %v10754_v21 = vld [vmem:[#allocation110_spill] sm:$0xff] }
 0x319   : > { %10744 = vst [vmem:[#allocation40_spill] sm:$0xff] %v8239_v53  ;;  %v1705_v7 = vadd.f32 %v10748_v12, %v1625_v55  ;;  %v8251_v14 = vmul.f32 %v5963_v29, %v2207_v46  ;;  %v1727_v47 = vadd.f32 %v10751_v15, %v1647_v4  ;;  %v1747_v51 = vadd.f32 %v10752_v19, %v1667_v8  ;;  %v10756_v55 = vld [vmem:[#allocation102_spill] sm:$0xff]  ;;  %v10757_v12 = vld [vmem:[#allocation103_spill] sm:$0xff]  ;;  %v10759_v46 = vld [vmem:[#allocation112_spill] sm:$0xff] }
 0x31a   : > { %v1746_v54 = vadd.f32 %v10753_v33, %v1666_v13  ;;  %v1766_v53 = vadd.f32 %v10754_v21, %v1686_v58  ;;  %v1707_v2 = vadd.f32 %v10756_v55, %v1627_v52  ;;  %v1706_v6 = vadd.f32 %v10757_v12, %v1626_v18  ;;  %v10758_v44 = vld [vmem:[#allocation111_spill] sm:$0xff]  ;;  %v10761_v4 = vld [vmem:[#allocation113_spill] sm:$0xff]  ;;  %v10762_v58 = vld [vmem:[#allocation114_spill] sm:$0xff] }
 0x31b   : > { %v8259_v63 = vpop.permute.xlu1 %2673  ;;  %v1765_v29 = vadd.f32 %v10758_v44, %v1685_v32  ;;  %v1785_v9 = vadd.f32 %v10759_v46, %v1705_v7  ;;  %v1767_v15 = vadd.f32 %v10761_v4, %v1687_v45  ;;  %v1798_v8 = vadd.f32 %v8029_v60, %v1726_v24  ;;  %v10763_v21 = vld [vmem:[#allocation115_spill] sm:$0xff]  ;;  %v10768_v44 = vld [vmem:[#allocation117_spill] sm:$0xff]  ;;  %v10769_v46 = vld [vmem:[#allocation118_spill] sm:$0xff] }
 0x31c   : > { %10755 = vst [vmem:[#allocation41_spill] sm:$0xff] %v8259_v63  ;;  %v8265_v35 = vpop.permute.xlu0 %2657  ;;  %v1797_v13 = vadd.f32 %v8031_v22, %v1725_v25  ;;  %v2379_v19 = vstv %s8215_s12  ;;  %v1787_v33 = vadd.f32 %v10762_v58, %v1707_v2  ;;  %v1786_v63 = vadd.f32 %v10763_v21, %v1706_v6  ;;  %v5966_v25 = vld [vmem:[#allocation2 + $0x50] sm:$0xff]  ;;  %s8989_s12 = sld [smem:[#allocation7 + $0x25]] }
 0x31d   : > { %10760 = vst [vmem:[#allocation189_spill] sm:$0xff] %v8265_v35  ;;  %v1805_v52 = vadd.f32 %v8034_v31, %v1745_v56  ;;  %v2387_v18 = vstv %s8223_s13  ;;  %v1799_v32 = vadd.f32 %v8036_v26, %v1727_v47  ;;  %v1807_v7 = vadd.f32 %v8049_v17, %v1747_v51  ;;  %v5967_v31 = vld [vmem:[#allocation2 + $0x48] sm:$0xff]  ;;  %s9031_s13 = sld [smem:[#allocation7 + $0x49]] }
 0x31e   : > { %v1806_v55 = vadd.f32 %v8051_v27, %v1746_v54  ;;  %v1814_v45 = vadd.f32 %v8059_v43, %v1766_v53  ;;  %v1813_v22 = vadd.f32 %v8061_v48, %v1765_v29  ;;  %v1821_v24 = vadd.f32 %v8065_v20, %v1785_v9  ;;  %v5968_v43 = vld [vmem:[#allocation2 + $0x58] sm:$0x3]  ;;  %v10766_v51 = vld [vmem:[#allocation116_spill] sm:$0xff]  ;;  %v10767_v54 = vld [vmem:[#allocation25_spill] sm:$0xff] }
 0x31f   : > { %v8279_v60 = vpop.permute.xlu1 %2677  ;;  %v8283_v2 = vmul.f32 %v5966_v25, %v2379_v19  ;;  %v8285_v56 = vmul.f32 %v5967_v31, %v2379_v19  ;;  %v1815_v17 = vadd.f32 %v8067_v50, %v1767_v15  ;;  %v8290_v27 = vmul.f32 %v5967_v31, %v2387_v18  ;;  %v10779_v35 = vld [vmem:[#allocation124_spill] sm:$0xff] }
 0x320   : > { %10764 = vst [vmem:[#allocation191_spill] sm:$0xff] %v8279_v60  ;;  %v8287_v26 = vpop.permute.xlu0 %2675  ;;  %v8292_v53 = vmul.f32 %v5968_v43, %v2379_v19  ;;  %v2395_v47 = vstv %s8246_s14  ;;  %v1842_v48 = vadd.f32 %v10766_v51, %v1798_v8  ;;  %v1823_v20 = vadd.f32 %v8072_v5, %v1787_v33  ;;  %v10771_v8 = vld [vmem:[#allocation119_spill] sm:$0xff]  ;;  %v10772_v5 = vld [vmem:[#allocation120_spill] sm:$0xff]  ;;  %v10775_v51 = vld [vmem:[#allocation122_spill] sm:$0xff]  ;;  %s9048_s14 = sld [smem:[#allocation7 + $0x6d]] }
 0x321   : > { %10765 = vst [vmem:[#allocation42_spill] sm:$0xff] %v8287_v26  ;;  %v1822_v12 = vadd.f32 %v10767_v54, %v1786_v63  ;;  %v2403_v6 = vstv %s8253_s15  ;;  %v1841_v29 = vadd.f32 %v10768_v44, %v1797_v13  ;;  %v1861_v9 = vadd.f32 %v10769_v46, %v1805_v52  ;;  %v10774_v13 = vld [vmem:[#allocation121_spill] sm:$0xff]  ;;  %v10776_v46 = vld [vmem:[#allocation123_spill] sm:$0xff]  ;;  %v10777_v60 = vld [vmem:[#allocation128_spill] sm:$0xff]  ;;  %s9067_s15 = sld [smem:[#allocation7 + $0x2]] }
 0x322   : > { %v8303_v50 = vmul.f32 %v5968_v43, %v2387_v18  ;;  %v8305_v4 = vmul.f32 %v5966_v25, %v2387_v18  ;;  %v1843_v19 = vadd.f32 %v10771_v8, %v1799_v32  ;;  %v1863_v58 = vadd.f32 %v10772_v5, %v1807_v7  ;;  %v10778_v8 = vld [vmem:[#allocation129_spill] sm:$0xff] }
 0x323   : > { %v8309_v15 = vpop.permute.xlu1 %2695  ;;  %v8313_v63 = vmul.f32 %v5966_v25, %v2395_v47  ;;  %v8315_v33 = vmul.f32 %v5967_v31, %v2395_v47  ;;  %v1862_v52 = vadd.f32 %v10774_v13, %v1806_v55  ;;  %v1882_v54 = vadd.f32 %v10775_v51, %v1814_v45  ;;  %v10781_v13 = vld [vmem:[#allocation130_spill] sm:$0xff] }
 0x324   : > { %10770 = vst [vmem:[#allocation43_spill] sm:$0xff] %v8309_v15  ;;  %v8317_v21 = vpop.permute.xlu0 %2693  ;;  %v8321_v18 = vmul.f32 %v5967_v31, %v2403_v6  ;;  %v8323_v44 = vmul.f32 %v5968_v43, %v2395_v47  ;;  %v1881_v26 = vadd.f32 %v10776_v46, %v1813_v22  ;;  %v1922_v32 = vadd.f32 %v10777_v60, %v1842_v48  ;;  %v10784_v60 = vld [vmem:[#allocation131_spill] sm:$0xff]  ;;  %v10785_v48 = vld [vmem:[#allocation132_spill] sm:$0xff]  ;;  %v10787_v46 = vld [vmem:[#allocation134_spill] sm:$0xff] }
 0x325   : > { %10773 = vst [vmem:[#allocation192_spill] sm:$0xff] %v8317_v21  ;;  %v1921_v7 = vadd.f32 %v10778_v8, %v1841_v29  ;;  %v8328_v5 = vmul.f32 %v5968_v43, %v2403_v6  ;;  %v1901_v49 = vadd.f32 %v10779_v35, %v1821_v24  ;;  %v10780_v21 = vld [vmem:[#allocation125_spill] sm:$0xff]  ;;  %v1941_v45 = vadd.f32 %v10781_v13, %v1861_v9  ;;  %v10791_v13 = vld [vmem:[#allocation136_spill] sm:$0xff] }
 0x326   : > { %v1883_v55 = vadd.f32 %v10780_v21, %v1815_v17  ;;  %v8335_v31 = vmul.f32 %v5966_v25, %v2403_v6  ;;  %v1923_v47 = vadd.f32 %v10784_v60, %v1843_v19  ;;  %v1943_v43 = vadd.f32 %v10785_v48, %v1863_v58  ;;  %v10786_v29 = vld [vmem:[#allocation133_spill] sm:$0xff]  ;;  %v10788_v17 = vld [vmem:[#allocation126_spill] sm:$0xff]  ;;  %v10789_v21 = vld [vmem:[#allocation127_spill] sm:$0xff] }
 0x327   : > { %v8339_v22 = vpop.permute.xlu1 %2713  ;;  %v1942_v51 = vadd.f32 %v10786_v29, %v1862_v52  ;;  %v1962_v35 = vadd.f32 %v10787_v46, %v1882_v54  ;;  %v1903_v9 = vadd.f32 %v10788_v17, %v1823_v20  ;;  %v1902_v25 = vadd.f32 %v10789_v21, %v1822_v12  ;;  %v10790_v6 = vld [vmem:[#allocation135_spill] sm:$0xff]  ;;  %v10793_v52 = vld [vmem:[#allocation138_spill] sm:$0xff] }
 0x328   : > { %10782 = vst [vmem:[#allocation194_spill] sm:$0xff] %v8335_v31  ;;  %10783 = vst [vmem:[#allocation195_spill] sm:$0xff] %v8339_v22  ;;  %v8345_v24 = vpop.permute.xlu0 %2697  ;;  %v1961_v8 = vadd.f32 %v10790_v6, %v1881_v26  ;;  %v1981_v15 = vadd.f32 %v10791_v13, %v1901_v49  ;;  %v10792_v22 = vld [vmem:[#allocation137_spill] sm:$0xff]  ;;  %v1993_v19 = vadd.f32 %v8113_v0, %v1922_v32  ;;  %v2574_v60 = vstv %s8299_s17  ;;  %v10794_v54 = vld [vmem:[#allocation139_spill] sm:$0xff]  ;;  %s9086_s17 = sld [smem:[#allocation7 + $0x26]] }
 0x329   : > { %v1963_v31 = vadd.f32 %v10792_v22, %v1883_v55  ;;  %v1992_v58 = vadd.f32 %v8115_v3, %v1921_v7  ;;  %v1983_v48 = vadd.f32 %v10793_v52, %v1903_v9  ;;  %v1982_v29 = vadd.f32 %v10794_v54, %v1902_v25  ;;  %v10799_v9 = vld [vmem:[#allocation36_spill] sm:$0xff]  ;;  %v10801_v25 = vld [vmem:[#allocation141_spill] sm:$0xff] }
 0x32a   : > { %v2000_v46 = vadd.f32 %v8118_v11, %v1941_v45  ;;  %v2582_v20 = vstv %s8307_s2  ;;  %v1994_v26 = vadd.f32 %v8120_v39, %v1923_v47  ;;  %v2002_v49 = vadd.f32 %v8135_v30, %v1943_v43  ;;  %v5969_v11 = vld [vmem:[#allocation2 + $0x51] sm:$0xff]  ;;  %v5970_v45 = vld [vmem:[#allocation2 + $0x49] sm:$0xff]  ;;  %s9097_s2 = sld [smem:[#allocation7 + $0x4a]] }
 0x32b   : > { %v8359_v17 = vpop.permute.xlu1 %2717  ;;  %v2001_v12 = vadd.f32 %v8137_v16, %v1942_v51  ;;  %v2009_v0 = vadd.f32 %v8143_v28, %v1962_v35  ;;  %v2008_v32 = vadd.f32 %v8145_v62, %v1961_v8  ;;  %v2016_v7 = vadd.f32 %v8149_v40, %v1981_v15  ;;  %v5971_v16 = vld [vmem:[#allocation2 + $0x59] sm:$0x3]  ;;  %v10797_v43 = vld [vmem:[#allocation140_spill] sm:$0xff] }
 0x32c   : > { %10795 = vst [vmem:[#allocation196_spill] sm:$0xff] %v8359_v17  ;;  %v8365_v3 = vpop.permute.xlu0 %2715  ;;  %v8369_v55 = vmul.f32 %v5969_v11, %v2574_v60  ;;  %v8371_v22 = vmul.f32 %v5970_v45, %v2574_v60  ;;  %v2010_v39 = vadd.f32 %v8151_v34, %v1963_v31  ;;  %v8374_v30 = vmul.f32 %v5970_v45, %v2582_v20  ;;  %v10798_v35 = vld [vmem:[#allocation34_spill] sm:$0xff] }
 0x32d   : > { %10796 = vst [vmem:[#allocation197_spill] sm:$0xff] %v8365_v3  ;;  %v8376_v47 = vmul.f32 %v5971_v16, %v2574_v60  ;;  %v2590_v28 = vstv %s8330_s3  ;;  %v2037_v51 = vadd.f32 %v10797_v43, %v1993_v19  ;;  %v2018_v62 = vadd.f32 %v10798_v35, %v1983_v48  ;;  %v10802_v34 = vld [vmem:[#allocation142_spill] sm:$0xff]  ;;  %v10804_v19 = vld [vmem:[#allocation143_spill] sm:$0xff]  ;;  %v10805_v48 = vld [vmem:[#allocation144_spill] sm:$0xff]  ;;  %s9108_s3 = sld [smem:[#allocation7 + $0x6e]] }
 0x32e   : > { %v2017_v40 = vadd.f32 %v10799_v9, %v1982_v29  ;;  %v2598_v15 = vstv %s8337_s19  ;;  %v2036_v6 = vadd.f32 %v10801_v25, %v1992_v58  ;;  %v2056_v31 = vadd.f32 %v10802_v34, %v2000_v46  ;;  %v10806_v35 = vld [vmem:[#allocation145_spill] sm:$0xff]  ;;  %v10807_v9 = vld [vmem:[#allocation152_spill] sm:$0xff]  ;;  %v10810_v34 = vld [vmem:[#allocation146_spill] sm:$0xff]  ;;  %s9126_s19 = sld [smem:[#allocation7 + $0x4]] }
 0x32f   : > { %v8383_v21 = vpop.permute.xlu1 %2735  ;;  %v8389_v8 = vmul.f32 %v5971_v16, %v2582_v20  ;;  %v8391_v13 = vmul.f32 %v5969_v11, %v2582_v20  ;;  %v2038_v52 = vadd.f32 %v10804_v19, %v1994_v26  ;;  %v2058_v54 = vadd.f32 %v10805_v48, %v2002_v49  ;;  %v10812_v19 = vld [vmem:[#allocation153_spill] sm:$0xff]  ;;  %v10815_v17 = vld [vmem:[#allocation154_spill] sm:$0xff] }
 0x330   : > { %10800 = vst [vmem:[#allocation198_spill] sm:$0xff] %v8383_v21  ;;  %v8393_v60 = vpop.permute.xlu0 %2733  ;;  %v8397_v29 = vmul.f32 %v5969_v11, %v2590_v28  ;;  %v8399_v43 = vmul.f32 %v5970_v45, %v2590_v28  ;;  %v2057_v58 = vadd.f32 %v10806_v35, %v2001_v12  ;;  %v2117_v46 = vadd.f32 %v10807_v9, %v2037_v51  ;;  %v10811_v21 = vld [vmem:[#allocation147_spill] sm:$0xff] }
 0x331   : > { %10803 = vst [vmem:[#allocation199_spill] sm:$0xff] %v8393_v60  ;;  %v8405_v25 = vmul.f32 %v5970_v45, %v2598_v15  ;;  %v8407_v20 = vmul.f32 %v5971_v16, %v2590_v28  ;;  %v2077_v60 = vadd.f32 %v10810_v34, %v2009_v0  ;;  %v2076_v26 = vadd.f32 %v10811_v21, %v2008_v32  ;;  %v10816_v35 = vld [vmem:[#allocation155_spill] sm:$0xff]  ;;  %v10817_v45 = vld [vmem:[#allocation156_spill] sm:$0xff]  ;;  %v10818_v28 = vld [vmem:[#allocation157_spill] sm:$0xff] }
 0x332   : > { %v2116_v49 = vadd.f32 %v10812_v19, %v2036_v6  ;;  %v8412_v48 = vmul.f32 %v5971_v16, %v2598_v15  ;;  %v2136_v12 = vadd.f32 %v10815_v17, %v2056_v31  ;;  %v2118_v51 = vadd.f32 %v10816_v35, %v2038_v52  ;;  %v10820_v32 = vld [vmem:[#allocation148_spill] sm:$0xff]  ;;  %v10821_v21 = vld [vmem:[#allocation149_spill] sm:$0xff]  ;;  %v10822_v34 = vld [vmem:[#allocation158_spill] sm:$0xff] }
 0x333   : > { %10808 = vst [vmem:[#allocation44_spill] sm:$0xff] %v8405_v25  ;;  %10809 = vst [vmem:[#allocation45_spill] sm:$0xff] %v8407_v20  ;;  %v8414_v3 = vpop.permute.xlu1 %2753  ;;  %v2138_v9 = vadd.f32 %v10817_v45, %v2058_v54  ;;  %v2137_v20 = vadd.f32 %v10818_v28, %v2057_v58  ;;  %v2096_v16 = vadd.f32 %v10820_v32, %v2016_v7  ;;  %v10823_v17 = vld [vmem:[#allocation150_spill] sm:$0xff]  ;;  %v10824_v52 = vld [vmem:[#allocation151_spill] sm:$0xff] }
 0x334   : > { %10813 = vst [vmem:[#allocation46_spill] sm:$0xff] %v8412_v48  ;;  %10814 = vst [vmem:[#allocation47_spill] sm:$0xff] %v8414_v3  ;;  %v8422_v0 = vpop.permute.xlu0 %2737  ;;  %v2078_v6 = vadd.f32 %v10821_v21, %v2010_v39  ;;  %v2157_v19 = vadd.f32 %v10822_v34, %v2077_v60  ;;  %v8429_v3 = vmul.f32 %v5969_v11, %v2598_v15  ;;  %v10825_v54 = vld [vmem:[#allocation159_spill] sm:$0xff]  ;;  %v10826_v28 = vld [vmem:[#allocation160_spill] sm:$0xff]  ;;  %v2769_v60 = vstv %s8385_s20  ;;  %s9135_s20 = sld [smem:[#allocation7 + $0x28]] }
 0x335   : > { %10819 = vst [vmem:[#allocation48_spill] sm:$0xff] %v8422_v0  ;;  %v2098_v31 = vadd.f32 %v10823_v17, %v2018_v62  ;;  %v2097_v35 = vadd.f32 %v10824_v52, %v2017_v40  ;;  %v2156_v45 = vadd.f32 %v10825_v54, %v2076_v26  ;;  %v2188_v58 = vadd.f32 %v8197_v59, %v2117_v46  ;;  %v10827_v48 = vld [vmem:[#allocation161_spill] sm:$0xff]  ;;  %v10830_v59 = vld [vmem:[#allocation162_spill] sm:$0xff]  ;;  %v10831_v32 = vld [vmem:[#allocation163_spill] sm:$0xff] }
 0x336   : > { %v2176_v0 = vadd.f32 %v10826_v28, %v2096_v16  ;;  %v2158_v25 = vadd.f32 %v10827_v48, %v2078_v6  ;;  %v2187_v7 = vadd.f32 %v8199_v36, %v2116_v49  ;;  %v2195_v11 = vadd.f32 %v8204_v38, %v2136_v12  ;;  %v10832_v16 = vld [vmem:[#allocation164_spill] sm:$0xff]  ;;  %v5974_v52 = vld [vmem:[#allocation2 + $0x5a] sm:$0x3] }
 0x337   : > { %v8438_v39 = vpop.permute.xlu1 %2757  ;;  %v2189_v62 = vadd.f32 %v8206_v23, %v2118_v51  ;;  %v2197_v40 = vadd.f32 %v8219_v10, %v2138_v9  ;;  %v2196_v15 = vadd.f32 %v8221_v42, %v2137_v20  ;;  %v2178_v46 = vadd.f32 %v10830_v59, %v2098_v31  ;;  %v5972_v23 = vld [vmem:[#allocation2 + $0x52] sm:$0xff]  ;;  %v5973_v10 = vld [vmem:[#allocation2 + $0x4a] sm:$0xff] }
 0x338   : > { %10828 = vst [vmem:[#allocation49_spill] sm:$0xff] %v8438_v39  ;;  %v8445_v26 = vpop.permute.xlu0 %2755  ;;  %v2177_v48 = vadd.f32 %v10831_v32, %v2097_v35  ;;  %v2204_v36 = vadd.f32 %v8227_v57, %v2157_v19  ;;  %v2777_v49 = vstv %s8401_s21  ;;  %v2232_v21 = vadd.f32 %v10832_v16, %v2188_v58  ;;  %v10833_v20 = vld [vmem:[#allocation165_spill] sm:$0xff]  ;;  %v10834_v19 = vld [vmem:[#allocation176_spill] sm:$0xff]  ;;  %s9148_s21 = sld [smem:[#allocation7 + $0x4c]] }
 0x339   : > { %10829 = vst [vmem:[#allocation50_spill] sm:$0xff] %v8445_v26  ;;  %v2203_v38 = vadd.f32 %v8229_v1, %v2156_v45  ;;  %v8453_v12 = vmul.f32 %v5972_v23, %v2769_v60  ;;  %v8455_v42 = vmul.f32 %v5973_v10, %v2769_v60  ;;  %v2231_v51 = vadd.f32 %v10833_v20, %v2187_v7  ;;  %v10837_v7 = vld [vmem:[#allocation167_spill] sm:$0xff]  ;;  %v10839_v20 = vld [vmem:[#allocation169_spill] sm:$0xff] }
 0x33a   : > { %v2211_v9 = vadd.f32 %v8235_v41, %v2176_v0  ;;  %v2205_v6 = vadd.f32 %v8237_v37, %v2158_v25  ;;  %v2785_v57 = vstv %s8416_s22  ;;  %v2312_v17 = vadd.f32 %v10834_v19, %v2232_v21  ;;  %v10835_v41 = vld [vmem:[#allocation177_spill] sm:$0xff]  ;;  %v10836_v25 = vld [vmem:[#allocation166_spill] sm:$0xff]  ;;  %v10838_v21 = vld [vmem:[#allocation168_spill] sm:$0xff]  ;;  %s9158_s22 = sld [smem:[#allocation7 + $0x70]] }
 0x33b   : > { %v8460_v34 = vpop.permute.xlu1 %2810  ;;  %v8466_v1 = vmul.f32 %v5973_v10, %v2777_v49  ;;  %v8468_v35 = vmul.f32 %v5974_v52, %v2769_v60  ;;  %v2793_v54 = vstv %s8424_s24  ;;  %v2213_v45 = vadd.f32 %v8244_v61, %v2178_v46  ;;  %v10841_v46 = vld [vmem:[#allocation170_spill] sm:$0xff]  ;;  %v10848_v39 = vld [vmem:[#allocation173_spill] sm:$0xff]  ;;  %s9169_s24 = sld [smem:[#allocation7 + $0x5]] }
 0x33c   : > { %v8464_v31 = vpop.permute.xlu0 %2808  ;;  %v2212_v58 = vadd.f32 %v8251_v14, %v2177_v48  ;;  %v2311_v0 = vadd.f32 %v10835_v41, %v2231_v51  ;;  %v8474_v37 = vmul.f32 %v5974_v52, %v2777_v49  ;;  %v2251_v28 = vadd.f32 %v10836_v25, %v2195_v11  ;;  %v10842_v51 = vld [vmem:[#allocation178_spill] sm:$0xff]  ;;  %v10844_v25 = vld [vmem:[#allocation171_spill] sm:$0xff] }
 0x33d   : > { %v2233_v59 = vadd.f32 %v10837_v7, %v2189_v62  ;;  %v8478_v32 = vmul.f32 %v5972_v23, %v2777_v49  ;;  %v8480_v16 = vmul.f32 %v5972_v23, %v2785_v57  ;;  %v2253_v60 = vadd.f32 %v10838_v21, %v2197_v40  ;;  %v10845_v7 = vld [vmem:[#allocation179_spill] sm:$0xff] }
 0x33e   : > { %v2252_v19 = vadd.f32 %v10839_v20, %v2196_v15  ;;  %v8486_v61 = vmul.f32 %v5973_v10, %v2785_v57  ;;  %v8488_v14 = vmul.f32 %v5973_v10, %v2793_v54  ;;  %v2272_v48 = vadd.f32 %v10841_v46, %v2204_v36  ;;  %v10847_v10 = vld [vmem:[#allocation172_spill] sm:$0xff]  ;;  %v10849_v46 = vld [vmem:[#allocation174_spill] sm:$0xff] }
 0x33f   : > { %v8484_v26 = vpop.permute.xlu1 %2828  ;;  %v2331_v11 = vadd.f32 %v10842_v51, %v2251_v28  ;;  %v2384_v62 = vadd.f32 %v8283_v2, %v2312_v17  ;;  %v8495_v41 = vmul.f32 %v5974_v52, %v2785_v57  ;;  %v2271_v40 = vadd.f32 %v10844_v25, %v2203_v38  ;;  %v10850_v51 = vld [vmem:[#allocation200_spill] sm:$0xff]  ;;  %v10851_v57 = vld [vmem:[#allocation175_spill] sm:$0xff]  ;;  %v10853_v25 = vld [vmem:[#allocation181_spill] sm:$0xff] }
 0x340   : > { %10840 = vst [vmem:[#allocation51_spill] sm:$0xff] %v8488_v14  ;;  %v8493_v49 = vpop.permute.xlu0 %2812  ;;  %v2313_v15 = vadd.f32 %v10845_v7, %v2233_v59  ;;  %v2383_v21 = vadd.f32 %v8285_v56, %v2311_v0  ;;  %v8500_v20 = vmul.f32 %v5974_v52, %v2793_v54  ;;  %v2291_v14 = vadd.f32 %v10847_v10, %v2211_v9  ;;  %v10854_v7 = vld [vmem:[#allocation203_spill] sm:$0xff]  ;;  %v10855_v0 = vld [vmem:[#allocation182_spill] sm:$0xff] }
 0x341   : > { %10843 = vst [vmem:[#allocation56_spill] sm:$0xff] %v8495_v41  ;;  %v2273_v36 = vadd.f32 %v10848_v39, %v2205_v6  ;;  %v2293_v28 = vadd.f32 %v10849_v46, %v2213_v45  ;;  %v2428_v2 = vadd.f32 %v10850_v51, %v2384_v62  ;;  %v2292_v17 = vadd.f32 %v10851_v57, %v2212_v58  ;;  %v10852_v41 = vld [vmem:[#allocation180_spill] sm:$0xff]  ;;  %v10856_v10 = vld [vmem:[#allocation183_spill] sm:$0xff] }
 0x342   : > { %10846 = vst [vmem:[#allocation57_spill] sm:$0xff] %v8500_v20  ;;  %v2333_v38 = vadd.f32 %v10852_v41, %v2253_v60  ;;  %v2332_v59 = vadd.f32 %v10853_v25, %v2252_v19  ;;  %v2427_v56 = vadd.f32 %v10854_v7, %v2383_v21  ;;  %v2352_v9 = vadd.f32 %v10855_v0, %v2272_v48  ;;  %v10857_v45 = vld [vmem:[#allocation187_spill] sm:$0xff]  ;;  %v10858_v51 = vld [vmem:[#allocation184_spill] sm:$0xff]  ;;  %v10860_v21 = vld [vmem:[#allocation185_spill] sm:$0xff] }
 0x343   : > { %v8512_v52 = vpop.permute.xlu1 %2832  ;;  %v2351_v39 = vadd.f32 %v10856_v10, %v2271_v40  ;;  %v2391_v6 = vadd.f32 %v8290_v27, %v2331_v11  ;;  %v2508_v62 = vadd.f32 %v10857_v45, %v2428_v2  ;;  %v2371_v58 = vadd.f32 %v10858_v51, %v2291_v14  ;;  %v10859_v41 = vld [vmem:[#allocation188_spill] sm:$0xff]  ;;  %v10861_v7 = vld [vmem:[#allocation190_spill] sm:$0xff]  ;;  %v10863_v27 = vld [vmem:[#allocation193_spill] sm:$0xff] }
 0x344   : > { %v8518_v46 = vpop.permute.xlu0 %2830  ;;  %v2385_v60 = vadd.f32 %v8292_v53, %v2313_v15  ;;  %v2507_v19 = vadd.f32 %v10859_v41, %v2427_v56  ;;  %v2960_v57 = vlaneseq  ;;  %v2353_v25 = vadd.f32 %v10860_v21, %v2273_v36  ;;  %v10862_v48 = vld [vmem:[#allocation206_spill] sm:$0xff]  ;;  %v10864_v2 = vld [vmem:[#allocation207_spill] sm:$0xff] }
 0x345   : > { %v2373_v20 = vadd.f32 %v10861_v7, %v2293_v28  ;;  %v2447_v0 = vadd.f32 %v10862_v48, %v2391_v6  ;;  %v8526_v40 = vmul.f32 %v5972_v23, %v2793_v54  ;;  %v2372_v11 = vadd.f32 %v10863_v27, %v2292_v17  ;;  %v10865_v28 = vld [vmem:[#allocation20_spill] sm:$0xff]  ;;  %v10866_v6 = vld [vmem:[#allocation21_spill] sm:$0xff]  ;;  %v10874_v7 = vld [vmem:[#allocation43_spill] sm:$0xff] }
 0x346   : > { %v2429_v10 = vadd.f32 %v10864_v2, %v2385_v60  ;;  %v2393_v14 = vadd.f32 %v8303_v50, %v2333_v38  ;;  %v2392_v53 = vadd.f32 %v8305_v4, %v2332_v59  ;;  %v2400_v56 = vadd.f32 %v8313_v63, %v2352_v9  ;;  %v10871_v60 = vld [vmem:[#allocation35_spill] sm:$0xff]  ;;  %v10875_v27 = vld [vmem:[#allocation17_spill] sm:$0xff] }
 0x347   : > { %v8532_v15 = vpop.permute.xlu1 %2850  ;;  %v2399_v36 = vadd.f32 %v8315_v33, %v2351_v39  ;;  %v2527_v45 = vadd.f32 %v10865_v28, %v2447_v0  ;;  %v2579_v23 = vadd.f32 %v8369_v55, %v2508_v62  ;;  %v2407_v17 = vadd.f32 %v8321_v18, %v2371_v58  ;;  %v10867_v33 = vld [vmem:[#allocation29_spill] sm:$0xff]  ;;  %v10868_v18 = vld [vmem:[#allocation208_spill] sm:$0xff] }
 0x348   : > { %v8538_v54 = vpop.permute.xlu0 %2848  ;;  %v2509_v51 = vadd.f32 %v10866_v6, %v2429_v10  ;;  %v2578_v50 = vadd.f32 %v8371_v22, %v2507_v19  ;;  %v8544_v4 = vand.u32 127, %v2960_v57  ;;  %v2401_v38 = vadd.f32 %v8323_v44, %v2353_v25  ;;  %v10869_v39 = vld [vmem:[#allocation209_spill] sm:$0xff]  ;;  %v10870_v22 = vld [vmem:[#allocation194_spill] sm:$0xff]  ;;  %v10872_v44 = vld [vmem:[#allocation15_spill] sm:$0xff] }
 0x349   : > { %v2409_v63 = vadd.f32 %v8328_v5, %v2373_v20  ;;  %v2623_v59 = vadd.f32 %v10867_v33, %v2579_v23  ;;  %v8550_v9 = vstv %s8506_s25  ;;  %v2449_v55 = vadd.f32 %v10868_v18, %v2393_v14  ;;  %v10873_v20 = vld [vmem:[#allocation16_spill] sm:$0xff]  ;;  %v10876_v10 = vld [vmem:[#allocation18_spill] sm:$0xff]  ;;  %v10878_v23 = vld [vmem:[#allocation19_spill] sm:$0xff]  ;;  %s9181_s25 = sld [smem:[#allocation7 + $0x29]] }
 0x34a   : > { %v2448_v62 = vadd.f32 %v10869_v39, %v2392_v53  ;;  %v2408_v58 = vadd.f32 %v10870_v22, %v2372_v11  ;;  %v2622_v41 = vadd.f32 %v10871_v60, %v2578_v50  ;;  %v2468_v5 = vadd.f32 %v10872_v44, %v2400_v56  ;;  %v10877_v53 = vld [vmem:[#allocation192_spill] sm:$0xff]  ;;  %v10879_v50 = vld [vmem:[#allocation186_spill] sm:$0xff]  ;;  %v10881_v18 = vld [vmem:[#allocation37_spill] sm:$0xff] }
 0x34b   : > { %v8560_v19 = vpop.permute.xlu1 %2868  ;;  %v2467_v21 = vadd.f32 %v10873_v20, %v2399_v36  ;;  %v2586_v25 = vadd.f32 %v8374_v30, %v2527_v45  ;;  %v2703_v48 = vadd.f32 %v10874_v7, %v2623_v59  ;;  %v2487_v2 = vadd.f32 %v10875_v27, %v2407_v17  ;;  %v10880_v33 = vld [vmem:[#allocation22_spill] sm:$0xff]  ;;  %v10882_v45 = vld [vmem:[#allocation23_spill] sm:$0xff]  ;;  %v10883_v39 = vld [vmem:[#allocation24_spill] sm:$0xff] }
 0x34c   : > { %v8566_v0 = vpop.permute.xlu0 %2852  ;;  %v2469_v14 = vadd.f32 %v10876_v10, %v2401_v38  ;;  %v2580_v11 = vadd.f32 %v8376_v47, %v2509_v51  ;;  %v2702_v28 = vadd.f32 %v10877_v53, %v2622_v41  ;;  %v2489_v6 = vadd.f32 %v10878_v23, %v2409_v63  ;;  %v10884_v17 = vld [vmem:[#allocation26_spill] sm:$0xff]  ;;  %v10886_v41 = vld [vmem:[#allocation27_spill] sm:$0xff]  ;;  %v10887_v44 = vld [vmem:[#allocation32_spill] sm:$0xff] }
 0x34d   : > { %v2488_v56 = vadd.f32 %v10879_v50, %v2408_v58  ;;  %v2529_v36 = vadd.f32 %v10880_v33, %v2449_v55  ;;  %v2642_v30 = vadd.f32 %v10881_v18, %v2586_v25  ;;  %v2528_v59 = vadd.f32 %v10882_v45, %v2448_v62  ;;  %v10885_v60 = vld [vmem:[#allocation38_spill] sm:$0xff]  ;;  %v10888_v20 = vld [vmem:[#allocation195_spill] sm:$0xff]  ;;  %v10889_v62 = vld [vmem:[#allocation33_spill] sm:$0xff] }
 0x34e   : > { %v2548_v22 = vadd.f32 %v10883_v39, %v2468_v5  ;;  %v2547_v38 = vadd.f32 %v10884_v17, %v2467_v21  ;;  %v2624_v47 = vadd.f32 %v10885_v60, %v2580_v11  ;;  %v2567_v63 = vadd.f32 %v10886_v41, %v2487_v2  ;;  %v10890_v5 = vld [vmem:[#allocation28_spill] sm:$0xff]  ;;  %v10893_v18 = vld [vmem:[#allocation46_spill] sm:$0xff]  ;;  %v10895_v39 = vld [vmem:[#allocation31_spill] sm:$0xff] }
 0x34f   : > { %v8580_v51 = vpop.permute.xlu1 %2872  ;;  %v2549_v58 = vadd.f32 %v10887_v44, %v2469_v14  ;;  %v2722_v55 = vadd.f32 %v10888_v20, %v2642_v30  ;;  %v2774_v25 = vadd.f32 %v8453_v12, %v2703_v48  ;;  %v2569_v27 = vadd.f32 %v10889_v62, %v2489_v6  ;;  %v10897_v60 = vld [vmem:[#allocation40_spill] sm:$0xff]  ;;  %v10900_v62 = vld [vmem:[#allocation197_spill] sm:$0xff] }
 0x350   : > { %v8586_v7 = vpop.permute.xlu0 %2870  ;;  %v2568_v10 = vadd.f32 %v10890_v5, %v2488_v56  ;;  %v2704_v21 = vadd.f32 %v8345_v24, %v2624_v47  ;;  %v2773_v11 = vadd.f32 %v8455_v42, %v2702_v28  ;;  %v2588_v53 = vadd.f32 %v8389_v8, %v2529_v36  ;;  %v10891_v24 = vld [vmem:[#allocation44_spill] sm:$0xff]  ;;  %v10892_v42 = vld [vmem:[#allocation45_spill] sm:$0xff]  ;;  %v10901_v5 = vld [vmem:[#allocation198_spill] sm:$0xff] }
 0x351   : > { %v2818_v2 = vadd.f32 %v8460_v34, %v2774_v25  ;;  %v8595_v23 = vstv %s8552_s4  ;;  %v8598_v14 = vstv %s8554_s30  ;;  %v2587_v12 = vadd.f32 %v8391_v13, %v2528_v59  ;;  %v10894_v59 = vld [vmem:[#allocation30_spill] sm:$0xff]  ;;  %s5620_s4 = sld [smem:[#allocation7 + $0x4d]]  ;;  %s9203_s30 = sld [smem:[#allocation7 + $0x71]] }
 0x352   : > { %v2595_v48 = vadd.f32 %v8397_v29, %v2548_v22  ;;  %v2594_v6 = vadd.f32 %v8399_v43, %v2547_v38  ;;  %v2817_v50 = vadd.f32 %v8464_v31, %v2773_v11  ;;  %v2602_v33 = vadd.f32 %v10891_v24, %v2567_v63  ;;  %v10896_v38 = vld [vmem:[#allocation39_spill] sm:$0xff]  ;;  %v10898_v63 = vld [vmem:[#allocation41_spill] sm:$0xff]  ;;  %v10905_v24 = vld [vmem:[#allocation42_spill] sm:$0xff] }
 0x353   : > { %v2891_v56 = vpop.permute.xlu1 %2890  ;;  %v2596_v28 = vadd.f32 %v10892_v42, %v2549_v58  ;;  %v2781_v8 = vadd.f32 %v8466_v1, %v2722_v55  ;;  %v2604_v30 = vadd.f32 %v10893_v18, %v2569_v27  ;;  %v2603_v45 = vadd.f32 %v8429_v3, %v2568_v10  ;;  %v10899_v58 = vld [vmem:[#allocation196_spill] sm:$0xff]  ;;  %v10902_v11 = vld [vmem:[#allocation189_spill] sm:$0xff] }
 0x354   : > { %v2898_v34 = vadd.f32 %v2891_v56, %v2818_v2  ;;  %v2889_v36 = vpop.permute.xlu0 %2888  ;;  %v2775_v13 = vadd.f32 %v8468_v35, %v2704_v21  ;;  %v2644_v43 = vadd.f32 %v10894_v59, %v2588_v53  ;;  %v2643_v31 = vadd.f32 %v10895_v39, %v2587_v12  ;;  %v10903_v2 = vld [vmem:[#allocation199_spill] sm:$0xff] }
 0x355   : > { %v2897_v29 = vadd.f32 %v2889_v36, %v2817_v50  ;;  %v2837_v22 = vadd.f32 %v8484_v26, %v2781_v8  ;;  %v2663_v1 = vadd.f32 %v10896_v38, %v2595_v48  ;;  %v2662_v47 = vadd.f32 %v10897_v60, %v2594_v6  ;;  %v10904_v50 = vld [vmem:[#allocation191_spill] sm:$0xff] }
 0x356   : > { %v8614_v17 = vadd.f32 %v8550_v9, %v2898_v34  ;;  %v2819_v41 = vadd.f32 %v8493_v49, %v2775_v13  ;;  %v2682_v44 = vadd.f32 %v10898_v63, %v2602_v33  ;;  %v2724_v20 = vadd.f32 %v10899_v58, %v2644_v43 }
 0x357   : > { %v8620_v3 = vadd.f32 %v8550_v9, %v2897_v29  ;;  %v2909_v35 = vpop.permute.xlu1 %2908  ;;  %v2723_v27 = vadd.f32 %v10900_v62, %v2643_v31  ;;  %v2743_v10 = vadd.f32 %v10901_v5, %v2663_v1  ;;  %v2664_v53 = vadd.f32 %v10902_v11, %v2596_v28  ;;  %v10906_v31 = vld [vmem:[#allocation47_spill] sm:$0xff] }
 0x358   : > { %v8625_v55 = vmul.f32 0.70710677, %v8614_v17  ;;  %v2917_v26 = vadd.f32 %v2909_v35, %v2837_v22  ;;  %v2893_v25 = vpop.permute.xlu0 %2892  ;;  %v2742_v12 = vadd.f32 %v10903_v2, %v2662_v47  ;;  %v2684_v56 = vadd.f32 %v10904_v50, %v2604_v30 }
 0x359   : > { %v8630_v21 = vmul.f32 0.70710677, %v8620_v3  ;;  %v2899_v49 = vadd.f32 %v2893_v25, %v2819_v41  ;;  %v2683_v33 = vadd.f32 %v10905_v24, %v2603_v45  ;;  %v2783_v28 = vadd.f32 %v8474_v37, %v2724_v20 }
 0x35a   : > { %v8635_v48 = vand.u32 2147483647, %v8625_v55  ;;  %v8638_v6 = vadd.f32 %v8595_v23, %v2917_v26  ;;  %v8651_v18 = vshrl.u32 %v2960_v57, 7  ;;  %v2782_v45 = vadd.f32 %v8478_v32, %v2723_v27 }
 0x35b   : > { %v8643_v42 = vand.u32 2147483647, %v8630_v21  ;;  %v8646_v8 = vadd.f32 %v8550_v9, %v2899_v49  ;;  %v2913_v34 = vpop.permute.xlu1 %2912  ;;  %v2790_v29 = vadd.f32 %v8480_v16, %v2743_v10  ;;  %v2839_v37 = vadd.f32 %v8512_v52, %v2783_v28 }
 0x35c   : > { %v2998_v36 = vmul.f32 0.5, %v8635_v48  ;;  %v8654_v13 = vmul.f32 0.70710677, %v8638_v6  ;;  %v2911_v30 = vpop.permute.xlu0 %2910  ;;  %v2789_v57 = vadd.f32 %v8486_v61, %v2742_v12  ;;  %v2762_v22 = vadd.f32 %v10906_v31, %v2682_v44  ;;  %v10907_v44 = vld [vmem:[#allocation48_spill] sm:$0xff] }
 0x35d   : > { %v2997_v59 = vmul.f32 0.5, %v8643_v42  ;;  %v8660_v9 = vmul.f32 0.70710677, %v8646_v8  ;;  %v2838_v32 = vadd.f32 %v8518_v46, %v2782_v45  ;;  %v2858_v60 = vadd.f32 %v8532_v15, %v2790_v29  ;;  %v10908_v15 = vld [vmem:[#allocation49_spill] sm:$0xff] }
 0x35e   : > { %v3001_v43 = vadd.f32 1.0, %v2998_v36  ;;  %v8667_v39 = vand.u32 2147483647, %v8654_v13  ;;  %v2919_v47 = vadd.f32 %v2913_v34, %v2839_v37  ;;  %v2857_v41 = vadd.f32 %v8538_v54, %v2789_v57  ;;  %v10909_v54 = vld [vmem:[#allocation50_spill] sm:$0xff]  ;;  %v10911_v34 = vld [vmem:[#allocation56_spill] sm:$0xff]  ;;  %v10912_v36 = vld [vmem:[#allocation57_spill] sm:$0xff] }
 0x35f   : > { %v3000_v16 = vadd.f32 1.0, %v2997_v59  ;;  %v8672_v38 = vand.u32 2147483647, %v8660_v9  ;;  %v2931_v1 = vpop.permute.xlu1 %2930  ;;  %v2918_v63 = vadd.f32 %v2911_v30, %v2838_v32  ;;  %v2744_v46 = vadd.f32 %v10907_v44, %v2664_v53 }
 0x360   : > { %5897 = vrcp.f32 %v3001_v43  ;;  %v3121_v52 = vmul.f32 0.5, %v8667_v39  ;;  %v2929_v61 = vpop.permute.xlu0 %2928  ;;  %v8680_v20 = vadd.f32 %v8595_v23, %v2919_v47  ;;  %v2938_v26 = vadd.f32 %v2931_v1, %v2858_v60 }
 0x361   : > { %5899 = vrcp.f32 %v3000_v16  ;;  %v2999_v35 = vmul.f32 0.5, %v8672_v38  ;;  %v2764_v25 = vadd.f32 %v10908_v15, %v2684_v56  ;;  %v8684_v27 = vadd.f32 %v8595_v23, %v2918_v63  ;;  %v10910_v23 = vld [vmem:[#allocation51_spill] sm:$0xff] }
 0x362   : > { %v3124_v58 = vadd.f32 1.0, %v3121_v52  ;;  %v2937_v5 = vadd.f32 %v2929_v61, %v2857_v41  ;;  %v2763_v10 = vadd.f32 %v10909_v54, %v2683_v33  ;;  %v8688_v49 = vmul.f32 0.70710677, %v8680_v20 }
 0x363   : > { %v3002_v62 = vadd.f32 1.0, %v2999_v35  ;;  %v8691_v11 = vadd.f32 %v8598_v14, %v2938_v26  ;;  %v8694_v53 = vmul.f32 0.70710677, %v8684_v27  ;;  %v8700_v12 = vstv %s8662_s9  ;;  %v2949_v35 = vpop.permute.xlu1 %2948  ;;  %s9210_s9 = sld [smem:[#allocation7 + $0x7]] }
 0x364   : > { %5901 = vrcp.f32 %v3124_v58  ;;  %v8697_v2 = vadd.f32 %v8598_v14, %v2937_v5  ;;  %v2797_v50 = vadd.f32 %v10910_v23, %v2762_v22  ;;  %v8704_v56 = vadd.s32 16, %v8651_v18  ;;  %v2933_v44 = vpop.permute.xlu0 %2932 }
 0x365   : > { %5903 = vrcp.f32 %v3002_v62  ;;  %v8707_v24 = vand.u32 2147483647, %v8688_v49  ;;  %v8710_v33 = vmul.f32 0.70710677, %v8691_v11  ;;  %v2791_v28 = vadd.f32 %v10911_v34, %v2744_v46 }
 0x366   : > { %v2799_v30 = vadd.f32 %v10912_v36, %v2764_v25  ;;  %v8715_v45 = vand.u32 2147483647, %v8694_v53  ;;  %v8718_v29 = vmul.f32 0.70710677, %v8697_v2  ;;  %v2877_v59 = vadd.f32 %v8560_v19, %v2797_v50 }
 0x367   : > { %v2798_v37 = vadd.f32 %v8526_v40, %v2763_v10  ;;  %v3123_v57 = vmul.f32 0.5, %v8707_v24  ;;  %v8724_v43 = vand.u32 2147483647, %v8710_v33  ;;  %v2859_v31 = vadd.f32 %v8566_v0, %v2791_v28 }
 0x368   : > { %v8728_v22 = vadd.f32 %v8580_v51, %v2799_v30  ;;  %v3122_v32 = vmul.f32 0.5, %v8715_v45  ;;  %v8732_v16 = vand.u32 2147483647, %v8718_v29  ;;  %v8740_v40 = vmul.f32 0.5, %v8614_v17 }
 0x369   : > { %v8737_v19 = vadd.f32 %v8586_v7, %v2798_v37  ;;  %v3126_v60 = vadd.f32 1.0, %v3123_v57  ;;  %v3245_v52 = vmul.f32 0.5, %v8724_v43  ;;  %v8747_v47 = vmul.f32 0.5, %v8620_v3 }
 0x36a   : > { %v8734_v1 = vpop.eup %5897  ;;  %v3125_v61 = vadd.f32 1.0, %v3122_v32  ;;  %v3244_v41 = vmul.f32 0.5, %v8732_v16  ;;  %v3064_v7 = vsub.f32 0.0, %v8635_v48  ;;  %v8753_v58 = vmul.f32 0.5, %v8638_v6 }
 0x36b   : > { %v8743_v0 = vpop.eup %5899  ;;  %v3010_v51 = vmul.f32 0.17087276, %v8734_v1  ;;  %5905 = vrcp.f32 %v3126_v60  ;;  %v3248_v17 = vadd.f32 1.0, %v3245_v52  ;;  %v3063_v25 = vsub.f32 0.0, %v8643_v42 }
 0x36c   : > { %v3009_v63 = vmul.f32 0.17087276, %v8743_v0  ;;  %5907 = vrcp.f32 %v3125_v61  ;;  %v3247_v26 = vadd.f32 1.0, %v3244_v41  ;;  %v2957_v62 = vadd.f32 %v2949_v35, %v2877_v59 }
 0x36d   : > { %v3013_v46 = vadd.f32 -0.82215226, %v3010_v51  ;;  %5909 = vrcp.f32 %v3248_v17  ;;  %v2939_v23 = vadd.f32 %v2933_v44, %v2859_v31  ;;  %v8764_v50 = vmul.f32 0.5, %v8646_v8 }
 0x36e   : > { %v8755_v15 = vpop.eup %5901  ;;  %v3012_v3 = vadd.f32 -0.82215226, %v3009_v63  ;;  %5911 = vrcp.f32 %v3247_v26  ;;  %v8768_v28 = vadd.f32 %v8700_v12, %v2957_v62  ;;  %v8771_v30 = vmul.f32 %v3064_v7, %v8635_v48 }
 0x36f   : > { %v8758_v5 = vpop.eup %5903  ;;  %v3016_v54 = vmul.f32 %v8734_v1, %v3013_v46  ;;  %v3133_v10 = vmul.f32 0.17087276, %v8755_v15  ;;  %v3187_v37 = vsub.f32 0.0, %v8667_v39  ;;  %v8775_v31 = vmul.f32 %v3063_v25, %v8643_v42 }
 0x370   : > { %v3015_v6 = vmul.f32 %v8743_v0, %v3012_v3  ;;  %v3011_v34 = vmul.f32 0.17087276, %v8758_v5  ;;  %10913 = vst [vmem:[#allocation52_spill] sm:$0xff] %v8768_v28  ;;  %v3065_v8 = vsub.f32 0.0, %v8672_v38  ;;  %v8781_v51 = vmul.f32 0.70710677, %v8768_v28 }
 0x371   : > { %v3019_v36 = vadd.f32 1.4885159, %v3016_v54  ;;  %v3136_v59 = vadd.f32 -0.82215226, %v3133_v10  ;;  %v8784_v48 = vadd.f32 %v8598_v14, %v2939_v23  ;;  %v8789_v42 = vmul.f32 0.5, %v8680_v20  ;;  %v2953_v23 = vpop.permute.xlu1 %2952 }
 0x372   : > { %v3018_v57 = vadd.f32 1.4885159, %v3015_v6  ;;  %v3014_v32 = vadd.f32 -0.82215226, %v3011_v34  ;;  %v3189_v35 = vsub.f32 0.0, %v8707_v24  ;;  %v8793_v17 = vmul.f32 %v3187_v37, %v8667_v39 }
 0x373   : > { %v3022_v60 = vmul.f32 %v8734_v1, %v3019_v36  ;;  %v3139_v52 = vmul.f32 %v8755_v15, %v3136_v59  ;;  %10914 = vst [vmem:[#allocation53_spill] sm:$0xff] %v8784_v48  ;;  %v8796_v44 = vand.u32 2147483647, %v8781_v51  ;;  %v8808_v10 = vmul.f32 0.70710677, %v8784_v48 }
 0x374   : > { %v3021_v61 = vmul.f32 %v8743_v0, %v3018_v57  ;;  %v3017_v41 = vmul.f32 %v8758_v5, %v3014_v32  ;;  %vm2975_vm14 = vcmp.ge.s32.totalorder %v8544_v4, 1  ;;  %vm2966_vm15 = vcmp.ge.s32.totalorder %v8651_v18, 1 }
 0x375   : > { %v3025_v7 = vadd.f32 -1.135204, %v3022_v60  ;;  %v3142_v63 = vadd.f32 1.4885159, %v3139_v52  ;;  %v8798_v46 = vpop.eup %5905  ;;  %v8816_v37 = vmul.f32 0.5, %v8796_v44  ;;  %v8821_v52 = vmul.f32 %v3065_v8, %v8672_v38  ;;  %vm8937_vm7 = vmand %vm2966_vm15, %vm2975_vm14 }
 0x376   : > { %v3024_v14 = vadd.f32 -1.135204, %v3021_v61  ;;  %v3020_v26 = vadd.f32 1.4885159, %v3017_v41  ;;  %v8802_v20 = vpop.eup %5907  ;;  %v3135_v39 = vmul.f32 0.17087276, %v8798_v46 }
 0x377   : > { %v3028_v62 = vmul.f32 %v8734_v1, %v3025_v7  ;;  %v3145_v54 = vmul.f32 %v8755_v15, %v3142_v63  ;;  %v8810_v6 = vpop.eup %5909  ;;  %v3134_v59 = vmul.f32 0.17087276, %v8802_v20  ;;  %vm2979_vm0 = vcmp.le.s32.totalorder %v8544_v4, 16 }
 0x378   : > { %v3027_v34 = vmul.f32 %v8743_v0, %v3024_v14  ;;  %v3023_v36 = vmul.f32 %v8758_v5, %v3020_v26  ;;  %v8818_v57 = vpop.eup %5911  ;;  %v3138_v61 = vadd.f32 -0.82215226, %v3135_v39  ;;  %v2959_v14 = vadd.f32 %v2953_v23, %v8728_v22  ;;  %vm8951_vm9 = vmand %vm2975_vm14, %vm2979_vm0 }
 0x379   : > { %v3031_v32 = vadd.f32 0.27886808, %v3028_v62  ;;  %v3148_v60 = vadd.f32 -1.135204, %v3145_v54  ;;  %v3137_v63 = vadd.f32 -0.82215226, %v3134_v59  ;;  %v8833_v22 = vmul.f32 %v3189_v35, %v8707_v24  ;;  %vm8960_vm10 = vmand %vm8937_vm7, %vm2979_vm0 }
 0x37a   : > { %v3030_v41 = vadd.f32 0.27886808, %v3027_v34  ;;  %v3026_v7 = vadd.f32 -1.135204, %v3023_v36  ;;  %v3141_v3 = vmul.f32 %v8798_v46, %v3138_v61  ;;  %v3257_v48 = vmul.f32 0.17087276, %v8810_v6 }
 0x37b   : > { %v3034_v26 = vmul.f32 %v8734_v1, %v3031_v32  ;;  %v3151_v25 = vmul.f32 %v8755_v15, %v3148_v60  ;;  %v3140_v38 = vmul.f32 %v8802_v20, %v3137_v63  ;;  %v3256_v8 = vmul.f32 0.17087276, %v8818_v57 }
 0x37c   : > { %v3033_v62 = vmul.f32 %v8743_v0, %v3030_v41  ;;  %v3029_v54 = vmul.f32 %v8758_v5, %v3026_v7  ;;  %v3144_v36 = vadd.f32 1.4885159, %v3141_v3  ;;  %v8836_v60 = vadd.f32 %v8700_v12, %v2959_v14 }
 0x37d   : > { %v3037_v39 = vadd.f32 -0.18628806, %v3034_v26  ;;  %v3154_v34 = vadd.f32 0.27886808, %v3151_v25  ;;  %v3143_v32 = vadd.f32 1.4885159, %v3140_v38 }
 0x37e   : > { %v3036_v23 = vadd.f32 -0.18628806, %v3033_v62  ;;  %v3032_v59 = vadd.f32 0.27886808, %v3029_v54  ;;  %v3147_v7 = vmul.f32 %v8798_v46, %v3144_v36  ;;  %v3260_v63 = vadd.f32 -0.82215226, %v3257_v48 }
 0x37f   : > { %v3040_v61 = vmul.f32 %v8734_v1, %v3037_v39  ;;  %v3157_v41 = vmul.f32 %v8755_v15, %v3154_v34  ;;  %v3146_v24 = vmul.f32 %v8802_v20, %v3143_v32  ;;  %v3259_v35 = vadd.f32 -0.82215226, %v3256_v8 }
 0x380   : > { %v3039_v26 = vmul.f32 %v8743_v0, %v3036_v23  ;;  %v3035_v3 = vmul.f32 %v8758_v5, %v3032_v59  ;;  %v3150_v54 = vadd.f32 -1.135204, %v3147_v7  ;;  %v3263_v14 = vmul.f32 %v8810_v6, %v3260_v63 }
 0x381   : > { %v3043_v25 = vadd.f32 0.09678418, %v3040_v61  ;;  %v3160_v62 = vadd.f32 -0.18628806, %v3157_v41  ;;  %v3149_v39 = vadd.f32 -1.135204, %v3146_v24  ;;  %v3262_v34 = vmul.f32 %v8818_v57, %v3259_v35 }
 0x382   : > { %v3042_v38 = vadd.f32 0.09678418, %v3039_v26  ;;  %v3038_v28 = vadd.f32 -0.18628806, %v3035_v3  ;;  %v3153_v23 = vmul.f32 %v8798_v46, %v3150_v54  ;;  %v3266_v59 = vadd.f32 1.4885159, %v3263_v14 }
 0x383   : > { %v3046_v36 = vmul.f32 %v8734_v1, %v3043_v25  ;;  %v3163_v48 = vmul.f32 %v8755_v15, %v3160_v62  ;;  %v3152_v61 = vmul.f32 %v8802_v20, %v3149_v39  ;;  %v3265_v41 = vadd.f32 1.4885159, %v3262_v34 }
 0x384   : > { %v3045_v32 = vmul.f32 %v8743_v0, %v3042_v38  ;;  %v3041_v8 = vmul.f32 %v8758_v5, %v3038_v28  ;;  %v3156_v26 = vadd.f32 0.27886808, %v3153_v23  ;;  %v3269_v3 = vmul.f32 %v8810_v6, %v3266_v59 }
 0x385   : > { %v3049_v7 = vadd.f32 0.37409195, %v3046_v36  ;;  %v3166_v63 = vadd.f32 0.09678418, %v3163_v48  ;;  %v3155_v25 = vadd.f32 0.27886808, %v3152_v61  ;;  %v3268_v62 = vmul.f32 %v8818_v57, %v3265_v41 }
 0x386   : > { %v3048_v24 = vadd.f32 0.37409195, %v3045_v32  ;;  %v3044_v35 = vadd.f32 0.09678418, %v3041_v8  ;;  %v3159_v38 = vmul.f32 %v8798_v46, %v3156_v26  ;;  %v3272_v28 = vadd.f32 -1.135204, %v3269_v3 }
 0x387   : > { %v3052_v54 = vmul.f32 %v8734_v1, %v3049_v7  ;;  %v3169_v14 = vmul.f32 %v8755_v15, %v3166_v63  ;;  %v3158_v36 = vmul.f32 %v8802_v20, %v3155_v25  ;;  %v3271_v48 = vadd.f32 -1.135204, %v3268_v62 }
 0x388   : > { %v3051_v39 = vmul.f32 %v8743_v0, %v3048_v24  ;;  %v3047_v34 = vmul.f32 %v8758_v5, %v3044_v35  ;;  %v3162_v32 = vadd.f32 -0.18628806, %v3159_v38  ;;  %v3275_v8 = vmul.f32 %v8810_v6, %v3272_v28 }
 0x389   : > { %v3055_v23 = vadd.f32 1.0000237, %v3052_v54  ;;  %v3172_v59 = vadd.f32 0.37409195, %v3169_v14  ;;  %v3161_v7 = vadd.f32 -0.18628806, %v3158_v36  ;;  %v3274_v63 = vmul.f32 %v8818_v57, %v3271_v48 }
 0x38a   : > { %v3054_v61 = vadd.f32 1.0000237, %v3051_v39  ;;  %v3050_v41 = vadd.f32 0.37409195, %v3047_v34  ;;  %v3165_v24 = vmul.f32 %v8798_v46, %v3162_v32  ;;  %v3278_v35 = vadd.f32 0.27886808, %v3275_v8 }
 0x38b   : > { %v3058_v26 = vmul.f32 %v8734_v1, %v3055_v23  ;;  %v3175_v3 = vmul.f32 %v8755_v15, %v3172_v59  ;;  %v3164_v54 = vmul.f32 %v8802_v20, %v3161_v7  ;;  %v3277_v14 = vadd.f32 0.27886808, %v3274_v63 }
 0x38c   : > { %v3057_v25 = vmul.f32 %v8743_v0, %v3054_v61  ;;  %v3053_v62 = vmul.f32 %v8758_v5, %v3050_v41  ;;  %v3168_v39 = vadd.f32 0.09678418, %v3165_v24  ;;  %v3281_v34 = vmul.f32 %v8810_v6, %v3278_v35 }
 0x38d   : > { %v3061_v38 = vadd.f32 -1.2655122, %v3058_v26  ;;  %v3178_v28 = vadd.f32 1.0000237, %v3175_v3  ;;  %v3167_v23 = vadd.f32 0.09678418, %v3164_v54  ;;  %v3280_v59 = vmul.f32 %v8818_v57, %v3277_v14 }
 0x38e   : > { %v3060_v36 = vadd.f32 -1.2655122, %v3057_v25  ;;  %v3056_v48 = vadd.f32 1.0000237, %v3053_v62  ;;  %v3171_v61 = vmul.f32 %v8798_v46, %v3168_v39  ;;  %v3284_v41 = vadd.f32 -0.18628806, %v3281_v34 }
 0x38f   : > { %v3070_v32 = vadd.f32 %v8771_v30, %v3061_v38  ;;  %v3181_v8 = vmul.f32 %v8755_v15, %v3178_v28  ;;  %v3170_v26 = vmul.f32 %v8802_v20, %v3167_v23  ;;  %v3283_v3 = vadd.f32 -0.18628806, %v3280_v59 }
 0x390   : > { %v3069_v7 = vadd.f32 %v8775_v31, %v3060_v36  ;;  %v3059_v63 = vmul.f32 %v8758_v5, %v3056_v48  ;;  %v3174_v25 = vadd.f32 0.37409195, %v3171_v61  ;;  %v3287_v62 = vmul.f32 %v8810_v6, %v3284_v41 }
 0x391   : > { %v3074_v24 = vmul.f32 1.442695, %v3070_v32  ;;  %v3184_v35 = vadd.f32 -1.2655122, %v3181_v8  ;;  %v3173_v30 = vadd.f32 0.37409195, %v3170_v26  ;;  %v3286_v38 = vmul.f32 %v8818_v57, %v3283_v3 }
 0x392   : > { %v3072_v54 = vmul.f32 1.442695, %v3069_v7  ;;  %v3062_v14 = vadd.f32 -1.2655122, %v3059_v63  ;;  %v3177_v31 = vmul.f32 %v8798_v46, %v3174_v25  ;;  %v3290_v39 = vadd.f32 0.09678418, %v3287_v62  ;;  %v2951_v63 = vpop.permute.xlu0 %2950 }
 0x393   : > { %5913 = vpow2.f32 %v3074_v24  ;;  %v3193_v28 = vadd.f32 %v8793_v17, %v3184_v35  ;;  %v3176_v36 = vmul.f32 %v8802_v20, %v3173_v30  ;;  %v3289_v48 = vadd.f32 0.09678418, %v3286_v38 }
 0x394   : > { %5915 = vpow2.f32 %v3072_v54  ;;  %v3071_v34 = vadd.f32 %v8821_v52, %v3062_v14  ;;  %v3180_v59 = vadd.f32 1.0000237, %v3177_v31  ;;  %v3293_v32 = vmul.f32 %v8810_v6, %v3290_v39 }
 0x395   : > { %v3196_v23 = vmul.f32 1.442695, %v3193_v28  ;;  %v3370_v8 = vadd.f32 1.0, %v8816_v37  ;;  %v3179_v41 = vadd.f32 1.0000237, %v3176_v36  ;;  %v3292_v7 = vmul.f32 %v8818_v57, %v3289_v48 }
 0x396   : > { %v3076_v61 = vmul.f32 1.442695, %v3071_v34  ;;  %v8886_v17 = vand.u32 2147483647, %v8808_v10  ;;  %v3183_v52 = vmul.f32 %v8798_v46, %v3180_v59  ;;  %v10915_v26 = vsub.f32 0.0, %v8715_v45 }
 0x397   : > { %5917 = vpow2.f32 %v3196_v23  ;;  %v3296_v37 = vadd.f32 0.37409195, %v3293_v32  ;;  %v3182_v24 = vmul.f32 %v8802_v20, %v3179_v41  ;;  %v3295_v35 = vadd.f32 0.37409195, %v3292_v7 }
 0x398   : > { %v3191_v3 = vmul.f32 %v10915_v26, %v8715_v45  ;;  %5919 = vpow2.f32 %v3076_v61  ;;  %v3246_v25 = vmul.f32 0.5, %v8886_v17  ;;  %vm3082_vm1 = vcmp.ge.f32.partialorder %v8625_v55, 0.0 }
 0x399   : > { %v3186_v62 = vadd.f32 -1.2655122, %v3183_v52  ;;  %v3299_v54 = vmul.f32 %v8810_v6, %v3296_v37  ;;  %5921 = vrcp.f32 %v3370_v8  ;;  %v2958_v14 = vadd.f32 %v2951_v63, %v8737_v19 }
 0x39a   : > { %vm3081_vm2 = vcmp.ge.f32.partialorder %v8630_v21, 0.0  ;;  %v3185_v45 = vadd.f32 -1.2655122, %v3182_v24  ;;  %v3298_v30 = vmul.f32 %v8818_v57, %v3295_v35  ;;  %v3249_v38 = vadd.f32 1.0, %v3246_v25 }
 0x39b   : > { %v8903_v28 = vmul.f32 0.70710677, %v8836_v60  ;;  %vm2971_vm3 = vcmp.le.s32.totalorder %v8704_v56, 16  ;;  %v3195_v31 = vadd.f32 %v8833_v22, %v3186_v62  ;;  %v8908_v39 = vmul.f32 0.5, %v8684_v27 }
 0x39c   : > { %v3302_v34 = vadd.f32 1.0000237, %v3299_v54  ;;  %v3310_v36 = vsub.f32 0.0, %v8732_v16  ;;  %v3194_v19 = vadd.f32 %v3191_v3, %v3185_v45  ;;  %v3301_v48 = vadd.f32 1.0000237, %v3298_v30  ;;  %vm8974_vm12 = vmand %vm2971_vm3, %vm2975_vm14 }
 0x39d   : > { %5923 = vrcp.f32 %v3249_v38  ;;  %v8912_v23 = vand.u32 2147483647, %v8903_v28  ;;  %v5914_v59 = vpop.eup %5913  ;;  %vm3205_vm5 = vcmp.ge.f32.partialorder %v8654_v13, 0.0  ;;  %v3200_v32 = vmul.f32 1.442695, %v3195_v31  ;;  %vm8997_vm13 = vmand %vm8974_vm12, %vm2979_vm0 }
 0x39e   : > { %v3305_v8 = vmul.f32 %v8810_v6, %v3302_v34  ;;  %v10916_v27 = vsub.f32 0.0, %v8724_v43  ;;  %v8920_v61 = vadd.f32 %v8700_v12, %v2958_v14  ;;  %v5916_v41 = vpop.eup %5915  ;;  %v3079_v7 = vmul.f32 %v5914_v59, %v8734_v1 }
 0x39f   : > { %vm3083_vm6 = vcmp.ge.f32.partialorder %v8660_v9, 0.0  ;;  %v3198_v63 = vmul.f32 1.442695, %v3194_v19  ;;  %v3304_v52 = vmul.f32 %v8818_v57, %v3301_v48  ;;  %v3369_v26 = vmul.f32 0.5, %v8912_v23 }
 0x3a0   : > { %v3314_v22 = vmul.f32 %v10916_v27, %v8724_v43  ;;  %v3078_v3 = vmul.f32 %v5916_v41, %v8743_v0  ;;  %5925 = vpow2.f32 %v3200_v32  ;;  %v3308_v37 = vadd.f32 -1.2655122, %v3305_v8 }
 0x3a1   : > { %v3313_v24 = vmul.f32 %v3310_v36, %v8732_v16  ;;  %v3085_v43 = vsub.f32 1.0, %v3079_v7  ;;  %v5585_v35 = vadd.f32 -1.0, %v3079_v7  ;;  %5927 = vpow2.f32 %v3198_v63  ;;  %v5918_v25 = vpop.eup %5917 }
 0x3a2   : > { %v3307_v12 = vadd.f32 -1.2655122, %v3304_v52  ;;  %v3084_v62 = vsub.f32 1.0, %v3078_v3  ;;  %v5584_v1 = vadd.f32 -1.0, %v3078_v3  ;;  %v3317_v54 = vadd.f32 %v3314_v22, %v3308_v37  ;;  %v5920_v45 = vpop.eup %5919 }
 0x3a3   : > { %v8929_v14 = vmul.f32 0.70710677, %v8920_v61  ;;  %v3091_v30 = vsel %vm3082_vm1, %v3085_v43, %v5585_v35  ;;  %v3202_v0 = vmul.f32 %v5918_v25, %v8755_v15  ;;  %v3372_v31 = vadd.f32 1.0, %v3369_v26  ;;  %v8942_v34 = vpop.eup %5921 }
 0x3a4   : > { %v3316_v38 = vadd.f32 %v3313_v24, %v3307_v12  ;;  %v3094_v36 = vadd.f32 1.0, %v3091_v30  ;;  %v3090_v55 = vsel %vm3081_vm2, %v3084_v62, %v5584_v1  ;;  %v3080_v19 = vmul.f32 %v5920_v45, %v8758_v5 }
 0x3a5   : > { %v3321_v48 = vmul.f32 1.442695, %v3317_v54  ;;  %v3093_v15 = vadd.f32 1.0, %v3090_v55  ;;  %v3208_v59 = vsub.f32 1.0, %v3202_v0  ;;  %v5588_v32 = vadd.f32 -1.0, %v3202_v0 }
 0x3a6   : > { %v3319_v8 = vmul.f32 1.442695, %v3316_v38  ;;  %v3097_v27 = vmul.f32 %v3094_v36, %v8740_v40  ;;  %v3086_v5 = vsub.f32 1.0, %v3080_v19  ;;  %v5586_v22 = vadd.f32 -1.0, %v3080_v19 }
 0x3a7   : > { %vm3207_vm11 = vcmp.ge.f32.partialorder %v8688_v49, 0.0  ;;  %5929 = vpow2.f32 %v3321_v48  ;;  %v8965_v41 = vpop.eup %5923  ;;  %v3096_v7 = vmul.f32 %v3093_v15, %v8747_v47  ;;  %v3214_v40 = vsel %vm3205_vm5, %v3208_v59, %v5588_v32 }
 0x3a8   : > { %5931 = vpow2.f32 %v3319_v8  ;;  %v3379_v52 = vmul.f32 0.17087276, %v8942_v34  ;;  %v3100_v26 = vsel %vm8951_vm9, %v3097_v27, 0.0  ;;  %v3217_v47 = vadd.f32 1.0, %v3214_v40 }
 0x3a9   : > { %v3092_v13 = vsel %vm3083_vm6, %v3086_v5, %v5586_v22  ;;  %v3258_v3 = vmul.f32 0.17087276, %v8965_v41  ;;  %3104 = vst.msk [vmem:[#allocation3 + $0x8] sm:$0xff] %vm3102_vm4, %v3100_v26  ;;  %v3099_v56 = vsel %vm8960_vm10, %v3096_v7, 0.0  ;;  %5933 = vrcp.f32 %v3372_v31 }
 0x3aa   : > { %v3095_v37 = vadd.f32 1.0, %v3092_v13  ;;  %v3382_v24 = vadd.f32 -0.82215226, %v3379_v52  ;;  %v5926_v43 = vpop.eup %5925  ;;  %3103 = vst.msk [vmem:[#allocation3] sm:$0xff] %vm3102_vm4, %v3099_v56  ;;  %v3220_v35 = vmul.f32 %v3217_v47, %v8753_v58  ;;  %v9002_v12 = vmul.f32 0.5, %v8691_v11 }
 0x3ab   : > { %v3261_v25 = vadd.f32 -0.82215226, %v3258_v3  ;;  %v9005_v62 = vand.u32 2147483647, %v8929_v14  ;;  %v5928_v1 = vpop.eup %5927  ;;  %v3204_v58 = vmul.f32 %v5926_v43, %v8798_v46  ;;  %vm3206_vm14 = vcmp.ge.f32.partialorder %v8694_v53, 0.0 }
 0x3ac   : > { %v3098_v54 = vmul.f32 %v3095_v37, %v8764_v50  ;;  %v3385_v4 = vmul.f32 %v8942_v34, %v3382_v24  ;;  %v3223_v45 = vsel %vm8960_vm10, %v3220_v35, 0.0  ;;  %v3203_v30 = vmul.f32 %v5928_v1, %v8802_v20 }
 0x3ad   : > { %vm3329_vm15 = vcmp.ge.f32.partialorder %v8710_v33, 0.0  ;;  %v3264_v11 = vmul.f32 %v8965_v41, %v3261_v25  ;;  %v3368_v16 = vmul.f32 0.5, %v9005_v62  ;;  %3227 = vst.msk [vmem:[#allocation3 + $0x18] sm:$0xff] %vm3102_vm4, %v3223_v45  ;;  %v3210_v46 = vsub.f32 1.0, %v3204_v58 }
 0x3ae   : > { %v3101_v50 = vsel %vm8997_vm13, %v3098_v54, 0.0  ;;  %v5590_v0 = vadd.f32 -1.0, %v3204_v58  ;;  %v3388_v38 = vadd.f32 1.4885159, %v3385_v4  ;;  %v3209_v31 = vsub.f32 1.0, %v3203_v30 }
 0x3af   : > { %3106 = vst.msk [vmem:[#allocation3 + $0x10] sm:$0x3] %vm3105_vm8, %v3101_v50  ;;  %v5589_v36 = vadd.f32 -1.0, %v3203_v30  ;;  %v3267_v20 = vadd.f32 1.4885159, %v3264_v11  ;;  %v3371_v55 = vadd.f32 1.0, %v3368_v16  ;;  %v3503_v15 = vstv %s8979_s0 }
 0x3b0   : > { %v3216_v19 = vsel %vm3207_vm11, %v3210_v46, %v5590_v0  ;;  %vm3328_vm0 = vcmp.ge.f32.partialorder %v8718_v29, 0.0  ;;  %v3391_v48 = vmul.f32 %v8942_v34, %v3388_v38  ;;  %v9026_v32 = vld [vmem:[#allocation3 + $0x8] sm:$0xff]  ;;  %v3517_v63 = vstv %s8989_s12  ;;  %s9219_s0 = sld [smem:[#allocation7 + $0x2b]]  ;;  %s5628_s12 = sld [smem:[#allocation7 + $0x4f]] }
 0x3b1   : > { %v5930_v59 = vpop.eup %5929  ;;  %v3219_v8 = vadd.f32 1.0, %v3216_v19  ;;  %v3215_v27 = vsel %vm3206_vm14, %v3209_v31, %v5589_v36  ;;  %v3270_v5 = vmul.f32 %v8965_v41, %v3267_v20  ;;  %5935 = vrcp.f32 %v3371_v55  ;;  %v9035_v52 = vld [vmem:[#allocation3] sm:$0xff] }
 0x3b2   : > { %v5932_v49 = vpop.eup %5931  ;;  %v3218_v22 = vadd.f32 1.0, %v3215_v27  ;;  %v3326_v7 = vmul.f32 %v5930_v59, %v8810_v6  ;;  %v3394_v40 = vadd.f32 -1.135204, %v3391_v48  ;;  %v3505_v53 = vmul.f32 %v3503_v15, %v9026_v32 }
 0x3b3   : > { %v3222_v26 = vmul.f32 %v3219_v8, %v8789_v42  ;;  %v3325_v47 = vmul.f32 %v5932_v49, %v8818_v57  ;;  %v3273_v13 = vadd.f32 -1.135204, %v3270_v5  ;;  %v9040_v3 = vpop.eup %5933  ;;  %v3504_v54 = vmul.f32 %v3503_v15, %v9035_v52 }
 0x3b4   : > { %v3221_v56 = vmul.f32 %v3218_v22, %v8908_v39  ;;  %v3332_v37 = vsub.f32 1.0, %v3326_v7  ;;  %v5593_v24 = vadd.f32 -1.0, %v3326_v7  ;;  %v3397_v43 = vmul.f32 %v8942_v34, %v3394_v40  ;;  %3510 = vrot.lane.b32.xlu1 %v3505_v53, %s6119_s18 }
 0x3b5   : > { %v3225_v6 = vsel %vm8997_vm13, %v3222_v26, 0.0  ;;  %v3331_v35 = vsub.f32 1.0, %v3325_v47  ;;  %v5592_v25 = vadd.f32 -1.0, %v3325_v47  ;;  %v3276_v42 = vmul.f32 %v8965_v41, %v3273_v13  ;;  %3508 = vrot.lane.b32.xlu0 %v3504_v54, %s6119_s18 }
 0x3b6   : > { %3229 = vst.msk [vmem:[#allocation3 + $0x28] sm:$0x3] %vm3105_vm8, %v3225_v6  ;;  %v3224_v57 = vsel %vm8951_vm9, %v3221_v56, 0.0  ;;  %v3338_v39 = vsel %vm3329_vm15, %v3332_v37, %v5593_v24  ;;  %v3400_v1 = vadd.f32 0.27886808, %v3397_v43  ;;  %v3235_v11 = vmul.f32 0.5, %v8697_v2 }
 0x3b7   : > { %3228 = vst.msk [vmem:[#allocation3 + $0x20] sm:$0xff] %vm3102_vm4, %v3224_v57  ;;  %v3341_v58 = vadd.f32 1.0, %v3338_v39  ;;  %v3337_v4 = vsel %vm3328_vm0, %v3331_v35, %v5592_v25  ;;  %v3279_v45 = vadd.f32 0.27886808, %v3276_v42  ;;  %v3381_v30 = vmul.f32 0.17087276, %v9040_v3 }
 0x3b8   : > { %v3340_v16 = vadd.f32 1.0, %v3337_v4  ;;  %v3403_v50 = vmul.f32 %v8942_v34, %v3400_v1  ;;  %v3519_v33 = vmul.f32 %v3517_v63, %v9026_v32  ;;  %v3531_v31 = vstv %s9031_s13  ;;  %s5629_s13 = sld [smem:[#allocation7 + $0x73]] }
 0x3b9   : > { %v3344_v46 = vmul.f32 %v3341_v58, %v9002_v12  ;;  %v3282_v0 = vmul.f32 %v8965_v41, %v3279_v45  ;;  %v3384_v38 = vadd.f32 -0.82215226, %v3381_v30  ;;  %v3518_v2 = vmul.f32 %v3517_v63, %v9035_v52 }
 0x3ba   : > { %v3343_v29 = vmul.f32 %v3340_v16, %v3235_v11  ;;  %v3406_v36 = vadd.f32 -0.18628806, %v3403_v50  ;;  %3524 = vrot.lane.b32.xlu1 %v3519_v33, %s6119_s18  ;;  %v3533_v8 = vmul.f32 %v3531_v31, %v9026_v32  ;;  %v3545_v49 = vstv %s9048_s14  ;;  %s5630_s14 = sld [smem:[#allocation7 + $0x8]] }
 0x3bb   : > { %v9071_v20 = vpop.eup %5935  ;;  %v3347_v55 = vsel %vm8951_vm9, %v3344_v46, 0.0  ;;  %v3285_v19 = vadd.f32 -0.18628806, %v3282_v0  ;;  %v3387_v12 = vmul.f32 %v9040_v3, %v3384_v38  ;;  %3522 = vrot.lane.b32.xlu0 %v3518_v2, %s6119_s18  ;;  %v3532_v7 = vmul.f32 %v3531_v31, %v9035_v52 }
 0x3bc   : > { %3351 = vst.msk [vmem:[#allocation3 + $0x38] sm:$0xff] %vm3102_vm4, %v3347_v55  ;;  %v3346_v48 = vsel %vm8960_vm10, %v3343_v29, 0.0  ;;  %v3409_v15 = vmul.f32 %v8942_v34, %v3406_v36  ;;  %v3380_v59 = vmul.f32 0.17087276, %v9071_v20  ;;  %v3547_v13 = vmul.f32 %v3545_v49, %v9026_v32 }
 0x3bd   : > { %3350 = vst.msk [vmem:[#allocation3 + $0x30] sm:$0xff] %vm3102_vm4, %v3346_v48  ;;  %v3288_v27 = vmul.f32 %v8965_v41, %v3285_v19  ;;  %v3390_v5 = vadd.f32 1.4885159, %v3387_v12  ;;  %v3559_v24 = vstv %s9067_s15  ;;  %v3546_v6 = vmul.f32 %v3545_v49, %v9035_v52  ;;  %s5631_s15 = sld [smem:[#allocation7 + $0x2c]] }
 0x3be   : > { %v3412_v22 = vadd.f32 0.09678418, %v3409_v15  ;;  %3538 = vrot.lane.b32.xlu1 %v3533_v8, %s6119_s18  ;;  %v3383_v26 = vadd.f32 -0.82215226, %v3380_v59  ;;  %v3561_v39 = vmul.f32 %v3559_v24, %v9026_v32  ;;  %v3573_v4 = vstv %s9086_s17  ;;  %s5632_s17 = sld [smem:[#allocation7 + $0x50]] }
 0x3bf   : > { %v3291_v40 = vadd.f32 0.09678418, %v3288_v27  ;;  %v3393_v63 = vmul.f32 %v9040_v3, %v3390_v5  ;;  %3536 = vrot.lane.b32.xlu0 %v3532_v7, %s6119_s18  ;;  %v3433_v30 = vsub.f32 0.0, %v8796_v44  ;;  %v3560_v11 = vmul.f32 %v3559_v24, %v9035_v52 }
 0x3c0   : > { %v3415_v47 = vmul.f32 %v8942_v34, %v3412_v22  ;;  %v3386_v37 = vmul.f32 %v9071_v20, %v3383_v26  ;;  %v3312_v50 = vsub.f32 0.0, %v8886_v17  ;;  %v3575_v38 = vmul.f32 %v3573_v4, %v9026_v32 }
 0x3c1   : > { %v3294_v53 = vmul.f32 %v8965_v41, %v3291_v40  ;;  %v3396_v56 = vadd.f32 -1.135204, %v3393_v63  ;;  %v3587_v2 = vstv %s9097_s2  ;;  %v3436_v19 = vmul.f32 %v3433_v30, %v8796_v44  ;;  %s5633_s2 = sld [smem:[#allocation7 + $0x74]] }
 0x3c2   : > { %v3418_v43 = vadd.f32 0.37409195, %v3415_v47  ;;  %3552 = vrot.lane.b32.xlu1 %v3547_v13, %s6119_s18  ;;  %v3389_v42 = vadd.f32 1.4885159, %v3386_v37  ;;  %v3574_v12 = vmul.f32 %v3573_v4, %v9035_v52  ;;  %v3315_v15 = vmul.f32 %v3312_v50, %v8886_v17 }
 0x3c3   : > { %v3297_v35 = vadd.f32 0.37409195, %v3294_v53  ;;  %v3399_v25 = vmul.f32 %v9040_v3, %v3396_v56  ;;  %3550 = vrot.lane.b32.xlu0 %v3546_v6, %s6119_s18  ;;  %v3589_v5 = vmul.f32 %v3587_v2, %v9026_v32  ;;  %v3601_v7 = vstv %s9108_s3  ;;  %v9139_v53 = vld [vmem:[#allocation3 + $0x9] sm:$0xff]  ;;  %s5638_s3 = sld [smem:[#allocation7 + $0xa]] }
 0x3c4   : > { %v3421_v57 = vmul.f32 %v8942_v34, %v3418_v43  ;;  %v3392_v58 = vmul.f32 %v9071_v20, %v3389_v42  ;;  %v3588_v17 = vmul.f32 %v3587_v2, %v9035_v52  ;;  %v3603_v13 = vmul.f32 %v3601_v7, %v9026_v32  ;;  %v9144_v43 = vld [vmem:[#allocation3 + $0x1] sm:$0xff] }
 0x3c5   : > { %v3300_v1 = vmul.f32 %v8965_v41, %v3297_v35  ;;  %v3402_v54 = vadd.f32 0.27886808, %v3399_v25  ;;  %v3602_v24 = vmul.f32 %v3601_v7, %v9035_v52  ;;  %v3641_v25 = vstv %s9126_s19  ;;  %s5639_s19 = sld [smem:[#allocation7 + $0x2e]] }
 0x3c6   : > { %v3424_v45 = vadd.f32 1.0000237, %v3421_v57  ;;  %3566 = vrot.lane.b32.xlu1 %v3561_v39, %s6120_s23  ;;  %v3395_v46 = vadd.f32 -1.135204, %v3392_v58  ;;  %v3643_v42 = vmul.f32 %v3641_v25, %v9139_v53  ;;  %v3435_v39 = vsub.f32 0.0, %v8912_v23 }
 0x3c7   : > { %v3303_v16 = vadd.f32 1.0000237, %v3300_v1  ;;  %v3405_v33 = vmul.f32 %v9040_v3, %v3402_v54  ;;  %3564 = vrot.lane.b32.xlu0 %v3560_v11, %s6120_s23  ;;  %v3642_v54 = vmul.f32 %v3641_v25, %v9144_v43  ;;  %v3669_v2 = vstv %s9148_s21  ;;  %s5641_s21 = sld [smem:[#allocation7 + $0x76]] }
 0x3c8   : > { %v3427_v0 = vmul.f32 %v8942_v34, %v3424_v45  ;;  %v3398_v36 = vmul.f32 %v9071_v20, %v3395_v46  ;;  %v3655_v45 = vstv %s9135_s20  ;;  %v3434_v46 = vsub.f32 0.0, %v9005_v62  ;;  %s5640_s20 = sld [smem:[#allocation7 + $0x52]] }
 0x3c9   : > { %v3306_v31 = vmul.f32 %v8965_v41, %v3303_v16  ;;  %v3408_v29 = vadd.f32 -0.18628806, %v3405_v33  ;;  %v3657_v30 = vmul.f32 %v3655_v45, %v9139_v53  ;;  %v3438_v16 = vmul.f32 %v3435_v39, %v8912_v23 }
 0x3ca   : > { %v3430_v55 = vadd.f32 -1.2655122, %v3427_v0  ;;  %3580 = vrot.lane.b32.xlu1 %v3575_v38, %s6120_s23  ;;  %v3401_v8 = vadd.f32 0.27886808, %v3398_v36  ;;  %v3656_v0 = vmul.f32 %v3655_v45, %v9144_v43  ;;  %vm3451_vm1 = vcmp.ge.f32.partialorder %v8781_v51, 0.0 }
 0x3cb   : > { %v3309_v48 = vadd.f32 -1.2655122, %v3306_v31  ;;  %v3411_v59 = vmul.f32 %v9040_v3, %v3408_v29  ;;  %3578 = vrot.lane.b32.xlu0 %v3574_v12, %s6120_s23  ;;  %vm3330_vm2 = vcmp.ge.f32.partialorder %v8808_v10, 0.0  ;;  %v3670_v51 = vmul.f32 %v3669_v2, %v9144_v43 }
 0x3cc   : > { %v3439_v27 = vadd.f32 %v3436_v19, %v3430_v55  ;;  %v3404_v44 = vmul.f32 %v9071_v20, %v3401_v8  ;;  %v3671_v55 = vmul.f32 %v3669_v2, %v9139_v53  ;;  %v3437_v8 = vmul.f32 %v3434_v46, %v9005_v62 }
 0x3cd   : > { %v3318_v49 = vadd.f32 %v3315_v15, %v3309_v48  ;;  %v3414_v22 = vadd.f32 0.09678418, %v3411_v59  ;;  %vm3453_vm3 = vcmp.ge.f32.partialorder %v8903_v28, 0.0  ;;  %v9224_v28 = vld [vmem:[#allocation3 + $0xa] sm:$0xff]  ;;  %vm3452_vm5 = vcmp.ge.f32.partialorder %v8929_v14, 0.0 }
 0x3ce   : > { %v3442_v40 = vmul.f32 1.442695, %v3439_v27  ;;  %3594 = vrot.lane.b32.xlu1 %v3589_v5, %s6120_s23  ;;  %v3407_v47 = vadd.f32 -0.18628806, %v3404_v44  ;;  %v3683_v5 = vstv %s9158_s22  ;;  %s5642_s22 = sld [smem:[#allocation7 + $0xb]] }
 0x3cf   : > { %v3323_v63 = vmul.f32 1.442695, %v3318_v49  ;;  %v3417_v26 = vmul.f32 %v9040_v3, %v3414_v22  ;;  %3592 = vrot.lane.b32.xlu0 %v3588_v17, %s6120_s23  ;;  %v10927_v49 = vld [vmem:[#allocation52_spill] sm:$0xff]  ;;  %v3685_v62 = vmul.f32 %v3683_v5, %v9139_v53 }
 0x3d0   : > { %5937 = vpow2.f32 %v3442_v40  ;;  %v3410_v37 = vmul.f32 %v9071_v20, %v3407_v47  ;;  %v3358_v22 = vmul.f32 0.5, %v10927_v49  ;;  %v10928_v40 = vld [vmem:[#allocation53_spill] sm:$0xff] }
 0x3d1   : > { %5939 = vpow2.f32 %v3323_v63  ;;  %v3420_v56 = vadd.f32 0.37409195, %v3417_v26  ;;  %v3237_v17 = vmul.f32 0.5, %v10928_v40  ;;  %v3863_v40 = vstv %s5632_s17  ;;  %s9330_s17 = sld [smem:[#allocation7 + $0x6c]] }
 0x3d2   : > { %3608 = vrot.lane.b32.xlu1 %v3603_v13, %s6120_s23  ;;  %v3413_v35 = vadd.f32 0.09678418, %v3410_v37  ;;  %v3684_v13 = vmul.f32 %v3683_v5, %v9144_v43  ;;  %v3835_v5 = vstv %s5630_s14  ;;  %s9316_s14 = sld [smem:[#allocation7 + $0x3]] }
 0x3d3   : > { %v3423_v6 = vmul.f32 %v9040_v3, %v3420_v56  ;;  %3606 = vrot.lane.b32.xlu0 %v3602_v24, %s6120_s23  ;;  %v3697_v24 = vstv %s9169_s24  ;;  %v3837_v49 = vmul.f32 %v3835_v5, %v9224_v28  ;;  %s5643_s24 = sld [smem:[#allocation7 + $0x2f]] }
 0x3d4   : > { %v3416_v1 = vmul.f32 %v9071_v20, %v3413_v35  ;;  %v3698_v25 = vmul.f32 %v3697_v24, %v9144_v43 }
 0x3d5   : > { %v3426_v57 = vadd.f32 1.0000237, %v3423_v6  ;;  %v3699_v6 = vmul.f32 %v3697_v24, %v9139_v53  ;;  %v3917_v24 = vstv %s5638_s3  ;;  %s9338_s3 = sld [smem:[#allocation7 + $0x27]] }
 0x3d6   : > { %3648 = vrot.lane.b32.xlu1 %v3643_v42, %s6119_s18  ;;  %v3419_v4 = vadd.f32 0.37409195, %v3416_v1  ;;  %v3711_v42 = vstv %s9181_s25  ;;  %s5644_s25 = sld [smem:[#allocation7 + $0x53]] }
 0x3d7   : > { %v3429_v58 = vmul.f32 %v9040_v3, %v3426_v57  ;;  %3646 = vrot.lane.b32.xlu0 %v3642_v54, %s6119_s18  ;;  %v3713_v21 = vmul.f32 %v3711_v42, %v9139_v53  ;;  %v3712_v1 = vmul.f32 %v3711_v42, %v9144_v43  ;;  %v3725_v54 = vstv %s5620_s4  ;;  %s5645_s4 = sld [smem:[#allocation7 + $0x77]] }
 0x3d8   : > { %v3422_v50 = vmul.f32 %v9071_v20, %v3419_v4  ;;  %v3727_v45 = vmul.f32 %v3725_v54, %v9139_v53 }
 0x3d9   : > { %v3432_v11 = vadd.f32 -1.2655122, %v3429_v58 }
 0x3da   : > { %v5938_v33 = vpop.eup %5937  ;;  %3662 = vrot.lane.b32.xlu1 %v3657_v30, %s6119_s18  ;;  %v3425_v36 = vadd.f32 1.0000237, %v3422_v50 }
 0x3db   : > { %v5940_v38 = vpop.eup %5939  ;;  %v3448_v31 = vmul.f32 %v5938_v33, %v8942_v34  ;;  %v3441_v29 = vadd.f32 %v3438_v16, %v3432_v11  ;;  %3660 = vrot.lane.b32.xlu0 %v3656_v0, %s6119_s18  ;;  %v3360_v16 = vmul.f32 0.5, %v8836_v60  ;;  %v3739_v33 = vstv %s9203_s30  ;;  %s9298_s30 = sld [smem:[#allocation7 + $0xd]] }
 0x3dc   : > { %v3327_v23 = vmul.f32 %v5940_v38, %v8965_v41  ;;  %v3428_v34 = vmul.f32 %v9071_v20, %v3425_v36  ;;  %v3741_v0 = vmul.f32 %v3739_v33, %v9139_v53  ;;  %v3740_v60 = vmul.f32 %v3739_v33, %v9144_v43  ;;  %v9228_v36 = vld [vmem:[#allocation3 + $0x2] sm:$0xff] }
 0x3dd   : > { %v3454_v19 = vsub.f32 1.0, %v3448_v31  ;;  %v5596_v12 = vadd.f32 -1.0, %v3448_v31  ;;  %v3446_v48 = vmul.f32 1.442695, %v3441_v29 }
 0x3de   : > { %v3333_v15 = vsub.f32 1.0, %v3327_v23  ;;  %v5594_v59 = vadd.f32 -1.0, %v3327_v23  ;;  %3676 = vrot.lane.b32.xlu1 %v3671_v55, %s6119_s18  ;;  %v3431_v27 = vadd.f32 -1.2655122, %v3428_v34  ;;  %v3793_v34 = vstv %s9219_s0  ;;  %s9306_s0 = sld [smem:[#allocation7 + $0x24]] }
 0x3df   : > { %v3460_v41 = vsel %vm3451_vm1, %v3454_v19, %v5596_v12  ;;  %5941 = vpow2.f32 %v3446_v48  ;;  %3674 = vrot.lane.b32.xlu0 %v3670_v51, %s6119_s18  ;;  %v3359_v19 = vmul.f32 0.5, %v8920_v61  ;;  %v3795_v14 = vmul.f32 %v3793_v34, %v9224_v28 }
 0x3e0   : > { %v3463_v44 = vadd.f32 1.0, %v3460_v41  ;;  %v3339_v7 = vsel %vm3330_vm2, %v3333_v15, %v5594_v59  ;;  %v3440_v26 = vadd.f32 %v3437_v8, %v3431_v27  ;;  %v3794_v61 = vmul.f32 %v3793_v34, %v9228_v36 }
 0x3e1   : > { %v3342_v63 = vadd.f32 1.0, %v3339_v7  ;;  %v3807_v59 = vstv %s5628_s12  ;;  %v3821_v41 = vstv %s5629_s13  ;;  %s9308_s12 = sld [smem:[#allocation7 + $0x31]]  ;;  %s9312_s13 = sld [smem:[#allocation7 + $0x48]] }
 0x3e2   : > { %v3466_v47 = vmul.f32 %v3463_v44, %v3358_v22  ;;  %3690 = vrot.lane.b32.xlu1 %v3685_v62, %s6119_s18  ;;  %v3444_v37 = vmul.f32 1.442695, %v3440_v26  ;;  %v3809_v8 = vmul.f32 %v3807_v59, %v9224_v28  ;;  %v3808_v51 = vmul.f32 %v3807_v59, %v9228_v36 }
 0x3e3   : > { %v3345_v56 = vmul.f32 %v3342_v63, %v3237_v17  ;;  %3688 = vrot.lane.b32.xlu0 %v3684_v13, %s6119_s18  ;;  %v3823_v18 = vmul.f32 %v3821_v41, %v9224_v28  ;;  %v3822_v27 = vmul.f32 %v3821_v41, %v9228_v36  ;;  %v3836_v22 = vmul.f32 %v3835_v5, %v9228_v36  ;;  %v9270_v13 = vld [vmem:[#allocation3 + $0x20] sm:$0xff] }
 0x3e4   : > { %v3469_v10 = vsel %vm8960_vm10, %v3466_v47, 0.0  ;;  %5943 = vpow2.f32 %v3444_v37  ;;  %v3849_v44 = vstv %s5631_s15  ;;  %v3865_v17 = vmul.f32 %v3863_v40, %v9224_v28  ;;  %v9274_v37 = vld [vmem:[#allocation3 + $0x18] sm:$0xff]  ;;  %s9321_s15 = sld [smem:[#allocation7 + $0x55]] }
 0x3e5   : > { %3473 = vst.msk [vmem:[#allocation3 + $0x48] sm:$0xff] %vm3102_vm4, %v3469_v10  ;;  %v3348_v35 = vsel %vm8997_vm13, %v3345_v56, 0.0  ;;  %v3851_v7 = vmul.f32 %v3849_v44, %v9224_v28  ;;  %v3850_v62 = vmul.f32 %v3849_v44, %v9228_v36  ;;  %v3864_v63 = vmul.f32 %v3863_v40, %v9228_v36 }
 0x3e6   : > { %3352 = vst.msk [vmem:[#allocation3 + $0x40] sm:$0x3] %vm3105_vm8, %v3348_v35  ;;  %3704 = vrot.lane.b32.xlu1 %v3699_v6, %s6120_s23  ;;  %v3877_v26 = vstv %s5633_s2  ;;  %v3919_v10 = vmul.f32 %v3917_v24, %v9270_v13  ;;  %v3918_v6 = vmul.f32 %v3917_v24, %v9274_v37  ;;  %v3931_v35 = vstv %s5639_s19  ;;  %s9336_s2 = sld [smem:[#allocation7 + $0x79]]  ;;  %s9352_s19 = sld [smem:[#allocation7 + $0xe]] }
 0x3e7   : > { %3702 = vrot.lane.b32.xlu0 %v3698_v25, %s6120_s23  ;;  %v3879_v47 = vmul.f32 %v3877_v26, %v9224_v28  ;;  %v3878_v56 = vmul.f32 %v3877_v26, %v9228_v36  ;;  %v3933_v25 = vmul.f32 %v3931_v35, %v9270_v13  ;;  %v3932_v42 = vmul.f32 %v3931_v35, %v9274_v37 }
 0x3e8   : > { %v4069_v59 = vstv %s9308_s12  ;;  %v3617_v44 = vstv %s9316_s14  ;;  %s9448_s12 = sld [smem:[#allocation7 + $0x7c]]  ;;  %s9458_s14 = sld [smem:[#allocation7 + $0x11]] }
 0x3e9   : > { %v5942_v57 = vpop.eup %5941  ;;  %v3618_v35 = vmul.f32 %v3617_v44, %v9144_v43 }
 0x3ea   : > { %v3450_v39 = vmul.f32 %v5942_v57, %v9040_v3  ;;  %3718 = vrot.lane.b32.xlu1 %v3713_v21, %s6120_s23  ;;  %v3726_v3 = vmul.f32 %v3725_v54, %v9144_v43  ;;  %v3945_v21 = vstv %s5640_s20  ;;  %s9355_s20 = sld [smem:[#allocation7 + $0x4b]]  ;;  %v4083_v40 = vstv %s9321_s15  ;;  %s9461_s15 = sld [smem:[#allocation7 + $0x4e]] }
 0x3eb   : > { %3716 = vrot.lane.b32.xlu0 %v3712_v1, %s6120_s23  ;;  %v3947_v57 = vmul.f32 %v3945_v21, %v9270_v13  ;;  %v3959_v1 = vstv %s5641_s21  ;;  %s9370_s21 = sld [smem:[#allocation7 + $0x32]] }
 0x3ec   : > { %v3456_v58 = vsub.f32 1.0, %v3450_v39  ;;  %v5598_v4 = vadd.f32 -1.0, %v3450_v39  ;;  %v3946_v39 = vmul.f32 %v3945_v21, %v9274_v37  ;;  %v3961_v54 = vmul.f32 %v3959_v1, %v9270_v13 }
 0x3ee   : > { %v3462_v30 = vsel %vm3453_vm3, %v3456_v58, %v5598_v4  ;;  %3732 = vrot.lane.b32.xlu1 %v3727_v45, %s6120_s23  ;;  %v5944_v11 = vpop.eup %5943  ;;  %v3960_v58 = vmul.f32 %v3959_v1, %v9274_v37  ;;  %v3973_v4 = vstv %s5642_s22  ;;  %s9373_s22 = sld [smem:[#allocation7 + $0x6f]] }
 0x3ef   : > { %v3465_v50 = vadd.f32 1.0, %v3462_v30  ;;  %v3449_v46 = vmul.f32 %v5944_v11, %v9071_v20  ;;  %3730 = vrot.lane.b32.xlu0 %v3726_v3, %s6120_s23  ;;  %v3779_v20 = vstv %s9210_s9  ;;  %v3975_v45 = vmul.f32 %v3973_v4, %v9270_v13  ;;  %s9300_s9 = sld [smem:[#allocation7]] }
 0x3f0   : > { %v3781_v55 = vmul.f32 %v3779_v20, %v9224_v28  ;;  %v3780_v48 = vmul.f32 %v3779_v20, %v9228_v36  ;;  %v3974_v30 = vmul.f32 %v3973_v4, %v9274_v37  ;;  %v3987_v11 = vstv %s5643_s24  ;;  %s9392_s24 = sld [smem:[#allocation7 + $0x56]] }
 0x3f1   : > { %v3468_v38 = vmul.f32 %v3465_v50, %v3360_v16  ;;  %v3455_v31 = vsub.f32 1.0, %v3449_v46  ;;  %v5597_v29 = vadd.f32 -1.0, %v3449_v46  ;;  %v3989_v16 = vmul.f32 %v3987_v11, %v9270_v13 }
 0x3f2   : > { %3746 = vrot.lane.b32.xlu1 %v3741_v0, %s6120_s23  ;;  %v3988_v33 = vmul.f32 %v3987_v11, %v9274_v37  ;;  %v4001_v46 = vstv %s5644_s25  ;;  %s9409_s25 = sld [smem:[#allocation7 + $0x7a]] }
 0x3f3   : > { %v3471_v2 = vsel %vm8997_vm13, %v3468_v38, 0.0  ;;  %v3461_v23 = vsel %vm3452_vm5, %v3455_v31, %v5597_v29  ;;  %3744 = vrot.lane.b32.xlu0 %v3740_v60, %s6120_s23  ;;  %v4003_v38 = vmul.f32 %v4001_v46, %v9270_v13  ;;  %v4002_v29 = vmul.f32 %v4001_v46, %v9274_v37 }
 0x3f4   : > { %3475 = vst.msk [vmem:[#allocation3 + $0x58] sm:$0x3] %vm3105_vm8, %v3471_v2  ;;  %v3464_v12 = vadd.f32 1.0, %v3461_v23  ;;  %v4015_v60 = vstv %s5645_s4  ;;  %v9318_v23 = vld [vmem:[#allocation3 + $0x21] sm:$0xff]  ;;  %s9422_s4 = sld [smem:[#allocation7 + $0x10]] }
 0x3f5   : > { %v4017_v20 = vmul.f32 %v4015_v60, %v9270_v13  ;;  %v4085_v21 = vmul.f32 %v4083_v40, %v9318_v23 }
 0x3f6   : > { %3786 = vrot.lane.b32.xlu1 %v3781_v55, %s6119_s18  ;;  %v3467_v9 = vmul.f32 %v3464_v12, %v3359_v19  ;;  %v4055_v55 = vstv %s9298_s30  ;;  %v3479_v19 = vstv %s9300_s9  ;;  %s9429_s30 = sld [smem:[#allocation7 + $0x34]]  ;;  %s9435_s9 = sld [smem:[#allocation7 + $0x6]] }
 0x3f7   : > { %3784 = vrot.lane.b32.xlu0 %v3780_v48, %s6119_s18  ;;  %v4016_v48 = vmul.f32 %v4015_v60, %v9274_v37 }
 0x3f8   : > { %v3470_v15 = vsel %vm8951_vm9, %v3467_v9, 0.0  ;;  %v9328_v9 = vld [vmem:[#allocation3 + $0x19] sm:$0xff] }
 0x3f9   : > { %3474 = vst.msk [vmem:[#allocation3 + $0x50] sm:$0xff] %vm3102_vm4, %v3470_v15  ;;  %v3481_v15 = vmul.f32 %v3479_v19, %v9026_v32  ;;  %vm5185_vm4 = vcmask 130048  }
 0x3fa   : > { %3800 = vrot.lane.b32.xlu1 %v3795_v14, %s6119_s18  ;;  %v4057_v14 = vmul.f32 %v4055_v55, %v9318_v23 }
 0x3fb   : > { %3798 = vrot.lane.b32.xlu0 %v3794_v61, %s6119_s18  ;;  %v3485_v61 = vstv %s9306_s0  ;;  %s9440_s0 = sld [smem:[#allocation7 + $0x58]] }
 0x3fc   : > { %v3487_v5 = vmul.f32 %v3485_v61, %v9026_v32 }
 0x3fe   : > { %3814 = vrot.lane.b32.xlu1 %v3809_v8, %s6119_s18 }
 0x3ff   : > { %3812 = vrot.lane.b32.xlu0 %v3808_v51, %s6119_s18  ;;  %v4056_v51 = vmul.f32 %v4055_v55, %v9328_v9 }
 0x402   : > { %3828 = vrot.lane.b32.xlu1 %v3823_v18, %s6119_s18  ;;  %v3480_v18 = vmul.f32 %v3479_v19, %v9035_v52 }
 0x403   : > { %3826 = vrot.lane.b32.xlu0 %v3822_v27, %s6119_s18  ;;  %v3491_v27 = vstv %s9312_s13  ;;  %s9450_s13 = sld [smem:[#allocation7 + $0x2a]] }
 0x404   : > { %v3493_v26 = vmul.f32 %v3491_v27, %v9026_v32 }
 0x406   : > { %3842 = vrot.lane.b32.xlu1 %v3837_v49, %s6120_s23 }
 0x407   : > { %3840 = vrot.lane.b32.xlu0 %v3836_v22, %s6120_s23  ;;  %v4071_v22 = vmul.f32 %v4069_v59, %v9318_v23 }
 0x40a   : > { %3856 = vrot.lane.b32.xlu1 %v3851_v7, %s6120_s23 }
 0x40b   : > { %3854 = vrot.lane.b32.xlu0 %v3850_v62, %s6120_s23 }
 0x40e   : > { %3870 = vrot.lane.b32.xlu1 %v3865_v17, %s6120_s23  ;;  %v3619_v17 = vmul.f32 %v3617_v44, %v9139_v53 }
 0x40f   : > { %3868 = vrot.lane.b32.xlu0 %v3864_v63, %s6120_s23  ;;  %v3486_v63 = vmul.f32 %v3485_v61, %v9035_v52 }
 0x412   : > { %3884 = vrot.lane.b32.xlu1 %v3879_v47, %s6120_s23 }
 0x413   : > { %3882 = vrot.lane.b32.xlu0 %v3878_v56, %s6120_s23  ;;  %v4070_v56 = vmul.f32 %v4069_v59, %v9328_v9 }
 0x416   : > { %3924 = vrot.lane.b32.xlu1 %v3919_v10, %s6119_s18 }
 0x417   : > { %3922 = vrot.lane.b32.xlu0 %v3918_v6, %s6119_s18 }
 0x41a   : > { %3938 = vrot.lane.b32.xlu1 %v3933_v25, %s6119_s18  ;;  %v3497_v25 = vstv %s9330_s17  ;;  %s9475_s17 = sld [smem:[#allocation7 + $0x35]] }
 0x41b   : > { %3936 = vrot.lane.b32.xlu0 %v3932_v42, %s6119_s18  ;;  %v3499_v46 = vmul.f32 %v3497_v25, %v9026_v32  ;;  %v3498_v32 = vmul.f32 %v3497_v25, %v9035_v52 }
 0x41e   : > { %3952 = vrot.lane.b32.xlu1 %v3947_v57, %s6119_s18  ;;  %v4097_v57 = vstv %s9336_s2  ;;  %s9478_s2 = sld [smem:[#allocation7 + $0x72]] }
 0x41f   : > { %3950 = vrot.lane.b32.xlu0 %v3946_v39, %s6119_s18  ;;  %v3623_v39 = vstv %s9338_s3  ;;  %s9497_s3 = sld [smem:[#allocation7 + $0x59]] }
 0x420   : > { %v3625_v4 = vmul.f32 %v3623_v39, %v9139_v53 }
 0x422   : > { %3966 = vrot.lane.b32.xlu1 %v3961_v54, %s6119_s18 }
 0x423   : > { %3964 = vrot.lane.b32.xlu0 %v3960_v58, %s6119_s18 }
 0x426   : > { %3980 = vrot.lane.b32.xlu1 %v3975_v45, %s6120_s23  ;;  %v3511_v3 = vpop.permute.xlu1 %3510  ;;  %v3492_v45 = vmul.f32 %v3491_v27, %v9035_v52  ;;  %v3635_v52 = vstv %s9373_s22  ;;  %s9539_s22 = sld [smem:[#allocation7 + $0x9]] }
 0x427   : > { %3978 = vrot.lane.b32.xlu0 %v3974_v30, %s6120_s23  ;;  %v3509_v50 = vpop.permute.xlu0 %3508  ;;  %v3515_v41 = vadd.f32 %v3511_v3, %v3481_v15  ;;  %v4084_v3 = vmul.f32 %v4083_v40, %v9328_v9 }
 0x428   : > { %v3514_v7 = vadd.f32 %v3509_v50, %v3480_v18 }
 0x42a   : > { %3994 = vrot.lane.b32.xlu1 %v3989_v16, %s6120_s23 }
 0x42b   : > { %3992 = vrot.lane.b32.xlu0 %v3988_v33, %s6120_s23  ;;  %v3624_v33 = vmul.f32 %v3623_v39, %v9144_v43 }
 0x42c   : > { %v3525_v0 = vpop.permute.xlu1 %3524 }
 0x42d   : > { %v3523_v31 = vpop.permute.xlu0 %3522  ;;  %v3529_v24 = vadd.f32 %v3525_v0, %v3487_v5 }
 0x42e   : > { %4008 = vrot.lane.b32.xlu1 %v4003_v38, %s6120_s23  ;;  %v3528_v1 = vadd.f32 %v3523_v31, %v3486_v63  ;;  %v4099_v38 = vmul.f32 %v4097_v57, %v9318_v23  ;;  %v4111_v31 = vstv %s9352_s19  ;;  %s9513_s19 = sld [smem:[#allocation7 + $0x7d]] }
 0x42f   : > { %4006 = vrot.lane.b32.xlu0 %v4002_v29, %s6120_s23  ;;  %v3629_v29 = vstv %s9355_s20  ;;  %s9526_s20 = sld [smem:[#allocation7 + $0x13]] }
 0x430   : > { %v3539_v2 = vpop.permute.xlu1 %3538  ;;  %v3631_v55 = vmul.f32 %v3629_v29, %v9139_v53  ;;  %v3630_v61 = vmul.f32 %v3629_v29, %v9144_v43 }
 0x431   : > { %v9324_v12 = vpop.permute.xlu0 %3536  ;;  %v3543_v11 = vadd.f32 %v3539_v2, %v3493_v26 }
 0x432   : > { %4022 = vrot.lane.b32.xlu1 %v4017_v20, %s6120_s23  ;;  %v3542_v60 = vadd.f32 %v9324_v12, %v3492_v45  ;;  %v4207_v45 = vstv %s9429_s30  ;;  %s9562_s30 = sld [smem:[#allocation7 + $0x14]] }
 0x433   : > { %4020 = vrot.lane.b32.xlu0 %v4016_v48, %s6120_s23  ;;  %v4098_v48 = vmul.f32 %v4097_v57, %v9328_v9 }
 0x434   : > { %v9333_v34 = vpop.permute.xlu1 %3552 }
 0x435   : > { %v9343_v8 = vpop.permute.xlu0 %3550 }
 0x436   : > { %4062 = vrot.lane.b32.xlu1 %v4057_v14, %s6119_s18  ;;  %v3557_v14 = vadd.f32 %v9333_v34, %v3499_v46  ;;  %v3556_v18 = vadd.f32 %v9343_v8, %v3498_v32  ;;  %v3637_v34 = vmul.f32 %v3635_v52, %v9139_v53  ;;  %v3755_v46 = vstv %s9435_s9  ;;  %s9565_s9 = sld [smem:[#allocation7 + $0x51]] }
 0x437   : > { %4060 = vrot.lane.b32.xlu0 %v4056_v51, %s6119_s18  ;;  %v4113_v51 = vmul.f32 %v4111_v31, %v9318_v23  ;;  %v3757_v29 = vmul.f32 %v3755_v46, %v9224_v28 }
 0x438   : > { %v3567_v49 = vpop.permute.xlu1 %3566 }
 0x439   : > { %v3571_v62 = vadd.f32 %v3567_v49, %v3515_v41  ;;  %v3565_v47 = vpop.permute.xlu0 %3564  ;;  %v4125_v41 = vstv %s9370_s21  ;;  %s9533_s21 = sld [smem:[#allocation7 + $0x37]] }
 0x43a   : > { %4076 = vrot.lane.b32.xlu1 %v4071_v22, %s6119_s18  ;;  %v3570_v10 = vadd.f32 %v3565_v47, %v3514_v7  ;;  %v4112_v22 = vmul.f32 %v4111_v31, %v9328_v9  ;;  %v4127_v40 = vmul.f32 %v4125_v41, %v9318_v23  ;;  %v4126_v26 = vmul.f32 %v4125_v41, %v9328_v9 }
 0x43b   : > { %v9363_v6 = vadd.f32 %v3619_v17, %v3571_v62  ;;  %4074 = vrot.lane.b32.xlu0 %v4070_v56, %s6119_s18  ;;  %v3636_v62 = vmul.f32 %v3635_v52, %v9144_v43  ;;  %v4139_v17 = vstv %s9392_s24  ;;  %v4153_v56 = vstv %s9409_s25  ;;  %s9544_s24 = sld [smem:[#allocation7 + $0x5b]]  ;;  %s9552_s25 = sld [smem:[#allocation7 + $0x7f]] }
 0x43c   : > { %v3581_v42 = vpop.permute.xlu1 %3580  ;;  %v9375_v58 = vadd.f32 %v3618_v35, %v3570_v10  ;;  %v4141_v43 = vmul.f32 %v4139_v17, %v9318_v23  ;;  %v4140_v10 = vmul.f32 %v4139_v17, %v9328_v9  ;;  %v4155_v25 = vmul.f32 %v4153_v56, %v9318_v23 }
 0x43d   : > { %v3585_v54 = vadd.f32 %v3581_v42, %v3529_v24  ;;  %v3579_v30 = vpop.permute.xlu0 %3578  ;;  %v9437_v42 = vld [vmem:[#allocation3 + $0x22] sm:$0xff]  ;;  %v4154_v39 = vmul.f32 %v4153_v56, %v9328_v9  ;;  %v4221_v31 = vstv %s9440_s0  ;;  %s9579_s0 = sld [smem:[#allocation7 + $0x38]] }
 0x43e   : > { %4090 = vrot.lane.b32.xlu1 %v4085_v21, %s6119_s18  ;;  %v3584_v16 = vadd.f32 %v3579_v30, %v3528_v1  ;;  %v4193_v21 = vstv %s9422_s4  ;;  %v9444_v1 = vld [vmem:[#allocation3 + $0x1a] sm:$0xff]  ;;  %s9554_s4 = sld [smem:[#allocation7 + $0x2d]] }
 0x43f   : > { %v9381_v50 = vadd.f32 %v3625_v4, %v3585_v54  ;;  %4088 = vrot.lane.b32.xlu0 %v4084_v3, %s6119_s18  ;;  %v4195_v4 = vmul.f32 %v4193_v21, %v9437_v42  ;;  %v4194_v3 = vmul.f32 %v4193_v21, %v9444_v1  ;;  %v4222_v52 = vmul.f32 %v4221_v31, %v9444_v1 }
 0x440   : > { %v3595_v0 = vpop.permute.xlu1 %3594  ;;  %v9390_v2 = vadd.f32 %v3624_v33, %v3584_v16  ;;  %v4209_v33 = vmul.f32 %v4207_v45, %v9437_v42 }
 0x441   : > { %v3599_v20 = vadd.f32 %v3595_v0, %v3543_v11  ;;  %v3593_v19 = vpop.permute.xlu0 %3592 }
 0x442   : > { %4104 = vrot.lane.b32.xlu1 %v4099_v38, %s6119_s18  ;;  %v3598_v15 = vadd.f32 %v3593_v19, %v3542_v60  ;;  %v3756_v19 = vmul.f32 %v3755_v46, %v9228_v36 }
 0x443   : > { %v9399_v12 = vadd.f32 %v3631_v55, %v3599_v20  ;;  %4102 = vrot.lane.b32.xlu0 %v4098_v48, %s6119_s18  ;;  %v4223_v48 = vmul.f32 %v4221_v31, %v9437_v42 }
 0x444   : > { %v3609_v59 = vpop.permute.xlu1 %3608  ;;  %v9407_v5 = vadd.f32 %v3630_v61, %v3598_v15  ;;  %v3761_v15 = vstv %s9450_s13  ;;  %s9601_s13 = sld [smem:[#allocation7 + $0x5c]] }
 0x445   : > { %v3613_v27 = vadd.f32 %v3609_v59, %v3557_v14  ;;  %v3607_v49 = vpop.permute.xlu0 %3606  ;;  %v4235_v14 = vstv %s9448_s12  ;;  %s9582_s12 = sld [smem:[#allocation7 + $0x75]] }
 0x446   : > { %4118 = vrot.lane.b32.xlu1 %v4113_v51, %s6120_s23  ;;  %v3612_v44 = vadd.f32 %v3607_v49, %v3556_v18  ;;  %v3763_v51 = vmul.f32 %v3761_v15, %v9224_v28  ;;  %v3762_v49 = vmul.f32 %v3761_v15, %v9228_v36 }
 0x447   : > { %v9414_v7 = vadd.f32 %v3637_v34, %v3613_v27  ;;  %4116 = vrot.lane.b32.xlu0 %v4112_v22, %s6120_s23  ;;  %v4237_v22 = vmul.f32 %v4235_v14, %v9437_v42 }
 0x448   : > { %v3649_v8 = vpop.permute.xlu1 %3648  ;;  %v9420_v63 = vadd.f32 %v3636_v62, %v3612_v44  ;;  %v4249_v44 = vstv %s9458_s14  ;;  %v3767_v62 = vstv %s9461_s15  ;;  %s9617_s14 = sld [smem:[#allocation7 + $0x80]]  ;;  %s5686_s15 = sld [smem:[#allocation7 + $0x16]] }
 0x449   : > { %v3647_v53 = vpop.permute.xlu0 %3646  ;;  %v3653_v11 = vadd.f32 %v3649_v8, %v9363_v6  ;;  %v4208_v6 = vmul.f32 %v4207_v45, %v9444_v1 }
 0x44a   : > { %4132 = vrot.lane.b32.xlu1 %v4127_v40, %s6120_s23  ;;  %v3652_v0 = vadd.f32 %v3647_v53, %v9375_v58 }
 0x44b   : > { %4130 = vrot.lane.b32.xlu0 %v4126_v26, %s6120_s23  ;;  %v4236_v26 = vmul.f32 %v4235_v14, %v9444_v1 }
 0x44c   : > { %v3663_v47 = vpop.permute.xlu1 %3662 }
 0x44d   : > { %v3661_v24 = vpop.permute.xlu0 %3660  ;;  %v3667_v20 = vadd.f32 %v3663_v47, %v9381_v50 }
 0x44e   : > { %4146 = vrot.lane.b32.xlu1 %v4141_v43, %s6120_s23  ;;  %v3666_v50 = vadd.f32 %v3661_v24, %v9390_v2 }
 0x44f   : > { %4144 = vrot.lane.b32.xlu0 %v4140_v10, %s6120_s23  ;;  %v4251_v10 = vmul.f32 %v4249_v44, %v9437_v42 }
 0x450   : > { %v3677_v35 = vpop.permute.xlu1 %3676 }
 0x451   : > { %v3675_v57 = vpop.permute.xlu0 %3674  ;;  %v3681_v18 = vadd.f32 %v3677_v35, %v9399_v12  ;;  %v3769_v12 = vmul.f32 %v3767_v62, %v9224_v28  ;;  %v4263_v35 = vstv %s9475_s17  ;;  %s9637_s17 = sld [smem:[#allocation7 + $0xc]] }
 0x452   : > { %4160 = vrot.lane.b32.xlu1 %v4155_v25, %s6120_s23  ;;  %v3680_v8 = vadd.f32 %v3675_v57, %v9407_v5  ;;  %v3768_v5 = vmul.f32 %v3767_v62, %v9228_v36  ;;  %v3773_v25 = vstv %s9478_s2  ;;  %v4264_v46 = vmul.f32 %v4263_v35, %v9444_v1  ;;  %s9639_s2 = sld [smem:[#allocation7 + $0x3a]] }
 0x453   : > { %4158 = vrot.lane.b32.xlu0 %v4154_v39, %s6120_s23 }
 0x454   : > { %v3691_v54 = vpop.permute.xlu1 %3690 }
 0x455   : > { %v3689_v30 = vpop.permute.xlu0 %3688  ;;  %v3695_v47 = vadd.f32 %v3691_v54, %v9414_v7  ;;  %v3775_v7 = vmul.f32 %v3773_v25, %v9224_v28 }
 0x456   : > { %4200 = vrot.lane.b32.xlu1 %v4195_v4, %s6119_s18  ;;  %v3694_v21 = vadd.f32 %v3689_v30, %v9420_v63  ;;  %v4250_v4 = vmul.f32 %v4249_v44, %v9444_v1  ;;  %v4265_v30 = vmul.f32 %v4263_v35, %v9437_v42 }
 0x457   : > { %4198 = vrot.lane.b32.xlu0 %v4194_v3, %s6119_s18 }
 0x458   : > { %v3705_v16 = vpop.permute.xlu1 %3704 }
 0x459   : > { %v3709_v38 = vadd.f32 %v3705_v16, %v3653_v11  ;;  %v3703_v60 = vpop.permute.xlu0 %3702  ;;  %v3774_v11 = vmul.f32 %v3773_v25, %v9228_v36  ;;  %v4277_v16 = vstv %s9497_s3  ;;  %s9647_s3 = sld [smem:[#allocation7 + $0x5e]] }
 0x45a   : > { %4214 = vrot.lane.b32.xlu1 %v4209_v33, %s6119_s18  ;;  %v3708_v55 = vadd.f32 %v3703_v60, %v3652_v0  ;;  %v4279_v36 = vmul.f32 %v4277_v16, %v9437_v42 }
 0x45b   : > { %v9469_v32 = vadd.f32 %v3757_v29, %v3709_v38  ;;  %4212 = vrot.lane.b32.xlu0 %v4208_v6, %s6119_s18  ;;  %v4291_v38 = vstv %s9513_s19  ;;  %v4278_v29 = vmul.f32 %v4277_v16, %v9444_v1  ;;  %s9649_s19 = sld [smem:[#allocation7 + $0x30]] }
 0x45c   : > { %v3719_v58 = vpop.permute.xlu1 %3718  ;;  %v9481_v59 = vadd.f32 %v3756_v19, %v3708_v55  ;;  %v4293_v6 = vmul.f32 %v4291_v38, %v9437_v42  ;;  %v4331_v55 = vstv %s9526_s20  ;;  %s9657_s20 = sld [smem:[#allocation7 + $0x82]] }
 0x45d   : > { %v3723_v61 = vadd.f32 %v3719_v58, %v3667_v20  ;;  %v3717_v41 = vpop.permute.xlu0 %3716  ;;  %v9541_v20 = vld [vmem:[#allocation3 + $0x38] sm:$0xff]  ;;  %v4292_v58 = vmul.f32 %v4291_v38, %v9444_v1 }
 0x45e   : > { %4228 = vrot.lane.b32.xlu1 %v4223_v48, %s6119_s18  ;;  %v3722_v27 = vadd.f32 %v3717_v41, %v3666_v50  ;;  %v9548_v48 = vld [vmem:[#allocation3 + $0x30] sm:$0xff]  ;;  %v4333_v15 = vmul.f32 %v4331_v55, %v9541_v20  ;;  %v4345_v50 = vstv %s9533_s21  ;;  %s9660_s21 = sld [smem:[#allocation7 + $0x54]] }
 0x45f   : > { %v9487_v34 = vadd.f32 %v3763_v51, %v3723_v61  ;;  %4226 = vrot.lane.b32.xlu0 %v4222_v52, %s6119_s18  ;;  %v4332_v51 = vmul.f32 %v4331_v55, %v9548_v48 }
 0x460   : > { %v3733_v2 = vpop.permute.xlu1 %3732  ;;  %v9495_v17 = vadd.f32 %v3762_v49, %v3722_v27  ;;  %v3893_v27 = vstv %s9539_s22  ;;  %s9671_s22 = sld [smem:[#allocation7 + $0x17]] }
 0x461   : > { %v3737_v40 = vadd.f32 %v3733_v2, %v3681_v18  ;;  %v3731_v53 = vpop.permute.xlu0 %3730  ;;  %v4347_v18 = vmul.f32 %v4345_v50, %v9541_v20  ;;  %v3895_v44 = vmul.f32 %v3893_v27, %v9270_v13 }
 0x462   : > { %4242 = vrot.lane.b32.xlu1 %v4237_v22, %s6119_s18  ;;  %v3736_v43 = vadd.f32 %v3731_v53, %v3680_v8  ;;  %v4359_v22 = vstv %s9544_s24  ;;  %v3894_v53 = vmul.f32 %v3893_v27, %v9274_v37  ;;  %s9674_s24 = sld [smem:[#allocation7 + $0x78]] }
 0x463   : > { %v9503_v56 = vadd.f32 %v3769_v12, %v3737_v40  ;;  %4240 = vrot.lane.b32.xlu0 %v4236_v26, %s6119_s18  ;;  %v4361_v26 = vmul.f32 %v4359_v22, %v9541_v20  ;;  %v4360_v25 = vmul.f32 %v4359_v22, %v9548_v48 }
 0x464   : > { %v3747_v24 = vpop.permute.xlu1 %3746  ;;  %v9511_v39 = vadd.f32 %v3768_v5, %v3736_v43  ;;  %v3899_v43 = vstv %s9554_s4  ;;  %s9707_s4 = sld [smem:[#allocation7 + $0x5f]] }
 0x465   : > { %v3751_v57 = vadd.f32 %v3747_v24, %v3695_v47  ;;  %v3745_v54 = vpop.permute.xlu0 %3744  ;;  %v4373_v47 = vstv %s9552_s25  ;;  %s9691_s25 = sld [smem:[#allocation7 + $0x3b]] }
 0x466   : > { %4256 = vrot.lane.b32.xlu1 %v4251_v10, %s6120_s23  ;;  %v3750_v45 = vadd.f32 %v3745_v54, %v3694_v21  ;;  %v3901_v10 = vmul.f32 %v3899_v43, %v9270_v13  ;;  %v3900_v54 = vmul.f32 %v3899_v43, %v9274_v37 }
 0x467   : > { %v9518_v3 = vadd.f32 %v3775_v7, %v3751_v57  ;;  %4254 = vrot.lane.b32.xlu0 %v4250_v4, %s6120_s23  ;;  %v4375_v4 = vmul.f32 %v4373_v47, %v9541_v20 }
 0x468   : > { %v3787_v63 = vpop.permute.xlu1 %3786  ;;  %v9524_v33 = vadd.f32 %v3774_v11, %v3750_v45  ;;  %v4387_v45 = vstv %s9562_s30  ;;  %v3905_v11 = vstv %s9565_s9  ;;  %s5693_s30 = sld [smem:[#allocation7 + $0x83]]  ;;  %s5698_s9 = sld [smem:[#allocation7 + $0x19]] }
 0x469   : > { %v3785_v28 = vpop.permute.xlu0 %3784  ;;  %v3791_v41 = vadd.f32 %v3787_v63, %v9469_v32  ;;  %v4346_v32 = vmul.f32 %v4345_v50, %v9548_v48 }
 0x46a   : > { %4270 = vrot.lane.b32.xlu1 %v4265_v30, %s6120_s23  ;;  %v3790_v49 = vadd.f32 %v3785_v28, %v9481_v59 }
 0x46b   : > { %4268 = vrot.lane.b32.xlu0 %v4264_v46, %s6120_s23  ;;  %v4374_v46 = vmul.f32 %v4373_v47, %v9548_v48 }
 0x46c   : > { %v3801_v0 = vpop.permute.xlu1 %3800 }
 0x46d   : > { %v3799_v31 = vpop.permute.xlu0 %3798  ;;  %v3805_v8 = vadd.f32 %v3801_v0, %v9487_v34 }
 0x46e   : > { %4284 = vrot.lane.b32.xlu1 %v4279_v36, %s6120_s23  ;;  %v3804_v34 = vadd.f32 %v3799_v31, %v9495_v17 }
 0x46f   : > { %4282 = vrot.lane.b32.xlu0 %v4278_v29, %s6120_s23  ;;  %v4389_v29 = vmul.f32 %v4387_v45, %v9541_v20 }
 0x470   : > { %v3815_v60 = vpop.permute.xlu1 %3814 }
 0x471   : > { %v3813_v19 = vpop.permute.xlu0 %3812  ;;  %v3819_v21 = vadd.f32 %v3815_v60, %v9503_v56  ;;  %v3907_v56 = vmul.f32 %v3905_v11, %v9270_v13  ;;  %v4401_v60 = vstv %s9579_s0  ;;  %s9735_s0 = sld [smem:[#allocation7 + $0xf]] }
 0x472   : > { %4298 = vrot.lane.b32.xlu1 %v4293_v6, %s6120_s23  ;;  %v3818_v63 = vadd.f32 %v3813_v19, %v9511_v39  ;;  %v3906_v39 = vmul.f32 %v3905_v11, %v9274_v37  ;;  %v3911_v6 = vstv %s9582_s12  ;;  %v4402_v27 = vmul.f32 %v4401_v60, %v9548_v48  ;;  %s9737_s12 = sld [smem:[#allocation7 + $0x3d]] }
 0x473   : > { %4296 = vrot.lane.b32.xlu0 %v4292_v58, %s6120_s23 }
 0x474   : > { %v3829_v14 = vpop.permute.xlu1 %3828 }
 0x475   : > { %v3827_v61 = vpop.permute.xlu0 %3826  ;;  %v3833_v0 = vadd.f32 %v3829_v14, %v9518_v3  ;;  %v3913_v3 = vmul.f32 %v3911_v6, %v9270_v13 }
 0x476   : > { %4338 = vrot.lane.b32.xlu1 %v4333_v15, %s6119_s18  ;;  %v3832_v55 = vadd.f32 %v3827_v61, %v9524_v33  ;;  %v4388_v15 = vmul.f32 %v4387_v45, %v9548_v48  ;;  %v4403_v61 = vmul.f32 %v4401_v60, %v9541_v20 }
 0x477   : > { %4336 = vrot.lane.b32.xlu0 %v4332_v51, %s6119_s18 }
 0x478   : > { %v3843_v52 = vpop.permute.xlu1 %3842 }
 0x479   : > { %v3847_v2 = vadd.f32 %v3843_v52, %v3791_v41  ;;  %v3841_v62 = vpop.permute.xlu0 %3840  ;;  %v3912_v41 = vmul.f32 %v3911_v6, %v9274_v37  ;;  %v4415_v52 = vstv %s9601_s13  ;;  %v4429_v37 = vstv %s9617_s14  ;;  %s9745_s13 = sld [smem:[#allocation7 + $0x61]]  ;;  %s9747_s14 = sld [smem:[#allocation7 + $0x33]] }
 0x47a   : > { %4352 = vrot.lane.b32.xlu1 %v4347_v18, %s6119_s18  ;;  %v3846_v40 = vadd.f32 %v3841_v62, %v3790_v49  ;;  %v4511_v6 = vstv %s9657_s20  ;;  %s9805_s20 = sld [smem:[#allocation7 + $0x62]] }
 0x47b   : > { %v9573_v12 = vadd.f32 %v3895_v44, %v3847_v2  ;;  %4350 = vrot.lane.b32.xlu0 %v4346_v32, %s6119_s18  ;;  %v4417_v2 = vmul.f32 %v4415_v52, %v9541_v20  ;;  %v4416_v44 = vmul.f32 %v4415_v52, %v9548_v48  ;;  %v4431_v32 = vmul.f32 %v4429_v37, %v9541_v20 }
 0x47c   : > { %v3857_v59 = vpop.permute.xlu1 %3856  ;;  %v9585_v24 = vadd.f32 %v3894_v53, %v3846_v40  ;;  %v4430_v53 = vmul.f32 %v4429_v37, %v9548_v48 }
 0x47d   : > { %v3861_v5 = vadd.f32 %v3857_v59, %v3805_v8  ;;  %v3855_v35 = vpop.permute.xlu0 %3854  ;;  %v9643_v8 = vld [vmem:[#allocation3 + $0x39] sm:$0xff]  ;;  %v9651_v59 = vld [vmem:[#allocation3 + $0x31] sm:$0xff] }
 0x47e   : > { %4366 = vrot.lane.b32.xlu1 %v4361_v26, %s6119_s18  ;;  %v3860_v57 = vadd.f32 %v3855_v35, %v3804_v34  ;;  %v4469_v26 = vstv %s5686_s15  ;;  %s9755_s15 = sld [smem:[#allocation7 + $0x85]] }
 0x47f   : > { %v9591_v7 = vadd.f32 %v3901_v10, %v3861_v5  ;;  %4364 = vrot.lane.b32.xlu0 %v4360_v25, %s6119_s18  ;;  %v4471_v43 = vmul.f32 %v4469_v26, %v9643_v8  ;;  %v4470_v5 = vmul.f32 %v4469_v26, %v9651_v59  ;;  %v4031_v10 = vstv %s9637_s17  ;;  %s9758_s17 = sld [smem:[#allocation7 + $0x57]] }
 0x480   : > { %v3871_v17 = vpop.permute.xlu1 %3870  ;;  %v9599_v16 = vadd.f32 %v3900_v54, %v3860_v57  ;;  %v4483_v25 = vstv %s9639_s2  ;;  %s9769_s2 = sld [smem:[#allocation7 + $0x1a]] }
 0x481   : > { %v3875_v30 = vadd.f32 %v3871_v17, %v3819_v21  ;;  %v3869_v28 = vpop.permute.xlu0 %3868  ;;  %v4485_v57 = vmul.f32 %v4483_v25, %v9643_v8  ;;  %v4484_v11 = vmul.f32 %v4483_v25, %v9651_v59 }
 0x482   : > { %4380 = vrot.lane.b32.xlu1 %v4375_v4, %s6119_s18  ;;  %v3874_v36 = vadd.f32 %v3869_v28, %v3818_v63  ;;  %v4033_v4 = vmul.f32 %v4031_v10, %v9318_v23  ;;  %v4497_v63 = vstv %s9647_s3  ;;  %v4032_v28 = vmul.f32 %v4031_v10, %v9328_v9  ;;  %s9772_s3 = sld [smem:[#allocation7 + $0x7b]] }
 0x483   : > { %v9607_v38 = vadd.f32 %v3907_v56, %v3875_v30  ;;  %4378 = vrot.lane.b32.xlu0 %v4374_v46, %s6119_s18 }
 0x484   : > { %v3885_v31 = vpop.permute.xlu1 %3884  ;;  %v9615_v58 = vadd.f32 %v3906_v39, %v3874_v36 }
 0x485   : > { %v3889_v19 = vadd.f32 %v3885_v31, %v3833_v0  ;;  %v3883_v14 = vpop.permute.xlu0 %3882  ;;  %v4499_v0 = vmul.f32 %v4497_v63, %v9643_v8 }
 0x486   : > { %4394 = vrot.lane.b32.xlu1 %v4389_v29, %s6120_s23  ;;  %v3888_v50 = vadd.f32 %v3883_v14, %v3832_v55  ;;  %v4043_v55 = vstv %s9660_s21  ;;  %s5705_s21 = sld [smem:[#allocation7 + $0x86]] }
 0x487   : > { %v9622_v51 = vadd.f32 %v3913_v3, %v3889_v19  ;;  %4392 = vrot.lane.b32.xlu0 %v4388_v15, %s6120_s23 }
 0x488   : > { %v3925_v33 = vpop.permute.xlu1 %3924  ;;  %v9628_v18 = vadd.f32 %v3912_v41, %v3888_v50  ;;  %v4513_v50 = vmul.f32 %v4511_v6, %v9643_v8 }
 0x489   : > { %v3923_v13 = vpop.permute.xlu0 %3922  ;;  %v3929_v35 = vadd.f32 %v3925_v33, %v9573_v12  ;;  %v4037_v12 = vstv %s9649_s19  ;;  %s9789_s19 = sld [smem:[#allocation7 + $0x3e]] }
 0x48a   : > { %4408 = vrot.lane.b32.xlu1 %v4403_v61, %s6120_s23  ;;  %v3928_v54 = vadd.f32 %v3923_v13, %v9585_v24  ;;  %v4039_v29 = vmul.f32 %v4037_v12, %v9318_v23  ;;  %v4038_v14 = vmul.f32 %v4037_v12, %v9328_v9  ;;  %v4512_v13 = vmul.f32 %v4511_v6, %v9651_v59  ;;  %v9741_v12 = vld [vmem:[#allocation3 + $0x3a] sm:$0xff] }
 0x48b   : > { %4406 = vrot.lane.b32.xlu0 %v4402_v27, %s6120_s23  ;;  %v4525_v27 = vstv %s9671_s22  ;;  %v4621_v6 = vstv %s9737_s12  ;;  %s5710_s22 = sld [smem:[#allocation7 + $0x1c]]  ;;  %s9867_s12 = sld [smem:[#allocation7 + $0x1d]] }
 0x48c   : > { %v3939_v49 = vpop.permute.xlu1 %3938 }
 0x48d   : > { %v3937_v22 = vpop.permute.xlu0 %3936  ;;  %v3943_v30 = vadd.f32 %v3939_v49, %v9591_v7  ;;  %v4498_v7 = vmul.f32 %v4497_v63, %v9651_v59  ;;  %v4049_v49 = vstv %s9674_s24  ;;  %s9833_s24 = sld [smem:[#allocation7 + $0x12]] }
 0x48e   : > { %4422 = vrot.lane.b32.xlu1 %v4417_v2, %s6120_s23  ;;  %v3942_v36 = vadd.f32 %v3937_v22, %v9599_v16 }
 0x48f   : > { %4420 = vrot.lane.b32.xlu0 %v4416_v44, %s6120_s23 }
 0x490   : > { %v3953_v62 = vpop.permute.xlu1 %3952 }
 0x491   : > { %v3951_v40 = vpop.permute.xlu0 %3950  ;;  %v3957_v19 = vadd.f32 %v3953_v62, %v9607_v38  ;;  %v4045_v38 = vmul.f32 %v4043_v55, %v9318_v23  ;;  %v4527_v62 = vmul.f32 %v4525_v27, %v9643_v8 }
 0x492   : > { %4436 = vrot.lane.b32.xlu1 %v4431_v32, %s6120_s23  ;;  %v3956_v41 = vadd.f32 %v3951_v40, %v9615_v58  ;;  %v4044_v58 = vmul.f32 %v4043_v55, %v9328_v9 }
 0x493   : > { %4434 = vrot.lane.b32.xlu0 %v4430_v53, %s6120_s23 }
 0x494   : > { %v3967_v47 = vpop.permute.xlu1 %3966 }
 0x495   : > { %v3965_v34 = vpop.permute.xlu0 %3964  ;;  %v3971_v2 = vadd.f32 %v3967_v47, %v9622_v51  ;;  %v4051_v51 = vmul.f32 %v4049_v49, %v9318_v23  ;;  %v4526_v47 = vmul.f32 %v4525_v27, %v9651_v59 }
 0x496   : > { %4476 = vrot.lane.b32.xlu1 %v4471_v43, %s6119_s18  ;;  %v3970_v32 = vadd.f32 %v3965_v34, %v9628_v18 }
 0x497   : > { %4474 = vrot.lane.b32.xlu0 %v4470_v5, %s6119_s18  ;;  %v4539_v5 = vstv %s9691_s25  ;;  %s9835_s25 = sld [smem:[#allocation7 + $0x40]] }
 0x498   : > { %v3981_v21 = vpop.permute.xlu1 %3980  ;;  %v4541_v34 = vmul.f32 %v4539_v5, %v9643_v8 }
 0x499   : > { %v3985_v17 = vadd.f32 %v3981_v21, %v3929_v35  ;;  %v3979_v45 = vpop.permute.xlu0 %3978  ;;  %v4050_v35 = vmul.f32 %v4049_v49, %v9328_v9  ;;  %v4540_v21 = vmul.f32 %v4539_v5, %v9651_v59 }
 0x49a   : > { %4490 = vrot.lane.b32.xlu1 %v4485_v57, %s6119_s18  ;;  %v3984_v56 = vadd.f32 %v3979_v45, %v3928_v54  ;;  %v4553_v57 = vstv %s9707_s4  ;;  %v4567_v45 = vstv %s5693_s30  ;;  %s9843_s4 = sld [smem:[#allocation7 + $0x64]]  ;;  %s9845_s30 = sld [smem:[#allocation7 + $0x36]] }
 0x49b   : > { %v9677_v24 = vadd.f32 %v4033_v4, %v3985_v17  ;;  %4488 = vrot.lane.b32.xlu0 %v4484_v11, %s6119_s18  ;;  %v4555_v17 = vmul.f32 %v4553_v57, %v9643_v8  ;;  %v4554_v4 = vmul.f32 %v4553_v57, %v9651_v59  ;;  %v4569_v63 = vmul.f32 %v4567_v45, %v9643_v8 }
 0x49c   : > { %v3995_v46 = vpop.permute.xlu1 %3994  ;;  %v9683_v31 = vadd.f32 %v4032_v28, %v3984_v56  ;;  %v4568_v56 = vmul.f32 %v4567_v45, %v9651_v59  ;;  %v9749_v28 = vld [vmem:[#allocation3 + $0x32] sm:$0xff]  ;;  %v4663_v57 = vstv %s9769_s2  ;;  %s9920_s2 = sld [smem:[#allocation7 + $0x1f]] }
 0x49d   : > { %v3999_v39 = vadd.f32 %v3995_v46, %v3943_v30  ;;  %v3993_v60 = vpop.permute.xlu0 %3992  ;;  %v4607_v46 = vstv %s5698_s9  ;;  %s9853_s9 = sld [smem:[#allocation7 + $0x88]] }
 0x49e   : > { %4504 = vrot.lane.b32.xlu1 %v4499_v0, %s6119_s18  ;;  %v3998_v3 = vadd.f32 %v3993_v60, %v3942_v36  ;;  %v4609_v36 = vmul.f32 %v4607_v46, %v9741_v12  ;;  %v4169_v60 = vstv %s9735_s0  ;;  %s9856_s0 = sld [smem:[#allocation7 + $0x5a]] }
 0x49f   : > { %v9693_v16 = vadd.f32 %v4039_v29, %v3999_v39  ;;  %4502 = vrot.lane.b32.xlu0 %v4498_v7, %s6119_s18  ;;  %v4608_v29 = vmul.f32 %v4607_v46, %v9749_v28 }
 0x4a0   : > { %v4009_v15 = vpop.permute.xlu1 %4008  ;;  %v9699_v61 = vadd.f32 %v4038_v14, %v3998_v3 }
 0x4a1   : > { %v4013_v33 = vadd.f32 %v4009_v15, %v3957_v19  ;;  %v4007_v52 = vpop.permute.xlu0 %4006  ;;  %v4623_v19 = vmul.f32 %v4621_v6, %v9741_v12  ;;  %v4171_v15 = vmul.f32 %v4169_v60, %v9437_v42 }
 0x4a2   : > { %4518 = vrot.lane.b32.xlu1 %v4513_v50, %s6119_s18  ;;  %v4012_v37 = vadd.f32 %v4007_v52, %v3956_v41  ;;  %v4622_v41 = vmul.f32 %v4621_v6, %v9749_v28 }
 0x4a3   : > { %v9709_v22 = vadd.f32 %v4045_v38, %v4013_v33  ;;  %4516 = vrot.lane.b32.xlu0 %v4512_v13, %s6119_s18  ;;  %v4635_v33 = vstv %s9745_s13  ;;  %v4170_v13 = vmul.f32 %v4169_v60, %v9444_v1  ;;  %s9870_s13 = sld [smem:[#allocation7 + $0x7e]] }
 0x4a4   : > { %v4023_v44 = vpop.permute.xlu1 %4022  ;;  %v9715_v53 = vadd.f32 %v4044_v58, %v4012_v37  ;;  %v4637_v49 = vmul.f32 %v4635_v33, %v9741_v12 }
 0x4a5   : > { %v4027_v40 = vadd.f32 %v4023_v44, %v3971_v2  ;;  %v4021_v26 = vpop.permute.xlu0 %4020 }
 0x4a6   : > { %4532 = vrot.lane.b32.xlu1 %v4527_v62, %s6120_s23  ;;  %v4026_v43 = vadd.f32 %v4021_v26, %v3970_v32  ;;  %v4649_v32 = vstv %s9755_s15  ;;  %s9903_s15 = sld [smem:[#allocation7 + $0x65]] }
 0x4a7   : > { %v9721_v10 = vadd.f32 %v4051_v51, %v4027_v40  ;;  %4530 = vrot.lane.b32.xlu0 %v4526_v47, %s6120_s23  ;;  %v4181_v40 = vstv %s9758_s17  ;;  %v4651_v5 = vmul.f32 %v4649_v32, %v9741_v12  ;;  %s5717_s17 = sld [smem:[#allocation7 + $0x89]] }
 0x4a8   : > { %v4063_v18 = vpop.permute.xlu1 %4062  ;;  %v9726_v25 = vadd.f32 %v4050_v35, %v4026_v43 }
 0x4a9   : > { %v4061_v23 = vpop.permute.xlu0 %4060  ;;  %v4067_v7 = vadd.f32 %v4063_v18, %v9677_v24  ;;  %v4175_v24 = vstv %s9747_s14  ;;  %s9887_s14 = sld [smem:[#allocation7 + $0x41]] }
 0x4aa   : > { %4546 = vrot.lane.b32.xlu1 %v4541_v34, %s6120_s23  ;;  %v4066_v3 = vadd.f32 %v4061_v23, %v9683_v31  ;;  %v4177_v44 = vmul.f32 %v4175_v24, %v9437_v42  ;;  %v4176_v47 = vmul.f32 %v4175_v24, %v9444_v1  ;;  %v9839_v24 = vld [vmem:[#allocation3 + $0x50] sm:$0xff] }
 0x4ab   : > { %4544 = vrot.lane.b32.xlu0 %v4540_v21, %s6120_s23  ;;  %v4650_v21 = vmul.f32 %v4649_v32, %v9749_v28  ;;  %v4759_v32 = vstv %s9835_s25  ;;  %s9961_s25 = sld [smem:[#allocation7 + $0x5d]] }
 0x4ac   : > { %v4077_v54 = vpop.permute.xlu1 %4076 }
 0x4ad   : > { %v4075_v9 = vpop.permute.xlu0 %4074  ;;  %v4081_v38 = vadd.f32 %v4077_v54, %v9693_v16  ;;  %v4636_v16 = vmul.f32 %v4635_v33, %v9749_v28  ;;  %v4187_v54 = vstv %s9772_s3  ;;  %s9927_s3 = sld [smem:[#allocation7 + $0x43]] }
 0x4ae   : > { %4560 = vrot.lane.b32.xlu1 %v4555_v17, %s6120_s23  ;;  %v4080_v2 = vadd.f32 %v4075_v9, %v9699_v61 }
 0x4af   : > { %4558 = vrot.lane.b32.xlu0 %v4554_v4, %s6120_s23 }
 0x4b0   : > { %v4091_v11 = vpop.permute.xlu1 %4090 }
 0x4b1   : > { %v4089_v30 = vpop.permute.xlu0 %4088  ;;  %v4095_v51 = vadd.f32 %v4091_v11, %v9709_v22  ;;  %v4183_v22 = vmul.f32 %v4181_v40, %v9437_v42  ;;  %v4665_v11 = vmul.f32 %v4663_v57, %v9741_v12 }
 0x4b2   : > { %4574 = vrot.lane.b32.xlu1 %v4569_v63, %s6120_s23  ;;  %v4094_v35 = vadd.f32 %v4089_v30, %v9715_v53  ;;  %v4182_v53 = vmul.f32 %v4181_v40, %v9444_v1 }
 0x4b3   : > { %4572 = vrot.lane.b32.xlu0 %v4568_v56, %s6120_s23 }
 0x4b4   : > { %v4105_v0 = vpop.permute.xlu1 %4104 }
 0x4b5   : > { %v4103_v39 = vpop.permute.xlu0 %4102  ;;  %v4109_v17 = vadd.f32 %v4105_v0, %v9721_v10  ;;  %v4189_v10 = vmul.f32 %v4187_v54, %v9437_v42  ;;  %v4664_v0 = vmul.f32 %v4663_v57, %v9749_v28 }
 0x4b6   : > { %4614 = vrot.lane.b32.xlu1 %v4609_v36, %s6119_s18  ;;  %v4108_v63 = vadd.f32 %v4103_v39, %v9726_v25 }
 0x4b7   : > { %4612 = vrot.lane.b32.xlu0 %v4608_v29, %s6119_s18  ;;  %v4677_v29 = vstv %s9789_s19  ;;  %s9933_s19 = sld [smem:[#allocation7 + $0x15]] }
 0x4b8   : > { %v4119_v55 = vpop.permute.xlu1 %4118  ;;  %v4679_v39 = vmul.f32 %v4677_v29, %v9741_v12 }
 0x4b9   : > { %v4123_v14 = vadd.f32 %v4119_v55, %v4067_v7  ;;  %v4117_v50 = vpop.permute.xlu0 %4116  ;;  %v4188_v7 = vmul.f32 %v4187_v54, %v9444_v1  ;;  %v4678_v55 = vmul.f32 %v4677_v29, %v9749_v28 }
 0x4ba   : > { %4628 = vrot.lane.b32.xlu1 %v4623_v19, %s6119_s18  ;;  %v4122_v52 = vadd.f32 %v4117_v50, %v4066_v3  ;;  %v4691_v19 = vstv %s9805_s20  ;;  %v4705_v50 = vstv %s5705_s21  ;;  %s9938_s20 = sld [smem:[#allocation7 + $0x67]]  ;;  %s9946_s21 = sld [smem:[#allocation7 + $0x8b]] }
 0x4bb   : > { %v9775_v31 = vadd.f32 %v4171_v15, %v4123_v14  ;;  %4626 = vrot.lane.b32.xlu0 %v4622_v41, %s6119_s18  ;;  %v4693_v14 = vmul.f32 %v4691_v19, %v9741_v12  ;;  %v4692_v15 = vmul.f32 %v4691_v19, %v9749_v28  ;;  %v4707_v33 = vmul.f32 %v4705_v50, %v9741_v12 }
 0x4bc   : > { %v4133_v27 = vpop.permute.xlu1 %4132  ;;  %v9781_v58 = vadd.f32 %v4170_v13, %v4122_v52  ;;  %v4706_v52 = vmul.f32 %v4705_v50, %v9749_v28  ;;  %v9847_v13 = vld [vmem:[#allocation3 + $0x48] sm:$0xff]  ;;  %v4801_v19 = vstv %s9867_s12  ;;  %s10009_s12 = sld [smem:[#allocation7 + $0x22]] }
 0x4bd   : > { %v4137_v37 = vadd.f32 %v4133_v27, %v4081_v38  ;;  %v4131_v62 = vpop.permute.xlu0 %4130  ;;  %v4745_v27 = vstv %s5710_s22  ;;  %s9948_s22 = sld [smem:[#allocation7 + $0x39]] }
 0x4be   : > { %4642 = vrot.lane.b32.xlu1 %v4637_v49, %s6119_s18  ;;  %v4136_v26 = vadd.f32 %v4131_v62, %v4080_v2  ;;  %v4747_v2 = vmul.f32 %v4745_v27, %v9839_v24  ;;  %v4307_v62 = vstv %s9833_s24  ;;  %s9958_s24 = sld [smem:[#allocation7 + $0x20]] }
 0x4bf   : > { %v9791_v61 = vadd.f32 %v4177_v44, %v4137_v37  ;;  %4640 = vrot.lane.b32.xlu0 %v4636_v16, %s6119_s18  ;;  %v4746_v44 = vmul.f32 %v4745_v27, %v9847_v13 }
 0x4c0   : > { %v4147_v43 = vpop.permute.xlu1 %4146  ;;  %v9797_v34 = vadd.f32 %v4176_v47, %v4136_v26 }
 0x4c1   : > { %v4151_v18 = vadd.f32 %v4147_v43, %v4095_v51  ;;  %v4145_v23 = vpop.permute.xlu0 %4144  ;;  %v4761_v51 = vmul.f32 %v4759_v32, %v9839_v24  ;;  %v4309_v43 = vmul.f32 %v4307_v62, %v9541_v20 }
 0x4c2   : > { %4656 = vrot.lane.b32.xlu1 %v4651_v5, %s6119_s18  ;;  %v4150_v9 = vadd.f32 %v4145_v23, %v4094_v35  ;;  %v4760_v35 = vmul.f32 %v4759_v32, %v9847_v13 }
 0x4c3   : > { %v9807_v4 = vadd.f32 %v4183_v22, %v4151_v18  ;;  %4654 = vrot.lane.b32.xlu0 %v4650_v21, %s6119_s18  ;;  %v4773_v18 = vstv %s9843_s4  ;;  %v4308_v21 = vmul.f32 %v4307_v62, %v9548_v48  ;;  %s9974_s4 = sld [smem:[#allocation7 + $0x81]] }
 0x4c4   : > { %v4161_v45 = vpop.permute.xlu1 %4160  ;;  %v9813_v56 = vadd.f32 %v4182_v53, %v4150_v9  ;;  %v4775_v54 = vmul.f32 %v4773_v18, %v9839_v24 }
 0x4c5   : > { %v4165_v30 = vadd.f32 %v4161_v45, %v4109_v17  ;;  %v4159_v46 = vpop.permute.xlu0 %4158 }
 0x4c6   : > { %4670 = vrot.lane.b32.xlu1 %v4665_v11, %s6120_s23  ;;  %v4164_v36 = vadd.f32 %v4159_v46, %v4108_v63  ;;  %v4787_v63 = vstv %s9853_s9  ;;  %s9989_s9 = sld [smem:[#allocation7 + $0x68]] }
 0x4c7   : > { %v9819_v60 = vadd.f32 %v4189_v10, %v4165_v30  ;;  %4668 = vrot.lane.b32.xlu0 %v4664_v0, %s6120_s23  ;;  %v4319_v30 = vstv %s9856_s0  ;;  %v4789_v29 = vmul.f32 %v4787_v63, %v9839_v24  ;;  %s9999_s0 = sld [smem:[#allocation7 + $0x8c]] }
 0x4c8   : > { %v4201_v25 = vpop.permute.xlu1 %4200  ;;  %v9824_v6 = vadd.f32 %v4188_v7, %v4164_v36 }
 0x4c9   : > { %v4199_v42 = vpop.permute.xlu0 %4198  ;;  %v4205_v16 = vadd.f32 %v4201_v25, %v9775_v31  ;;  %v4313_v31 = vstv %s9845_s30  ;;  %s9977_s30 = sld [smem:[#allocation7 + $0x44]] }
 0x4ca   : > { %4684 = vrot.lane.b32.xlu1 %v4679_v39, %s6120_s23  ;;  %v4204_v26 = vadd.f32 %v4199_v42, %v9781_v58  ;;  %v4315_v45 = vmul.f32 %v4313_v31, %v9541_v20  ;;  %v4314_v0 = vmul.f32 %v4313_v31, %v9548_v48  ;;  %v9935_v31 = vld [vmem:[#allocation3 + $0x51] sm:$0xff] }
 0x4cb   : > { %4682 = vrot.lane.b32.xlu0 %v4678_v55, %s6120_s23  ;;  %v4788_v55 = vmul.f32 %v4787_v63, %v9847_v13 }
 0x4cc   : > { %v4215_v3 = vpop.permute.xlu1 %4214 }
 0x4cd   : > { %v4213_v1 = vpop.permute.xlu0 %4212  ;;  %v4219_v22 = vadd.f32 %v4215_v3, %v9791_v61  ;;  %v4774_v61 = vmul.f32 %v4773_v18, %v9847_v13  ;;  %v4325_v3 = vstv %s9870_s13  ;;  %s10016_s13 = sld [smem:[#allocation7 + $0x46]] }
 0x4ce   : > { %4698 = vrot.lane.b32.xlu1 %v4693_v14, %s6120_s23  ;;  %v4218_v17 = vadd.f32 %v4213_v1, %v9797_v34 }
 0x4cf   : > { %4696 = vrot.lane.b32.xlu0 %v4692_v15, %s6120_s23 }
 0x4d0   : > { %v4229_v41 = vpop.permute.xlu1 %4228 }
 0x4d1   : > { %v4227_v38 = vpop.permute.xlu0 %4226  ;;  %v4233_v10 = vadd.f32 %v4229_v41, %v9807_v4  ;;  %v4321_v4 = vmul.f32 %v4319_v30, %v9541_v20  ;;  %v4803_v41 = vmul.f32 %v4801_v19, %v9839_v24 }
 0x4d2   : > { %4712 = vrot.lane.b32.xlu1 %v4707_v33, %s6120_s23  ;;  %v4232_v7 = vadd.f32 %v4227_v38, %v9813_v56  ;;  %v4320_v56 = vmul.f32 %v4319_v30, %v9548_v48 }
 0x4d3   : > { %4710 = vrot.lane.b32.xlu0 %v4706_v52, %s6120_s23 }
 0x4d4   : > { %v4243_v49 = vpop.permute.xlu1 %4242 }
 0x4d5   : > { %v4241_v37 = vpop.permute.xlu0 %4240  ;;  %v4247_v14 = vadd.f32 %v4243_v49, %v9819_v60  ;;  %v4327_v60 = vmul.f32 %v4325_v3, %v9541_v20  ;;  %v4802_v49 = vmul.f32 %v4801_v19, %v9847_v13 }
 0x4d6   : > { %4752 = vrot.lane.b32.xlu1 %v4747_v2, %s6119_s18  ;;  %v4246_v33 = vadd.f32 %v4241_v37, %v9824_v6 }
 0x4d7   : > { %4750 = vrot.lane.b32.xlu0 %v4746_v44, %s6119_s18  ;;  %v4815_v44 = vstv %s9887_s14  ;;  %s10024_s14 = sld [smem:[#allocation7 + $0x18]] }
 0x4d8   : > { %v4257_v40 = vpop.permute.xlu1 %4256  ;;  %v4817_v37 = vmul.f32 %v4815_v44, %v9839_v24 }
 0x4d9   : > { %v4261_v47 = vadd.f32 %v4257_v40, %v4205_v16  ;;  %v4255_v5 = vpop.permute.xlu0 %4254  ;;  %v4326_v16 = vmul.f32 %v4325_v3, %v9548_v48  ;;  %v4816_v40 = vmul.f32 %v4815_v44, %v9847_v13 }
 0x4da   : > { %4766 = vrot.lane.b32.xlu1 %v4761_v51, %s6119_s18  ;;  %v4260_v23 = vadd.f32 %v4255_v5, %v4204_v26  ;;  %v4829_v51 = vstv %s9903_s15  ;;  %v4843_v5 = vstv %s5717_s17  ;;  %s10031_s15 = sld [smem:[#allocation7 + $0x6a]]  ;;  %s10041_s17 = sld [smem:[#allocation7 + $0x8e]] }
 0x4db   : > { %v9873_v58 = vadd.f32 %v4309_v43, %v4261_v47  ;;  %4764 = vrot.lane.b32.xlu0 %v4760_v35, %s6119_s18  ;;  %v4831_v48 = vmul.f32 %v4829_v51, %v9839_v24  ;;  %v4830_v43 = vmul.f32 %v4829_v51, %v9847_v13  ;;  %v4845_v18 = vmul.f32 %v4843_v5, %v9839_v24 }
 0x4dc   : > { %v4271_v57 = vpop.permute.xlu1 %4270  ;;  %v9879_v53 = vadd.f32 %v4308_v21, %v4260_v23  ;;  %v4844_v21 = vmul.f32 %v4843_v5, %v9847_v13  ;;  %v4463_v5 = vstv %s9974_s4  ;;  %s10084_s4 = sld [smem:[#allocation7 + $0x8f]] }
 0x4dd   : > { %v4275_v9 = vadd.f32 %v4271_v57, %v4219_v22  ;;  %v4269_v11 = vpop.permute.xlu0 %4268  ;;  %v4883_v22 = vstv %s9920_s2  ;;  %v9942_v57 = vld [vmem:[#allocation3 + $0x49] sm:$0xff]  ;;  %s10043_s2 = sld [smem:[#allocation7 + $0x3c]] }
 0x4de   : > { %4780 = vrot.lane.b32.xlu1 %v4775_v54, %s6119_s18  ;;  %v4274_v46 = vadd.f32 %v4269_v11, %v4218_v17  ;;  %v4885_v17 = vmul.f32 %v4883_v22, %v9935_v31 }
 0x4df   : > { %v9889_v34 = vadd.f32 %v4315_v45, %v4275_v9  ;;  %4778 = vrot.lane.b32.xlu0 %v4774_v61, %s6119_s18  ;;  %v4897_v45 = vstv %s9927_s3  ;;  %v4884_v61 = vmul.f32 %v4883_v22, %v9942_v57  ;;  %s10048_s3 = sld [smem:[#allocation7 + $0x23]] }
 0x4e0   : > { %v4285_v36 = vpop.permute.xlu1 %4284  ;;  %v9895_v39 = vadd.f32 %v4314_v0, %v4274_v46  ;;  %v4899_v46 = vmul.f32 %v4897_v45, %v9935_v31  ;;  %v4445_v0 = vstv %s9933_s19  ;;  %s10052_s19 = sld [smem:[#allocation7 + $0x47]] }
 0x4e1   : > { %v4289_v25 = vadd.f32 %v4285_v36, %v4233_v10  ;;  %v4283_v42 = vpop.permute.xlu0 %4282  ;;  %v4446_v3 = vmul.f32 %v4445_v0, %v9651_v59 }
 0x4e2   : > { %4794 = vrot.lane.b32.xlu1 %v4789_v29, %s6119_s18  ;;  %v4288_v1 = vadd.f32 %v4283_v42, %v4232_v7  ;;  %v4911_v7 = vstv %s9938_s20  ;;  %s10054_s20 = sld [smem:[#allocation7 + $0x6b]] }
 0x4e3   : > { %v9905_v15 = vadd.f32 %v4321_v4, %v4289_v25  ;;  %4792 = vrot.lane.b32.xlu0 %v4788_v55, %s6119_s18  ;;  %v4898_v4 = vmul.f32 %v4897_v45, %v9942_v57 }
 0x4e4   : > { %v4299_v50 = vpop.permute.xlu1 %4298  ;;  %v9911_v52 = vadd.f32 %v4320_v56, %v4288_v1  ;;  %v4925_v1 = vstv %s9946_s21  ;;  %v4451_v56 = vstv %s9948_s22  ;;  %s10058_s21 = sld [smem:[#allocation7 + $0x60]] }
 0x4e5   : > { %v4303_v38 = vadd.f32 %v4299_v50, %v4247_v14  ;;  %v4297_v27 = vpop.permute.xlu0 %4296  ;;  %v4452_v44 = vmul.f32 %v4451_v56, %v9651_v59  ;;  %v4926_v51 = vmul.f32 %v4925_v1, %v9942_v57  ;;  %s10065_s22 = sld [smem:[#allocation9]] }
 0x4e6   : > { %4808 = vrot.lane.b32.xlu1 %v4803_v41, %s6120_s23  ;;  %v4302_v2 = vadd.f32 %v4297_v27, %v4246_v33 }
 0x4e7   : > { %v4329_v62 = vadd.f32 %v4327_v60, %v4303_v38  ;;  %4806 = vrot.lane.b32.xlu0 %v4802_v49, %s6120_s23  ;;  %v4912_v60 = vmul.f32 %v4911_v7, %v9942_v57 }
 0x4e8   : > { %v4339_v6 = vpop.permute.xlu1 %4338  ;;  %v4328_v32 = vadd.f32 %v4326_v16, %v4302_v2  ;;  %v4939_v16 = vstv %s9958_s24  ;;  %s10067_s24 = sld [smem:[#allocation9 + $0x1]] }
 0x4e9   : > { %v4337_v20 = vpop.permute.xlu0 %4336  ;;  %v4343_v63 = vadd.f32 %v4339_v6, %v9873_v58  ;;  %v4447_v58 = vmul.f32 %v4445_v0, %v9643_v8  ;;  %v4457_v6 = vstv %s9961_s25  ;;  %s10074_s25 = sld [smem:[#allocation7 + $0x84]] }
 0x4ea   : > { %4822 = vrot.lane.b32.xlu1 %v4817_v37, %s6120_s23  ;;  %v4342_v36 = vadd.f32 %v4337_v20, %v9879_v53  ;;  %v4913_v53 = vmul.f32 %v4911_v7, %v9935_v31  ;;  %v4981_v7 = vstv %s9999_s0  ;;  %s10094_s0 = sld [smem:[#allocation9 + $0x5]] }
 0x4eb   : > { %4820 = vrot.lane.b32.xlu0 %v4816_v40, %s6120_s23 }
 0x4ec   : > { %v4353_v26 = vpop.permute.xlu1 %4352 }
 0x4ed   : > { %v4351_v47 = vpop.permute.xlu0 %4350  ;;  %v4357_v42 = vadd.f32 %v4353_v26, %v9889_v34  ;;  %v4453_v34 = vmul.f32 %v4451_v56, %v9643_v8  ;;  %v10035_v56 = vld [vmem:[#allocation3 + $0x4a] sm:$0xff] }
 0x4ee   : > { %4836 = vrot.lane.b32.xlu1 %v4831_v48, %s6120_s23  ;;  %v4356_v50 = vadd.f32 %v4351_v47, %v9895_v39  ;;  %v4458_v47 = vmul.f32 %v4457_v6, %v9651_v59 }
 0x4ef   : > { %4834 = vrot.lane.b32.xlu0 %v4830_v43, %s6120_s23 }
 0x4f0   : > { %v4367_v35 = vpop.permute.xlu1 %4366 }
 0x4f1   : > { %v4365_v23 = vpop.permute.xlu0 %4364  ;;  %v4371_v27 = vadd.f32 %v4367_v35, %v9905_v15  ;;  %v4459_v15 = vmul.f32 %v4457_v6, %v9643_v8 }
 0x4f2   : > { %4850 = vrot.lane.b32.xlu1 %v4845_v18, %s6120_s23  ;;  %v4370_v37 = vadd.f32 %v4365_v23, %v9911_v52  ;;  %v4941_v52 = vmul.f32 %v4939_v16, %v9935_v31  ;;  %v4953_v18 = vstv %s9977_s30  ;;  %v4465_v23 = vmul.f32 %v4463_v5, %v9643_v8  ;;  %s10086_s30 = sld [smem:[#allocation9 + $0x2]] }
 0x4f3   : > { %4848 = vrot.lane.b32.xlu0 %v4844_v21, %s6120_s23  ;;  %v4954_v0 = vmul.f32 %v4953_v18, %v9942_v57 }
 0x4f4   : > { %v4381_v54 = vpop.permute.xlu1 %4380 }
 0x4f5   : > { %v4385_v9 = vadd.f32 %v4381_v54, %v4329_v62  ;;  %v4379_v11 = vpop.permute.xlu0 %4378  ;;  %v4927_v62 = vmul.f32 %v4925_v1, %v9935_v31  ;;  %v4940_v54 = vmul.f32 %v4939_v16, %v9942_v57  ;;  %v4982_v1 = vmul.f32 %v4981_v7, %v9942_v57 }
 0x4f6   : > { %4890 = vrot.lane.b32.xlu1 %v4885_v17, %s6119_s18  ;;  %v9954_v30 = vadd.f32 %v4379_v11, %v4328_v32  ;;  %v4464_v11 = vmul.f32 %v4463_v5, %v9651_v59  ;;  %v5049_v16 = vstv %s10031_s15  ;;  %s10141_s15 = sld [smem:[#allocation9 + $0x9]] }
 0x4f7   : > { %4888 = vrot.lane.b32.xlu0 %v4884_v61, %s6119_s18  ;;  %v4955_v61 = vmul.f32 %v4953_v18, %v9935_v31 }
 0x4f8   : > { %v4395_v10 = vpop.permute.xlu1 %4394 }
 0x4f9   : > { %v4399_v29 = vadd.f32 %v4395_v10, %v4343_v63  ;;  %v4393_v25 = vpop.permute.xlu0 %4392  ;;  %v4967_v10 = vstv %s9989_s9  ;;  %s10092_s9 = sld [smem:[#allocation9 + $0x4]] }
 0x4fa   : > { %4904 = vrot.lane.b32.xlu1 %v4899_v46, %s6119_s18  ;;  %v4398_v55 = vadd.f32 %v4393_v25, %v4342_v36  ;;  %v4969_v36 = vmul.f32 %v4967_v10, %v9935_v31  ;;  %v4968_v25 = vmul.f32 %v4967_v10, %v9942_v57 }
 0x4fb   : > { %v4449_v19 = vadd.f32 %v4447_v58, %v4399_v29  ;;  %4902 = vrot.lane.b32.xlu0 %v4898_v4, %s6119_s18 }
 0x4fc   : > { %v4409_v14 = vpop.permute.xlu1 %4408  ;;  %v4448_v33 = vadd.f32 %v4446_v3, %v4398_v55  ;;  %v4983_v55 = vmul.f32 %v4981_v7, %v9935_v31  ;;  %v10120_v7 = vld [vmem:[%s6235_s16 + $0x2] sm:$0xff] }
 0x4fd   : > { %v4413_v41 = vadd.f32 %v4409_v14, %v4357_v42  ;;  %v4407_v38 = vpop.permute.xlu0 %4406  ;;  %v5021_v14 = vstv %s10009_s12  ;;  %s10101_s12 = sld [smem:[#allocation9 + $0x3]] }
 0x4fe   : > { %4918 = vrot.lane.b32.xlu1 %v4913_v53, %s6119_s18  ;;  %v4412_v49 = vadd.f32 %v4407_v38, %v4356_v50  ;;  %v5035_v38 = vstv %s10016_s13  ;;  %s10132_s13 = sld [smem:[#allocation9 + $0x6]] }
 0x4ff   : > { %v4455_v2 = vadd.f32 %v4453_v34, %v4413_v41  ;;  %4916 = vrot.lane.b32.xlu0 %v4912_v60, %s6119_s18 }
 0x500   : > { %v4423_v39 = vpop.permute.xlu1 %4422  ;;  %v4454_v20 = vadd.f32 %v4452_v44, %v4412_v49 }
 0x501   : > { %v4427_v32 = vadd.f32 %v4423_v39, %v4371_v27  ;;  %v4421_v40 = vpop.permute.xlu0 %4420  ;;  %v5022_v27 = vmul.f32 %v5021_v14, %v10035_v56  ;;  %v4583_v39 = vstv %s10024_s14  ;;  %s10139_s14 = sld [smem:[#allocation9 + $0x8]] }
 0x502   : > { %4932 = vrot.lane.b32.xlu1 %v4927_v62, %s6119_s18  ;;  %v4426_v26 = vadd.f32 %v4421_v40, %v4370_v37  ;;  %v4585_v6 = vmul.f32 %v4583_v39, %v9741_v12  ;;  %v4584_v40 = vmul.f32 %v4583_v39, %v9749_v28 }
 0x503   : > { %v4461_v48 = vadd.f32 %v4459_v15, %v4427_v32  ;;  %4930 = vrot.lane.b32.xlu0 %v4926_v51, %s6119_s18  ;;  %v5036_v32 = vmul.f32 %v5035_v38, %v10035_v56 }
 0x504   : > { %v4437_v43 = vpop.permute.xlu1 %4436  ;;  %v4460_v22 = vadd.f32 %v4458_v47, %v4426_v26  ;;  %v4589_v47 = vstv %s10043_s2  ;;  %s10173_s2 = sld [smem:[#allocation9 + $0xc]] }
 0x505   : > { %v4441_v35 = vadd.f32 %v4437_v43, %v4385_v9  ;;  %v4435_v21 = vpop.permute.xlu0 %4434 }
 0x506   : > { %4946 = vrot.lane.b32.xlu1 %v4941_v52, %s6120_s23  ;;  %v4440_v17 = vadd.f32 %v4435_v21, %v9954_v30  ;;  %v5077_v52 = vstv %s10048_s3  ;;  %v5105_v21 = vstv %s10054_s20  ;;  %s10175_s3 = sld [smem:[#allocation9 + $0xd]]  ;;  %s10227_s20 = sld [smem:[#allocation9 + $0xf]] }
 0x507   : > { %v4467_v45 = vadd.f32 %v4465_v23, %v4441_v35  ;;  %4944 = vrot.lane.b32.xlu0 %v4940_v54, %s6120_s23  ;;  %v4591_v35 = vmul.f32 %v4589_v47, %v9741_v12  ;;  %v5091_v23 = vstv %s10052_s19  ;;  %s10206_s19 = sld [smem:[#allocation9 + $0xe]] }
 0x508   : > { %v4477_v9 = vpop.permute.xlu1 %4476  ;;  %v4466_v46 = vadd.f32 %v4464_v11, %v4440_v17  ;;  %v4595_v11 = vstv %s10058_s21  ;;  %s10229_s21 = sld [smem:[#allocation7 + $0x1b]] }
 0x509   : > { %v4481_v63 = vadd.f32 %v4477_v9, %v4449_v19  ;;  %v4475_v8 = vpop.permute.xlu0 %4474  ;;  %v10026_v19 = vld [vmem:[#allocation3 + $0x52] sm:$0xff] }
 0x50a   : > { %4960 = vrot.lane.b32.xlu1 %v4955_v61, %s6120_s23  ;;  %v4480_v30 = vadd.f32 %v4475_v8, %v4448_v33  ;;  %v5023_v33 = vmul.f32 %v5021_v14, %v10026_v19  ;;  %v5037_v44 = vmul.f32 %v5035_v38, %v10026_v19  ;;  %v5051_v26 = vmul.f32 %v5049_v16, %v10026_v19  ;;  %v10109_v8 = vld [vmem:[%s6235_s16 + $0xa] sm:$0xff] }
 0x50b   : > { %4958 = vrot.lane.b32.xlu0 %v4954_v0, %s6120_s23  ;;  %v5079_v10 = vmul.f32 %v5077_v52, %v10026_v19  ;;  %v10112_v0 = vld [vmem:[%s6235_s16 + $0x22] sm:$0xff] }
 0x50c   : > { %v4491_v59 = vpop.permute.xlu1 %4490 }
 0x50d   : > { %v4495_v29 = vadd.f32 %v4491_v59, %v4455_v2  ;;  %v4489_v58 = vpop.permute.xlu0 %4488 }
 0x50e   : > { %4974 = vrot.lane.b32.xlu1 %v4969_v36, %s6120_s23  ;;  %v10020_v4 = vadd.f32 %v4489_v58, %v4454_v20  ;;  %v5135_v36 = vstv %s10065_s22  ;;  %v10123_v58 = vld [vmem:[%s6235_s16 + $0x1a] sm:$0xff]  ;;  %s10252_s22 = sld [smem:[#allocation7 + $0x3f]] }
 0x50f   : > { %4972 = vrot.lane.b32.xlu0 %v4968_v25, %s6120_s23  ;;  %v5137_v38 = vmul.f32 %v5135_v36, %v10109_v8 }
 0x510   : > { %v4505_v42 = vpop.permute.xlu1 %4504 }
 0x511   : > { %v10028_v3 = vadd.f32 %v4505_v42, %v4461_v48  ;;  %v4503_v53 = vpop.permute.xlu0 %4502  ;;  %v5063_v48 = vstv %s10041_s17  ;;  %v5093_v42 = vmul.f32 %v5091_v23, %v10026_v19  ;;  %s10166_s17 = sld [smem:[#allocation9 + $0xa]] }
 0x512   : > { %4988 = vrot.lane.b32.xlu1 %v4983_v55, %s6120_s23  ;;  %v10037_v50 = vadd.f32 %v4503_v53, %v4460_v22  ;;  %v5050_v22 = vmul.f32 %v5049_v16, %v10035_v56  ;;  %v5065_v61 = vmul.f32 %v5063_v48, %v10026_v19  ;;  %v5092_v55 = vmul.f32 %v5091_v23, %v10035_v56  ;;  %v10189_v23 = vld [vmem:[%s6235_s16 + $0x4a] sm:$0xff] }
 0x513   : > { %4986 = vrot.lane.b32.xlu0 %v4982_v1, %s6120_s23  ;;  %v4596_v1 = vmul.f32 %v4595_v11, %v9749_v28  ;;  %v5153_v16 = vstv %s10086_s30  ;;  %s5720_s30 = sld [smem:[#allocation7 + $0x66]] }
 0x514   : > { %v4519_v41 = vpop.permute.xlu1 %4518 }
 0x515   : > { %v10045_v34 = vadd.f32 %v4519_v41, %v4467_v45  ;;  %v4517_v60 = vpop.permute.xlu0 %4516  ;;  %v4590_v45 = vmul.f32 %v4589_v47, %v9749_v28  ;;  %v4601_v41 = vstv %s10074_s25  ;;  %s10275_s25 = sld [smem:[#allocation7 + $0x87]] }
 0x516   : > { %5028 = vrot.lane.b32.xlu1 %v5023_v33, %s6119_s18  ;;  %v10056_v49 = vadd.f32 %v4517_v60, %v4466_v46  ;;  %v4597_v46 = vmul.f32 %v4595_v11, %v9741_v12  ;;  %v5136_v60 = vmul.f32 %v5135_v36, %v10120_v7  ;;  %v4603_v39 = vmul.f32 %v4601_v41, %v9741_v12 }
 0x517   : > { %5026 = vrot.lane.b32.xlu0 %v5022_v27, %s6119_s18 }
 0x518   : > { %v4533_v2 = vpop.permute.xlu1 %4532 }
 0x519   : > { %v4537_v62 = vadd.f32 %v4533_v2, %v4481_v63  ;;  %v4531_v37 = vpop.permute.xlu0 %4530  ;;  %v5064_v63 = vmul.f32 %v5063_v48, %v10035_v56  ;;  %v5162_v48 = vstv %s10101_s12  ;;  %s5731_s12 = sld [smem:[#allocation7 + $0x45]] }
 0x51a   : > { %5042 = vrot.lane.b32.xlu1 %v5037_v44, %s6119_s18  ;;  %v4536_v20 = vadd.f32 %v4531_v37, %v4480_v30 }
 0x51b   : > { %v10071_v15 = vadd.f32 %v4585_v6, %v4537_v62  ;;  %5040 = vrot.lane.b32.xlu0 %v5036_v32, %s6119_s18  ;;  %v10153_v62 = vld [vmem:[%s6235_s16 + $0x3a] sm:$0xff]  ;;  %v10157_v6 = vld [vmem:[%s6235_s16 + $0x32] sm:$0xff]  ;;  %v5106_v32 = vmul.f32 %v5105_v21, %v10035_v56 }
 0x51c   : > { %v4547_v51 = vpop.permute.xlu1 %4546  ;;  %v10081_v5 = vadd.f32 %v4584_v40, %v4536_v20  ;;  %v5119_v20 = vstv %s10084_s4  ;;  %v5191_v40 = vstv %s10092_s9  ;;  %s5719_s4 = sld [smem:[#allocation7 + $0x42]] }
 0x51d   : > { %v4551_v43 = vadd.f32 %v4547_v51, %v4495_v29  ;;  %v4545_v18 = vpop.permute.xlu0 %4544  ;;  %v5144_v29 = vstv %s10067_s24  ;;  %v5121_v11 = vmul.f32 %v5119_v20, %v10026_v19  ;;  %s10264_s24 = sld [smem:[#allocation7 + $0x63]]  ;;  %s5721_s9 = sld [smem:[#allocation7 + $0x8a]] }
 0x51e   : > { %5056 = vrot.lane.b32.xlu1 %v5051_v26, %s6119_s18  ;;  %v4550_v54 = vadd.f32 %v4545_v18, %v10020_v4  ;;  %v5078_v4 = vmul.f32 %v5077_v52, %v10035_v56  ;;  %v5145_v27 = vmul.f32 %v10123_v58, %v5144_v29  ;;  %v4602_v26 = vmul.f32 %v4601_v41, %v9749_v28 }
 0x51f   : > { %v10097_v17 = vadd.f32 %v4591_v35, %v4551_v43  ;;  %5054 = vrot.lane.b32.xlu0 %v5050_v22, %s6119_s18  ;;  %v5155_v52 = vmul.f32 %v10153_v62, %v5153_v16  ;;  %v10186_v22 = vld [vmem:[%s6235_s16 + $0x52] sm:$0xff]  ;;  %s10204_s16 = sld [smem:[#allocation9 + $0xb]] }
 0x520   : > { %v4561_v9 = vpop.permute.xlu1 %4560  ;;  %v10115_v59 = vadd.f32 %v4590_v45, %v4550_v54  ;;  %v5147_v35 = vadd.f32 %v5145_v27, %v5136_v60 }
 0x521   : > { %v4565_v30 = vadd.f32 %v4561_v9, %v10028_v3  ;;  %v4559_v25 = vpop.permute.xlu0 %4558  ;;  %v10130_v3 = vmul.f32 %v5105_v21, %v10026_v19  ;;  %v5193_v21 = vmul.f32 %v5191_v40, %v10109_v8  ;;  %v5207_v9 = vstv %s10132_s13  ;;  %s10301_s13 = sld [smem:[#allocation7 + $0x69]] }
 0x522   : > { %5070 = vrot.lane.b32.xlu1 %v5065_v61, %s6119_s18  ;;  %v4564_v14 = vadd.f32 %v4559_v25, %v10037_v50  ;;  %v5146_v50 = vmul.f32 %v10112_v0, %v5144_v29  ;;  %v5192_v61 = vmul.f32 %v5191_v40, %v10120_v7  ;;  %v5164_v25 = vmul.f32 %v10186_v22, %v5162_v48 }
 0x523   : > { %v10135_v53 = vadd.f32 %v4597_v46, %v4565_v30  ;;  %5068 = vrot.lane.b32.xlu0 %v5064_v63, %s6119_s18  ;;  %s10159_s18 = sld [smem:[#allocation9 + $0x7]]  ;;  %v5244_v46 = vstv %s10139_s14  ;;  %v5252_v30 = vstv %s10141_s15  ;;  %s10304_s14 = sld [smem:[#allocation7 + $0x8d]] }
 0x524   : > { %v4575_v33 = vpop.permute.xlu1 %4574  ;;  %v10149_v44 = vadd.f32 %v4596_v1, %v4564_v14  ;;  %v5148_v43 = vadd.f32 %v5146_v50, %v5137_v38  ;;  %v5209_v1 = vmul.f32 %v10153_v62, %v5207_v9  ;;  %v5208_v38 = vmul.f32 %v10157_v6, %v5207_v9  ;;  %s5167_s15 = sld [smem:[#allocation8]] }
 0x525   : > { %v4579_v2 = vadd.f32 %v4575_v33, %v10045_v34  ;;  %v4573_v37 = vpop.permute.xlu0 %4572  ;;  %v5199_v34 = vstv %s10094_s0  ;;  %v5246_v50 = vmul.f32 %v5244_v46, %v10109_v8  ;;  %v5254_v60 = vmul.f32 %v10112_v0, %v5252_v30  ;;  %s5730_s0 = sld [smem:[#allocation7 + $0x21]] }
 0x526   : > { %5084 = vrot.lane.b32.xlu1 %v5079_v10, %s6120_s23  ;;  %v4578_v12 = vadd.f32 %v4573_v37, %v10056_v49  ;;  %v5154_v49 = vmul.f32 %v10157_v6, %v5153_v16  ;;  %v5201_v54 = vmul.f32 %v10112_v0, %v5199_v34  ;;  %v5120_v10 = vmul.f32 %v5119_v20, %v10035_v56 }
 0x527   : > { %v10169_v51 = vadd.f32 %v4603_v39, %v4579_v2  ;;  %5082 = vrot.lane.b32.xlu0 %v5078_v4, %s6120_s23  ;;  %v5157_v29 = vadd.f32 %v5155_v52, %v5148_v43  ;;  %v5297_v2 = vstv %s10173_s2  ;;  %v5305_v39 = vstv %s10175_s3  ;;  %s139_s2 = sand.u32 1, %s6103_s26   ;;  %s10320_s3 = sld [smem:[#allocation10 + $0x1]] }
 0x528   : > { %v4615_v47 = vpop.permute.xlu1 %4614  ;;  %v10183_v28 = vadd.f32 %v4602_v26, %v4578_v12  ;;  %v5156_v4 = vadd.f32 %v5154_v49, %v5147_v35  ;;  %v5203_v14 = vadd.f32 %v5201_v54, %v5193_v21  ;;  %v5245_v20 = vmul.f32 %v5244_v46, %v10120_v7 }
 0x529   : > { %v10181_v18 = vadd.f32 %v4615_v47, %v10071_v15  ;;  %v4613_v45 = vpop.permute.xlu0 %4612  ;;  %v5200_v15 = vmul.f32 %v10123_v58, %v5199_v34  ;;  %v5215_v41 = vstv %s10159_s18  ;;  %v5166_v16 = vadd.f32 %v5164_v25, %v5157_v29  ;;  %s10315_s18 = sld [smem:[#allocation10]] }
 0x52a   : > { %5098 = vrot.lane.b32.xlu1 %v5093_v42, %s6120_s23  ;;  %v10199_v63 = vadd.f32 %v4613_v45, %v10081_v5  ;;  %v5163_v5 = vmul.f32 %v10189_v23, %v5162_v48  ;;  %v5217_v37 = vmul.f32 %v10186_v22, %v5215_v41  ;;  %v5211_v12 = vadd.f32 %v5209_v1, %v5203_v14 }
 0x52b   : > { %5096 = vrot.lane.b32.xlu0 %v5092_v55, %s6120_s23  ;;  %v5202_v55 = vadd.f32 %v5200_v15, %v5192_v61  ;;  %v5216_v26 = vmul.f32 %v10189_v23, %v5215_v41  ;;  %v5299_v43 = vmul.f32 %v5297_v2, %v10109_v8  ;;  %v5307_v52 = vmul.f32 %v10112_v0, %v5305_v39 }
 0x52c   : > { %v4629_v36 = vpop.permute.xlu1 %4628  ;;  %v5165_v34 = vadd.f32 %v5163_v5, %v5156_v4  ;;  %v5313_v21 = vstv %s10206_s19  ;;  %v5298_v9 = vmul.f32 %v5297_v2, %v10120_v7  ;;  %v5306_v8 = vmul.f32 %v10123_v58, %v5305_v39  ;;  %s5427_s19 = sshll.u32 %s139_s2, 6 }
 0x52d   : > { %v10212_v42 = vadd.f32 %v4629_v36, %v10097_v17  ;;  %v4627_v33 = vpop.permute.xlu0 %4626  ;;  %v5260_v17 = vstv %s10166_s17  ;;  %v5210_v49 = vadd.f32 %v5208_v38, %v5202_v55  ;;  %v5309_v46 = vadd.f32 %v5307_v52, %v5299_v43  ;;  %s10317_s17 = sld [smem:[#allocation8 + $0x1]] }
 0x52e   : > { %5112 = vrot.lane.b32.xlu1 %v10130_v3, %s6120_s23  ;;  %v10222_v27 = vadd.f32 %v4627_v33, %v10115_v59  ;;  %v5253_v59 = vmul.f32 %v10123_v58, %v5252_v30  ;;  %v5262_v47 = vmul.f32 %v10153_v62, %v5260_v17  ;;  %v5315_v30 = vmul.f32 %v10153_v62, %v5313_v21 }
 0x52f   : > { %5110 = vrot.lane.b32.xlu0 %v5106_v32, %s6120_s23  ;;  %v5256_v32 = vadd.f32 %v5254_v60, %v5246_v50  ;;  %v5218_v29 = vadd.f32 %v5216_v26, %v5210_v49  ;;  %v5321_v7 = vstv %s10227_s20  ;;  %v4721_v25 = vstv %s10229_s21  ;;  %s10328_s20 = sld [smem:[#allocation10 + $0x2]]  ;;  %s10330_s21 = sld [smem:[#allocation8 + $0x3]] }
 0x530   : > { %v4643_v3 = vpop.permute.xlu1 %4642  ;;  %v5255_v45 = vadd.f32 %v5253_v59, %v5245_v20  ;;  %v5308_v5 = vadd.f32 %v5306_v8, %v5298_v9  ;;  %v5314_v14 = vmul.f32 %v10157_v6, %v5313_v21  ;;  %v4723_v62 = vmul.f32 %v4721_v25, %v9839_v24 }
 0x531   : > { %v10236_v40 = vadd.f32 %v4643_v3, %v10135_v53  ;;  %v4641_v48 = vpop.permute.xlu0 %4640  ;;  %v5268_v53 = vstv %s10204_s16  ;;  %v5264_v15 = vadd.f32 %v5262_v47, %v5256_v32  ;;  %v5317_v33 = vadd.f32 %v5315_v30, %v5309_v46  ;;  %s10322_s16 = sld [smem:[#allocation8 + $0x2]] }
 0x532   : > { %5126 = vrot.lane.b32.xlu1 %v5121_v11, %s6120_s23  ;;  %v10244_v35 = vadd.f32 %v4641_v48, %v10149_v44  ;;  %v5261_v11 = vmul.f32 %v10157_v6, %v5260_v17  ;;  %v5219_v44 = vadd.f32 %v5217_v37, %v5211_v12  ;;  %v5323_v55 = vmul.f32 %v10186_v22, %v5321_v7 }
 0x533   : > { %5124 = vrot.lane.b32.xlu0 %v5120_v10, %s6120_s23  ;;  %v5270_v10 = vmul.f32 %v10186_v22, %v5268_v53  ;;  %v4722_v60 = vmul.f32 %v4721_v25, %v9847_v13  ;;  %v5316_v2 = vadd.f32 %v5314_v14, %v5308_v5  ;;  %v4727_v39 = vstv %s10252_s22  ;;  %s10334_s22 = sld [smem:[#allocation10 + $0x3]] }
 0x534   : > { %v4657_v54 = vpop.permute.xlu1 %4656  ;;  %v5263_v4 = vadd.f32 %v5261_v11, %v5255_v45  ;;  %v4729_v22 = vmul.f32 %v4727_v39, %v9839_v24  ;;  %v5325_v37 = vadd.f32 %v5323_v55, %v5317_v33  ;;  %v4733_v26 = vstv %s10264_s24  ;;  %s10336_s24 = scalar_lea.vmem [#allocation11], %s5427_s19 }
 0x535   : > { %v4661_v0 = vadd.f32 %v4657_v54, %v10169_v51  ;;  %v4655_v61 = vpop.permute.xlu0 %4654  ;;  %v5269_v51 = vmul.f32 %v10189_v23, %v5268_v53  ;;  %v5272_v41 = vadd.f32 %v5270_v10, %v5264_v15  ;;  %v4735_v32 = vmul.f32 %v4733_v26, %v9839_v24 }
 0x536   : > { %5175 = vrot.lane.b32.xlu1 %v5166_v16, %s6120_s23  ;;  %v4660_v36 = vadd.f32 %v4655_v61, %v10183_v28  ;;  %v4734_v52 = vmul.f32 %v4733_v26, %v9847_v13  ;;  %v4739_v53 = vstv %s10275_s25  ;;  %s5798_s25 = sshll.u32 %s6203_s29, 10  ;;  %s10368_s29 = scalar_lea.sflag [#allocation12], %s139_s2 }
 0x537   : > { %5173 = vrot.lane.b32.xlu0 %v5165_v34, %s6120_s23  ;;  %v5271_v17 = vadd.f32 %v5269_v51, %v5263_v4  ;;  %v4728_v34 = vmul.f32 %v4727_v39, %v9847_v13  ;;  %v4741_v45 = vmul.f32 %v4739_v53, %v9839_v24  ;;  %v4740_v8 = vmul.f32 %v4739_v53, %v9847_v13 }
 0x538   : > { %v4671_v58 = vpop.permute.xlu1 %4670 }
 0x539   : > { %v4675_v1 = vadd.f32 %v4671_v58, %v10181_v18  ;;  %v4669_v28 = vpop.permute.xlu0 %4668  ;;  %v5322_v18 = vmul.f32 %v10189_v23, %v5321_v7 }
 0x53a   : > { %5228 = vrot.lane.b32.xlu1 %v5219_v44, %s6120_s23  ;;  %v4674_v38 = vadd.f32 %v4669_v28, %v10199_v63 }
 0x53b   : > { %v4725_v50 = vadd.f32 %v4723_v62, %v4675_v1  ;;  %5226 = vrot.lane.b32.xlu0 %v5218_v29, %s6120_s23  ;;  %v5324_v12 = vadd.f32 %v5322_v18, %v5316_v2  ;;  %v4871_v18 = vstv %s5720_s30 }
 0x53c   : > { %v4685_v6 = vpop.permute.xlu1 %4684  ;;  %v4724_v16 = vadd.f32 %v4722_v60, %v4674_v38  ;;  %v4872_v26 = vmul.f32 %v4871_v18, %v9942_v57 }
 0x53d   : > { %v4689_v3 = vadd.f32 %v4685_v6, %v10212_v42  ;;  %v4683_v63 = vpop.permute.xlu0 %4682 }
 0x53e   : > { %5281 = vrot.lane.b32.xlu1 %v5272_v41, %s6120_s23  ;;  %v4688_v20 = vadd.f32 %v4683_v63, %v10222_v27  ;;  %v4865_v41 = vstv %s5719_s4 }
 0x53f   : > { %v4731_v59 = vadd.f32 %v4729_v22, %v4689_v3  ;;  %5279 = vrot.lane.b32.xlu0 %v5271_v17, %s6120_s23  ;;  %v4867_v17 = vmul.f32 %v4865_v41, %v9935_v31 }
 0x540   : > { %v4699_v23 = vpop.permute.xlu1 %4698  ;;  %v4730_v48 = vadd.f32 %v4728_v34, %v4688_v20  ;;  %v4873_v20 = vmul.f32 %v4871_v18, %v9935_v31  ;;  %v4877_v34 = vstv %s5721_s9  ;;  %s10358_s9 = scalar_lea.hbm %s10411_s7, %s5798_s25 }
 0x541   : > { %v4703_v42 = vadd.f32 %v4699_v23, %v10236_v40  ;;  %v4697_v47 = vpop.permute.xlu0 %4696 }
 0x542   : > { %5334 = vrot.lane.b32.xlu1 %v5325_v37, %s6120_s23  ;;  %v4702_v43 = vadd.f32 %v4697_v47, %v10244_v35  ;;  %v4879_v47 = vmul.f32 %v4877_v34, %v9935_v31 }
 0x543   : > { %v4737_v27 = vadd.f32 %v4735_v32, %v4703_v42  ;;  %5332 = vrot.lane.b32.xlu0 %v5324_v12, %s6120_s23  ;;  %s5718_s23 = sld [smem:[#allocation7 + $0x1e]] }
 0x544   : > { %v4713_v49 = vpop.permute.xlu1 %4712  ;;  %v4736_v54 = vadd.f32 %v4734_v52, %v4702_v43 }
 0x545   : > { %v4717_v21 = vadd.f32 %v4713_v49, %v4661_v0  ;;  %v4711_v40 = vpop.permute.xlu0 %4710  ;;  %v4878_v49 = vmul.f32 %v4877_v34, %v9942_v57 }
 0x546   : > { %v4716_v11 = vadd.f32 %v4711_v40, %v4660_v36 }
 0x547   : > { %v4743_v9 = vadd.f32 %v4741_v45, %v4717_v21 }
 0x548   : > { %v4753_v44 = vpop.permute.xlu1 %4752  ;;  %v4742_v15 = vadd.f32 %v4740_v8, %v4716_v11 }
 0x549   : > { %v4757_v61 = vadd.f32 %v4753_v44, %v4725_v50  ;;  %v4751_v35 = vpop.permute.xlu0 %4750  ;;  %v4859_v5 = vstv %s5718_s23  ;;  %s5361_s23 = sshll.u32 %s10336_s24, 4  ;;  %s10360_s23 = int_to_ptr.vmem [resolvable:$true] %s5361_s23 }
 0x54a   : > { %v4756_v10 = vadd.f32 %v4751_v35, %v4724_v16  ;;  %v4861_v62 = vmul.f32 %v4859_v5, %v9935_v31  ;;  %v4860_v38 = vmul.f32 %v4859_v5, %v9942_v57  ;;  %v4866_v16 = vmul.f32 %v4865_v41, %v9942_v57 }
 0x54c   : > { %v4767_v46 = vpop.permute.xlu1 %4766 }
 0x54d   : > { %v4771_v30 = vadd.f32 %v4767_v46, %v4731_v59  ;;  %v4765_v29 = vpop.permute.xlu0 %4764 }
 0x54e   : > { %v4770_v7 = vadd.f32 %v4765_v29, %v4730_v48 }
 0x550   : > { %v4781_v25 = vpop.permute.xlu1 %4780 }
 0x551   : > { %v4785_v0 = vadd.f32 %v4781_v25, %v4737_v27  ;;  %v4779_v58 = vpop.permute.xlu0 %4778 }
 0x552   : > { %v4784_v24 = vadd.f32 %v4779_v58, %v4736_v54 }
 0x554   : > { %v4795_v4 = vpop.permute.xlu1 %4794 }
 0x555   : > { %v4799_v36 = vadd.f32 %v4795_v4, %v4743_v9  ;;  %v4793_v51 = vpop.permute.xlu0 %4792 }
 0x556   : > { %v4798_v13 = vadd.f32 %v4793_v51, %v4742_v15 }
 0x558   : > { %v4809_v14 = vpop.permute.xlu1 %4808 }
 0x559   : > { %v4813_v1 = vadd.f32 %v4809_v14, %v4757_v61  ;;  %v4807_v28 = vpop.permute.xlu0 %4806  ;;  %v4997_v61 = vstv %s5730_s0  ;;  %s6047_s0 = scalar_lea.vmem %s10360_s23, 1024 }
 0x55a   : > { %v4812_v33 = vadd.f32 %v4807_v28, %v4756_v10  ;;  %v4999_v57 = vmul.f32 %v4997_v61, %v10026_v19  ;;  %p6048_p13 = scmp.ne.s32.totalorder %s10360_s23, %s6047_s0 }
 0x55b   : > { %v4863_v55 = vadd.f32 %v4861_v62, %v4813_v1 }
 0x55c   : > { %v4823_v50 = vpop.permute.xlu1 %4822  ;;  %v4862_v6 = vadd.f32 %v4860_v38, %v4812_v33  ;;  %p6049_p0 = pnand %p6048_p13, %p6220_p7 }
 0x55d   : > { %v4827_v60 = vadd.f32 %v4823_v50, %v4771_v30  ;;  %v4821_v2 = vpop.permute.xlu0 %4820  ;;  %v5003_v30 = vstv %s5731_s12  ;;  %s6121_s12 = smov [#allocation11]  }
 0x55e   : > { %v4826_v39 = vadd.f32 %v4821_v2, %v4770_v7  ;;  %v5005_v51 = vmul.f32 %v5003_v30, %v10026_v19  ;;  %v5004_v28 = vmul.f32 %v5003_v30, %v10035_v56  ;;  %v5221_v30 = vstv %s10317_s17  ;;  %p6050_p1 = pneg %p6049_p0 }
 0x55f   : > { %v4869_v3 = vadd.f32 %v4867_v17, %v4827_v60 }
 0x560   : > { %v4837_v22 = vpop.permute.xlu1 %4836  ;;  %v4868_v37 = vadd.f32 %v4866_v16, %v4826_v39 }
 0x561   : > { %v4841_v63 = vadd.f32 %v4837_v22, %v4785_v0  ;;  %v4835_v59 = vpop.permute.xlu0 %4834  ;;  %v4998_v0 = vmul.f32 %v4997_v61, %v10035_v56 }
 0x562   : > { %v4840_v23 = vadd.f32 %v4835_v59, %v4784_v24 }
 0x563   : > { %v4875_v12 = vadd.f32 %v4873_v20, %v4841_v63 }
 0x564   : > { %v4851_v42 = vpop.permute.xlu1 %4850  ;;  %v4874_v32 = vadd.f32 %v4872_v26, %v4840_v23 }
 0x565   : > { %v4855_v48 = vadd.f32 %v4851_v42, %v4799_v36  ;;  %v4849_v43 = vpop.permute.xlu0 %4848 }
 0x566   : > { %v4854_v27 = vadd.f32 %v4849_v43, %v4798_v13  ;;  %v5009_v13 = vstv %s10301_s13  ;;  %s6051_s13 = sshll.u32 %s6121_s12, 4  ;;  %s6052_s13 = int_to_ptr.vmem [resolvable:$false] %s6051_s13 }
 0x567   : > { %v4881_v52 = vadd.f32 %v4879_v47, %v4855_v48  ;;  %v5011_v50 = vmul.f32 %v5009_v13, %v10026_v19  ;;  %v5010_v39 = vmul.f32 %v5009_v13, %v10035_v56  ;;  %p6054_p2 = scmp.lt.s32.totalorder %s10360_s23, %s6052_s13 }
 0x568   : > { %v4891_v53 = vpop.permute.xlu1 %4890  ;;  %v4880_v21 = vadd.f32 %v4878_v49, %v4854_v27 }
 0x569   : > { %v4889_v54 = vpop.permute.xlu0 %4888  ;;  %v4895_v31 = vadd.f32 %v4891_v53, %v4863_v55 }
 0x56a   : > { %v4894_v35 = vadd.f32 %v4889_v54, %v4862_v6  ;;  %v5015_v6 = vstv %s10304_s14  ;;  %s6053_s14 = scalar_lea.vmem %s6052_s13, 2048 }
 0x56b   : > { %v5016_v23 = vmul.f32 %v5015_v6, %v10035_v56  ;;  %p6055_p3 = scmp.lt.s32.totalorder %s6053_s14, %s6047_s0 }
 0x56c   : > { %v4905_v45 = vpop.permute.xlu1 %4904 }
 0x56d   : > { %v4903_v40 = vpop.permute.xlu0 %4902  ;;  %v4909_v29 = vadd.f32 %v4905_v45, %v4869_v3  ;;  %p6056_p4 = por %p6055_p3, %p6054_p2 }
 0x56e   : > { %v4908_v24 = vadd.f32 %v4903_v40, %v4868_v37  ;;  %v5017_v37 = vmul.f32 %v5015_v6, %v10026_v19 }
 0x56f   : > { %p6057_p5 = pnand %p6056_p4, %p6050_p1 }
 0x570   : > { %v4919_v11 = vpop.permute.xlu1 %4918 }
 0x571   : > { %v4917_v9 = vpop.permute.xlu0 %4916  ;;  %v4923_v14 = vadd.f32 %v4919_v11, %v4875_v12 }
 0x572   : > { %v4922_v33 = vadd.f32 %v4917_v9, %v4874_v32 }
 0x574   : > { %v4933_v8 = vpop.permute.xlu1 %4932 }
 0x575   : > { %v4931_v44 = vpop.permute.xlu0 %4930  ;;  %v4937_v17 = vadd.f32 %v4933_v8, %v4881_v52  ;;  %v5168_v8 = vstv %s5167_s15 }
 0x576   : > { %v4936_v16 = vadd.f32 %v4931_v44, %v4880_v21 }
 0x578   : > { %v4947_v15 = vpop.permute.xlu1 %4946 }
 0x579   : > { %v4951_v10 = vadd.f32 %v4947_v15, %v4895_v31  ;;  %v4945_v46 = vpop.permute.xlu0 %4944 }
 0x57a   : > { %v4950_v7 = vadd.f32 %v4945_v46, %v4894_v35 }
 0x57b   : > { %v5001_v25 = vadd.f32 %v4999_v57, %v4951_v10  ;;  %v5182_v57 = vstv %s10315_s18 }
 0x57c   : > { %v4961_v58 = vpop.permute.xlu1 %4960  ;;  %v5000_v36 = vadd.f32 %v4998_v0, %v4950_v7 }
 0x57d   : > { %v4965_v4 = vadd.f32 %v4961_v58, %v4909_v29  ;;  %v4959_v5 = vpop.permute.xlu0 %4958 }
 0x57e   : > { %v4964_v1 = vadd.f32 %v4959_v5, %v4908_v24 }
 0x57f   : > { %v5007_v62 = vadd.f32 %v5005_v51, %v4965_v4 }
 0x580   : > { %v4975_v41 = vpop.permute.xlu1 %4974  ;;  %v5006_v38 = vadd.f32 %v5004_v28, %v4964_v1 }
 0x581   : > { %v4979_v55 = vadd.f32 %v4975_v41, %v4923_v14  ;;  %v4973_v60 = vpop.permute.xlu0 %4972  ;;  %v5235_v14 = vstv %s10320_s3 }
 0x582   : > { %v4978_v2 = vadd.f32 %v4973_v60, %v4922_v33 }
 0x583   : > { %v5013_v18 = vadd.f32 %v5011_v50, %v4979_v55 }
 0x584   : > { %v4989_v3 = vpop.permute.xlu1 %4988  ;;  %v5012_v63 = vadd.f32 %v5010_v39, %v4978_v2 }
 0x585   : > { %v4993_v22 = vadd.f32 %v4989_v3, %v4937_v17  ;;  %v4987_v20 = vpop.permute.xlu0 %4986  ;;  %v5327_v3 = vstv %s10330_s21 }
 0x586   : > { %v4992_v59 = vadd.f32 %v4987_v20, %v4936_v16 }
 0x587   : > { %v5019_v34 = vadd.f32 %v5017_v37, %v4993_v22 }
 0x588   : > { %v5029_v12 = vpop.permute.xlu1 %5028  ;;  %v5018_v26 = vadd.f32 %v5016_v23, %v4992_v59 }
 0x589   : > { %v5027_v42 = vpop.permute.xlu0 %5026  ;;  %v5033_v56 = vadd.f32 %v5029_v12, %v5001_v25  ;;  %v5341_v12 = vstv %s10334_s22 }
 0x58a   : > { %v5032_v40 = vadd.f32 %v5027_v42, %v5000_v36 }
 0x58c   : > { %v5043_v48 = vpop.permute.xlu1 %5042 }
 0x58d   : > { %v5041_v32 = vpop.permute.xlu0 %5040  ;;  %v5047_v44 = vadd.f32 %v5043_v48, %v5007_v62  ;;  %v5274_v62 = vstv %s10322_s16 }
 0x58e   : > { %v5046_v15 = vadd.f32 %v5041_v32, %v5006_v38 }
 0x590   : > { %v5057_v47 = vpop.permute.xlu1 %5056 }
 0x591   : > { %v5055_v43 = vpop.permute.xlu0 %5054  ;;  %v5061_v29 = vadd.f32 %v5057_v47, %v5013_v18  ;;  %v5288_v18 = vstv %s10328_s20 }
 0x592   : > { %v5060_v58 = vadd.f32 %v5055_v43, %v5012_v63 }
 0x594   : > { %v5071_v27 = vpop.permute.xlu1 %5070 }
 0x595   : > { %v5069_v52 = vpop.permute.xlu0 %5068  ;;  %v5075_v13 = vadd.f32 %v5071_v27, %v5019_v34 }
 0x596   : > { %v5074_v38 = vadd.f32 %v5069_v52, %v5018_v26 }
 0x598   : > { %v5085_v49 = vpop.permute.xlu1 %5084 }
 0x599   : > { %v5083_v53 = vpop.permute.xlu0 %5082  ;;  %v5089_v11 = vadd.f32 %v5085_v49, %v5033_v56 }
 0x59a   : > { %v5088_v61 = vadd.f32 %v5083_v53, %v5032_v40 }
 0x59b   : > { %v5170_v10 = vadd.f32 %v5168_v8, %v5089_v11 }
 0x59c   : > { %v5099_v21 = vpop.permute.xlu1 %5098  ;;  %v5169_v0 = vadd.f32 %v5168_v8, %v5088_v61 }
 0x59d   : > { %v5097_v19 = vpop.permute.xlu0 %5096  ;;  %v5103_v35 = vadd.f32 %v5099_v21, %v5047_v44 }
 0x59e   : > { %v5102_v7 = vadd.f32 %v5097_v19, %v5046_v15 }
 0x59f   : > { %v5223_v5 = vadd.f32 %v5221_v30, %v5103_v35 }
 0x5a0   : > { %v5113_v54 = vpop.permute.xlu1 %5112  ;;  %v5222_v55 = vadd.f32 %v5221_v30, %v5102_v7 }
 0x5a1   : > { %v5111_v45 = vpop.permute.xlu0 %5110  ;;  %v5117_v4 = vadd.f32 %v5113_v54, %v5061_v29 }
 0x5a2   : > { %v5116_v28 = vadd.f32 %v5111_v45, %v5060_v58 }
 0x5a3   : > { %v5276_v2 = vadd.f32 %v5274_v62, %v5117_v4 }
 0x5a4   : > { %v5127_v9 = vpop.permute.xlu1 %5126  ;;  %v5275_v37 = vadd.f32 %v5274_v62, %v5116_v28 }
 0x5a5   : > { %v5125_v31 = vpop.permute.xlu0 %5124  ;;  %v5131_v60 = vadd.f32 %v5127_v9, %v5075_v13 }
 0x5a6   : > { %v5130_v16 = vadd.f32 %v5125_v31, %v5074_v38 }
 0x5a7   : > { %v5329_v23 = vadd.f32 %v5327_v3, %v5131_v60 }
 0x5a8   : > { %v5176_v46 = vpop.permute.xlu1 %5175  ;;  %v5328_v32 = vadd.f32 %v5327_v3, %v5130_v16 }
 0x5a9   : > { %v5180_v25 = vadd.f32 %v5176_v46, %v5170_v10  ;;  %v5174_v24 = vpop.permute.xlu0 %5173 }
 0x5aa   : > { %v5179_v51 = vadd.f32 %v5174_v24, %v5169_v0 }
 0x5ab   : > { %v5184_v36 = vadd.f32 %v5182_v57, %v5180_v25 }
 0x5ac   : > { %v5229_v1 = vpop.permute.xlu1 %5228  ;;  %v5183_v41 = vadd.f32 %v5182_v57, %v5179_v51 }
 0x5ad   : > { %5187 = vst.msk [vmem:[%s10336_s24 + $0x8] sm:$0xff] %vm5185_vm4, %v5184_v36  ;;  %v5233_v33 = vadd.f32 %v5229_v1, %v5223_v5  ;;  %v5227_v50 = vpop.permute.xlu0 %5226 }
 0x5ae   : > { %5186 = vst.msk [vmem:[%s10336_s24] sm:$0xff] %vm5185_vm4, %v5183_v41  ;;  %v5232_v17 = vadd.f32 %v5227_v50, %v5222_v55 }
 0x5af   : > { %v5237_v6 = vadd.f32 %v5235_v14, %v5233_v33 }
 0x5b0   : > { %v5282_v39 = vpop.permute.xlu1 %5281  ;;  %v5236_v22 = vadd.f32 %v5235_v14, %v5232_v17 }
 0x5b1   : > { %5764 = vst.msk [vmem:[%s10336_s24 + $0x18] sm:$0xff] %vm5185_vm4, %v5237_v6  ;;  %v5286_v63 = vadd.f32 %v5282_v39, %v5276_v2  ;;  %v5280_v20 = vpop.permute.xlu0 %5279 }
 0x5b2   : > { %5763 = vst.msk [vmem:[%s10336_s24 + $0x10] sm:$0xff] %vm5185_vm4, %v5236_v22  ;;  %v5285_v34 = vadd.f32 %v5280_v20, %v5275_v37 }
 0x5b3   : > { %v5290_v59 = vadd.f32 %v5288_v18, %v5286_v63 }
 0x5b4   : > { %v5335_v26 = vpop.permute.xlu1 %5334  ;;  %v5289_v42 = vadd.f32 %v5288_v18, %v5285_v34 }
 0x5b5   : > { %5778 = vst.msk [vmem:[%s10336_s24 + $0x28] sm:$0xff] %vm5185_vm4, %v5290_v59  ;;  %v5339_v48 = vadd.f32 %v5335_v26, %v5329_v23  ;;  %v5333_v47 = vpop.permute.xlu0 %5332 }
 0x5b6   : > { %5777 = vst.msk [vmem:[%s10336_s24 + $0x20] sm:$0xff] %vm5185_vm4, %v5289_v42  ;;  %v5338_v27 = vadd.f32 %v5333_v47, %v5328_v32 }
 0x5b7   : > { %v5343_v43 = vadd.f32 %v5341_v12, %v5339_v48 }
 0x5b8   : > { %v5342_v52 = vadd.f32 %v5341_v12, %v5338_v27 }
 0x5b9   : > { %5792 = vst.msk [vmem:[%s10336_s24 + $0x38] sm:$0xff] %vm5185_vm4, %v5343_v43 }
 0x5ba   : > { %5791 = vst.msk [vmem:[%s10336_s24 + $0x30] sm:$0xff] %vm5185_vm4, %v5342_v52 }
 0x5bb   : > { %6060 = shalt.err (!%p6057_p5)
}
 0x5bc   : > { %s6061_s15 = scalar_lea.hbm %s10358_s9, 1024  ;;  %s6065_s2 = scalar_lea.hbm %s10411_s7, 2048 }
 0x5bd   : > { %p6062_p6 = scmp.ne.s32.totalorder %s10358_s9, %s6061_s15  ;;  %p6066_p11 = scmp.lt.u32.totalorder %s10358_s9, %s10411_s7 }
 0x5be   : > { %p6067_p12 = scmp.lt.u32.totalorder %s6065_s2, %s6061_s15  ;;  %p6069_p0 = scmp.lt.u32.totalorder %s6061_s15, %s10358_s9 }
 0x5bf   : > { %p6063_p9 = pnand %p6062_p6, %p6220_p7 }
 0x5c0   : > { %p6068_p13 = por %p6067_p12, %p6066_p11 }
 0x5c1   : > { %p6064_p10 = pneg %p6063_p9 }
 0x5c2   : > { %p6070_p1 = por %p6069_p0, %p6068_p13 }
 0x5c4   : > { %p6071_p2 = pnand %p6070_p1, %p6064_p10 }
 0x5c6   : > { %6074 = shalt.err (!%p6071_p2)
}
 0x5c7   : > { %s6122_s19 = smov 128   ;;  %s6123_s20 = smov 8  }
 0x5c8   : > { %5800 = dma.vmem_to_hbm [thread:$0]  (%p6220_p7), %s10360_s23, 1024, %s10358_s9, %s10368_s29, %s6122_s19, %s6122_s19, %s6123_s20  }
 0x5c9 PF: > { %p5806_p3 = scmp.ge.s32.totalorder %s6111_s28, 2  ;;  %s5376_s21 = sand.u32 1, %s6099_s5  }
 0x5ca   : > { %s5377_s22 = scalar_lea.sflag [#allocation12], %s5376_s21 }
 0x5cb   : > { %p5803_p4 = pnand %p5806_p3, %p6224_p8 }
 0x5cd   : > { %6094 = dma.done.wait (!%p5803_p4), %s5377_s22, 1024  }
 0x5ce   : > { %6096 = vsyncadd (!%p5803_p4), %s5377_s22, 4294966272  ;;  %p43_p5 = scmp.ge.s32.totalorder %s6207_s8, 4   ;;  %s10929_s5 = smov %s6103_s26 }
 0x5cf   : > { %s10930_s26 = smov %s6107_s27  ;;  %s10931_s27 = smov %s6218_s1 }
 0x5d0   : > { %s10932_s28 = smov %s6207_s8  ;;  %45 = sbr.rel (!%p43_p5) target bundleno = 70 (0x46), region = 71 }
 0x5d7   :  { %5382 = vsyncpa [#allocation12], 1 }
 0x5d8   :  { %5384 = vsyncpa [#allocation12 + $0x1], 1 }

</bundles_post_ra>
